<compile_context>
chip_gen: v6e
topology: v6e:2x2x1
jax: 0.10.0
libtpu: 0.0.40
codegen_flags: <defaults>
</compile_context>

<pallas_src>
import jax
import jax.numpy as jnp
from jax.experimental import pallas as pl
from jax.experimental.pallas import tpu as pltpu

NUM_QUERY = 96
TRANS_DIM = 384
IN_DIM = NUM_QUERY * TRANS_DIM          # 36864
TN = 128                                # output-column tile of the big matmul
HEAD_PAD = 128                          # padded lane width for the fused heads


def _leaky_relu(x, slope=0.2):
    return jnp.where(x > 0, x, slope * x)


# -----------------------------------------------------------------------------
# Kernel 1: h1 = LeakyReLU(x @ w1 + b1), tiled over the 384 output columns.
# x and w1 streamed in bf16; f32 accumulation on the MXU.
# -----------------------------------------------------------------------------
def encoder_kernel(x_ref, w1_ref, b1_ref, h1_ref):
    acc = jnp.dot(x_ref[...], w1_ref[...], preferred_element_type=jnp.float32)
    h1_ref[...] = _leaky_relu(acc + b1_ref[...])


def make_encoder_call(B):
    grid = (TRANS_DIM // TN,)           # 3 independent 128-lane column blocks
    return pl.pallas_call(
        encoder_kernel,
        out_shape=[jax.ShapeDtypeStruct((B, TRANS_DIM), jnp.float32)],
        grid_spec=pltpu.PrefetchScalarGridSpec(
            num_scalar_prefetch=0,
            grid=grid,
            in_specs=[
                pl.BlockSpec((B, IN_DIM), lambda j: (0, 0)),    # x, resident
                pl.BlockSpec((IN_DIM, TN), lambda j: (0, j)),   # w1 column slab
                pl.BlockSpec((1, TN), lambda j: (0, j)),        # b1 slice
            ],
            out_specs=[pl.BlockSpec((B, TN), lambda j: (0, j))],
        ),
        compiler_params=pltpu.CompilerParams(
            dimension_semantics=("parallel",),
            vmem_limit_bytes=28 * 1024 * 1024),
    )


# -----------------------------------------------------------------------------
# Kernel 2: 384->384 conv, fused (padded) bbox/center heads, SmoothL1 + EIoU.
# -----------------------------------------------------------------------------
def head_kernel(h1_ref, w2_ref, b2_ref, wh1_ref, bh1_ref, wh2_ref, bh2_ref,
                gt_ref, feat_ref, out_ref, loss_ref):
    # bbox_feature_encoder, second Conv1d: 384 -> 384
    feat = jnp.dot(h1_ref[...], w2_ref[...],
                   preferred_element_type=jnp.float32) + b2_ref[...]
    feat_ref[...] = feat

    # Fused zero-padded heads:
    #   hd[:, 0:6] == LeakyReLU(feat @ wb1 + bb1), hd[:, 6:9] likewise (center)
    #   out[:, 0:6] == bbox, out[:, 6:9] == center, lanes 9..127 are exactly 0.
    hd = _leaky_relu(jnp.dot(feat, wh1_ref[...],
                             preferred_element_type=jnp.float32) + bh1_ref[...])
    out = jnp.dot(hd, wh2_ref[...],
                  preferred_element_type=jnp.float32) + bh2_ref[...]
    out_ref[...] = out

    bbox = out[:, 0:6]
    center = out[:, 6:9]
    gt_bbox = gt_ref[:, 0:6]
    gt_center = gt_ref[:, 6:9]

    # nn.SmoothL1Loss (beta = 1.0, mean reduction)
    def smooth_l1(pred, gt):
        d = pred - gt
        ad = jnp.abs(d)
        e = jnp.where(ad < 1.0, 0.5 * d * d, ad - 0.5)
        return jnp.mean(e, axis=(0, 1), keepdims=True)         # (1, 1)

    lb = smooth_l1(bbox, gt_bbox)
    lc = smooth_l1(center, gt_center)

    # TODO(synk): IoULoss.EIoU reference implementation is external to the given
    # module; using a standard axis-aligned 3D EIoU
    # (1 - IoU + center_dist^2/diag^2 + per-axis size term).
    eps = jnp.float32(1e-7)
    pmin, pmax = bbox[:, 0:3], bbox[:, 3:6]
    gmin, gmax = gt_bbox[:, 0:3], gt_bbox[:, 3:6]
    idim = jnp.maximum(jnp.minimum(pmax, gmax) - jnp.maximum(pmin, gmin), 0.0)
    ivol = idim[:, 0:1] * idim[:, 1:2] * idim[:, 2:3]
    pdim = jnp.maximum(pmax - pmin, 0.0)
    gdim = jnp.maximum(gmax - gmin, 0.0)
    pvol = pdim[:, 0:1] * pdim[:, 1:2] * pdim[:, 2:3]
    gvol = gdim[:, 0:1] * gdim[:, 1:2] * gdim[:, 2:3]
    iou = ivol / (pvol + gvol - ivol + eps)
    cdim = jnp.maximum(pmax, gmax) - jnp.minimum(pmin, gmin)
    cdiag2 = jnp.sum(cdim * cdim, axis=1, keepdims=True)
    cdist2 = jnp.sum((0.5 * (pmin + pmax) - 0.5 * (gmin + gmax)) ** 2,
                     axis=1, keepdims=True)
    dim_term = jnp.sum((pdim - gdim) ** 2 / (cdim * cdim + eps),
                       axis=1, keepdims=True)
    eiou = 1.0 - iou + cdist2 / (cdiag2 + eps) + dim_term        # (B, 1)
    le = jnp.mean(eiou, axis=(0, 1), keepdims=True)              # (1, 1)

    # Pack the three loss scalars into one lane-dense (1, 128) store.
    lane = jax.lax.broadcasted_iota(jnp.int32, (1, HEAD_PAD), 1)
    loss_ref[...] = (jnp.where(lane == 0, lb, 0.0)
                     + jnp.where(lane == 1, lc, 0.0)
                     + jnp.where(lane == 2, le, 0.0))


def make_head_call(B):
    const = lambda i: (0, 0)
    in_specs = [
        pl.BlockSpec((B, TRANS_DIM), const),          # h1
        pl.BlockSpec((TRANS_DIM, TRANS_DIM), const),  # w2
        pl.BlockSpec((1, TRANS_DIM), const),          # b2
        pl.BlockSpec((TRANS_DIM, HEAD_PAD), const),   # fused head conv1 weight
        pl.BlockSpec((1, HEAD_PAD), const),           # fused head conv1 bias
        pl.BlockSpec((HEAD_PAD, HEAD_PAD), const),    # fused head conv2 weight
        pl.BlockSpec((1, HEAD_PAD), const),           # fused head conv2 bias
        pl.BlockSpec((B, HEAD_PAD), const),           # packed gt (bbox|center)
    ]
    out_specs = [
        pl.BlockSpec((B, TRANS_DIM), const),          # origin_bbox_feature
        pl.BlockSpec((B, HEAD_PAD), const),           # packed bbox|center
        pl.BlockSpec((1, HEAD_PAD), const),           # packed losses
    ]
    out_shape = [
        jax.ShapeDtypeStruct((B, TRANS_DIM), jnp.float32),
        jax.ShapeDtypeStruct((B, HEAD_PAD), jnp.float32),
        jax.ShapeDtypeStruct((1, HEAD_PAD), jnp.float32),
    ]
    return pl.pallas_call(
        head_kernel,
        out_shape=out_shape,
        grid_spec=pltpu.PrefetchScalarGridSpec(
            num_scalar_prefetch=0,
            grid=(1,),
            in_specs=in_specs,
            out_specs=out_specs),
        compiler_params=pltpu.CompilerParams(
            dimension_semantics=("arbitrary",)),
    )


# -----------------------------------------------------------------------------
# Parameters (PyTorch Conv1d weights (out, in, 1) stored transposed as (in, out))
# -----------------------------------------------------------------------------
def init_params(key):
    ks = jax.random.split(key, 12)

    def w(k, shape, fan_in):
        return (jax.random.normal(k, shape, jnp.float32) /
                jnp.sqrt(jnp.float32(fan_in)))

    return dict(
        # w1 is stored in bf16: the kernel is HBM-bound on this 27 MiB stream.
        w1=w(ks[0], (IN_DIM, TRANS_DIM), IN_DIM).astype(jnp.bfloat16),
        b1=w(ks[1], (1, TRANS_DIM), IN_DIM),
        w2=w(ks[2], (TRANS_DIM, TRANS_DIM), TRANS_DIM),
        b2=w(ks[3], (1, TRANS_DIM), TRANS_DIM),
        wb1=w(ks[4], (TRANS_DIM, 6), TRANS_DIM),
        bb1=w(ks[5], (1, 6), TRANS_DIM),
        wb2=w(ks[6], (6, 6), 6),
        bb2=w(ks[7], (1, 6), 6),
        wc1=w(ks[8], (TRANS_DIM, 3), TRANS_DIM),
        bc1=w(ks[9], (1, 3), TRANS_DIM),
        wc2=w(ks[10], (3, 3), 3),
        bc2=w(ks[11], (1, 3), 3),
    )


def fuse_head_params(params):
    """Build zero-padded fused bbox+center head weights (lane-dense, 128 wide)."""
    wh1 = jnp.zeros((TRANS_DIM, HEAD_PAD), jnp.float32)
    wh1 = wh1.at[:, 0:6].set(params['wb1']).at[:, 6:9].set(params['wc1'])
    bh1 = jnp.zeros((1, HEAD_PAD), jnp.float32)
    bh1 = bh1.at[:, 0:6].set(params['bb1']).at[:, 6:9].set(params['bc1'])
    wh2 = jnp.zeros((HEAD_PAD, HEAD_PAD), jnp.float32)
    wh2 = wh2.at[0:6, 0:6].set(params['wb2']).at[6:9, 6:9].set(params['wc2'])
    bh2 = jnp.zeros((1, HEAD_PAD), jnp.float32)
    bh2 = bh2.at[:, 0:6].set(params['bb2']).at[:, 6:9].set(params['bc2'])
    return wh1, bh1, wh2, bh2


def _set_weight(losses, name, weight, max_value=None):
    # TODO(synk): external setWeight() source is unavailable; applying a
    # multiplicative weight with an optional clamp at max_value.
    v = losses[name] * jnp.float32(weight)
    if max_value is not None:
        v = jnp.minimum(v, jnp.float32(max_value))
    losses[name] = v


def bboxnet_forward(data, params, infer=False):
    pred = data['predictions']
    B = pred['origin_encode_feature'].shape[0]
    x = pred['origin_reduce_global_feature'].reshape(B, -1).astype(jnp.bfloat16)
    assert x.shape[1] == IN_DIM
    gt_bbox = data['inputs']['origin_bbox'].astype(jnp.float32)
    gt_center = data['inputs']['origin_center'].astype(jnp.float32)
    gt_packed = jnp.zeros((B, HEAD_PAD), jnp.float32)
    gt_packed = gt_packed.at[:, 0:6].set(gt_bbox).at[:, 6:9].set(gt_center)

    wh1, bh1, wh2, bh2 = fuse_head_params(params)

    (h1,) = make_encoder_call(B)(x, params['w1'], params['b1'])
    feat, packed, losses = make_head_call(B)(
        h1, params['w2'], params['b2'], wh1, bh1, wh2, bh2, gt_packed)

    pred['origin_bbox_feature'] = feat.reshape(B, TRANS_DIM, 1)   # (B, C, 1)
    pred['origin_bbox'] = packed[:, 0:6]                          # (B, 6)
    pred['origin_center'] = packed[:, 6:9]                        # (B, 3)

    if not infer:
        loss_d = data.setdefault('losses', {})
        loss_d['loss_origin_bbox_l1'] = losses[0, 0]
        loss_d['loss_origin_center_l1'] = losses[0, 1]
        loss_d['loss_origin_bbox_eiou'] = losses[0, 2]
        _set_weight(loss_d, 'loss_origin_bbox_l1', 1000)
        _set_weight(loss_d, 'loss_origin_center_l1', 1000)
        _set_weight(loss_d, 'loss_origin_bbox_eiou', 100, max_value=100)
    return data


if __name__ == "__main__":
    B = 2
    key = jax.random.PRNGKey(0)
    k_feat, k_enc, k_c, k_h, k_params = jax.random.split(key, 5)

    # ground-truth 3D boxes: [xmin, ymin, zmin, xmax, ymax, zmax]
    gt_center = jax.random.normal(k_c, (B, 3), jnp.float32) * 0.1
    half = jnp.abs(jax.random.normal(k_h, (B, 3), jnp.float32)) * 0.5 + 0.1
    gt_bbox = jnp.concatenate([gt_center - half, gt_center + half], axis=1)

    data = {
        'predictions': {
            'origin_reduce_global_feature':
                jax.random.normal(k_feat, (B, NUM_QUERY, TRANS_DIM), jnp.float32),
            'origin_encode_feature':
                jax.random.normal(k_enc, (B, NUM_QUERY, TRANS_DIM), jnp.float32),
        },
        'inputs': {
            'origin_bbox': gt_bbox,
            'origin_center': gt_center,
        },
        'losses': {},
    }

    params = init_params(k_params)
    data = bboxnet_forward(data, params, infer=False)

    jax.block_until_ready((data['predictions']['origin_bbox'],
                           data['predictions']['origin_center'],
                           data['predictions']['origin_bbox_feature'],
                           data['losses']['loss_origin_bbox_l1'],
                           data['losses']['loss_origin_center_l1'],
                           data['losses']['loss_origin_bbox_eiou']))
    print("KERNEL_OK")
</pallas_src>

<mosaic_0001>
module attributes {stable_mosaic.version = 11 : i64} {
  func.func @encoder_kernel(%arg0: i32, %arg1: memref<2x36864xbf16, #tpu.memory_space<vmem>>, %arg2: memref<36864x128xbf16, #tpu.memory_space<vmem>>, %arg3: memref<1x128xf32, #tpu.memory_space<vmem>>, %arg4: memref<2x128xf32, #tpu.memory_space<vmem>>) attributes {dimension_semantics = [#tpu.dimension_semantics<parallel>], iteration_bounds = array<i64: 3>, scalar_prefetch = 0 : i64, scratch_operands = 0 : i64, tpu.core_type = #tpu.core_type<tc>, window_params = [{pipeline_mode = #tpu.pipeline_mode<synchronous>, transform_indices = @transform_0, window_bounds = array<i64: 2, 36864>}, {transform_indices = @transform_1, window_bounds = array<i64: 36864, 128>}, {transform_indices = @transform_2, window_bounds = array<i64: 1, 128>}, {transform_indices = @transform_3, window_bounds = array<i64: 2, 128>}]} {
    %c0 = arith.constant 0 : index
    %c0_0 = arith.constant 0 : index
    %0 = vector.load %arg1[%c0, %c0_0] : memref<2x36864xbf16, #tpu.memory_space<vmem>>, vector<2x36864xbf16>
    %c0_1 = arith.constant 0 : index
    %c0_2 = arith.constant 0 : index
    %1 = vector.load %arg2[%c0_1, %c0_2] : memref<36864x128xbf16, #tpu.memory_space<vmem>>, vector<36864x128xbf16>
    %cst = arith.constant dense<0.000000e+00> : vector<2x128xf32>
    %2 = tpu.matmul %0, %1, %cst {dimension_numbers = #tpu.dot_dimension_numbers<[1], [0], [0], [1], [0, 0, 1, 1], [], []>} : vector<2x36864xbf16>, vector<36864x128xbf16>, vector<2x128xf32> -> vector<2x128xf32>
    %c0_3 = arith.constant 0 : index
    %c0_4 = arith.constant 0 : index
    %3 = vector.load %arg3[%c0_3, %c0_4] : memref<1x128xf32, #tpu.memory_space<vmem>>, vector<1x128xf32>
    %4 = vector.broadcast %3 : vector<1x128xf32> to vector<2x128xf32>
    %5 = arith.addf %2, %4 : vector<2x128xf32>
    %cst_5 = arith.constant 0.000000e+00 : f32
    %6 = vector.broadcast %cst_5 : f32 to vector<2x128xf32>
    %7 = arith.cmpf ogt, %5, %6 : vector<2x128xf32>
    %cst_6 = arith.constant 2.000000e-01 : f32
    %8 = vector.broadcast %cst_6 : f32 to vector<2x128xf32>
    %9 = arith.mulf %8, %5 : vector<2x128xf32>
    %10 = arith.select %7, %5, %9 : vector<2x128xi1>, vector<2x128xf32>
    %c0_7 = arith.constant 0 : index
    %c0_8 = arith.constant 0 : index
    %11 = vector.load %arg4[%c0_7, %c0_8] : memref<2x128xf32, #tpu.memory_space<vmem>>, vector<2x128xf32>
    tpu.vector_store %arg4[%c0_7, %c0_8], %10 {strides = array<i32>} : memref<2x128xf32, #tpu.memory_space<vmem>>, vector<2x128xf32>,
    return
  }
  func.func @transform_0(%arg0: i32) -> (i32, i32) {
    %c0_i32 = arith.constant 0 : i32
    %c0_i32_0 = arith.constant 0 : i32
    %c0_i32_1 = arith.constant 0 : i32
    return %c0_i32, %c0_i32_0 : i32, i32
  }
  func.func @transform_1(%arg0: i32) -> (i32, i32) {
    %c0_i32 = arith.constant 0 : i32
    %c0_i32_0 = arith.constant 0 : i32
    return %c0_i32, %arg0 : i32, i32
  }
  func.func @transform_2(%arg0: i32) -> (i32, i32) {
    %c0_i32 = arith.constant 0 : i32
    %c0_i32_0 = arith.constant 0 : i32
    return %c0_i32, %arg0 : i32, i32
  }
  func.func @transform_3(%arg0: i32) -> (i32, i32) {
    %c0_i32 = arith.constant 0 : i32
    %c0_i32_0 = arith.constant 0 : i32
    return %c0_i32, %arg0 : i32, i32
  }
}

</mosaic_0001>

<bundles_post_ra>
// kernel: tpu_custom_call.1
= control target key start
LH: loop header
LB: loop body
LE: loop exit
PB: predicated region body
PF: predicated region fallthrough
CT: control target
= control target key end

     0   :  { %8 = vsyncpa [#allocation3], 0  ;;  %s37859_s0 = inlined_call_operand.hbm [shape: bf16[2,36864], index: 0, kind: input, shape index: {}]   ;;  %s37860_s1 = inlined_call_operand.hbm [shape: bf16[36864,384], index: 1, kind: input, shape index: {}]   ;;  %s37861_s2 = inlined_call_operand.hbm [shape: f32[1,384], index: 2, kind: input, shape index: {}]   ;;  %s37862_s3 = inlined_call_operand.hbm [shape: f32[2,384], index: 3, kind: output, shape index: {}]  }
   0x1   :  { %9 = vsyncpa [#allocation6], 0 }
   0x2   :  { %11 = vsyncpa [#allocation6 + $0x1], 0 }
   0x3   :  { %12 = vsyncpa [#allocation4], 0 }
   0x4   :  { %14 = vsyncpa [#allocation4 + $0x1], 0  ;;  %s34747_s12 = smov 0   ;;  %s34749_s13 = smov 0  }
   0x5   :  { %s34751_s14 = smov 0   ;;  %s34753_s15 = smov 0  }
   0x6 LB: > { %s34768_s16 = sadd.s32 1, %s34717_s15   ;;  %s48_s17 = sadd.s32 1, %s34713_s14  ;;  %s34717_s15 = sphi %s34753_s15, %s37884_s15   ;;  %s34713_s14 = sphi %s34751_s14, %s37883_s14   ;;  %s34709_s13 = sphi %s34749_s13, %s37882_s13   ;;  %s34705_s12 = sphi %s34747_s12, %s37881_s12  }
   0x7   : > { %s45_s18 = ssub.s32 %s34717_s15, %s34768_s16  ;;  %p55_p0 = scmp.ne.s32.totalorder %s34713_s14, %s34709_s13 }
   0x8   : > { %p46_p1 = scmp.eq.s32.totalorder %s45_s18, 0  ;;  %p56_p2 = scmp.eq.s32.totalorder %s34717_s15, 0 }
   0x9   : > { %p32187_p3 = scmp.lt.s32.totalorder %s34717_s15, 3  ;;  %s148_s20 = sand.u32 1, %s34717_s15  }
   0xa   : > { %s34778_s19 = scalar_select %p46_p1, %s34713_s14, %s48_s17  }
   0xb   : > { %p57_p4 = por %p56_p2, %p55_p0  ;;  %s150_s21 = sand.u32 1, %s34713_s14  }
   0xc   : > { %s32159_s22 = smul.u32 18432, %s150_s21  ;;  %s26677_s23 = sshll.u32 %s34717_s15, 6 }
   0xd   : > { %s34791_s26 = scalar_lea.hbm %s37860_s1, %s26677_s23  ;;  %p34793_p5 = pnand %p32187_p3, %p57_p4 }
   0xe   : > { %s152_s28 = scalar_lea.vmem [#allocation5], %s32159_s22  ;;  %s34799_s30 = scalar_lea.sflag [#allocation6], %s148_s20 }
   0xf   : > { %s158_s29 = sshll.u32 %s152_s28, 4  ;;  %s34567_s4 = scalar_lea.hbm %s34791_s26, 294912  ;;  %s34797_s29 = int_to_ptr.vmem [resolvable:$true] %s158_s29 }
  0x10   : > { %p34568_p6 = scmp.ne.s32.totalorder %s34791_s26, %s34567_s4  ;;  %p34569_p7 = pneg %p34793_p5 }
  0x11   : > { %s34572_s7 = scalar_lea.hbm %s37860_s1, 884736  ;;  %p34573_p10 = scmp.lt.s32.totalorder %s34791_s26, %s37860_s1 }
  0x12   : > { %p34570_p8 = pnand %p34569_p7, %p34568_p6  ;;  %p34574_p11 = scmp.lt.s32.totalorder %s34572_s7, %s34567_s4 }
  0x14   : > { %p34571_p9 = pneg %p34570_p8  ;;  %p34575_p12 = por %p34574_p11, %p34573_p10 }
  0x16   : > { %p34576_p13 = pnand %p34575_p12, %p34571_p9 }
  0x18   : > { %34579 = shalt.err (!%p34576_p13)
}
  0x19   : > { %s34580_s10 = scalar_lea.vmem %s34797_s29, 294912  ;;  %s34719_s11 = smov [#allocation5]  }
  0x1a   : > { %p34581_p1 = scmp.ne.s32.totalorder %s34797_s29, %s34580_s10  ;;  %s34585_s17 = sshll.u32 %s34719_s11, 4  ;;  %s34586_s17 = int_to_ptr.vmem [resolvable:$false] %s34585_s17 }
  0x1b   : > { %s34587_s18 = scalar_lea.vmem %s34586_s17, 589824  ;;  %p34588_p4 = scmp.lt.s32.totalorder %s34797_s29, %s34586_s17 }
  0x1c   : > { %p34583_p2 = pnand %p34581_p1, %p34569_p7  ;;  %p34589_p6 = scmp.lt.s32.totalorder %s34587_s18, %s34580_s10 }
  0x1e   : > { %p34584_p3 = pneg %p34583_p2  ;;  %p34590_p8 = por %p34589_p6, %p34588_p4 }
  0x20   : > { %p34591_p10 = pnand %p34590_p8, %p34584_p3 }
  0x22   : > { %34594 = shalt.err (!%p34591_p10)
}
  0x23   : > { %s34720_s20 = smov 192   ;;  %s34721_s22 = smov 64  }
  0x24   : > { %s34722_s23 = smov 4   ;;  %s34827_s24 = sadd.s32 4294967295, %s34717_s15  }
  0x25   : > { %32178 = dma.hbm_to_vmem [thread:$0]  (!%p34793_p5), %s34791_s26, 294912, %s34797_s29, %s34799_s30, %s34720_s20, %s34721_s22, %s34722_s23  }
  0x26   : > { %s26673_s25 = sadd.s32 4294967294, %s34717_s15   ;;  %p61_p9 = scmp.ne.s32.totalorder %s34709_s13, %s34705_s12 }
  0x27   : > { %p37863_p11 = scmp.eq.s32.totalorder %s34827_s24, 0  ;;  %p111_p12 = scmp.eq.s32.totalorder %s34827_s24, 2 }
  0x28   : > { %p117_p13 = scmp.eq.s32.totalorder %s26673_s25, 2  ;;  %p26674_p1 = scmp.ge.s32.totalorder %s34717_s15, 1 }
  0x29   : > { %p34837_p2 = por %p37863_p11, %p61_p9  ;;  %p34844_p3 = por %p111_p12, %p55_p0 }
  0x2a   : > { %p34848_p4 = por %p117_p13, %p61_p9  ;;  %p124_p6 = scmp.lt.s32.totalorder %s34717_s15, 4 }
  0x2b   : > { %s37869_s28 = scalar_select %p34837_p2, 1, 0 }
  0x2c   : > { %s37870_s26 = scalar_select %p34844_p3, 1, 0 }
  0x2d   : > { %s37871_s29 = scalar_select %p34848_p4, 1, 0 }
  0x2e   : > { %p34853_p8 = pnand %p26674_p1, %p124_p6  ;;  %s34723_s5 = smov [#allocation2]  }
  0x2f   : > { %s137_s6 = sshll.u32 %s34723_s5, 4  ;;  %s26678_s7 = sshll.u32 %s34717_s15, 4  ;;  %s34857_s6 = int_to_ptr.vmem [resolvable:$true] %s137_s6 }
  0x30   : > { %s37872_s4 = scalar_select %p34853_p8, 1, 0 }
  0x31   : > { %p32171_p0 = pneg %p34853_p8  ;;  %s34865_s10 = scalar_lea.hbm %s37861_s2, %s26678_s7 }
  0x32   : > { %s171_s11 = scalar_lea.vmem [#allocation7], %s150_s21  ;;  %s34595_s20 = scalar_lea.hbm %s34865_s10, 16 }
  0x33   : > { %s178_s17 = sshll.u32 %s171_s11, 4  ;;  %p34871_p10 = pnand %p32171_p0, %p37863_p11  ;;  %s179_s17 = int_to_ptr.vmem [resolvable:$true] %s178_s17 }
  0x34   : > { %p34596_p9 = scmp.ne.s32.totalorder %s34865_s10, %s34595_s20  ;;  %s34600_s25 = scalar_lea.hbm %s37861_s2, 48 }
  0x35   : > { %s37873_s18 = scalar_select %p34871_p10, 1, 0 }
  0x36   : > { %p34598_p12 = pnand %p34596_p9, %p34569_p7  ;;  %p34601_p1 = scmp.lt.s32.totalorder %s34865_s10, %s37861_s2 }
  0x37   : > { %p34602_p6 = scmp.lt.s32.totalorder %s34600_s25, %s34595_s20 }
  0x38   : > { %p34599_p13 = pneg %p34598_p12 }
  0x39   : > { %p34603_p0 = por %p34602_p6, %p34601_p1 }
  0x3b   : > { %p34604_p11 = pnand %p34603_p0, %p34599_p13 }
  0x3d   : > { %34607 = shalt.err (!%p34604_p11)
}
  0x3e   : > { %s34608_s21 = scalar_lea.vmem %s179_s17, 16  ;;  %s34724_s8 = smov [#allocation7]  }
  0x3f   : > { %p34609_p4 = scmp.ne.s32.totalorder %s179_s17, %s34608_s21  ;;  %s34613_s9 = sshll.u32 %s34724_s8, 4  ;;  %s34614_s9 = int_to_ptr.vmem [resolvable:$false] %s34613_s9 }
  0x40   : > { %s34615_s11 = scalar_lea.vmem %s34614_s9, 32  ;;  %p34616_p12 = scmp.lt.s32.totalorder %s179_s17, %s34614_s9 }
  0x41   : > { %p34611_p3 = pnand %p34609_p4, %p34569_p7  ;;  %p34617_p2 = scmp.lt.s32.totalorder %s34615_s11, %s34608_s21 }
  0x43   : > { %p34612_p9 = pneg %p34611_p3  ;;  %p34618_p8 = por %p34617_p2, %p34616_p12 }
  0x45   : > { %p34619_p10 = pnand %p34618_p8, %p34612_p9 }
  0x47   : > { %34622 = shalt.err (!%p34619_p10)
}
  0x48   : > { %32181 = dma.hbm_to_vmem [thread:$0]  (!%p34793_p5), %s34865_s10, 16, %s179_s17, %s34799_s30  }
  0x49   : > { %p37874_p7 = scmp.ne.s32.totalorder %s37873_s18, 0  ;;  %s34634_s20 = scalar_lea.vmem %s34857_s6, 4608 }
  0x4a   : > { %p34635_p3 = scmp.ne.s32.totalorder %s34857_s6, %s34634_s20  ;;  %p34642_p1 = scmp.lt.s32.totalorder %s34857_s6, %s34857_s6 }
  0x4b   : > { %p34625_p11 = pneg %p37874_p7  ;;  %p34643_p2 = scmp.lt.s32.totalorder %s34634_s20, %s34634_s20 }
  0x4d   : > { %p34637_p4 = pnand %p34635_p3, %p34625_p11  ;;  %p34644_p8 = por %p34643_p2, %p34642_p1 }
  0x4f   : > { %p34638_p13 = pneg %p34637_p4 }
  0x51   : > { %p34645_p10 = pnand %p34644_p8, %p34638_p13 }
  0x53   : > { %34648 = shalt.err (!%p34645_p10)
}
  0x54   : > { %32174 = dma.hbm_to_vmem [thread:$0]  (!%p37874_p7), %s37859_s0, 4608, %s34857_s6, [#allocation3]  }
  0x55   : > { %p37875_p5 = scmp.ne.s32.totalorder %s37872_s4, 0 }
  0x56   : > { %p37876_p6 = scmp.eq.s32.totalorder (!%p37875_p5), %s34827_s24, 0 }
  0x57   : > { %187 = sbr.rel (%p37875_p5) target bundleno = 2621 (0xa3d), region = 32 }
  0x5c   : > { %34692 = dma.done.wait (%p37876_p6), [#allocation3], 4608   ;;  %p37877_p0 = pmov %p37876_p6 }
  0x5d   : > { %s193_s30 = sand.u32 1, %s34827_s24   ;;  %s34914_s10 = sand.u32 1, %s34709_s13  }
  0x5e   : > { %34694 = vsyncadd (%p37877_p0), [#allocation3], 4294962688  ;;  %s32160_s17 = smul.u32 18432, %s34914_s10  ;;  %s194_s18 = scalar_lea.sflag [#allocation6], %s193_s30 }
  0x5f   : > { %p37878_p9 = scmp.ne.s32.totalorder %s37869_s28, 0 }
  0x60   : > { %s34917_s23 = scalar_lea.vmem [#allocation5], %s32160_s17 }
  0x61   : > { %34696 = dma.done.wait (%p37878_p9), %s194_s18, 294928  }
  0x62   : > { %34698 = vsyncadd (%p37878_p9), %s194_s18, 4294672368  ;;  %v32227_v0 = vld [vmem:[%s34917_s23 + $0x78] sm:$0xff]   ;;  %v32231_v4 = vld [vmem:[%s34917_s23 + $0x70] sm:$0xff]   ;;  %v34725_v22 = vmov 1966171168   ;;  %v4924_v24 = vlaneseq  ;;  %s205_s28 = scalar_lea.vmem [#allocation7], %s34914_s10 }
  0x63   : > { %v32228_v1 = vld [vmem:[%s34917_s23 + $0xf8] sm:$0xff]   ;;  %28991 = vmatprep.subr.bf16.mxu0 %v32227_v0  ;;  %v32232_v5 = vld [vmem:[%s34917_s23 + $0xf0] sm:$0xff]   ;;  %v32235_v8 = vld [vmem:[%s34917_s23 + $0x68] sm:$0xff]   ;;  %v4922_v23 = vunpack.c.l.s4 %v34725_v22  ;;  %s26681_s4 = sshll.u32 %s34914_s10, 1  ;;  %s28988_s6 = sshll.u32 %s34827_s24, 5 }
  0x64   : > { %v32229_v2 = vld [vmem:[%s34917_s23 + $0x38] sm:$0xff]   ;;  %29013 = vmatprep.subr.bf16.mxu1 %v32228_v1  ;;  %v32233_v6 = vld [vmem:[%s34917_s23 + $0x30] sm:$0xff]   ;;  %v32236_v9 = vld [vmem:[%s34917_s23 + $0xe8] sm:$0xff]   ;;  %v4925_v30 = vshrl.u32 %v4924_v24, 7  ;;  %s231_s25 = scalar_lea.vmem [#allocation8], %s26681_s4  ;;  %s37823_s8 = scalar_lea.hbm %s37862_s3, %s28988_s6 }
  0x65   : > { %v32230_v3 = vld [vmem:[%s34917_s23 + $0xb8] sm:$0xff]   ;;  %28992 = vmatpush3.bf16.msra.mxu0 %v32229_v2  ;;  %v32234_v7 = vld [vmem:[%s34917_s23 + $0xb0] sm:$0xff]   ;;  %v32237_v10 = vld [vmem:[%s34917_s23 + $0x28] sm:$0xff]   ;;  %v4923_v29 = vunpack.c.0.s8 %v4922_v23  ;;  %s26574_s5 = sshll.u32 %s231_s25, 4  ;;  %s26561_s9 = scalar_lea.sflag [#allocation4], %s34914_s10  ;;  %s26575_s5 = int_to_ptr.vmem [resolvable:$true] %s26574_s5 }
  0x66   : > { %29014 = vmatpush3.bf16.msra.mxu1 %v32230_v3  ;;  %28993 = vmatprep.subr.bf16.mxu0 %v32231_v4  ;;  %v32238_v11 = vld [vmem:[%s34917_s23 + $0xa8] sm:$0xff]   ;;  %v32239_v12 = vld [vmem:[%s34917_s23 + $0x60] sm:$0xff]   ;;  %v32243_v16 = vld [vmem:[%s34917_s23 + $0x58] sm:$0xff]   ;;  %s34649_s11 = scalar_lea.vmem %s26575_s5, 32  ;;  %p37879_p7 = scmp.ne.s32.totalorder %s37870_s26, 0 }
  0x67   : > { %29015 = vmatprep.subr.bf16.mxu1 %v32232_v5  ;;  %v32240_v13 = vld [vmem:[%s34917_s23 + $0xe0] sm:$0xff]   ;;  %v32244_v17 = vld [vmem:[%s34917_s23 + $0xd8] sm:$0xff]   ;;  %v32247_v20 = vld [vmem:[%s34917_s23 + $0x50] sm:$0xff]   ;;  %v34953_v35 = vsub.s32 %v4923_v29, %v4925_v30  ;;  %p34650_p12 = scmp.ne.s32.totalorder %s26575_s5, %s34649_s11  ;;  %s34726_s24 = smov [#allocation8]  }
  0x68   : > { %v32241_v14 = vld [vmem:[%s34917_s23 + $0x20] sm:$0xff]   ;;  %v32245_v18 = vld [vmem:[%s34917_s23 + $0x18] sm:$0xff]   ;;  %v32248_v21 = vld [vmem:[%s34917_s23 + $0xd0] sm:$0xff]   ;;  %s34653_s20 = sshll.u32 %s34726_s24, 4  ;;  %s34654_s20 = int_to_ptr.vmem [resolvable:$false] %s34653_s20 }
  0x69   : > { %28994 = vmatpush3.bf16.msra.mxu0 %v32233_v6  ;;  %v32242_v15 = vld [vmem:[%s34917_s23 + $0xa0] sm:$0xff]   ;;  %v32246_v19 = vld [vmem:[%s34917_s23 + $0x98] sm:$0xff]   ;;  %v32249_v25 = vld [vmem:[%s34917_s23 + $0x10] sm:$0xff]   ;;  %p34651_p11 = pnand %p34650_p12, %p37879_p7  ;;  %s34655_s27 = scalar_lea.vmem %s34654_s20, 64 }
  0x6a   : > { %29016 = vmatpush3.bf16.msra.mxu1 %v32234_v7  ;;  %28995 = vmatprep.subr.bf16.mxu0 %v32235_v8  ;;  %v32250_v26 = vld [vmem:[%s34917_s23 + $0x90] sm:$0xff]   ;;  %v32251_v27 = vld [vmem:[%s34917_s23 + $0x48] sm:$0xff]   ;;  %v32255_v33 = vld [vmem:[%s34917_s23 + $0x40] sm:$0xff]   ;;  %p34656_p4 = scmp.lt.s32.totalorder %s26575_s5, %s34654_s20  ;;  %p34657_p13 = scmp.lt.s32.totalorder %s34655_s27, %s34649_s11 }
  0x6b   : > { %29017 = vmatprep.subr.bf16.mxu1 %v32236_v9  ;;  %v32252_v28 = vld [vmem:[%s34917_s23 + $0xc8] sm:$0xff]   ;;  %v32256_v34 = vld [vmem:[%s34917_s23 + $0xc0] sm:$0xff]   ;;  %v32260_v41 = vld [vmem:[%s34917_s23 + $0x178] sm:$0xff]   ;;  %p34652_p3 = pneg %p34651_p11 }
  0x6c   : > { %v32253_v31 = vld [vmem:[%s34917_s23 + $0x8] sm:$0xff]   ;;  %v32257_v36 = vld [vmem:[%s34917_s23] sm:$0xff]   ;;  %v32261_v42 = vld [vmem:[%s34917_s23 + $0x1f8] sm:$0xff]   ;;  %p34658_p1 = por %p34657_p13, %p34656_p4 }
  0x6d   : > { %28996 = vmatpush3.bf16.msra.mxu0 %v32237_v10  ;;  %v32254_v32 = vld [vmem:[%s34917_s23 + $0x88] sm:$0xff]   ;;  %v32258_v37 = vld [vmem:[%s34917_s23 + $0x80] sm:$0xff]   ;;  %v32262_v46 = vld [vmem:[%s34917_s23 + $0x138] sm:$0xff]  }
  0x6e   : > { %29018 = vmatpush3.bf16.msra.mxu1 %v32238_v11  ;;  %28997 = vmatprep.subr.bf16.mxu0 %v32239_v12  ;;  %v233_v38 = vld [vmem:[#allocation2] sm:$0xff]  ;;  %v32263_v48 = vld [vmem:[%s34917_s23 + $0x1b8] sm:$0xff]   ;;  %v32264_v51 = vld [vmem:[%s34917_s23 + $0x170] sm:$0xff]   ;;  %p34659_p2 = pnand %p34658_p1, %p34652_p3 }
  0x6f   : > { %29019 = vmatprep.subr.bf16.mxu1 %v32240_v13  ;;  %v4920_v39 = vcombine.high %v233_v38, %v233_v38  ;;  %v4927_v40 = vrot.slane %v233_v38, %v34953_v35  ;;  %v32265_v53 = vld [vmem:[%s34917_s23 + $0x1f0] sm:$0xff]   ;;  %v32268_v58 = vld [vmem:[%s34917_s23 + $0x168] sm:$0xff]   ;;  %v32272_v62 = vld [vmem:[%s34917_s23 + $0x160] sm:$0xff]  }
  0x70   : > { %v32266_v55 = vld [vmem:[%s34917_s23 + $0x130] sm:$0xff]   ;;  %v32269_v59 = vld [vmem:[%s34917_s23 + $0x1e8] sm:$0xff]   ;;  %v32273_v63 = vld [vmem:[%s34917_s23 + $0x1e0] sm:$0xff]  }
  0x71   : > { %28998 = vmatpush3.bf16.msra.mxu0 %v32241_v14  ;;  %v4935_v43 = vcombine.high %v4927_v40, %v4927_v40  ;;  %v4943_v44 = vrot.slane %v4927_v40, %v34953_v35  ;;  %v34962_v45 = vrot.slane %v4920_v39, %v34953_v35  ;;  %v32267_v56 = vld [vmem:[%s34917_s23 + $0x1b0] sm:$0xff]   ;;  %v32270_v60 = vld [vmem:[%s34917_s23 + $0x128] sm:$0xff]   ;;  %v32274_v0 = vld [vmem:[%s34917_s23 + $0x120] sm:$0xff]  }
  0x72   : > { %29020 = vmatpush3.bf16.msra.mxu1 %v32242_v15  ;;  %28999 = vmatprep.subr.bf16.mxu0 %v32243_v16  ;;  %v32271_v61 = vld [vmem:[%s34917_s23 + $0x1a8] sm:$0xff]   ;;  %v32275_v1 = vld [vmem:[%s34917_s23 + $0x1a0] sm:$0xff]   ;;  %v32276_v2 = vld [vmem:[%s34917_s23 + $0x158] sm:$0xff]  }
  0x73   : > { %29021 = vmatprep.subr.bf16.mxu1 %v32244_v17  ;;  %v4957_v47 = vrot.slane %v4935_v43, %v34953_v35  ;;  %v4936_v49 = vcombine.high %v34962_v45, %v34962_v45  ;;  %v4965_v50 = vcombine.high %v4943_v44, %v4943_v44  ;;  %v32277_v3 = vld [vmem:[%s34917_s23 + $0x1d8] sm:$0xff]   ;;  %v32280_v6 = vld [vmem:[%s34917_s23 + $0x150] sm:$0xff]   ;;  %v32284_v10 = vld [vmem:[%s34917_s23 + $0x148] sm:$0xff]  }
  0x74   : > { %v32278_v4 = vld [vmem:[%s34917_s23 + $0x118] sm:$0xff]   ;;  %v32281_v7 = vld [vmem:[%s34917_s23 + $0x1d0] sm:$0xff]   ;;  %v32285_v11 = vld [vmem:[%s34917_s23 + $0x1c8] sm:$0xff]  }
  0x75   : > { %29000 = vmatpush3.bf16.msra.mxu0 %v32245_v18  ;;  %20828 = vmatprep.mubr.bf16.mxu0 %v4957_v47  ;;  %v4967_v52 = vcombine.high %v4957_v47, %v4957_v47  ;;  %v4964_v54 = vrot.slane %v4936_v49, %v34953_v35  ;;  %v32279_v5 = vld [vmem:[%s34917_s23 + $0x198] sm:$0xff]   ;;  %v32282_v8 = vld [vmem:[%s34917_s23 + $0x110] sm:$0xff]   ;;  %v32286_v12 = vld [vmem:[%s34917_s23 + $0x108] sm:$0xff]   ;;  %v4950_v18 = vrot.slane %v34962_v45, %v34953_v35 }
  0x76   : > { %29022 = vmatpush3.bf16.msra.mxu1 %v32246_v19  ;;  %29001 = vmatprep.subr.bf16.mxu0 %v32247_v20  ;;  %v32283_v9 = vld [vmem:[%s34917_s23 + $0x190] sm:$0xff]   ;;  %v32287_v13 = vld [vmem:[%s34917_s23 + $0x188] sm:$0xff]   ;;  %v32288_v14 = vld [vmem:[%s34917_s23 + $0x140] sm:$0xff]  }
  0x77   : > { %29023 = vmatprep.subr.bf16.mxu1 %v32248_v21  ;;  %20868 = vmatprep.mubr.bf16.mxu1 %v4967_v52  ;;  %v4968_v57 = vcombine.high %v4964_v54, %v4964_v54  ;;  %v32289_v15 = vld [vmem:[%s34917_s23 + $0x1c0] sm:$0xff]   ;;  %v32292_v19 = vld [vmem:[%s34917_s23 + $0x278] sm:$0xff]   ;;  %v4966_v23 = vcombine.high %v4950_v18, %v4950_v18  ;;  %v32296_v24 = vld [vmem:[%s34917_s23 + $0x270] sm:$0xff]  }
  0x78   : > { %v32290_v16 = vld [vmem:[%s34917_s23 + $0x100] sm:$0xff]   ;;  %v32293_v20 = vld [vmem:[%s34917_s23 + $0x2f8] sm:$0xff]   ;;  %v32301_v29 = vld [vmem:[%s34917_s23 + $0x2e8] sm:$0xff]  }
  0x79   : > { %29002 = vmatpush3.bf16.msra.mxu0 %v32249_v25  ;;  %v32291_v17 = vld [vmem:[%s34917_s23 + $0x180] sm:$0xff]   ;;  %v32294_v21 = vld [vmem:[%s34917_s23 + $0x238] sm:$0xff]   ;;  %v32297_v25 = vld [vmem:[%s34917_s23 + $0x2f0] sm:$0xff]  }
  0x7a   : > { %29024 = vmatpush3.bf16.msra.mxu1 %v32250_v26  ;;  %29003 = vmatprep.subr.bf16.mxu0 %v32251_v27  ;;  %v32295_v22 = vld [vmem:[%s34917_s23 + $0x2b8] sm:$0xff]   ;;  %v32298_v26 = vld [vmem:[%s34917_s23 + $0x230] sm:$0xff]   ;;  %v32302_v30 = vld [vmem:[%s34917_s23 + $0x228] sm:$0xff]  }
  0x7b   : > { %29025 = vmatprep.subr.bf16.mxu1 %v32252_v28  ;;  %v32299_v27 = vld [vmem:[%s34917_s23 + $0x2b0] sm:$0xff]   ;;  %v32300_v28 = vld [vmem:[%s34917_s23 + $0x268] sm:$0xff]   ;;  %v32309_v38 = vld [vmem:[%s34917_s23 + $0x2d8] sm:$0xff]  }
  0x7c   : > { %v32310_v39 = vld [vmem:[%s34917_s23 + $0x218] sm:$0xff]   ;;  %v32314_v43 = vld [vmem:[%s34917_s23 + $0x210] sm:$0xff]   ;;  %v32316_v45 = vld [vmem:[%s34917_s23 + $0x248] sm:$0xff]  }
  0x7d   : > { %29004 = vmatpush3.bf16.msra.mxu0 %v32253_v31  ;;  %v32303_v31 = vld [vmem:[%s34917_s23 + $0x2a8] sm:$0xff]   ;;  %v32311_v40 = vld [vmem:[%s34917_s23 + $0x298] sm:$0xff]   ;;  %v32320_v49 = vld [vmem:[%s34917_s23 + $0x240] sm:$0xff]  }
  0x7e   : > { %29026 = vmatpush3.bf16.msra.mxu1 %v32254_v32  ;;  %29005 = vmatprep.subr.bf16.mxu0 %v32255_v33  ;;  %v32304_v32 = vld [vmem:[%s34917_s23 + $0x260] sm:$0xff]   ;;  %v32318_v47 = vld [vmem:[%s34917_s23 + $0x208] sm:$0xff]  }
  0x7f   : > { %29027 = vmatprep.subr.bf16.mxu1 %v32256_v34  ;;  %v32305_v33 = vld [vmem:[%s34917_s23 + $0x2e0] sm:$0xff]   ;;  %v234_v52 = vld [vmem:[#allocation2 + $0x8] sm:$0xff] }
  0x80   : > { %v32306_v34 = vld [vmem:[%s34917_s23 + $0x220] sm:$0xff]  }
  0x81   : > { %29006 = vmatpush3.bf16.msra.mxu0 %v32257_v36  ;;  %v32307_v36 = vld [vmem:[%s34917_s23 + $0x2a0] sm:$0xff]  }
  0x82   : > { %29028 = vmatpush3.bf16.msra.mxu1 %v32258_v37  ;;  %29035 = vmatprep.subr.bf16.mxu0 %v32260_v41  ;;  %v32308_v37 = vld [vmem:[%s34917_s23 + $0x258] sm:$0xff]   ;;  %v32312_v41 = vld [vmem:[%s34917_s23 + $0x250] sm:$0xff]  }
  0x83   : > { %29057 = vmatprep.subr.bf16.mxu1 %v32261_v42  ;;  %v32313_v42 = vld [vmem:[%s34917_s23 + $0x2d0] sm:$0xff]  }
  0x84   : > { %20829 = vmatmul.mubr.bf16.vlgmr.msra.gmra.mxu0 %v4943_v44  ;;  %v32315_v44 = vld [vmem:[%s34917_s23 + $0x290] sm:$0xff]  }
  0x85   : > { %29036 = vmatpush3.bf16.msra.mxu0 %v32262_v46  ;;  %20869 = vmatmul.mubr.bf16.vlgmr.msra.gmra.mxu1 %v4965_v50  ;;  %v32317_v46 = vld [vmem:[%s34917_s23 + $0x2c8] sm:$0xff]   ;;  %v32321_v50 = vld [vmem:[%s34917_s23 + $0x2c0] sm:$0xff]  }
  0x86   : > { %29037 = vmatprep.subr.bf16.mxu0 %v32264_v51  ;;  %29058 = vmatpush3.bf16.msra.mxu1 %v32263_v48  ;;  %v32319_v48 = vld [vmem:[%s34917_s23 + $0x288] sm:$0xff]   ;;  %v32322_v51 = vld [vmem:[%s34917_s23 + $0x200] sm:$0xff]  }
  0x87   : > { %20908 = vmatprep.mubr.bf16.mxu0 %v4964_v54  ;;  %29059 = vmatprep.subr.bf16.mxu1 %v32265_v53  ;;  %v32323_v53 = vld [vmem:[%s34917_s23 + $0x280] sm:$0xff]   ;;  %v4976_v54 = vrot.slane %v234_v52, %v34953_v35 }
  0x88   : > { %20948 = vmatprep.mubr.bf16.mxu1 %v4968_v57 }
  0x89   : > { %29038 = vmatpush3.bf16.msra.mxu0 %v32266_v55  ;;  %v4969_v55 = vcombine.high %v234_v52, %v234_v52  ;;  %v4984_v57 = vcombine.high %v4976_v54, %v4976_v54  ;;  %v32373_v52 = vld [vmem:[%s34917_s23 + $0x458] sm:$0xff]  }
  0x8a   : > { %29039 = vmatprep.subr.bf16.mxu0 %v32268_v58  ;;  %29060 = vmatpush3.bf16.msra.mxu1 %v32267_v56  ;;  %v32324_v56 = vld [vmem:[%s34917_s23 + $0x378] sm:$0xff]   ;;  %v4992_v58 = vrot.slane %v4976_v54, %v34953_v35 }
  0x8b   : > { %29061 = vmatprep.subr.bf16.mxu1 %v32269_v59  ;;  %v32325_v59 = vld [vmem:[%s34917_s23 + $0x3f8] sm:$0xff]  }
  0x8c   : > { %v32375_v54 = vld [vmem:[%s34917_s23 + $0x418] sm:$0xff]  }
  0x8d   : > { %29040 = vmatpush3.bf16.msra.mxu0 %v32270_v60  ;;  %v35037_v60 = vrot.slane %v4969_v55, %v34953_v35  ;;  %v32376_v55 = vld [vmem:[%s34917_s23 + $0x498] sm:$0xff]  }
  0x8e   : > { %29041 = vmatprep.subr.bf16.mxu0 %v32272_v62  ;;  %29062 = vmatpush3.bf16.msra.mxu1 %v32271_v61  ;;  %v32326_v61 = vld [vmem:[%s34917_s23 + $0x338] sm:$0xff]   ;;  %v5006_v62 = vrot.slane %v4984_v57, %v34953_v35  ;;  %v32378_v57 = vld [vmem:[%s34917_s23 + $0x4d0] sm:$0xff]  }
  0x8f   : > { %29063 = vmatprep.subr.bf16.mxu1 %v32273_v63  ;;  %v32327_v63 = vld [vmem:[%s34917_s23 + $0x3b8] sm:$0xff]  }
  0x91   : > { %29042 = vmatpush3.bf16.msra.mxu0 %v32274_v0  ;;  %v4985_v0 = vcombine.high %v35037_v60, %v35037_v60 }
  0x92   : > { %29043 = vmatprep.subr.bf16.mxu0 %v32276_v2  ;;  %29064 = vmatpush3.bf16.msra.mxu1 %v32275_v1  ;;  %v5014_v1 = vcombine.high %v4992_v58, %v4992_v58  ;;  %v32328_v2 = vld [vmem:[%s34917_s23 + $0x370] sm:$0xff]  }
  0x93   : > { %29065 = vmatprep.subr.bf16.mxu1 %v32277_v3  ;;  %v5016_v3 = vcombine.high %v5006_v62, %v5006_v62 }
  0x95   : > { %29044 = vmatpush3.bf16.msra.mxu0 %v32278_v4  ;;  %v32329_v4 = vld [vmem:[%s34917_s23 + $0x3f0] sm:$0xff]  }
  0x96   : > { %29045 = vmatprep.subr.bf16.mxu0 %v32280_v6  ;;  %29066 = vmatpush3.bf16.msra.mxu1 %v32279_v5  ;;  %v5013_v5 = vrot.slane %v4985_v0, %v34953_v35  ;;  %v32330_v6 = vld [vmem:[%s34917_s23 + $0x330] sm:$0xff]   ;;  %v32385_v0 = vld [vmem:[%s34917_s23 + $0x440] sm:$0xff]  }
  0x97   : > { %29067 = vmatprep.subr.bf16.mxu1 %v32281_v7  ;;  %v32331_v7 = vld [vmem:[%s34917_s23 + $0x3b0] sm:$0xff]  }
  0x99   : > { %29046 = vmatpush3.bf16.msra.mxu0 %v32282_v8  ;;  %v5017_v8 = vcombine.high %v5013_v5, %v5013_v5 }
  0x9a   : > { %29047 = vmatprep.subr.bf16.mxu0 %v32284_v10  ;;  %29068 = vmatpush3.bf16.msra.mxu1 %v32283_v9  ;;  %v32332_v9 = vld [vmem:[%s34917_s23 + $0x368] sm:$0xff]  }
  0x9b   : > { %29069 = vmatprep.subr.bf16.mxu1 %v32285_v11  ;;  %v32333_v10 = vld [vmem:[%s34917_s23 + $0x3e8] sm:$0xff]  }
  0x9c   : > { %v32334_v11 = vld [vmem:[%s34917_s23 + $0x328] sm:$0xff]  }
  0x9d   : > { %29048 = vmatpush3.bf16.msra.mxu0 %v32286_v12  ;;  %v32335_v12 = vld [vmem:[%s34917_s23 + $0x3a8] sm:$0xff]  }
  0x9e   : > { %29049 = vmatprep.subr.bf16.mxu0 %v32288_v14  ;;  %29070 = vmatpush3.bf16.msra.mxu1 %v32287_v13  ;;  %v32336_v13 = vld [vmem:[%s34917_s23 + $0x360] sm:$0xff]  }
  0x9f   : > { %29071 = vmatprep.subr.bf16.mxu1 %v32289_v15  ;;  %v32337_v14 = vld [vmem:[%s34917_s23 + $0x3e0] sm:$0xff]  }
  0xa0   : > { %v32338_v15 = vld [vmem:[%s34917_s23 + $0x320] sm:$0xff]  }
  0xa1   : > { %29050 = vmatpush3.bf16.msra.mxu0 %v32290_v16  ;;  %v32339_v16 = vld [vmem:[%s34917_s23 + $0x3a0] sm:$0xff]  }
  0xa2   : > { %29079 = vmatprep.subr.bf16.mxu0 %v32292_v19  ;;  %29072 = vmatpush3.bf16.msra.mxu1 %v32291_v17  ;;  %v32340_v17 = vld [vmem:[%s34917_s23 + $0x358] sm:$0xff]  }
  0xa3   : > { %29101 = vmatprep.subr.bf16.mxu1 %v32293_v20  ;;  %v32342_v19 = vld [vmem:[%s34917_s23 + $0x318] sm:$0xff]  }
  0xa4   : > { %20909 = vmatmul.mubr.bf16.vlgmr.msra.gmra.mxu0 %v4950_v18  ;;  %v32341_v18 = vld [vmem:[%s34917_s23 + $0x3d8] sm:$0xff]  }
  0xa5   : > { %29080 = vmatpush3.bf16.msra.mxu0 %v32294_v21  ;;  %20949 = vmatmul.mubr.bf16.vlgmr.msra.gmra.mxu1 %v4966_v23  ;;  %v32343_v20 = vld [vmem:[%s34917_s23 + $0x398] sm:$0xff]   ;;  %v32344_v21 = vld [vmem:[%s34917_s23 + $0x350] sm:$0xff]  }
  0xa6   : > { %29081 = vmatprep.subr.bf16.mxu0 %v32296_v24  ;;  %29102 = vmatpush3.bf16.msra.mxu1 %v32295_v22  ;;  %v32345_v22 = vld [vmem:[%s34917_s23 + $0x3d0] sm:$0xff]  }
  0xa7   : > { %29103 = vmatprep.subr.bf16.mxu1 %v32297_v25  ;;  %20988 = vmatprep.mubr.bf16.mxu0 %v5006_v62  ;;  %v32346_v23 = vld [vmem:[%s34917_s23 + $0x310] sm:$0xff]   ;;  %v32348_v25 = vld [vmem:[%s34917_s23 + $0x348] sm:$0xff]  }
  0xa8   : > { %21028 = vmatprep.mubr.bf16.mxu1 %v5016_v3  ;;  %v32347_v24 = vld [vmem:[%s34917_s23 + $0x390] sm:$0xff]   ;;  %v32383_v62 = vld [vmem:[%s34917_s23 + $0x408] sm:$0xff]  }
  0xa9   : > { %29082 = vmatpush3.bf16.msra.mxu0 %v32298_v26  ;;  %v32349_v26 = vld [vmem:[%s34917_s23 + $0x3c8] sm:$0xff]   ;;  %v235_v3 = vld [vmem:[#allocation2 + $0x10] sm:$0xff] }
  0xaa   : > { %29083 = vmatprep.subr.bf16.mxu0 %v32300_v28  ;;  %29104 = vmatpush3.bf16.msra.mxu1 %v32299_v27  ;;  %v32350_v27 = vld [vmem:[%s34917_s23 + $0x308] sm:$0xff]  }
  0xab   : > { %29105 = vmatprep.subr.bf16.mxu1 %v32301_v29  ;;  %v32351_v28 = vld [vmem:[%s34917_s23 + $0x388] sm:$0xff]   ;;  %v32352_v29 = vld [vmem:[%s34917_s23 + $0x340] sm:$0xff]  }
  0xad   : > { %29084 = vmatpush3.bf16.msra.mxu0 %v32302_v30  ;;  %v32353_v30 = vld [vmem:[%s34917_s23 + $0x3c0] sm:$0xff]  }
  0xae   : > { %29085 = vmatprep.subr.bf16.mxu0 %v32304_v32  ;;  %29106 = vmatpush3.bf16.msra.mxu1 %v32303_v31  ;;  %v32354_v31 = vld [vmem:[%s34917_s23 + $0x300] sm:$0xff]  }
  0xaf   : > { %29107 = vmatprep.subr.bf16.mxu1 %v32305_v33  ;;  %v32355_v32 = vld [vmem:[%s34917_s23 + $0x380] sm:$0xff]   ;;  %v4999_v33 = vrot.slane %v35037_v60, %v34953_v35  ;;  %v32381_v60 = vld [vmem:[%s34917_s23 + $0x448] sm:$0xff]  }
  0xb1   : > { %29086 = vmatpush3.bf16.msra.mxu0 %v32306_v34  ;;  %v32357_v34 = vld [vmem:[%s34917_s23 + $0x478] sm:$0xff]  }
  0xb2   : > { %29087 = vmatprep.subr.bf16.mxu0 %v32308_v37  ;;  %29108 = vmatpush3.bf16.msra.mxu1 %v32307_v36  ;;  %v32358_v36 = vld [vmem:[%s34917_s23 + $0x4f8] sm:$0xff]  }
  0xb3   : > { %29109 = vmatprep.subr.bf16.mxu1 %v32309_v38  ;;  %v32359_v37 = vld [vmem:[%s34917_s23 + $0x438] sm:$0xff]  }
  0xb4   : > { %v32360_v38 = vld [vmem:[%s34917_s23 + $0x4b8] sm:$0xff]  }
  0xb5   : > { %29088 = vmatpush3.bf16.msra.mxu0 %v32310_v39  ;;  %v5015_v39 = vcombine.high %v4999_v33, %v4999_v33 }
  0xb6   : > { %29089 = vmatprep.subr.bf16.mxu0 %v32312_v41  ;;  %29110 = vmatpush3.bf16.msra.mxu1 %v32311_v40  ;;  %v32361_v40 = vld [vmem:[%s34917_s23 + $0x470] sm:$0xff]  }
  0xb7   : > { %29111 = vmatprep.subr.bf16.mxu1 %v32313_v42  ;;  %v32362_v41 = vld [vmem:[%s34917_s23 + $0x4f0] sm:$0xff]  }
  0xb8   : > { %v32363_v42 = vld [vmem:[%s34917_s23 + $0x430] sm:$0xff]  }
  0xb9   : > { %29090 = vmatpush3.bf16.msra.mxu0 %v32314_v43  ;;  %v32364_v43 = vld [vmem:[%s34917_s23 + $0x4b0] sm:$0xff]  }
  0xba   : > { %29091 = vmatprep.subr.bf16.mxu0 %v32316_v45  ;;  %29112 = vmatpush3.bf16.msra.mxu1 %v32315_v44  ;;  %v32365_v44 = vld [vmem:[%s34917_s23 + $0x468] sm:$0xff]  }
  0xbb   : > { %29113 = vmatprep.subr.bf16.mxu1 %v32317_v46  ;;  %v32366_v45 = vld [vmem:[%s34917_s23 + $0x4e8] sm:$0xff]  }
  0xbc   : > { %v32367_v46 = vld [vmem:[%s34917_s23 + $0x428] sm:$0xff]  }
  0xbd   : > { %29092 = vmatpush3.bf16.msra.mxu0 %v32318_v47  ;;  %v32368_v47 = vld [vmem:[%s34917_s23 + $0x4a8] sm:$0xff]  }
  0xbe   : > { %29093 = vmatprep.subr.bf16.mxu0 %v32320_v49  ;;  %29114 = vmatpush3.bf16.msra.mxu1 %v32319_v48  ;;  %v32369_v48 = vld [vmem:[%s34917_s23 + $0x460] sm:$0xff]  }
  0xbf   : > { %29115 = vmatprep.subr.bf16.mxu1 %v32321_v50  ;;  %v32370_v49 = vld [vmem:[%s34917_s23 + $0x4e0] sm:$0xff]  }
  0xc0   : > { %v32371_v50 = vld [vmem:[%s34917_s23 + $0x420] sm:$0xff]  }
  0xc1   : > { %29094 = vmatpush3.bf16.msra.mxu0 %v32322_v51  ;;  %v32372_v51 = vld [vmem:[%s34917_s23 + $0x4a0] sm:$0xff]  }
  0xc2   : > { %29123 = vmatprep.subr.bf16.mxu0 %v32324_v56  ;;  %29116 = vmatpush3.bf16.msra.mxu1 %v32323_v53  ;;  %v32374_v53 = vld [vmem:[%s34917_s23 + $0x4d8] sm:$0xff]   ;;  %v32377_v56 = vld [vmem:[%s34917_s23 + $0x450] sm:$0xff]  }
  0xc3   : > { %29145 = vmatprep.subr.bf16.mxu1 %v32325_v59  ;;  %v32380_v59 = vld [vmem:[%s34917_s23 + $0x490] sm:$0xff]  }
  0xc4   : > { %20989 = vmatmul.mubr.bf16.vlgmr.msra.gmra.mxu0 %v4992_v58  ;;  %v32379_v58 = vld [vmem:[%s34917_s23 + $0x410] sm:$0xff]  }
  0xc5   : > { %29124 = vmatpush3.bf16.msra.mxu0 %v32326_v61  ;;  %21029 = vmatmul.mubr.bf16.vlgmr.msra.gmra.mxu1 %v5014_v1  ;;  %v32382_v61 = vld [vmem:[%s34917_s23 + $0x4c8] sm:$0xff]   ;;  %v32386_v1 = vld [vmem:[%s34917_s23 + $0x4c0] sm:$0xff]  }
  0xc6   : > { %29125 = vmatprep.subr.bf16.mxu0 %v32328_v2  ;;  %29146 = vmatpush3.bf16.msra.mxu1 %v32327_v63  ;;  %v32384_v63 = vld [vmem:[%s34917_s23 + $0x488] sm:$0xff]   ;;  %v32387_v2 = vld [vmem:[%s34917_s23 + $0x400] sm:$0xff]  }
  0xc7   : > { %21068 = vmatprep.mubr.bf16.mxu0 %v5013_v5  ;;  %29147 = vmatprep.subr.bf16.mxu1 %v32329_v4  ;;  %v32388_v4 = vld [vmem:[%s34917_s23 + $0x480] sm:$0xff]   ;;  %v5025_v5 = vrot.slane %v235_v3, %v34953_v35 }
  0xc8   : > { %21108 = vmatprep.mubr.bf16.mxu1 %v5017_v8 }
  0xc9   : > { %29126 = vmatpush3.bf16.msra.mxu0 %v32330_v6  ;;  %v5018_v6 = vcombine.high %v235_v3, %v235_v3  ;;  %v5033_v8 = vcombine.high %v5025_v5, %v5025_v5  ;;  %v32438_v3 = vld [vmem:[%s34917_s23 + $0x658] sm:$0xff]  }
  0xca   : > { %29127 = vmatprep.subr.bf16.mxu0 %v32332_v9  ;;  %29148 = vmatpush3.bf16.msra.mxu1 %v32331_v7  ;;  %v32389_v7 = vld [vmem:[%s34917_s23 + $0x578] sm:$0xff]   ;;  %v5041_v9 = vrot.slane %v5025_v5, %v34953_v35 }
  0xcb   : > { %29149 = vmatprep.subr.bf16.mxu1 %v32333_v10  ;;  %v32390_v10 = vld [vmem:[%s34917_s23 + $0x5f8] sm:$0xff]  }
  0xcc   : > { %v32440_v5 = vld [vmem:[%s34917_s23 + $0x618] sm:$0xff]  }
  0xcd   : > { %29128 = vmatpush3.bf16.msra.mxu0 %v32334_v11  ;;  %v35112_v11 = vrot.slane %v5018_v6, %v34953_v35  ;;  %v32441_v6 = vld [vmem:[%s34917_s23 + $0x698] sm:$0xff]  }
  0xce   : > { %29129 = vmatprep.subr.bf16.mxu0 %v32336_v13  ;;  %29150 = vmatpush3.bf16.msra.mxu1 %v32335_v12  ;;  %v32391_v12 = vld [vmem:[%s34917_s23 + $0x538] sm:$0xff]   ;;  %v5055_v13 = vrot.slane %v5033_v8, %v34953_v35  ;;  %v32443_v8 = vld [vmem:[%s34917_s23 + $0x6d0] sm:$0xff]  }
  0xcf   : > { %29151 = vmatprep.subr.bf16.mxu1 %v32337_v14  ;;  %v32392_v14 = vld [vmem:[%s34917_s23 + $0x5b8] sm:$0xff]  }
  0xd1   : > { %29130 = vmatpush3.bf16.msra.mxu0 %v32338_v15  ;;  %v5034_v15 = vcombine.high %v35112_v11, %v35112_v11 }
  0xd2   : > { %29131 = vmatprep.subr.bf16.mxu0 %v32340_v17  ;;  %29152 = vmatpush3.bf16.msra.mxu1 %v32339_v16  ;;  %v5063_v16 = vcombine.high %v5041_v9, %v5041_v9  ;;  %v32393_v17 = vld [vmem:[%s34917_s23 + $0x570] sm:$0xff]  }
  0xd3   : > { %29153 = vmatprep.subr.bf16.mxu1 %v32341_v18  ;;  %v5065_v18 = vcombine.high %v5055_v13, %v5055_v13 }
  0xd5   : > { %29132 = vmatpush3.bf16.msra.mxu0 %v32342_v19  ;;  %v32394_v19 = vld [vmem:[%s34917_s23 + $0x5f0] sm:$0xff]  }
  0xd6   : > { %29133 = vmatprep.subr.bf16.mxu0 %v32344_v21  ;;  %29154 = vmatpush3.bf16.msra.mxu1 %v32343_v20  ;;  %v5062_v20 = vrot.slane %v5034_v15, %v34953_v35  ;;  %v32395_v21 = vld [vmem:[%s34917_s23 + $0x530] sm:$0xff]   ;;  %v32450_v15 = vld [vmem:[%s34917_s23 + $0x640] sm:$0xff]  }
  0xd7   : > { %29155 = vmatprep.subr.bf16.mxu1 %v32345_v22  ;;  %v32396_v22 = vld [vmem:[%s34917_s23 + $0x5b0] sm:$0xff]  }
  0xd9   : > { %29134 = vmatpush3.bf16.msra.mxu0 %v32346_v23  ;;  %v5066_v23 = vcombine.high %v5062_v20, %v5062_v20 }
  0xda   : > { %29135 = vmatprep.subr.bf16.mxu0 %v32348_v25  ;;  %29156 = vmatpush3.bf16.msra.mxu1 %v32347_v24  ;;  %v32397_v24 = vld [vmem:[%s34917_s23 + $0x568] sm:$0xff]  }
  0xdb   : > { %29157 = vmatprep.subr.bf16.mxu1 %v32349_v26  ;;  %v32398_v25 = vld [vmem:[%s34917_s23 + $0x5e8] sm:$0xff]  }
  0xdc   : > { %v32399_v26 = vld [vmem:[%s34917_s23 + $0x528] sm:$0xff]  }
  0xdd   : > { %29136 = vmatpush3.bf16.msra.mxu0 %v32350_v27  ;;  %v32400_v27 = vld [vmem:[%s34917_s23 + $0x5a8] sm:$0xff]  }
  0xde   : > { %29137 = vmatprep.subr.bf16.mxu0 %v32352_v29  ;;  %29158 = vmatpush3.bf16.msra.mxu1 %v32351_v28  ;;  %v32401_v28 = vld [vmem:[%s34917_s23 + $0x560] sm:$0xff]  }
  0xdf   : > { %29159 = vmatprep.subr.bf16.mxu1 %v32353_v30  ;;  %v32402_v29 = vld [vmem:[%s34917_s23 + $0x5e0] sm:$0xff]  }
  0xe0   : > { %v32403_v30 = vld [vmem:[%s34917_s23 + $0x520] sm:$0xff]  }
  0xe1   : > { %29138 = vmatpush3.bf16.msra.mxu0 %v32354_v31  ;;  %v32404_v31 = vld [vmem:[%s34917_s23 + $0x5a0] sm:$0xff]  }
  0xe2   : > { %29167 = vmatprep.subr.bf16.mxu0 %v32357_v34  ;;  %29160 = vmatpush3.bf16.msra.mxu1 %v32355_v32  ;;  %v32405_v32 = vld [vmem:[%s34917_s23 + $0x558] sm:$0xff]  }
  0xe3   : > { %29189 = vmatprep.subr.bf16.mxu1 %v32358_v36  ;;  %v32407_v34 = vld [vmem:[%s34917_s23 + $0x518] sm:$0xff]  }
  0xe4   : > { %21069 = vmatmul.mubr.bf16.vlgmr.msra.gmra.mxu0 %v4999_v33  ;;  %v32406_v33 = vld [vmem:[%s34917_s23 + $0x5d8] sm:$0xff]  }
  0xe5   : > { %29168 = vmatpush3.bf16.msra.mxu0 %v32359_v37  ;;  %21109 = vmatmul.mubr.bf16.vlgmr.msra.gmra.mxu1 %v5015_v39  ;;  %v32408_v36 = vld [vmem:[%s34917_s23 + $0x598] sm:$0xff]   ;;  %v32409_v37 = vld [vmem:[%s34917_s23 + $0x550] sm:$0xff]  }
  0xe6   : > { %29169 = vmatprep.subr.bf16.mxu0 %v32361_v40  ;;  %29190 = vmatpush3.bf16.msra.mxu1 %v32360_v38  ;;  %v32410_v38 = vld [vmem:[%s34917_s23 + $0x5d0] sm:$0xff]  }
  0xe7   : > { %29191 = vmatprep.subr.bf16.mxu1 %v32362_v41  ;;  %21148 = vmatprep.mubr.bf16.mxu0 %v5055_v13  ;;  %v32411_v39 = vld [vmem:[%s34917_s23 + $0x510] sm:$0xff]   ;;  %v32413_v41 = vld [vmem:[%s34917_s23 + $0x548] sm:$0xff]  }
  0xe8   : > { %21188 = vmatprep.mubr.bf16.mxu1 %v5065_v18  ;;  %v32412_v40 = vld [vmem:[%s34917_s23 + $0x590] sm:$0xff]   ;;  %v32448_v13 = vld [vmem:[%s34917_s23 + $0x608] sm:$0xff]   ;;  %v236_v18 = vld [vmem:[#allocation2 + $0x18] sm:$0xff] }
  0xe9   : > { %29170 = vmatpush3.bf16.msra.mxu0 %v32363_v42  ;;  %v32414_v42 = vld [vmem:[%s34917_s23 + $0x5c8] sm:$0xff]  }
  0xea   : > { %29171 = vmatprep.subr.bf16.mxu0 %v32365_v44  ;;  %29192 = vmatpush3.bf16.msra.mxu1 %v32364_v43  ;;  %v32415_v43 = vld [vmem:[%s34917_s23 + $0x508] sm:$0xff]  }
  0xeb   : > { %29193 = vmatprep.subr.bf16.mxu1 %v32366_v45  ;;  %v32416_v44 = vld [vmem:[%s34917_s23 + $0x588] sm:$0xff]   ;;  %v32417_v45 = vld [vmem:[%s34917_s23 + $0x540] sm:$0xff]  }
  0xed   : > { %29172 = vmatpush3.bf16.msra.mxu0 %v32367_v46  ;;  %v32418_v46 = vld [vmem:[%s34917_s23 + $0x5c0] sm:$0xff]  }
  0xee   : > { %29173 = vmatprep.subr.bf16.mxu0 %v32369_v48  ;;  %29194 = vmatpush3.bf16.msra.mxu1 %v32368_v47  ;;  %v32419_v47 = vld [vmem:[%s34917_s23 + $0x500] sm:$0xff]  }
  0xef   : > { %29195 = vmatprep.subr.bf16.mxu1 %v32370_v49  ;;  %v32420_v48 = vld [vmem:[%s34917_s23 + $0x580] sm:$0xff]   ;;  %v5048_v49 = vrot.slane %v35112_v11, %v34953_v35  ;;  %v32446_v11 = vld [vmem:[%s34917_s23 + $0x648] sm:$0xff]  }
  0xf1   : > { %29174 = vmatpush3.bf16.msra.mxu0 %v32371_v50  ;;  %v32422_v50 = vld [vmem:[%s34917_s23 + $0x678] sm:$0xff]  }
  0xf2   : > { %29175 = vmatprep.subr.bf16.mxu0 %v32373_v52  ;;  %29196 = vmatpush3.bf16.msra.mxu1 %v32372_v51  ;;  %v32423_v51 = vld [vmem:[%s34917_s23 + $0x6f8] sm:$0xff]  }
  0xf3   : > { %29197 = vmatprep.subr.bf16.mxu1 %v32374_v53  ;;  %v32424_v52 = vld [vmem:[%s34917_s23 + $0x638] sm:$0xff]  }
  0xf4   : > { %v32425_v53 = vld [vmem:[%s34917_s23 + $0x6b8] sm:$0xff]  }
  0xf5   : > { %29176 = vmatpush3.bf16.msra.mxu0 %v32375_v54  ;;  %v5064_v54 = vcombine.high %v5048_v49, %v5048_v49 }
  0xf6   : > { %29177 = vmatprep.subr.bf16.mxu0 %v32377_v56  ;;  %29198 = vmatpush3.bf16.msra.mxu1 %v32376_v55  ;;  %v32426_v55 = vld [vmem:[%s34917_s23 + $0x670] sm:$0xff]  }
  0xf7   : > { %29199 = vmatprep.subr.bf16.mxu1 %v32378_v57  ;;  %v32427_v56 = vld [vmem:[%s34917_s23 + $0x6f0] sm:$0xff]  }
  0xf8   : > { %v32428_v57 = vld [vmem:[%s34917_s23 + $0x630] sm:$0xff]  }
  0xf9   : > { %29178 = vmatpush3.bf16.msra.mxu0 %v32379_v58  ;;  %v32429_v58 = vld [vmem:[%s34917_s23 + $0x6b0] sm:$0xff]  }
  0xfa   : > { %29179 = vmatprep.subr.bf16.mxu0 %v32381_v60  ;;  %29200 = vmatpush3.bf16.msra.mxu1 %v32380_v59  ;;  %v32430_v59 = vld [vmem:[%s34917_s23 + $0x668] sm:$0xff]  }
  0xfb   : > { %29201 = vmatprep.subr.bf16.mxu1 %v32382_v61  ;;  %v32431_v60 = vld [vmem:[%s34917_s23 + $0x6e8] sm:$0xff]  }
  0xfc   : > { %v32432_v61 = vld [vmem:[%s34917_s23 + $0x628] sm:$0xff]  }
  0xfd   : > { %29180 = vmatpush3.bf16.msra.mxu0 %v32383_v62  ;;  %v32433_v62 = vld [vmem:[%s34917_s23 + $0x6a8] sm:$0xff]  }
  0xfe   : > { %29181 = vmatprep.subr.bf16.mxu0 %v32385_v0  ;;  %29202 = vmatpush3.bf16.msra.mxu1 %v32384_v63  ;;  %v32434_v63 = vld [vmem:[%s34917_s23 + $0x660] sm:$0xff]  }
  0xff   : > { %29203 = vmatprep.subr.bf16.mxu1 %v32386_v1  ;;  %v32435_v0 = vld [vmem:[%s34917_s23 + $0x6e0] sm:$0xff]  }
 0x100   : > { %v32436_v1 = vld [vmem:[%s34917_s23 + $0x620] sm:$0xff]  }
 0x101   : > { %29182 = vmatpush3.bf16.msra.mxu0 %v32387_v2  ;;  %v32437_v2 = vld [vmem:[%s34917_s23 + $0x6a0] sm:$0xff]  }
 0x102   : > { %29211 = vmatprep.subr.bf16.mxu0 %v32389_v7  ;;  %29204 = vmatpush3.bf16.msra.mxu1 %v32388_v4  ;;  %v32439_v4 = vld [vmem:[%s34917_s23 + $0x6d8] sm:$0xff]   ;;  %v32442_v7 = vld [vmem:[%s34917_s23 + $0x650] sm:$0xff]  }
 0x103   : > { %29233 = vmatprep.subr.bf16.mxu1 %v32390_v10  ;;  %v32445_v10 = vld [vmem:[%s34917_s23 + $0x690] sm:$0xff]  }
 0x104   : > { %21149 = vmatmul.mubr.bf16.vlgmr.msra.gmra.mxu0 %v5041_v9  ;;  %v32444_v9 = vld [vmem:[%s34917_s23 + $0x610] sm:$0xff]  }
 0x105   : > { %29212 = vmatpush3.bf16.msra.mxu0 %v32391_v12  ;;  %21189 = vmatmul.mubr.bf16.vlgmr.msra.gmra.mxu1 %v5063_v16  ;;  %v32447_v12 = vld [vmem:[%s34917_s23 + $0x6c8] sm:$0xff]   ;;  %v32451_v16 = vld [vmem:[%s34917_s23 + $0x6c0] sm:$0xff]  }
 0x106   : > { %29213 = vmatprep.subr.bf16.mxu0 %v32393_v17  ;;  %29234 = vmatpush3.bf16.msra.mxu1 %v32392_v14  ;;  %v32449_v14 = vld [vmem:[%s34917_s23 + $0x688] sm:$0xff]   ;;  %v32452_v17 = vld [vmem:[%s34917_s23 + $0x600] sm:$0xff]  }
 0x107   : > { %21228 = vmatprep.mubr.bf16.mxu0 %v5062_v20  ;;  %29235 = vmatprep.subr.bf16.mxu1 %v32394_v19  ;;  %v5074_v19 = vrot.slane %v236_v18, %v34953_v35  ;;  %v32454_v20 = vld [vmem:[%s34917_s23 + $0x778] sm:$0xff]  }
 0x108   : > { %21268 = vmatprep.mubr.bf16.mxu1 %v5066_v23 }
 0x109   : > { %29214 = vmatpush3.bf16.msra.mxu0 %v32395_v21  ;;  %v5067_v21 = vcombine.high %v236_v18, %v236_v18  ;;  %v5082_v23 = vcombine.high %v5074_v19, %v5074_v19 }
 0x10a   : > { %29215 = vmatprep.subr.bf16.mxu0 %v32397_v24  ;;  %29236 = vmatpush3.bf16.msra.mxu1 %v32396_v22  ;;  %v32453_v22 = vld [vmem:[%s34917_s23 + $0x680] sm:$0xff]   ;;  %v5090_v24 = vrot.slane %v5074_v19, %v34953_v35  ;;  %v32491_v19 = vld [vmem:[%s34917_s23 + $0x870] sm:$0xff]  }
 0x10b   : > { %29237 = vmatprep.subr.bf16.mxu1 %v32398_v25  ;;  %v32455_v25 = vld [vmem:[%s34917_s23 + $0x7f8] sm:$0xff]  }
 0x10d   : > { %29216 = vmatpush3.bf16.msra.mxu0 %v32399_v26  ;;  %v35187_v26 = vrot.slane %v5067_v21, %v34953_v35  ;;  %v32492_v21 = vld [vmem:[%s34917_s23 + $0x8f0] sm:$0xff]  }
 0x10e   : > { %29217 = vmatprep.subr.bf16.mxu0 %v32401_v28  ;;  %29238 = vmatpush3.bf16.msra.mxu1 %v32400_v27  ;;  %v32456_v27 = vld [vmem:[%s34917_s23 + $0x738] sm:$0xff]   ;;  %v5104_v28 = vrot.slane %v5082_v23, %v34953_v35 }
 0x10f   : > { %29239 = vmatprep.subr.bf16.mxu1 %v32402_v29  ;;  %v32457_v29 = vld [vmem:[%s34917_s23 + $0x7b8] sm:$0xff]  }
 0x111   : > { %29218 = vmatpush3.bf16.msra.mxu0 %v32403_v30  ;;  %v5083_v30 = vcombine.high %v35187_v26, %v35187_v26 }
 0x112   : > { %29219 = vmatprep.subr.bf16.mxu0 %v32405_v32  ;;  %29240 = vmatpush3.bf16.msra.mxu1 %v32404_v31  ;;  %v5112_v31 = vcombine.high %v5090_v24, %v5090_v24  ;;  %v32458_v32 = vld [vmem:[%s34917_s23 + $0x770] sm:$0xff]  }
 0x113   : > { %29241 = vmatprep.subr.bf16.mxu1 %v32406_v33  ;;  %v5114_v33 = vcombine.high %v5104_v28, %v5104_v28 }
 0x115   : > { %29220 = vmatpush3.bf16.msra.mxu0 %v32407_v34 }
 0x116   : > { %29221 = vmatprep.subr.bf16.mxu0 %v32409_v37  ;;  %29242 = vmatpush3.bf16.msra.mxu1 %v32408_v36  ;;  %v26682_v36 = vld [vmem:[%s205_s28] ss:$0 sm:$0xff]  ;;  %v32459_v37 = vld [vmem:[%s34917_s23 + $0x7f0] sm:$0xff]  }
 0x117   : > { %29243 = vmatprep.subr.bf16.mxu1 %v32410_v38  ;;  %v5111_v38 = vrot.slane %v5083_v30, %v34953_v35  ;;  %v32496_v30 = vld [vmem:[%s34917_s23 + $0x8e8] sm:$0xff]  }
 0x119   : > { %29222 = vmatpush3.bf16.msra.mxu0 %v32411_v39  ;;  %v32460_v39 = vld [vmem:[%s34917_s23 + $0x730] sm:$0xff]  }
 0x11a   : > { %29223 = vmatprep.subr.bf16.mxu0 %v32413_v41  ;;  %29244 = vmatpush3.bf16.msra.mxu1 %v32412_v40 }
 0x11b   : > { %29245 = vmatprep.subr.bf16.mxu1 %v32414_v42  ;;  %v32461_v42 = vld [vmem:[%s34917_s23 + $0x7b0] sm:$0xff]  }
 0x11d   : > { %29224 = vmatpush3.bf16.msra.mxu0 %v32415_v43  ;;  %v5115_v43 = vcombine.high %v5111_v38, %v5111_v38 }
 0x11e   : > { %29225 = vmatprep.subr.bf16.mxu0 %v32417_v45  ;;  %29246 = vmatpush3.bf16.msra.mxu1 %v32416_v44  ;;  %v32462_v45 = vld [vmem:[%s34917_s23 + $0x768] sm:$0xff]  }
 0x11f   : > { %29247 = vmatprep.subr.bf16.mxu1 %v32418_v46 }
 0x121   : > { %29226 = vmatpush3.bf16.msra.mxu0 %v32419_v47 }
 0x122   : > { %29255 = vmatprep.subr.bf16.mxu0 %v32422_v50  ;;  %29248 = vmatpush3.bf16.msra.mxu1 %v32420_v48  ;;  %v32463_v48 = vld [vmem:[%s34917_s23 + $0x7e8] sm:$0xff]  }
 0x123   : > { %29277 = vmatprep.subr.bf16.mxu1 %v32423_v51  ;;  %v32464_v51 = vld [vmem:[%s34917_s23 + $0x728] sm:$0xff]  }
 0x124   : > { %21229 = vmatmul.mubr.bf16.vlgmr.msra.gmra.mxu0 %v5048_v49 }
 0x125   : > { %29256 = vmatpush3.bf16.msra.mxu0 %v32424_v52  ;;  %21269 = vmatmul.mubr.bf16.vlgmr.msra.gmra.mxu1 %v5064_v54  ;;  %v32465_v54 = vld [vmem:[%s34917_s23 + $0x7a8] sm:$0xff]  }
 0x126   : > { %29257 = vmatprep.subr.bf16.mxu0 %v32426_v55  ;;  %29278 = vmatpush3.bf16.msra.mxu1 %v32425_v53 }
 0x127   : > { %29279 = vmatprep.subr.bf16.mxu1 %v32427_v56  ;;  %21308 = vmatprep.mubr.bf16.mxu0 %v5104_v28  ;;  %v32466_v56 = vld [vmem:[%s34917_s23 + $0x760] sm:$0xff]  }
 0x128   : > { %21348 = vmatprep.mubr.bf16.mxu1 %v5114_v33  ;;  %v32497_v33 = vld [vmem:[%s34917_s23 + $0x828] sm:$0xff]  }
 0x129   : > { %29258 = vmatpush3.bf16.msra.mxu0 %v32428_v57 }
 0x12a   : > { %29259 = vmatprep.subr.bf16.mxu0 %v32430_v59  ;;  %29280 = vmatpush3.bf16.msra.mxu1 %v32429_v58  ;;  %v32467_v58 = vld [vmem:[%s34917_s23 + $0x7e0] sm:$0xff]  }
 0x12b   : > { %29281 = vmatprep.subr.bf16.mxu1 %v32431_v60  ;;  %v32468_v59 = vld [vmem:[%s34917_s23 + $0x720] sm:$0xff]  }
 0x12c   : > { %v32469_v60 = vld [vmem:[%s34917_s23 + $0x7a0] sm:$0xff]  }
 0x12d   : > { %29260 = vmatpush3.bf16.msra.mxu0 %v32432_v61  ;;  %v32470_v61 = vld [vmem:[%s34917_s23 + $0x758] sm:$0xff]  }
 0x12e   : > { %29261 = vmatprep.subr.bf16.mxu0 %v32434_v63  ;;  %29282 = vmatpush3.bf16.msra.mxu1 %v32433_v62  ;;  %v32471_v62 = vld [vmem:[%s34917_s23 + $0x7d8] sm:$0xff]  }
 0x12f   : > { %29283 = vmatprep.subr.bf16.mxu1 %v32435_v0  ;;  %v32472_v63 = vld [vmem:[%s34917_s23 + $0x718] sm:$0xff]  }
 0x130   : > { %v32473_v0 = vld [vmem:[%s34917_s23 + $0x798] sm:$0xff]  }
 0x131   : > { %29262 = vmatpush3.bf16.msra.mxu0 %v32436_v1  ;;  %v32474_v1 = vld [vmem:[%s34917_s23 + $0x750] sm:$0xff]  }
 0x132   : > { %29263 = vmatprep.subr.bf16.mxu0 %v32438_v3  ;;  %29284 = vmatpush3.bf16.msra.mxu1 %v32437_v2  ;;  %v32475_v2 = vld [vmem:[%s34917_s23 + $0x7d0] sm:$0xff]  }
 0x133   : > { %29285 = vmatprep.subr.bf16.mxu1 %v32439_v4  ;;  %v32476_v3 = vld [vmem:[%s34917_s23 + $0x710] sm:$0xff]  }
 0x134   : > { %v32477_v4 = vld [vmem:[%s34917_s23 + $0x790] sm:$0xff]  }
 0x135   : > { %29264 = vmatpush3.bf16.msra.mxu0 %v32440_v5  ;;  %v32478_v5 = vld [vmem:[%s34917_s23 + $0x748] sm:$0xff]  }
 0x136   : > { %29265 = vmatprep.subr.bf16.mxu0 %v32442_v7  ;;  %29286 = vmatpush3.bf16.msra.mxu1 %v32441_v6  ;;  %v32479_v6 = vld [vmem:[%s34917_s23 + $0x7c8] sm:$0xff]  }
 0x137   : > { %29287 = vmatprep.subr.bf16.mxu1 %v32443_v8  ;;  %v32480_v7 = vld [vmem:[%s34917_s23 + $0x708] sm:$0xff]  }
 0x138   : > { %v32481_v8 = vld [vmem:[%s34917_s23 + $0x788] sm:$0xff]  }
 0x139   : > { %29266 = vmatpush3.bf16.msra.mxu0 %v32444_v9  ;;  %v32482_v9 = vld [vmem:[%s34917_s23 + $0x740] sm:$0xff]  }
 0x13a   : > { %29267 = vmatprep.subr.bf16.mxu0 %v32446_v11  ;;  %29288 = vmatpush3.bf16.msra.mxu1 %v32445_v10  ;;  %v32483_v10 = vld [vmem:[%s34917_s23 + $0x7c0] sm:$0xff]  }
 0x13b   : > { %29289 = vmatprep.subr.bf16.mxu1 %v32447_v12  ;;  %v32484_v11 = vld [vmem:[%s34917_s23 + $0x700] sm:$0xff]  }
 0x13c   : > { %v32485_v12 = vld [vmem:[%s34917_s23 + $0x780] sm:$0xff]  }
 0x13d   : > { %29268 = vmatpush3.bf16.msra.mxu0 %v32448_v13  ;;  %v5097_v13 = vrot.slane %v35187_v26, %v34953_v35 }
 0x13e   : > { %29269 = vmatprep.subr.bf16.mxu0 %v32450_v15  ;;  %29290 = vmatpush3.bf16.msra.mxu1 %v32449_v14  ;;  %v32487_v14 = vld [vmem:[%s34917_s23 + $0x878] sm:$0xff]  }
 0x13f   : > { %29291 = vmatprep.subr.bf16.mxu1 %v32451_v16  ;;  %v32488_v15 = vld [vmem:[%s34917_s23 + $0x8f8] sm:$0xff]   ;;  %v5113_v18 = vcombine.high %v5097_v13, %v5097_v13 }
 0x140   : > { %v32489_v16 = vld [vmem:[%s34917_s23 + $0x838] sm:$0xff]  }
 0x141   : > { %29270 = vmatpush3.bf16.msra.mxu0 %v32452_v17  ;;  %v32490_v17 = vld [vmem:[%s34917_s23 + $0x8b8] sm:$0xff]  }
 0x142   : > { %29299 = vmatprep.subr.bf16.mxu0 %v32454_v20  ;;  %29292 = vmatpush3.bf16.msra.mxu1 %v32453_v22  ;;  %v32493_v22 = vld [vmem:[%s34917_s23 + $0x830] sm:$0xff]  }
 0x143   : > { %29321 = vmatprep.subr.bf16.mxu1 %v32455_v25  ;;  %v32494_v25 = vld [vmem:[%s34917_s23 + $0x8b0] sm:$0xff]  }
 0x144   : > { %v29007_v34 = vpop.f32.mrf.mxu0  ;;  %21309 = vmatmul.mubr.bf16.vlgmr.msra.gmra.mxu0 %v5090_v24 }
 0x145   : > { %v29029_v40 = vpop.f32.mrf.mxu1  ;;  %29300 = vmatpush3.bf16.msra.mxu0 %v32456_v27  ;;  %21349 = vmatmul.mubr.bf16.vlgmr.msra.gmra.mxu1 %v5112_v31  ;;  %v32495_v27 = vld [vmem:[%s34917_s23 + $0x868] sm:$0xff]  }
 0x146   : > { %v29008_v41 = vpop.f32.mrf.mxu0  ;;  %29301 = vmatprep.subr.bf16.mxu0 %v32458_v32  ;;  %29322 = vmatpush3.bf16.msra.mxu1 %v32457_v29 }
 0x147   : > { %v29009_v44 = vadd.f32 %v29008_v41, %v29007_v34  ;;  %v29030_v46 = vpop.f32.mrf.mxu1  ;;  %21388 = vmatprep.mubr.bf16.mxu0 %v5111_v38  ;;  %29323 = vmatprep.subr.bf16.mxu1 %v32459_v37  ;;  %v32498_v37 = vld [vmem:[%s34917_s23 + $0x8a8] sm:$0xff]   ;;  %v32500_v41 = vld [vmem:[%s34917_s23 + $0x8e0] sm:$0xff]  }
 0x148   : > { %v29010_v47 = vpop.f32.mrf.mxu0  ;;  %v29031_v50 = vadd.f32 %v29030_v46, %v29029_v40  ;;  %21428 = vmatprep.mubr.bf16.mxu1 %v5115_v43  ;;  %v32502_v43 = vld [vmem:[%s34917_s23 + $0x8a0] sm:$0xff]   ;;  %v32505_v46 = vld [vmem:[%s34917_s23 + $0x818] sm:$0xff]  }
 0x149   : > { %v20831_v49 = vadd.f32 %v29009_v44, %v26682_v36  ;;  %v29032_v52 = vpop.f32.mrf.mxu1  ;;  %29302 = vmatpush3.bf16.msra.mxu0 %v32460_v39  ;;  %v32499_v39 = vld [vmem:[%s34917_s23 + $0x860] sm:$0xff]   ;;  %v32503_v44 = vld [vmem:[%s34917_s23 + $0x858] sm:$0xff]  }
 0x14a   : > { %v29011_v53 = vpop.f32.mrf.mxu0  ;;  %29303 = vmatprep.subr.bf16.mxu0 %v32462_v45  ;;  %29324 = vmatpush3.bf16.msra.mxu1 %v32461_v42  ;;  %v32501_v42 = vld [vmem:[%s34917_s23 + $0x820] sm:$0xff]   ;;  %v32504_v45 = vld [vmem:[%s34917_s23 + $0x8d8] sm:$0xff]   ;;  %v32511_v52 = vld [vmem:[%s34917_s23 + $0x848] sm:$0xff]  }
 0x14b   : > { %v35204_v55 = vadd.f32 %v29031_v50, %v20831_v49  ;;  %v29033_v57 = vpop.f32.mrf.mxu1  ;;  %29325 = vmatprep.subr.bf16.mxu1 %v32463_v48  ;;  %v32506_v47 = vld [vmem:[%s34917_s23 + $0x898] sm:$0xff]   ;;  %v32507_v48 = vld [vmem:[%s34917_s23 + $0x850] sm:$0xff]   ;;  %v32512_v53 = vld [vmem:[%s34917_s23 + $0x8c8] sm:$0xff]  }
 0x14c   : > { %v32508_v49 = vld [vmem:[%s34917_s23 + $0x8d0] sm:$0xff]   ;;  %v32516_v57 = vld [vmem:[%s34917_s23 + $0x8c0] sm:$0xff]  }
 0x14d   : > { %29304 = vmatpush3.bf16.msra.mxu0 %v32464_v51  ;;  %v32509_v50 = vld [vmem:[%s34917_s23 + $0x810] sm:$0xff]  }
 0x14e   : > { %29305 = vmatprep.subr.bf16.mxu0 %v32466_v56  ;;  %29326 = vmatpush3.bf16.msra.mxu1 %v32465_v54  ;;  %v32510_v51 = vld [vmem:[%s34917_s23 + $0x890] sm:$0xff]   ;;  %v32513_v54 = vld [vmem:[%s34917_s23 + $0x808] sm:$0xff]   ;;  %v32515_v56 = vld [vmem:[%s34917_s23 + $0x840] sm:$0xff]  }
 0x14f   : > { %29327 = vmatprep.subr.bf16.mxu1 %v32467_v58  ;;  %v32517_v58 = vld [vmem:[%s34917_s23 + $0x800] sm:$0xff]  }
 0x151   : > { %29306 = vmatpush3.bf16.msra.mxu0 %v32468_v59  ;;  %v237_v59 = vld [vmem:[#allocation2 + $0x20] sm:$0xff] }
 0x152   : > { %29307 = vmatprep.subr.bf16.mxu0 %v32470_v61  ;;  %29328 = vmatpush3.bf16.msra.mxu1 %v32469_v60  ;;  %v32518_v60 = vld [vmem:[%s34917_s23 + $0x880] sm:$0xff]   ;;  %v5123_v61 = vrot.slane %v237_v59, %v34953_v35 }
 0x153   : > { %29329 = vmatprep.subr.bf16.mxu1 %v32471_v62  ;;  %v5116_v62 = vcombine.high %v237_v59, %v237_v59  ;;  %v32556_v59 = vld [vmem:[%s34917_s23 + $0xa70] sm:$0xff]  }
 0x155   : > { %29308 = vmatpush3.bf16.msra.mxu0 %v32472_v63  ;;  %v32519_v63 = vld [vmem:[%s34917_s23 + $0x978] sm:$0xff]  }
 0x156   : > { %29309 = vmatprep.subr.bf16.mxu0 %v32474_v1  ;;  %29330 = vmatpush3.bf16.msra.mxu1 %v32473_v0  ;;  %v5131_v0 = vcombine.high %v5123_v61, %v5123_v61  ;;  %v5139_v1 = vrot.slane %v5123_v61, %v34953_v35  ;;  %v32557_v61 = vld [vmem:[%s34917_s23 + $0xaf0] sm:$0xff]  }
 0x157   : > { %29331 = vmatprep.subr.bf16.mxu1 %v32475_v2  ;;  %v32520_v2 = vld [vmem:[%s34917_s23 + $0x9f8] sm:$0xff]  }
 0x159   : > { %29310 = vmatpush3.bf16.msra.mxu0 %v32476_v3  ;;  %v35268_v3 = vrot.slane %v5116_v62, %v34953_v35  ;;  %v32558_v62 = vld [vmem:[%s34917_s23 + $0xa30] sm:$0xff]  }
 0x15a   : > { %29311 = vmatprep.subr.bf16.mxu0 %v32478_v5  ;;  %29332 = vmatpush3.bf16.msra.mxu1 %v32477_v4  ;;  %v32521_v4 = vld [vmem:[%s34917_s23 + $0x938] sm:$0xff]   ;;  %v5153_v5 = vrot.slane %v5131_v0, %v34953_v35 }
 0x15b   : > { %29333 = vmatprep.subr.bf16.mxu1 %v32479_v6  ;;  %v32522_v6 = vld [vmem:[%s34917_s23 + $0x9b8] sm:$0xff]  }
 0x15d   : > { %29312 = vmatpush3.bf16.msra.mxu0 %v32480_v7  ;;  %v5132_v7 = vcombine.high %v35268_v3, %v35268_v3 }
 0x15e   : > { %29313 = vmatprep.subr.bf16.mxu0 %v32482_v9  ;;  %29334 = vmatpush3.bf16.msra.mxu1 %v32481_v8  ;;  %v5161_v8 = vcombine.high %v5139_v1, %v5139_v1  ;;  %v32523_v9 = vld [vmem:[%s34917_s23 + $0x970] sm:$0xff]  }
 0x15f   : > { %29335 = vmatprep.subr.bf16.mxu1 %v32483_v10  ;;  %v5163_v10 = vcombine.high %v5153_v5, %v5153_v5 }
 0x161   : > { %29314 = vmatpush3.bf16.msra.mxu0 %v32484_v11 }
 0x162   : > { %29343 = vmatprep.subr.bf16.mxu0 %v32487_v14  ;;  %29336 = vmatpush3.bf16.msra.mxu1 %v32485_v12  ;;  %v32524_v12 = vld [vmem:[%s34917_s23 + $0x9f0] sm:$0xff]  }
 0x163   : > { %29365 = vmatprep.subr.bf16.mxu1 %v32488_v15  ;;  %v32525_v14 = vld [vmem:[%s34917_s23 + $0x930] sm:$0xff]  }
 0x164   : > { %v29051_v20 = vpop.f32.mrf.mxu0  ;;  %21389 = vmatmul.mubr.bf16.vlgmr.msra.gmra.mxu0 %v5097_v13  ;;  %v5160_v13 = vrot.slane %v5132_v7, %v34953_v35 }
 0x165   : > { %v29073_v23 = vpop.f32.mrf.mxu1  ;;  %29344 = vmatpush3.bf16.msra.mxu0 %v32489_v16  ;;  %21429 = vmatmul.mubr.bf16.vlgmr.msra.gmra.mxu1 %v5113_v18 }
 0x166   : > { %v29052_v24 = vpop.f32.mrf.mxu0  ;;  %29345 = vmatprep.subr.bf16.mxu0 %v32491_v19  ;;  %29366 = vmatpush3.bf16.msra.mxu1 %v32490_v17  ;;  %v32526_v17 = vld [vmem:[%s34917_s23 + $0x9b0] sm:$0xff]   ;;  %v5164_v18 = vcombine.high %v5160_v13, %v5160_v13 }
 0x167   : > { %v29053_v26 = vadd.f32 %v29052_v24, %v29051_v20  ;;  %v29074_v28 = vpop.f32.mrf.mxu1  ;;  %29367 = vmatprep.subr.bf16.mxu1 %v32492_v21  ;;  %21468 = vmatprep.mubr.bf16.mxu0 %v5153_v5  ;;  %v32527_v20 = vld [vmem:[%s34917_s23 + $0x968] sm:$0xff]  }
 0x168   : > { %v29054_v29 = vpop.f32.mrf.mxu0  ;;  %v29075_v32 = vadd.f32 %v29074_v28, %v29073_v23  ;;  %21508 = vmatprep.mubr.bf16.mxu1 %v5163_v10  ;;  %v32528_v23 = vld [vmem:[%s34917_s23 + $0x9e8] sm:$0xff]  }
 0x169   : > { %v20911_v31 = vadd.f32 %v29053_v26, %v35204_v55  ;;  %v29076_v34 = vpop.f32.mrf.mxu1  ;;  %29346 = vmatpush3.bf16.msra.mxu0 %v32493_v22  ;;  %v32514_v55 = vld [vmem:[%s34917_s23 + $0x888] sm:$0xff]  }
 0x16a   : > { %v29055_v36 = vpop.f32.mrf.mxu0  ;;  %29347 = vmatprep.subr.bf16.mxu0 %v32495_v27  ;;  %29368 = vmatpush3.bf16.msra.mxu1 %v32494_v25  ;;  %v32529_v26 = vld [vmem:[%s34917_s23 + $0x928] sm:$0xff]   ;;  %v32533_v34 = vld [vmem:[%s34917_s23 + $0x920] sm:$0xff]  }
 0x16b   : > { %v35241_v38 = vadd.f32 %v29075_v32, %v20911_v31  ;;  %v29077_v40 = vpop.f32.mrf.mxu1  ;;  %29369 = vmatprep.subr.bf16.mxu1 %v32496_v30  ;;  %v32530_v29 = vld [vmem:[%s34917_s23 + $0x9a8] sm:$0xff]   ;;  %v32531_v31 = vld [vmem:[%s34917_s23 + $0x960] sm:$0xff]  }
 0x16c   : > { %v32534_v36 = vld [vmem:[%s34917_s23 + $0x9a0] sm:$0xff]   ;;  %v32538_v40 = vld [vmem:[%s34917_s23 + $0x998] sm:$0xff]  }
 0x16d   : > { %29348 = vmatpush3.bf16.msra.mxu0 %v32497_v33  ;;  %v32532_v33 = vld [vmem:[%s34917_s23 + $0x9e0] sm:$0xff]  }
 0x16e   : > { %29349 = vmatprep.subr.bf16.mxu0 %v32499_v39  ;;  %29370 = vmatpush3.bf16.msra.mxu1 %v32498_v37  ;;  %v32535_v37 = vld [vmem:[%s34917_s23 + $0x958] sm:$0xff]  }
 0x16f   : > { %29371 = vmatprep.subr.bf16.mxu1 %v32500_v41  ;;  %v32537_v39 = vld [vmem:[%s34917_s23 + $0x918] sm:$0xff]   ;;  %v32539_v41 = vld [vmem:[%s34917_s23 + $0x950] sm:$0xff]  }
 0x171   : > { %29350 = vmatpush3.bf16.msra.mxu0 %v32501_v42  ;;  %v32540_v42 = vld [vmem:[%s34917_s23 + $0x9d0] sm:$0xff]  }
 0x172   : > { %29351 = vmatprep.subr.bf16.mxu0 %v32503_v44  ;;  %29372 = vmatpush3.bf16.msra.mxu1 %v32502_v43  ;;  %v32541_v43 = vld [vmem:[%s34917_s23 + $0x910] sm:$0xff]  }
 0x173   : > { %29373 = vmatprep.subr.bf16.mxu1 %v32504_v45  ;;  %v32542_v44 = vld [vmem:[%s34917_s23 + $0x990] sm:$0xff]   ;;  %v32543_v45 = vld [vmem:[%s34917_s23 + $0x948] sm:$0xff]  }
 0x175   : > { %29352 = vmatpush3.bf16.msra.mxu0 %v32505_v46  ;;  %v32544_v46 = vld [vmem:[%s34917_s23 + $0x9c8] sm:$0xff]  }
 0x176   : > { %29353 = vmatprep.subr.bf16.mxu0 %v32507_v48  ;;  %29374 = vmatpush3.bf16.msra.mxu1 %v32506_v47  ;;  %v32545_v47 = vld [vmem:[%s34917_s23 + $0x908] sm:$0xff]  }
 0x177   : > { %29375 = vmatprep.subr.bf16.mxu1 %v32508_v49  ;;  %v32546_v48 = vld [vmem:[%s34917_s23 + $0x988] sm:$0xff]   ;;  %v32547_v49 = vld [vmem:[%s34917_s23 + $0x940] sm:$0xff]  }
 0x179   : > { %29354 = vmatpush3.bf16.msra.mxu0 %v32509_v50  ;;  %v32548_v50 = vld [vmem:[%s34917_s23 + $0x9c0] sm:$0xff]  }
 0x17a   : > { %29355 = vmatprep.subr.bf16.mxu0 %v32511_v52  ;;  %29376 = vmatpush3.bf16.msra.mxu1 %v32510_v51  ;;  %v32549_v51 = vld [vmem:[%s34917_s23 + $0x900] sm:$0xff]  }
 0x17b   : > { %29377 = vmatprep.subr.bf16.mxu1 %v32512_v53  ;;  %v32550_v52 = vld [vmem:[%s34917_s23 + $0x980] sm:$0xff]   ;;  %v5146_v53 = vrot.slane %v35268_v3, %v34953_v35  ;;  %v32560_v3 = vld [vmem:[%s34917_s23 + $0xa68] sm:$0xff]  }
 0x17d   : > { %29356 = vmatpush3.bf16.msra.mxu0 %v32513_v54  ;;  %v32552_v54 = vld [vmem:[%s34917_s23 + $0xa78] sm:$0xff]  }
 0x17e   : > { %29357 = vmatprep.subr.bf16.mxu0 %v32515_v56  ;;  %29378 = vmatpush3.bf16.msra.mxu1 %v32514_v55  ;;  %v32553_v55 = vld [vmem:[%s34917_s23 + $0xaf8] sm:$0xff]  }
 0x17f   : > { %29379 = vmatprep.subr.bf16.mxu1 %v32516_v57  ;;  %v32554_v56 = vld [vmem:[%s34917_s23 + $0xa38] sm:$0xff]  }
 0x180   : > { %v32555_v57 = vld [vmem:[%s34917_s23 + $0xab8] sm:$0xff]  }
 0x181   : > { %29358 = vmatpush3.bf16.msra.mxu0 %v32517_v58  ;;  %v5162_v58 = vcombine.high %v5146_v53, %v5146_v53 }
 0x182   : > { %29387 = vmatprep.subr.bf16.mxu0 %v32519_v63  ;;  %29380 = vmatpush3.bf16.msra.mxu1 %v32518_v60 }
 0x183   : > { %29409 = vmatprep.subr.bf16.mxu1 %v32520_v2 }
 0x184   : > { %v29095_v11 = vpop.f32.mrf.mxu0  ;;  %21469 = vmatmul.mubr.bf16.vlgmr.msra.gmra.mxu0 %v5139_v1  ;;  %v32559_v1 = vld [vmem:[%s34917_s23 + $0xab0] sm:$0xff]  }
 0x185   : > { %v29117_v15 = vpop.f32.mrf.mxu1  ;;  %29388 = vmatpush3.bf16.msra.mxu0 %v32521_v4  ;;  %21509 = vmatmul.mubr.bf16.vlgmr.msra.gmra.mxu1 %v5161_v8 }
 0x186   : > { %v29096_v16 = vpop.f32.mrf.mxu0  ;;  %29389 = vmatprep.subr.bf16.mxu0 %v32523_v9  ;;  %29410 = vmatpush3.bf16.msra.mxu1 %v32522_v6  ;;  %v32561_v6 = vld [vmem:[%s34917_s23 + $0xae8] sm:$0xff]  }
 0x187   : > { %v29097_v19 = vadd.f32 %v29096_v16, %v29095_v11  ;;  %v29118_v21 = vpop.f32.mrf.mxu1  ;;  %21548 = vmatprep.mubr.bf16.mxu0 %v5160_v13  ;;  %29411 = vmatprep.subr.bf16.mxu1 %v32524_v12  ;;  %v32562_v9 = vld [vmem:[%s34917_s23 + $0xa28] sm:$0xff]   ;;  %v32565_v16 = vld [vmem:[%s34917_s23 + $0xae0] sm:$0xff]  }
 0x188   : > { %v29098_v22 = vpop.f32.mrf.mxu0  ;;  %v29119_v25 = vadd.f32 %v29118_v21, %v29117_v15  ;;  %21588 = vmatprep.mubr.bf16.mxu1 %v5164_v18  ;;  %v32563_v12 = vld [vmem:[%s34917_s23 + $0xaa8] sm:$0xff]   ;;  %v32567_v18 = vld [vmem:[%s34917_s23 + $0xaa0] sm:$0xff]   ;;  %v32570_v21 = vld [vmem:[%s34917_s23 + $0xa18] sm:$0xff]  }
 0x189   : > { %v20991_v24 = vadd.f32 %v29097_v19, %v35241_v38  ;;  %v29120_v27 = vpop.f32.mrf.mxu1  ;;  %29390 = vmatpush3.bf16.msra.mxu0 %v32525_v14  ;;  %v32536_v38 = vld [vmem:[%s34917_s23 + $0x9d8] sm:$0xff]   ;;  %v32564_v14 = vld [vmem:[%s34917_s23 + $0xa60] sm:$0xff]  }
 0x18a   : > { %v29099_v28 = vpop.f32.mrf.mxu0  ;;  %29391 = vmatprep.subr.bf16.mxu0 %v32527_v20  ;;  %29412 = vmatpush3.bf16.msra.mxu1 %v32526_v17  ;;  %v32566_v17 = vld [vmem:[%s34917_s23 + $0xa20] sm:$0xff]   ;;  %v32568_v19 = vld [vmem:[%s34917_s23 + $0xa58] sm:$0xff]   ;;  %v32576_v27 = vld [vmem:[%s34917_s23 + $0xa48] sm:$0xff]  }
 0x18b   : > { %v35285_v30 = vadd.f32 %v29119_v25, %v20991_v24  ;;  %v29121_v32 = vpop.f32.mrf.mxu1  ;;  %29413 = vmatprep.subr.bf16.mxu1 %v32528_v23  ;;  %v32569_v20 = vld [vmem:[%s34917_s23 + $0xad8] sm:$0xff]   ;;  %v32572_v23 = vld [vmem:[%s34917_s23 + $0xa50] sm:$0xff]   ;;  %v32577_v28 = vld [vmem:[%s34917_s23 + $0xac8] sm:$0xff]  }
 0x18c   : > { %v32571_v22 = vld [vmem:[%s34917_s23 + $0xa98] sm:$0xff]   ;;  %v32573_v24 = vld [vmem:[%s34917_s23 + $0xad0] sm:$0xff]   ;;  %v32581_v32 = vld [vmem:[%s34917_s23 + $0xac0] sm:$0xff]  }
 0x18d   : > { %29392 = vmatpush3.bf16.msra.mxu0 %v32529_v26  ;;  %v32574_v25 = vld [vmem:[%s34917_s23 + $0xa10] sm:$0xff]  }
 0x18e   : > { %29393 = vmatprep.subr.bf16.mxu0 %v32531_v31  ;;  %29414 = vmatpush3.bf16.msra.mxu1 %v32530_v29  ;;  %v32575_v26 = vld [vmem:[%s34917_s23 + $0xa90] sm:$0xff]   ;;  %v32578_v29 = vld [vmem:[%s34917_s23 + $0xa08] sm:$0xff]   ;;  %v32580_v31 = vld [vmem:[%s34917_s23 + $0xa40] sm:$0xff]  }
 0x18f   : > { %29415 = vmatprep.subr.bf16.mxu1 %v32532_v33  ;;  %v32582_v33 = vld [vmem:[%s34917_s23 + $0xa00] sm:$0xff]  }
 0x191   : > { %29394 = vmatpush3.bf16.msra.mxu0 %v32533_v34  ;;  %v238_v34 = vld [vmem:[#allocation2 + $0x28] sm:$0xff] }
 0x192   : > { %29395 = vmatprep.subr.bf16.mxu0 %v32535_v37  ;;  %29416 = vmatpush3.bf16.msra.mxu1 %v32534_v36  ;;  %v5172_v36 = vrot.slane %v238_v34, %v34953_v35  ;;  %v32584_v37 = vld [vmem:[%s34917_s23 + $0xb78] sm:$0xff]  }
 0x193   : > { %29417 = vmatprep.subr.bf16.mxu1 %v32536_v38  ;;  %v5165_v38 = vcombine.high %v238_v34, %v238_v34 }
 0x195   : > { %29396 = vmatpush3.bf16.msra.mxu0 %v32537_v39  ;;  %v32583_v39 = vld [vmem:[%s34917_s23 + $0xa80] sm:$0xff]  }
 0x196   : > { %29397 = vmatprep.subr.bf16.mxu0 %v32539_v41  ;;  %29418 = vmatpush3.bf16.msra.mxu1 %v32538_v40  ;;  %v5180_v40 = vcombine.high %v5172_v36, %v5172_v36  ;;  %v5188_v41 = vrot.slane %v5172_v36, %v34953_v35  ;;  %v32621_v36 = vld [vmem:[%s34917_s23 + $0xc70] sm:$0xff]  }
 0x197   : > { %29419 = vmatprep.subr.bf16.mxu1 %v32540_v42  ;;  %v32585_v42 = vld [vmem:[%s34917_s23 + $0xbf8] sm:$0xff]  }
 0x199   : > { %29398 = vmatpush3.bf16.msra.mxu0 %v32541_v43  ;;  %v35349_v43 = vrot.slane %v5165_v38, %v34953_v35 }
 0x19a   : > { %29399 = vmatprep.subr.bf16.mxu0 %v32543_v45  ;;  %29420 = vmatpush3.bf16.msra.mxu1 %v32542_v44  ;;  %v32586_v44 = vld [vmem:[%s34917_s23 + $0xb38] sm:$0xff]   ;;  %v5202_v45 = vrot.slane %v5180_v40, %v34953_v35  ;;  %v32623_v40 = vld [vmem:[%s34917_s23 + $0xc30] sm:$0xff]  }
 0x19b   : > { %29421 = vmatprep.subr.bf16.mxu1 %v32544_v46  ;;  %v32587_v46 = vld [vmem:[%s34917_s23 + $0xbb8] sm:$0xff]  }
 0x19d   : > { %29400 = vmatpush3.bf16.msra.mxu0 %v32545_v47  ;;  %v5181_v47 = vcombine.high %v35349_v43, %v35349_v43 }
 0x19e   : > { %29401 = vmatprep.subr.bf16.mxu0 %v32547_v49  ;;  %29422 = vmatpush3.bf16.msra.mxu1 %v32546_v48  ;;  %v5210_v49 = vcombine.high %v5188_v41, %v5188_v41 }
 0x19f   : > { %29423 = vmatprep.subr.bf16.mxu1 %v32548_v50  ;;  %v32588_v50 = vld [vmem:[%s34917_s23 + $0xb70] sm:$0xff]  }
 0x1a1   : > { %29402 = vmatpush3.bf16.msra.mxu0 %v32549_v51  ;;  %v5212_v51 = vcombine.high %v5202_v45, %v5202_v45 }
 0x1a2   : > { %29431 = vmatprep.subr.bf16.mxu0 %v32552_v54  ;;  %29424 = vmatpush3.bf16.msra.mxu1 %v32550_v52  ;;  %v32589_v52 = vld [vmem:[%s34917_s23 + $0xbf0] sm:$0xff]  }
 0x1a3   : > { %29453 = vmatprep.subr.bf16.mxu1 %v32553_v55 }
 0x1a4   : > { %v29139_v60 = vpop.f32.mrf.mxu0  ;;  %21549 = vmatmul.mubr.bf16.vlgmr.msra.gmra.mxu0 %v5146_v53  ;;  %v5209_v53 = vrot.slane %v5181_v47, %v34953_v35 }
 0x1a5   : > { %v29161_v63 = vpop.f32.mrf.mxu1  ;;  %29432 = vmatpush3.bf16.msra.mxu0 %v32554_v56  ;;  %21589 = vmatmul.mubr.bf16.vlgmr.msra.gmra.mxu1 %v5162_v58  ;;  %v32590_v56 = vld [vmem:[%s34917_s23 + $0xb30] sm:$0xff]  }
 0x1a6   : > { %v29140_v0 = vpop.f32.mrf.mxu0  ;;  %29433 = vmatprep.subr.bf16.mxu0 %v32556_v59  ;;  %29454 = vmatpush3.bf16.msra.mxu1 %v32555_v57  ;;  %v32591_v58 = vld [vmem:[%s34917_s23 + $0xbb0] sm:$0xff]   ;;  %v5213_v59 = vcombine.high %v5209_v53, %v5209_v53 }
 0x1a7   : > { %v29141_v2 = vadd.f32 %v29140_v0, %v29139_v60  ;;  %v29162_v4 = vpop.f32.mrf.mxu1  ;;  %29455 = vmatprep.subr.bf16.mxu1 %v32557_v61  ;;  %21628 = vmatprep.mubr.bf16.mxu0 %v5202_v45  ;;  %v32625_v45 = vld [vmem:[%s34917_s23 + $0xc68] sm:$0xff]  }
 0x1a8   : > { %v29142_v5 = vpop.f32.mrf.mxu0  ;;  %v29163_v8 = vadd.f32 %v29162_v4, %v29161_v63  ;;  %21668 = vmatprep.mubr.bf16.mxu1 %v5212_v51  ;;  %v32594_v4 = vld [vmem:[%s34917_s23 + $0xb28] sm:$0xff]  }
 0x1a9   : > { %v21071_v7 = vadd.f32 %v29141_v2, %v35285_v30  ;;  %v29164_v10 = vpop.f32.mrf.mxu1  ;;  %29434 = vmatpush3.bf16.msra.mxu0 %v32558_v62  ;;  %v32579_v30 = vld [vmem:[%s34917_s23 + $0xa88] sm:$0xff]  }
 0x1aa   : > { %v29143_v11 = vpop.f32.mrf.mxu0  ;;  %29435 = vmatprep.subr.bf16.mxu0 %v32560_v3  ;;  %29456 = vmatpush3.bf16.msra.mxu1 %v32559_v1  ;;  %v32592_v62 = vld [vmem:[%s34917_s23 + $0xb68] sm:$0xff]   ;;  %v32598_v10 = vld [vmem:[%s34917_s23 + $0xb20] sm:$0xff]  }
 0x1ab   : > { %v35322_v13 = vadd.f32 %v29163_v8, %v21071_v7  ;;  %v29165_v15 = vpop.f32.mrf.mxu1  ;;  %29457 = vmatprep.subr.bf16.mxu1 %v32561_v6  ;;  %v32593_v1 = vld [vmem:[%s34917_s23 + $0xbe8] sm:$0xff]   ;;  %v32596_v8 = vld [vmem:[%s34917_s23 + $0xb60] sm:$0xff]  }
 0x1ac   : > { %v32595_v6 = vld [vmem:[%s34917_s23 + $0xba8] sm:$0xff]   ;;  %v32599_v11 = vld [vmem:[%s34917_s23 + $0xba0] sm:$0xff]   ;;  %v32603_v15 = vld [vmem:[%s34917_s23 + $0xb98] sm:$0xff]  }
 0x1ad   : > { %29436 = vmatpush3.bf16.msra.mxu0 %v32562_v9  ;;  %v32597_v9 = vld [vmem:[%s34917_s23 + $0xbe0] sm:$0xff]   ;;  %v32627_v51 = vld [vmem:[%s34917_s23 + $0xc28] sm:$0xff]  }
 0x1ae   : > { %29437 = vmatprep.subr.bf16.mxu0 %v32564_v14  ;;  %29458 = vmatpush3.bf16.msra.mxu1 %v32563_v12  ;;  %v32600_v12 = vld [vmem:[%s34917_s23 + $0xb58] sm:$0xff]  }
 0x1af   : > { %29459 = vmatprep.subr.bf16.mxu1 %v32565_v16  ;;  %v32602_v14 = vld [vmem:[%s34917_s23 + $0xb18] sm:$0xff]   ;;  %v32604_v16 = vld [vmem:[%s34917_s23 + $0xb50] sm:$0xff]  }
 0x1b1   : > { %29438 = vmatpush3.bf16.msra.mxu0 %v32566_v17  ;;  %v32605_v17 = vld [vmem:[%s34917_s23 + $0xbd0] sm:$0xff]  }
 0x1b2   : > { %29439 = vmatprep.subr.bf16.mxu0 %v32568_v19  ;;  %29460 = vmatpush3.bf16.msra.mxu1 %v32567_v18  ;;  %v32606_v18 = vld [vmem:[%s34917_s23 + $0xb10] sm:$0xff]  }
 0x1b3   : > { %29461 = vmatprep.subr.bf16.mxu1 %v32569_v20  ;;  %v32607_v19 = vld [vmem:[%s34917_s23 + $0xb90] sm:$0xff]   ;;  %v32608_v20 = vld [vmem:[%s34917_s23 + $0xb48] sm:$0xff]  }
 0x1b5   : > { %29440 = vmatpush3.bf16.msra.mxu0 %v32570_v21  ;;  %v32609_v21 = vld [vmem:[%s34917_s23 + $0xbc8] sm:$0xff]  }
 0x1b6   : > { %29441 = vmatprep.subr.bf16.mxu0 %v32572_v23  ;;  %29462 = vmatpush3.bf16.msra.mxu1 %v32571_v22  ;;  %v32610_v22 = vld [vmem:[%s34917_s23 + $0xb08] sm:$0xff]  }
 0x1b7   : > { %29463 = vmatprep.subr.bf16.mxu1 %v32573_v24  ;;  %v32611_v23 = vld [vmem:[%s34917_s23 + $0xb88] sm:$0xff]   ;;  %v32612_v24 = vld [vmem:[%s34917_s23 + $0xb40] sm:$0xff]  }
 0x1b9   : > { %29442 = vmatpush3.bf16.msra.mxu0 %v32574_v25  ;;  %v32613_v25 = vld [vmem:[%s34917_s23 + $0xbc0] sm:$0xff]  }
 0x1ba   : > { %29443 = vmatprep.subr.bf16.mxu0 %v32576_v27  ;;  %29464 = vmatpush3.bf16.msra.mxu1 %v32575_v26  ;;  %v32614_v26 = vld [vmem:[%s34917_s23 + $0xb00] sm:$0xff]  }
 0x1bb   : > { %29465 = vmatprep.subr.bf16.mxu1 %v32577_v28  ;;  %v32615_v27 = vld [vmem:[%s34917_s23 + $0xb80] sm:$0xff]   ;;  %v5195_v28 = vrot.slane %v35349_v43, %v34953_v35 }
 0x1bd   : > { %29444 = vmatpush3.bf16.msra.mxu0 %v32578_v29  ;;  %v32617_v29 = vld [vmem:[%s34917_s23 + $0xc78] sm:$0xff]   ;;  %v5211_v34 = vcombine.high %v5195_v28, %v5195_v28 }
 0x1be   : > { %29445 = vmatprep.subr.bf16.mxu0 %v32580_v31  ;;  %29466 = vmatpush3.bf16.msra.mxu1 %v32579_v30  ;;  %v32618_v30 = vld [vmem:[%s34917_s23 + $0xcf8] sm:$0xff]  }
 0x1bf   : > { %29467 = vmatprep.subr.bf16.mxu1 %v32581_v32  ;;  %v32619_v31 = vld [vmem:[%s34917_s23 + $0xc38] sm:$0xff]  }
 0x1c0   : > { %v32620_v32 = vld [vmem:[%s34917_s23 + $0xcb8] sm:$0xff]  }
 0x1c1   : > { %29446 = vmatpush3.bf16.msra.mxu0 %v32582_v33 }
 0x1c2   : > { %29475 = vmatprep.subr.bf16.mxu0 %v32584_v37  ;;  %29468 = vmatpush3.bf16.msra.mxu1 %v32583_v39  ;;  %v32622_v37 = vld [vmem:[%s34917_s23 + $0xcf0] sm:$0xff]  }
 0x1c3   : > { %29497 = vmatprep.subr.bf16.mxu1 %v32585_v42  ;;  %v32624_v42 = vld [vmem:[%s34917_s23 + $0xcb0] sm:$0xff]  }
 0x1c4   : > { %v29183_v48 = vpop.f32.mrf.mxu0  ;;  %21629 = vmatmul.mubr.bf16.vlgmr.msra.gmra.mxu0 %v5188_v41 }
 0x1c5   : > { %v29205_v54 = vpop.f32.mrf.mxu1  ;;  %29476 = vmatpush3.bf16.msra.mxu0 %v32586_v44  ;;  %21669 = vmatmul.mubr.bf16.vlgmr.msra.gmra.mxu1 %v5210_v49 }
 0x1c6   : > { %v29184_v55 = vpop.f32.mrf.mxu0  ;;  %29477 = vmatprep.subr.bf16.mxu0 %v32588_v50  ;;  %29498 = vmatpush3.bf16.msra.mxu1 %v32587_v46 }
 0x1c7   : > { %v29185_v57 = vadd.f32 %v29184_v55, %v29183_v48  ;;  %v29206_v60 = vpop.f32.mrf.mxu1  ;;  %21708 = vmatprep.mubr.bf16.mxu0 %v5209_v53  ;;  %29499 = vmatprep.subr.bf16.mxu1 %v32589_v52  ;;  %v32626_v48 = vld [vmem:[%s34917_s23 + $0xce8] sm:$0xff]   ;;  %v32629_v55 = vld [vmem:[%s34917_s23 + $0xc60] sm:$0xff]  }
 0x1c8   : > { %v29186_v61 = vpop.f32.mrf.mxu0  ;;  %v29207_v0 = vadd.f32 %v29206_v60, %v29205_v54  ;;  %21748 = vmatprep.mubr.bf16.mxu1 %v5213_v59  ;;  %v32628_v53 = vld [vmem:[%s34917_s23 + $0xca8] sm:$0xff]   ;;  %v32633_v59 = vld [vmem:[%s34917_s23 + $0xc58] sm:$0xff]  }
 0x1c9   : > { %v21151_v63 = vadd.f32 %v29185_v57, %v35322_v13  ;;  %v29208_v2 = vpop.f32.mrf.mxu1  ;;  %29478 = vmatpush3.bf16.msra.mxu0 %v32590_v56  ;;  %v32601_v13 = vld [vmem:[%s34917_s23 + $0xbd8] sm:$0xff]   ;;  %v32630_v56 = vld [vmem:[%s34917_s23 + $0xce0] sm:$0xff]  }
 0x1ca   : > { %v29187_v3 = vpop.f32.mrf.mxu0  ;;  %29479 = vmatprep.subr.bf16.mxu0 %v32592_v62  ;;  %29500 = vmatpush3.bf16.msra.mxu1 %v32591_v58  ;;  %v32631_v57 = vld [vmem:[%s34917_s23 + $0xc20] sm:$0xff]   ;;  %v32634_v60 = vld [vmem:[%s34917_s23 + $0xcd8] sm:$0xff]   ;;  %v32640_v2 = vld [vmem:[%s34917_s23 + $0xc90] sm:$0xff]  }
 0x1cb   : > { %v35365_v5 = vadd.f32 %v29207_v0, %v21151_v63  ;;  %v29209_v7 = vpop.f32.mrf.mxu1  ;;  %29501 = vmatprep.subr.bf16.mxu1 %v32593_v1  ;;  %v32632_v58 = vld [vmem:[%s34917_s23 + $0xca0] sm:$0xff]   ;;  %v32635_v61 = vld [vmem:[%s34917_s23 + $0xc18] sm:$0xff]   ;;  %v32637_v63 = vld [vmem:[%s34917_s23 + $0xc50] sm:$0xff]  }
 0x1cc   : > { %v32636_v62 = vld [vmem:[%s34917_s23 + $0xc98] sm:$0xff]   ;;  %v32638_v0 = vld [vmem:[%s34917_s23 + $0xcd0] sm:$0xff]   ;;  %v32641_v3 = vld [vmem:[%s34917_s23 + $0xc48] sm:$0xff]  }
 0x1cd   : > { %29480 = vmatpush3.bf16.msra.mxu0 %v32594_v4  ;;  %v32639_v1 = vld [vmem:[%s34917_s23 + $0xc10] sm:$0xff]   ;;  %v32642_v4 = vld [vmem:[%s34917_s23 + $0xcc8] sm:$0xff]   ;;  %v32645_v7 = vld [vmem:[%s34917_s23 + $0xc40] sm:$0xff]  }
 0x1ce   : > { %29481 = vmatprep.subr.bf16.mxu0 %v32596_v8  ;;  %29502 = vmatpush3.bf16.msra.mxu1 %v32595_v6  ;;  %v32644_v6 = vld [vmem:[%s34917_s23 + $0xc88] sm:$0xff]   ;;  %v32646_v8 = vld [vmem:[%s34917_s23 + $0xcc0] sm:$0xff]  }
 0x1cf   : > { %29503 = vmatprep.subr.bf16.mxu1 %v32597_v9  ;;  %v32647_v9 = vld [vmem:[%s34917_s23 + $0xc00] sm:$0xff]  }
 0x1d1   : > { %29482 = vmatpush3.bf16.msra.mxu0 %v32598_v10  ;;  %v239_v10 = vld [vmem:[#allocation2 + $0x30] sm:$0xff] }
 0x1d2   : > { %29483 = vmatprep.subr.bf16.mxu0 %v32600_v12  ;;  %29504 = vmatpush3.bf16.msra.mxu1 %v32599_v11  ;;  %v32648_v11 = vld [vmem:[%s34917_s23 + $0xc80] sm:$0xff]   ;;  %v5221_v12 = vrot.slane %v239_v10, %v34953_v35 }
 0x1d3   : > { %29505 = vmatprep.subr.bf16.mxu1 %v32601_v13  ;;  %v5214_v13 = vcombine.high %v239_v10, %v239_v10  ;;  %v32686_v10 = vld [vmem:[%s34917_s23 + $0xe70] sm:$0xff]  }
 0x1d5   : > { %29484 = vmatpush3.bf16.msra.mxu0 %v32602_v14  ;;  %v32649_v14 = vld [vmem:[%s34917_s23 + $0xd78] sm:$0xff]  }
 0x1d6   : > { %29485 = vmatprep.subr.bf16.mxu0 %v32604_v16  ;;  %29506 = vmatpush3.bf16.msra.mxu1 %v32603_v15  ;;  %v5229_v15 = vcombine.high %v5221_v12, %v5221_v12  ;;  %v5237_v16 = vrot.slane %v5221_v12, %v34953_v35  ;;  %v32687_v12 = vld [vmem:[%s34917_s23 + $0xef0] sm:$0xff]  }
 0x1d7   : > { %29507 = vmatprep.subr.bf16.mxu1 %v32605_v17  ;;  %v32650_v17 = vld [vmem:[%s34917_s23 + $0xdf8] sm:$0xff]  }
 0x1d9   : > { %29486 = vmatpush3.bf16.msra.mxu0 %v32606_v18  ;;  %v35430_v18 = vrot.slane %v5214_v13, %v34953_v35  ;;  %v32688_v13 = vld [vmem:[%s34917_s23 + $0xe30] sm:$0xff]  }
 0x1da   : > { %29487 = vmatprep.subr.bf16.mxu0 %v32608_v20  ;;  %29508 = vmatpush3.bf16.msra.mxu1 %v32607_v19  ;;  %v32651_v19 = vld [vmem:[%s34917_s23 + $0xd38] sm:$0xff]   ;;  %v5251_v20 = vrot.slane %v5229_v15, %v34953_v35 }
 0x1db   : > { %29509 = vmatprep.subr.bf16.mxu1 %v32609_v21  ;;  %v32652_v21 = vld [vmem:[%s34917_s23 + $0xdb8] sm:$0xff]  }
 0x1dd   : > { %29488 = vmatpush3.bf16.msra.mxu0 %v32610_v22  ;;  %v5230_v22 = vcombine.high %v35430_v18, %v35430_v18 }
 0x1de   : > { %29489 = vmatprep.subr.bf16.mxu0 %v32612_v24  ;;  %29510 = vmatpush3.bf16.msra.mxu1 %v32611_v23  ;;  %v5259_v23 = vcombine.high %v5237_v16, %v5237_v16  ;;  %v32653_v24 = vld [vmem:[%s34917_s23 + $0xd70] sm:$0xff]  }
 0x1df   : > { %29511 = vmatprep.subr.bf16.mxu1 %v32613_v25  ;;  %v5261_v25 = vcombine.high %v5251_v20, %v5251_v20 }
 0x1e1   : > { %29490 = vmatpush3.bf16.msra.mxu0 %v32614_v26 }
 0x1e2   : > { %29519 = vmatprep.subr.bf16.mxu0 %v32617_v29  ;;  %29512 = vmatpush3.bf16.msra.mxu1 %v32615_v27  ;;  %v32654_v27 = vld [vmem:[%s34917_s23 + $0xdf0] sm:$0xff]  }
 0x1e3   : > { %29541 = vmatprep.subr.bf16.mxu1 %v32618_v30  ;;  %v32655_v29 = vld [vmem:[%s34917_s23 + $0xd30] sm:$0xff]  }
 0x1e4   : > { %v29227_v33 = vpop.f32.mrf.mxu0  ;;  %21709 = vmatmul.mubr.bf16.vlgmr.msra.gmra.mxu0 %v5195_v28  ;;  %v5258_v28 = vrot.slane %v5230_v22, %v34953_v35 }
 0x1e5   : > { %v29249_v38 = vpop.f32.mrf.mxu1  ;;  %29520 = vmatpush3.bf16.msra.mxu0 %v32619_v31  ;;  %21749 = vmatmul.mubr.bf16.vlgmr.msra.gmra.mxu1 %v5211_v34 }
 0x1e6   : > { %v29228_v39 = vpop.f32.mrf.mxu0  ;;  %29521 = vmatprep.subr.bf16.mxu0 %v32621_v36  ;;  %29542 = vmatpush3.bf16.msra.mxu1 %v32620_v32  ;;  %v32656_v32 = vld [vmem:[%s34917_s23 + $0xdb0] sm:$0xff]   ;;  %v32657_v36 = vld [vmem:[%s34917_s23 + $0xd68] sm:$0xff]  }
 0x1e7   : > { %v29229_v41 = vadd.f32 %v29228_v39, %v29227_v33  ;;  %v29250_v43 = vpop.f32.mrf.mxu1  ;;  %29543 = vmatprep.subr.bf16.mxu1 %v32622_v37  ;;  %21788 = vmatprep.mubr.bf16.mxu0 %v5251_v20  ;;  %v5262_v33 = vcombine.high %v5258_v28, %v5258_v28  ;;  %v32658_v39 = vld [vmem:[%s34917_s23 + $0xde8] sm:$0xff]  }
 0x1e8   : > { %v29230_v44 = vpop.f32.mrf.mxu0  ;;  %v29251_v47 = vadd.f32 %v29250_v43, %v29249_v38  ;;  %21828 = vmatprep.mubr.bf16.mxu1 %v5261_v25 }
 0x1e9   : > { %v21231_v46 = vadd.f32 %v29229_v41, %v35365_v5  ;;  %v29252_v49 = vpop.f32.mrf.mxu1  ;;  %29522 = vmatpush3.bf16.msra.mxu0 %v32623_v40  ;;  %v32643_v5 = vld [vmem:[%s34917_s23 + $0xc08] sm:$0xff]  }
 0x1ea   : > { %v29231_v50 = vpop.f32.mrf.mxu0  ;;  %29523 = vmatprep.subr.bf16.mxu0 %v32625_v45  ;;  %29544 = vmatpush3.bf16.msra.mxu1 %v32624_v42  ;;  %v32659_v42 = vld [vmem:[%s34917_s23 + $0xd28] sm:$0xff]   ;;  %v32662_v49 = vld [vmem:[%s34917_s23 + $0xde0] sm:$0xff]  }
 0x1eb   : > { %v35402_v52 = vadd.f32 %v29251_v47, %v21231_v46  ;;  %v29253_v54 = vpop.f32.mrf.mxu1  ;;  %29545 = vmatprep.subr.bf16.mxu1 %v32626_v48  ;;  %v32660_v45 = vld [vmem:[%s34917_s23 + $0xda8] sm:$0xff]   ;;  %v32661_v47 = vld [vmem:[%s34917_s23 + $0xd60] sm:$0xff]  }
 0x1ec   : > { %v32663_v50 = vld [vmem:[%s34917_s23 + $0xd20] sm:$0xff]   ;;  %v32667_v54 = vld [vmem:[%s34917_s23 + $0xd18] sm:$0xff]  }
 0x1ed   : > { %29524 = vmatpush3.bf16.msra.mxu0 %v32627_v51  ;;  %v32664_v51 = vld [vmem:[%s34917_s23 + $0xda0] sm:$0xff]  }
 0x1ee   : > { %29525 = vmatprep.subr.bf16.mxu0 %v32629_v55  ;;  %29546 = vmatpush3.bf16.msra.mxu1 %v32628_v53  ;;  %v32666_v53 = vld [vmem:[%s34917_s23 + $0xdd8] sm:$0xff]  }
 0x1ef   : > { %29547 = vmatprep.subr.bf16.mxu1 %v32630_v56  ;;  %v32668_v55 = vld [vmem:[%s34917_s23 + $0xd98] sm:$0xff]   ;;  %v32669_v56 = vld [vmem:[%s34917_s23 + $0xd50] sm:$0xff]  }
 0x1f1   : > { %29526 = vmatpush3.bf16.msra.mxu0 %v32631_v57  ;;  %v32670_v57 = vld [vmem:[%s34917_s23 + $0xdd0] sm:$0xff]  }
 0x1f2   : > { %29527 = vmatprep.subr.bf16.mxu0 %v32633_v59  ;;  %29548 = vmatpush3.bf16.msra.mxu1 %v32632_v58  ;;  %v32671_v58 = vld [vmem:[%s34917_s23 + $0xd10] sm:$0xff]  }
 0x1f3   : > { %29549 = vmatprep.subr.bf16.mxu1 %v32634_v60  ;;  %v32672_v59 = vld [vmem:[%s34917_s23 + $0xd90] sm:$0xff]   ;;  %v32673_v60 = vld [vmem:[%s34917_s23 + $0xd48] sm:$0xff]  }
 0x1f5   : > { %29528 = vmatpush3.bf16.msra.mxu0 %v32635_v61  ;;  %v32674_v61 = vld [vmem:[%s34917_s23 + $0xdc8] sm:$0xff]  }
 0x1f6   : > { %29529 = vmatprep.subr.bf16.mxu0 %v32637_v63  ;;  %29550 = vmatpush3.bf16.msra.mxu1 %v32636_v62  ;;  %v32675_v62 = vld [vmem:[%s34917_s23 + $0xd08] sm:$0xff]  }
 0x1f7   : > { %29551 = vmatprep.subr.bf16.mxu1 %v32638_v0  ;;  %v32676_v63 = vld [vmem:[%s34917_s23 + $0xd88] sm:$0xff]   ;;  %v32677_v0 = vld [vmem:[%s34917_s23 + $0xd40] sm:$0xff]  }
 0x1f9   : > { %29530 = vmatpush3.bf16.msra.mxu0 %v32639_v1  ;;  %v32678_v1 = vld [vmem:[%s34917_s23 + $0xdc0] sm:$0xff]  }
 0x1fa   : > { %29531 = vmatprep.subr.bf16.mxu0 %v32641_v3  ;;  %29552 = vmatpush3.bf16.msra.mxu1 %v32640_v2  ;;  %v32679_v2 = vld [vmem:[%s34917_s23 + $0xd00] sm:$0xff]  }
 0x1fb   : > { %29553 = vmatprep.subr.bf16.mxu1 %v32642_v4  ;;  %v32680_v3 = vld [vmem:[%s34917_s23 + $0xd80] sm:$0xff]   ;;  %v5244_v4 = vrot.slane %v35430_v18, %v34953_v35  ;;  %v32690_v18 = vld [vmem:[%s34917_s23 + $0xe68] sm:$0xff]  }
 0x1fd   : > { %29532 = vmatpush3.bf16.msra.mxu0 %v32643_v5  ;;  %v32682_v5 = vld [vmem:[%s34917_s23 + $0xe78] sm:$0xff]  }
 0x1fe   : > { %29533 = vmatprep.subr.bf16.mxu0 %v32645_v7  ;;  %29554 = vmatpush3.bf16.msra.mxu1 %v32644_v6  ;;  %v32683_v6 = vld [vmem:[%s34917_s23 + $0xef8] sm:$0xff]  }
 0x1ff   : > { %29555 = vmatprep.subr.bf16.mxu1 %v32646_v8  ;;  %v32684_v7 = vld [vmem:[%s34917_s23 + $0xe38] sm:$0xff]  }
 0x200   : > { %v32685_v8 = vld [vmem:[%s34917_s23 + $0xeb8] sm:$0xff]  }
 0x201   : > { %29534 = vmatpush3.bf16.msra.mxu0 %v32647_v9  ;;  %v5260_v9 = vcombine.high %v5244_v4, %v5244_v4 }
 0x202   : > { %29563 = vmatprep.subr.bf16.mxu0 %v32649_v14  ;;  %29556 = vmatpush3.bf16.msra.mxu1 %v32648_v11 }
 0x203   : > { %29585 = vmatprep.subr.bf16.mxu1 %v32650_v17 }
 0x204   : > { %v29271_v26 = vpop.f32.mrf.mxu0  ;;  %21789 = vmatmul.mubr.bf16.vlgmr.msra.gmra.mxu0 %v5237_v16  ;;  %v32689_v16 = vld [vmem:[%s34917_s23 + $0xeb0] sm:$0xff]  }
 0x205   : > { %v29293_v30 = vpop.f32.mrf.mxu1  ;;  %29564 = vmatpush3.bf16.msra.mxu0 %v32651_v19  ;;  %21829 = vmatmul.mubr.bf16.vlgmr.msra.gmra.mxu1 %v5259_v23 }
 0x206   : > { %v29272_v31 = vpop.f32.mrf.mxu0  ;;  %29565 = vmatprep.subr.bf16.mxu0 %v32653_v24  ;;  %29586 = vmatpush3.bf16.msra.mxu1 %v32652_v21  ;;  %v32691_v21 = vld [vmem:[%s34917_s23 + $0xee8] sm:$0xff]  }
 0x207   : > { %v29273_v34 = vadd.f32 %v29272_v31, %v29271_v26  ;;  %v29294_v37 = vpop.f32.mrf.mxu1  ;;  %21868 = vmatprep.mubr.bf16.mxu0 %v5258_v28  ;;  %29587 = vmatprep.subr.bf16.mxu1 %v32654_v27  ;;  %v32692_v24 = vld [vmem:[%s34917_s23 + $0xe28] sm:$0xff]   ;;  %v32695_v31 = vld [vmem:[%s34917_s23 + $0xee0] sm:$0xff]  }
 0x208   : > { %v29274_v38 = vpop.f32.mrf.mxu0  ;;  %v29295_v41 = vadd.f32 %v29294_v37, %v29293_v30  ;;  %21908 = vmatprep.mubr.bf16.mxu1 %v5262_v33  ;;  %v32693_v27 = vld [vmem:[%s34917_s23 + $0xea8] sm:$0xff]   ;;  %v32697_v33 = vld [vmem:[%s34917_s23 + $0xea0] sm:$0xff]   ;;  %v32700_v37 = vld [vmem:[%s34917_s23 + $0xe18] sm:$0xff]  }
 0x209   : > { %v21311_v40 = vadd.f32 %v29273_v34, %v35402_v52  ;;  %v29296_v43 = vpop.f32.mrf.mxu1  ;;  %29566 = vmatpush3.bf16.msra.mxu0 %v32655_v29  ;;  %v32665_v52 = vld [vmem:[%s34917_s23 + $0xd58] sm:$0xff]   ;;  %v32694_v29 = vld [vmem:[%s34917_s23 + $0xe60] sm:$0xff]  }
 0x20a   : > { %v29275_v44 = vpop.f32.mrf.mxu0  ;;  %29567 = vmatprep.subr.bf16.mxu0 %v32657_v36  ;;  %29588 = vmatpush3.bf16.msra.mxu1 %v32656_v32  ;;  %v32696_v32 = vld [vmem:[%s34917_s23 + $0xe20] sm:$0xff]   ;;  %v32698_v34 = vld [vmem:[%s34917_s23 + $0xe58] sm:$0xff]   ;;  %v32706_v43 = vld [vmem:[%s34917_s23 + $0xe48] sm:$0xff]  }
 0x20b   : > { %v35447_v46 = vadd.f32 %v29295_v41, %v21311_v40  ;;  %v29297_v48 = vpop.f32.mrf.mxu1  ;;  %29589 = vmatprep.subr.bf16.mxu1 %v32658_v39  ;;  %v32699_v36 = vld [vmem:[%s34917_s23 + $0xed8] sm:$0xff]   ;;  %v32702_v39 = vld [vmem:[%s34917_s23 + $0xe50] sm:$0xff]   ;;  %v32707_v44 = vld [vmem:[%s34917_s23 + $0xec8] sm:$0xff]  }
 0x20c   : > { %v32701_v38 = vld [vmem:[%s34917_s23 + $0xe98] sm:$0xff]   ;;  %v32703_v40 = vld [vmem:[%s34917_s23 + $0xed0] sm:$0xff]   ;;  %v32711_v48 = vld [vmem:[%s34917_s23 + $0xec0] sm:$0xff]  }
 0x20d   : > { %29568 = vmatpush3.bf16.msra.mxu0 %v32659_v42  ;;  %v32704_v41 = vld [vmem:[%s34917_s23 + $0xe10] sm:$0xff]  }
 0x20e   : > { %29569 = vmatprep.subr.bf16.mxu0 %v32661_v47  ;;  %29590 = vmatpush3.bf16.msra.mxu1 %v32660_v45  ;;  %v32705_v42 = vld [vmem:[%s34917_s23 + $0xe90] sm:$0xff]   ;;  %v32708_v45 = vld [vmem:[%s34917_s23 + $0xe08] sm:$0xff]   ;;  %v32710_v47 = vld [vmem:[%s34917_s23 + $0xe40] sm:$0xff]  }
 0x20f   : > { %29591 = vmatprep.subr.bf16.mxu1 %v32662_v49  ;;  %v32712_v49 = vld [vmem:[%s34917_s23 + $0xe00] sm:$0xff]  }
 0x211   : > { %29570 = vmatpush3.bf16.msra.mxu0 %v32663_v50  ;;  %v240_v50 = vld [vmem:[#allocation2 + $0x38] sm:$0xff] }
 0x212   : > { %29571 = vmatprep.subr.bf16.mxu0 %v32665_v52  ;;  %29592 = vmatpush3.bf16.msra.mxu1 %v32664_v51  ;;  %v32713_v51 = vld [vmem:[%s34917_s23 + $0xe80] sm:$0xff]   ;;  %v5270_v52 = vrot.slane %v240_v50, %v34953_v35 }
 0x213   : > { %29593 = vmatprep.subr.bf16.mxu1 %v32666_v53  ;;  %v5263_v53 = vcombine.high %v240_v50, %v240_v50  ;;  %v32751_v50 = vld [vmem:[%s34917_s23 + $0x1070] sm:$0xff]  }
 0x215   : > { %29572 = vmatpush3.bf16.msra.mxu0 %v32667_v54  ;;  %v32714_v54 = vld [vmem:[%s34917_s23 + $0xf78] sm:$0xff]  }
 0x216   : > { %29573 = vmatprep.subr.bf16.mxu0 %v32669_v56  ;;  %29594 = vmatpush3.bf16.msra.mxu1 %v32668_v55  ;;  %v5278_v55 = vcombine.high %v5270_v52, %v5270_v52  ;;  %v5286_v56 = vrot.slane %v5270_v52, %v34953_v35  ;;  %v32752_v52 = vld [vmem:[%s34917_s23 + $0x10f0] sm:$0xff]  }
 0x217   : > { %29595 = vmatprep.subr.bf16.mxu1 %v32670_v57  ;;  %v32715_v57 = vld [vmem:[%s34917_s23 + $0xff8] sm:$0xff]  }
 0x219   : > { %29574 = vmatpush3.bf16.msra.mxu0 %v32671_v58  ;;  %v35511_v58 = vrot.slane %v5263_v53, %v34953_v35  ;;  %v32753_v53 = vld [vmem:[%s34917_s23 + $0x1030] sm:$0xff]  }
 0x21a   : > { %29575 = vmatprep.subr.bf16.mxu0 %v32673_v60  ;;  %29596 = vmatpush3.bf16.msra.mxu1 %v32672_v59  ;;  %v32716_v59 = vld [vmem:[%s34917_s23 + $0xf38] sm:$0xff]   ;;  %v5300_v60 = vrot.slane %v5278_v55, %v34953_v35 }
 0x21b   : > { %29597 = vmatprep.subr.bf16.mxu1 %v32674_v61  ;;  %v32717_v61 = vld [vmem:[%s34917_s23 + $0xfb8] sm:$0xff]  }
 0x21d   : > { %29576 = vmatpush3.bf16.msra.mxu0 %v32675_v62  ;;  %v5279_v62 = vcombine.high %v35511_v58, %v35511_v58 }
 0x21e   : > { %29577 = vmatprep.subr.bf16.mxu0 %v32677_v0  ;;  %29598 = vmatpush3.bf16.msra.mxu1 %v32676_v63  ;;  %v5308_v63 = vcombine.high %v5286_v56, %v5286_v56  ;;  %v32718_v0 = vld [vmem:[%s34917_s23 + $0xf70] sm:$0xff]  }
 0x21f   : > { %29599 = vmatprep.subr.bf16.mxu1 %v32678_v1  ;;  %v5310_v1 = vcombine.high %v5300_v60, %v5300_v60 }
 0x221   : > { %29578 = vmatpush3.bf16.msra.mxu0 %v32679_v2 }
 0x222   : > { %29607 = vmatprep.subr.bf16.mxu0 %v32682_v5  ;;  %29600 = vmatpush3.bf16.msra.mxu1 %v32680_v3  ;;  %v32719_v3 = vld [vmem:[%s34917_s23 + $0xff0] sm:$0xff]  }
 0x223   : > { %29629 = vmatprep.subr.bf16.mxu1 %v32683_v6  ;;  %v32720_v5 = vld [vmem:[%s34917_s23 + $0xf30] sm:$0xff]  }
 0x224   : > { %v29315_v11 = vpop.f32.mrf.mxu0  ;;  %21869 = vmatmul.mubr.bf16.vlgmr.msra.gmra.mxu0 %v5244_v4  ;;  %v5307_v4 = vrot.slane %v5279_v62, %v34953_v35 }
 0x225   : > { %v29337_v14 = vpop.f32.mrf.mxu1  ;;  %29608 = vmatpush3.bf16.msra.mxu0 %v32684_v7  ;;  %21909 = vmatmul.mubr.bf16.vlgmr.msra.gmra.mxu1 %v5260_v9 }
 0x226   : > { %v29316_v15 = vpop.f32.mrf.mxu0  ;;  %29609 = vmatprep.subr.bf16.mxu0 %v32686_v10  ;;  %29630 = vmatpush3.bf16.msra.mxu1 %v32685_v8  ;;  %v32721_v8 = vld [vmem:[%s34917_s23 + $0xfb0] sm:$0xff]   ;;  %v5311_v9 = vcombine.high %v5307_v4, %v5307_v4 }
 0x227   : > { %v29317_v17 = vadd.f32 %v29316_v15, %v29315_v11  ;;  %v29338_v19 = vpop.f32.mrf.mxu1  ;;  %29631 = vmatprep.subr.bf16.mxu1 %v32687_v12  ;;  %21948 = vmatprep.mubr.bf16.mxu0 %v5300_v60  ;;  %v32722_v11 = vld [vmem:[%s34917_s23 + $0xf68] sm:$0xff]  }
 0x228   : > { %v29318_v20 = vpop.f32.mrf.mxu0  ;;  %v29339_v23 = vadd.f32 %v29338_v19, %v29337_v14  ;;  %21988 = vmatprep.mubr.bf16.mxu1 %v5310_v1  ;;  %v32723_v14 = vld [vmem:[%s34917_s23 + $0xfe8] sm:$0xff]  }
 0x229   : > { %v21391_v22 = vadd.f32 %v29317_v17, %v35447_v46  ;;  %v29340_v25 = vpop.f32.mrf.mxu1  ;;  %29610 = vmatpush3.bf16.msra.mxu0 %v32688_v13  ;;  %v32709_v46 = vld [vmem:[%s34917_s23 + $0xe88] sm:$0xff]  }
 0x22a   : > { %v29319_v26 = vpop.f32.mrf.mxu0  ;;  %29611 = vmatprep.subr.bf16.mxu0 %v32690_v18  ;;  %29632 = vmatpush3.bf16.msra.mxu1 %v32689_v16  ;;  %v32724_v17 = vld [vmem:[%s34917_s23 + $0xf28] sm:$0xff]   ;;  %v32728_v25 = vld [vmem:[%s34917_s23 + $0xf20] sm:$0xff]  }
 0x22b   : > { %v35484_v28 = vadd.f32 %v29339_v23, %v21391_v22  ;;  %v29341_v30 = vpop.f32.mrf.mxu1  ;;  %29633 = vmatprep.subr.bf16.mxu1 %v32691_v21  ;;  %v32725_v20 = vld [vmem:[%s34917_s23 + $0xfa8] sm:$0xff]   ;;  %v32726_v22 = vld [vmem:[%s34917_s23 + $0xf60] sm:$0xff]  }
 0x22c   : > { %v32729_v26 = vld [vmem:[%s34917_s23 + $0xfa0] sm:$0xff]   ;;  %v32733_v30 = vld [vmem:[%s34917_s23 + $0xf98] sm:$0xff]  }
 0x22d   : > { %29612 = vmatpush3.bf16.msra.mxu0 %v32692_v24  ;;  %v32727_v24 = vld [vmem:[%s34917_s23 + $0xfe0] sm:$0xff]  }
 0x22e   : > { %29613 = vmatprep.subr.bf16.mxu0 %v32694_v29  ;;  %29634 = vmatpush3.bf16.msra.mxu1 %v32693_v27  ;;  %v32730_v27 = vld [vmem:[%s34917_s23 + $0xf58] sm:$0xff]  }
 0x22f   : > { %29635 = vmatprep.subr.bf16.mxu1 %v32695_v31  ;;  %v32732_v29 = vld [vmem:[%s34917_s23 + $0xf18] sm:$0xff]   ;;  %v32734_v31 = vld [vmem:[%s34917_s23 + $0xf50] sm:$0xff]  }
 0x231   : > { %29614 = vmatpush3.bf16.msra.mxu0 %v32696_v32  ;;  %v32735_v32 = vld [vmem:[%s34917_s23 + $0xfd0] sm:$0xff]  }
 0x232   : > { %29615 = vmatprep.subr.bf16.mxu0 %v32698_v34  ;;  %29636 = vmatpush3.bf16.msra.mxu1 %v32697_v33  ;;  %v32736_v33 = vld [vmem:[%s34917_s23 + $0xf10] sm:$0xff]  }
 0x233   : > { %29637 = vmatprep.subr.bf16.mxu1 %v32699_v36  ;;  %v32737_v34 = vld [vmem:[%s34917_s23 + $0xf90] sm:$0xff]   ;;  %v32738_v36 = vld [vmem:[%s34917_s23 + $0xf48] sm:$0xff]  }
 0x235   : > { %29616 = vmatpush3.bf16.msra.mxu0 %v32700_v37  ;;  %v32739_v37 = vld [vmem:[%s34917_s23 + $0xfc8] sm:$0xff]  }
 0x236   : > { %29617 = vmatprep.subr.bf16.mxu0 %v32702_v39  ;;  %29638 = vmatpush3.bf16.msra.mxu1 %v32701_v38  ;;  %v32740_v38 = vld [vmem:[%s34917_s23 + $0xf08] sm:$0xff]  }
 0x237   : > { %29639 = vmatprep.subr.bf16.mxu1 %v32703_v40  ;;  %v32741_v39 = vld [vmem:[%s34917_s23 + $0xf88] sm:$0xff]   ;;  %v32742_v40 = vld [vmem:[%s34917_s23 + $0xf40] sm:$0xff]  }
 0x239   : > { %29618 = vmatpush3.bf16.msra.mxu0 %v32704_v41  ;;  %v32743_v41 = vld [vmem:[%s34917_s23 + $0xfc0] sm:$0xff]  }
 0x23a   : > { %29619 = vmatprep.subr.bf16.mxu0 %v32706_v43  ;;  %29640 = vmatpush3.bf16.msra.mxu1 %v32705_v42  ;;  %v32744_v42 = vld [vmem:[%s34917_s23 + $0xf00] sm:$0xff]  }
 0x23b   : > { %29641 = vmatprep.subr.bf16.mxu1 %v32707_v44  ;;  %v32745_v43 = vld [vmem:[%s34917_s23 + $0xf80] sm:$0xff]   ;;  %v5293_v44 = vrot.slane %v35511_v58, %v34953_v35  ;;  %v32755_v58 = vld [vmem:[%s34917_s23 + $0x1068] sm:$0xff]  }
 0x23d   : > { %29620 = vmatpush3.bf16.msra.mxu0 %v32708_v45  ;;  %v32747_v45 = vld [vmem:[%s34917_s23 + $0x1078] sm:$0xff]  }
 0x23e   : > { %29621 = vmatprep.subr.bf16.mxu0 %v32710_v47  ;;  %29642 = vmatpush3.bf16.msra.mxu1 %v32709_v46  ;;  %v32748_v46 = vld [vmem:[%s34917_s23 + $0x10f8] sm:$0xff]  }
 0x23f   : > { %29643 = vmatprep.subr.bf16.mxu1 %v32711_v48  ;;  %v32749_v47 = vld [vmem:[%s34917_s23 + $0x1038] sm:$0xff]  }
 0x240   : > { %v32750_v48 = vld [vmem:[%s34917_s23 + $0x10b8] sm:$0xff]  }
 0x241   : > { %29622 = vmatpush3.bf16.msra.mxu0 %v32712_v49  ;;  %v5309_v49 = vcombine.high %v5293_v44, %v5293_v44 }
 0x242   : > { %29651 = vmatprep.subr.bf16.mxu0 %v32714_v54  ;;  %29644 = vmatpush3.bf16.msra.mxu1 %v32713_v51 }
 0x243   : > { %29673 = vmatprep.subr.bf16.mxu1 %v32715_v57 }
 0x244   : > { %v29359_v2 = vpop.f32.mrf.mxu0  ;;  %21949 = vmatmul.mubr.bf16.vlgmr.msra.gmra.mxu0 %v5286_v56  ;;  %v32754_v56 = vld [vmem:[%s34917_s23 + $0x10b0] sm:$0xff]  }
 0x245   : > { %v29381_v6 = vpop.f32.mrf.mxu1  ;;  %29652 = vmatpush3.bf16.msra.mxu0 %v32716_v59  ;;  %21989 = vmatmul.mubr.bf16.vlgmr.msra.gmra.mxu1 %v5308_v63 }
 0x246   : > { %v29360_v7 = vpop.f32.mrf.mxu0  ;;  %29653 = vmatprep.subr.bf16.mxu0 %v32718_v0  ;;  %29674 = vmatpush3.bf16.msra.mxu1 %v32717_v61  ;;  %v32756_v61 = vld [vmem:[%s34917_s23 + $0x10e8] sm:$0xff]  }
 0x247   : > { %v29361_v10 = vadd.f32 %v29360_v7, %v29359_v2  ;;  %v29382_v12 = vpop.f32.mrf.mxu1  ;;  %22028 = vmatprep.mubr.bf16.mxu0 %v5307_v4  ;;  %29675 = vmatprep.subr.bf16.mxu1 %v32719_v3  ;;  %v32757_v0 = vld [vmem:[%s34917_s23 + $0x1028] sm:$0xff]   ;;  %v32760_v7 = vld [vmem:[%s34917_s23 + $0x10e0] sm:$0xff]  }
 0x248   : > { %v29362_v13 = vpop.f32.mrf.mxu0  ;;  %v29383_v16 = vadd.f32 %v29382_v12, %v29381_v6  ;;  %22068 = vmatprep.mubr.bf16.mxu1 %v5311_v9  ;;  %v32758_v3 = vld [vmem:[%s34917_s23 + $0x10a8] sm:$0xff]   ;;  %v32762_v9 = vld [vmem:[%s34917_s23 + $0x10a0] sm:$0xff]   ;;  %v32765_v12 = vld [vmem:[%s34917_s23 + $0x1018] sm:$0xff]  }
 0x249   : > { %v21471_v15 = vadd.f32 %v29361_v10, %v35484_v28  ;;  %v29384_v18 = vpop.f32.mrf.mxu1  ;;  %29654 = vmatpush3.bf16.msra.mxu0 %v32720_v5  ;;  %v32731_v28 = vld [vmem:[%s34917_s23 + $0xfd8] sm:$0xff]   ;;  %v32759_v5 = vld [vmem:[%s34917_s23 + $0x1060] sm:$0xff]  }
 0x24a   : > { %v29363_v19 = vpop.f32.mrf.mxu0  ;;  %29655 = vmatprep.subr.bf16.mxu0 %v32722_v11  ;;  %29676 = vmatpush3.bf16.msra.mxu1 %v32721_v8  ;;  %v32761_v8 = vld [vmem:[%s34917_s23 + $0x1020] sm:$0xff]   ;;  %v32763_v10 = vld [vmem:[%s34917_s23 + $0x1058] sm:$0xff]   ;;  %v32771_v18 = vld [vmem:[%s34917_s23 + $0x1048] sm:$0xff]  }
 0x24b   : > { %v35528_v21 = vadd.f32 %v29383_v16, %v21471_v15  ;;  %v29385_v23 = vpop.f32.mrf.mxu1  ;;  %29677 = vmatprep.subr.bf16.mxu1 %v32723_v14  ;;  %v32764_v11 = vld [vmem:[%s34917_s23 + $0x10d8] sm:$0xff]   ;;  %v32767_v14 = vld [vmem:[%s34917_s23 + $0x1050] sm:$0xff]   ;;  %v32772_v19 = vld [vmem:[%s34917_s23 + $0x10c8] sm:$0xff]  }
 0x24c   : > { %v32766_v13 = vld [vmem:[%s34917_s23 + $0x1098] sm:$0xff]   ;;  %v32768_v15 = vld [vmem:[%s34917_s23 + $0x10d0] sm:$0xff]   ;;  %v32776_v23 = vld [vmem:[%s34917_s23 + $0x10c0] sm:$0xff]  }
 0x24d   : > { %29656 = vmatpush3.bf16.msra.mxu0 %v32724_v17  ;;  %v32769_v16 = vld [vmem:[%s34917_s23 + $0x1010] sm:$0xff]  }
 0x24e   : > { %29657 = vmatprep.subr.bf16.mxu0 %v32726_v22  ;;  %29678 = vmatpush3.bf16.msra.mxu1 %v32725_v20  ;;  %v32770_v17 = vld [vmem:[%s34917_s23 + $0x1090] sm:$0xff]   ;;  %v32773_v20 = vld [vmem:[%s34917_s23 + $0x1008] sm:$0xff]   ;;  %v32775_v22 = vld [vmem:[%s34917_s23 + $0x1040] sm:$0xff]  }
 0x24f   : > { %29679 = vmatprep.subr.bf16.mxu1 %v32727_v24  ;;  %v32777_v24 = vld [vmem:[%s34917_s23 + $0x1000] sm:$0xff]  }
 0x251   : > { %29658 = vmatpush3.bf16.msra.mxu0 %v32728_v25  ;;  %v241_v25 = vld [vmem:[#allocation2 + $0x40] sm:$0xff] }
 0x252   : > { %29659 = vmatprep.subr.bf16.mxu0 %v32730_v27  ;;  %29680 = vmatpush3.bf16.msra.mxu1 %v32729_v26  ;;  %v5319_v26 = vrot.slane %v241_v25, %v34953_v35  ;;  %v32779_v27 = vld [vmem:[%s34917_s23 + $0x1178] sm:$0xff]  }
 0x253   : > { %29681 = vmatprep.subr.bf16.mxu1 %v32731_v28  ;;  %v5312_v28 = vcombine.high %v241_v25, %v241_v25  ;;  %v32816_v25 = vld [vmem:[%s34917_s23 + $0x1270] sm:$0xff]  }
 0x255   : > { %29660 = vmatpush3.bf16.msra.mxu0 %v32732_v29  ;;  %v32778_v29 = vld [vmem:[%s34917_s23 + $0x1080] sm:$0xff]  }
 0x256   : > { %29661 = vmatprep.subr.bf16.mxu0 %v32734_v31  ;;  %29682 = vmatpush3.bf16.msra.mxu1 %v32733_v30  ;;  %v5327_v30 = vcombine.high %v5319_v26, %v5319_v26  ;;  %v5335_v31 = vrot.slane %v5319_v26, %v34953_v35 }
 0x257   : > { %29683 = vmatprep.subr.bf16.mxu1 %v32735_v32  ;;  %v32780_v32 = vld [vmem:[%s34917_s23 + $0x11f8] sm:$0xff]  }
 0x259   : > { %29662 = vmatpush3.bf16.msra.mxu0 %v32736_v33  ;;  %v35592_v33 = vrot.slane %v5312_v28, %v34953_v35  ;;  %v32818_v28 = vld [vmem:[%s34917_s23 + $0x1230] sm:$0xff]  }
 0x25a   : > { %29663 = vmatprep.subr.bf16.mxu0 %v32738_v36  ;;  %29684 = vmatpush3.bf16.msra.mxu1 %v32737_v34  ;;  %v32781_v34 = vld [vmem:[%s34917_s23 + $0x1138] sm:$0xff]   ;;  %v5349_v36 = vrot.slane %v5327_v30, %v34953_v35 }
 0x25b   : > { %29685 = vmatprep.subr.bf16.mxu1 %v32739_v37  ;;  %v32782_v37 = vld [vmem:[%s34917_s23 + $0x11b8] sm:$0xff]  }
 0x25d   : > { %29664 = vmatpush3.bf16.msra.mxu0 %v32740_v38  ;;  %v5328_v38 = vcombine.high %v35592_v33, %v35592_v33 }
 0x25e   : > { %29665 = vmatprep.subr.bf16.mxu0 %v32742_v40  ;;  %29686 = vmatpush3.bf16.msra.mxu1 %v32741_v39  ;;  %v5357_v39 = vcombine.high %v5335_v31, %v5335_v31  ;;  %v32783_v40 = vld [vmem:[%s34917_s23 + $0x1170] sm:$0xff]  }
 0x25f   : > { %29687 = vmatprep.subr.bf16.mxu1 %v32743_v41  ;;  %v5359_v41 = vcombine.high %v5349_v36, %v5349_v36 }
 0x261   : > { %29666 = vmatpush3.bf16.msra.mxu0 %v32744_v42 }
 0x262   : > { %29695 = vmatprep.subr.bf16.mxu0 %v32747_v45  ;;  %29688 = vmatpush3.bf16.msra.mxu1 %v32745_v43  ;;  %v32784_v43 = vld [vmem:[%s34917_s23 + $0x11f0] sm:$0xff]  }
 0x263   : > { %29717 = vmatprep.subr.bf16.mxu1 %v32748_v46  ;;  %v32785_v45 = vld [vmem:[%s34917_s23 + $0x1130] sm:$0xff]  }
 0x264   : > { %v29403_v51 = vpop.f32.mrf.mxu0  ;;  %22029 = vmatmul.mubr.bf16.vlgmr.msra.gmra.mxu0 %v5293_v44  ;;  %v5356_v44 = vrot.slane %v5328_v38, %v34953_v35 }
 0x265   : > { %v29425_v54 = vpop.f32.mrf.mxu1  ;;  %29696 = vmatpush3.bf16.msra.mxu0 %v32749_v47  ;;  %22069 = vmatmul.mubr.bf16.vlgmr.msra.gmra.mxu1 %v5309_v49 }
 0x266   : > { %v29404_v55 = vpop.f32.mrf.mxu0  ;;  %29697 = vmatprep.subr.bf16.mxu0 %v32751_v50  ;;  %29718 = vmatpush3.bf16.msra.mxu1 %v32750_v48  ;;  %v32786_v48 = vld [vmem:[%s34917_s23 + $0x11b0] sm:$0xff]   ;;  %v5360_v49 = vcombine.high %v5356_v44, %v5356_v44 }
 0x267   : > { %v29405_v57 = vadd.f32 %v29404_v55, %v29403_v51  ;;  %v29426_v59 = vpop.f32.mrf.mxu1  ;;  %29719 = vmatprep.subr.bf16.mxu1 %v32752_v52  ;;  %22108 = vmatprep.mubr.bf16.mxu0 %v5349_v36  ;;  %v32787_v51 = vld [vmem:[%s34917_s23 + $0x1168] sm:$0xff]  }
 0x268   : > { %v29406_v60 = vpop.f32.mrf.mxu0  ;;  %v29427_v63 = vadd.f32 %v29426_v59, %v29425_v54  ;;  %22148 = vmatprep.mubr.bf16.mxu1 %v5359_v41  ;;  %v32788_v54 = vld [vmem:[%s34917_s23 + $0x11e8] sm:$0xff]  }
 0x269   : > { %v21551_v62 = vadd.f32 %v29405_v57, %v35528_v21  ;;  %v29428_v1 = vpop.f32.mrf.mxu1  ;;  %29698 = vmatpush3.bf16.msra.mxu0 %v32753_v53  ;;  %v32774_v21 = vld [vmem:[%s34917_s23 + $0x1088] sm:$0xff]  }
 0x26a   : > { %v29407_v2 = vpop.f32.mrf.mxu0  ;;  %29699 = vmatprep.subr.bf16.mxu0 %v32755_v58  ;;  %29720 = vmatpush3.bf16.msra.mxu1 %v32754_v56  ;;  %v32789_v57 = vld [vmem:[%s34917_s23 + $0x1128] sm:$0xff]   ;;  %v32793_v1 = vld [vmem:[%s34917_s23 + $0x1120] sm:$0xff]  }
 0x26b   : > { %v35565_v4 = vadd.f32 %v29427_v63, %v21551_v62  ;;  %v29429_v6 = vpop.f32.mrf.mxu1  ;;  %29721 = vmatprep.subr.bf16.mxu1 %v32756_v61  ;;  %v32790_v60 = vld [vmem:[%s34917_s23 + $0x11a8] sm:$0xff]   ;;  %v32791_v62 = vld [vmem:[%s34917_s23 + $0x1160] sm:$0xff]  }
 0x26c   : > { %v32794_v2 = vld [vmem:[%s34917_s23 + $0x11a0] sm:$0xff]   ;;  %v32798_v6 = vld [vmem:[%s34917_s23 + $0x1198] sm:$0xff]  }
 0x26d   : > { %29700 = vmatpush3.bf16.msra.mxu0 %v32757_v0  ;;  %v32792_v0 = vld [vmem:[%s34917_s23 + $0x11e0] sm:$0xff]  }
 0x26e   : > { %29701 = vmatprep.subr.bf16.mxu0 %v32759_v5  ;;  %29722 = vmatpush3.bf16.msra.mxu1 %v32758_v3  ;;  %v32795_v3 = vld [vmem:[%s34917_s23 + $0x1158] sm:$0xff]  }
 0x26f   : > { %29723 = vmatprep.subr.bf16.mxu1 %v32760_v7  ;;  %v32797_v5 = vld [vmem:[%s34917_s23 + $0x1118] sm:$0xff]   ;;  %v32799_v7 = vld [vmem:[%s34917_s23 + $0x1150] sm:$0xff]  }
 0x271   : > { %29702 = vmatpush3.bf16.msra.mxu0 %v32761_v8  ;;  %v32800_v8 = vld [vmem:[%s34917_s23 + $0x11d0] sm:$0xff]  }
 0x272   : > { %29703 = vmatprep.subr.bf16.mxu0 %v32763_v10  ;;  %29724 = vmatpush3.bf16.msra.mxu1 %v32762_v9  ;;  %v32801_v9 = vld [vmem:[%s34917_s23 + $0x1110] sm:$0xff]  }
 0x273   : > { %29725 = vmatprep.subr.bf16.mxu1 %v32764_v11  ;;  %v32802_v10 = vld [vmem:[%s34917_s23 + $0x1190] sm:$0xff]   ;;  %v32803_v11 = vld [vmem:[%s34917_s23 + $0x1148] sm:$0xff]  }
 0x275   : > { %29704 = vmatpush3.bf16.msra.mxu0 %v32765_v12  ;;  %v32804_v12 = vld [vmem:[%s34917_s23 + $0x11c8] sm:$0xff]  }
 0x276   : > { %29705 = vmatprep.subr.bf16.mxu0 %v32767_v14  ;;  %29726 = vmatpush3.bf16.msra.mxu1 %v32766_v13  ;;  %v32805_v13 = vld [vmem:[%s34917_s23 + $0x1108] sm:$0xff]  }
 0x277   : > { %29727 = vmatprep.subr.bf16.mxu1 %v32768_v15  ;;  %v32806_v14 = vld [vmem:[%s34917_s23 + $0x1188] sm:$0xff]   ;;  %v32807_v15 = vld [vmem:[%s34917_s23 + $0x1140] sm:$0xff]  }
 0x279   : > { %29706 = vmatpush3.bf16.msra.mxu0 %v32769_v16  ;;  %v32808_v16 = vld [vmem:[%s34917_s23 + $0x11c0] sm:$0xff]  }
 0x27a   : > { %29707 = vmatprep.subr.bf16.mxu0 %v32771_v18  ;;  %29728 = vmatpush3.bf16.msra.mxu1 %v32770_v17  ;;  %v32809_v17 = vld [vmem:[%s34917_s23 + $0x1100] sm:$0xff]  }
 0x27b   : > { %29729 = vmatprep.subr.bf16.mxu1 %v32772_v19  ;;  %v32810_v18 = vld [vmem:[%s34917_s23 + $0x1180] sm:$0xff]   ;;  %v5342_v19 = vrot.slane %v35592_v33, %v34953_v35  ;;  %v32820_v33 = vld [vmem:[%s34917_s23 + $0x1268] sm:$0xff]  }
 0x27d   : > { %29708 = vmatpush3.bf16.msra.mxu0 %v32773_v20  ;;  %v32812_v20 = vld [vmem:[%s34917_s23 + $0x1278] sm:$0xff]  }
 0x27e   : > { %29709 = vmatprep.subr.bf16.mxu0 %v32775_v22  ;;  %29730 = vmatpush3.bf16.msra.mxu1 %v32774_v21  ;;  %v32813_v21 = vld [vmem:[%s34917_s23 + $0x12f8] sm:$0xff]  }
 0x27f   : > { %29731 = vmatprep.subr.bf16.mxu1 %v32776_v23  ;;  %v32814_v22 = vld [vmem:[%s34917_s23 + $0x1238] sm:$0xff]  }
 0x280   : > { %v32815_v23 = vld [vmem:[%s34917_s23 + $0x12b8] sm:$0xff]  }
 0x281   : > { %29710 = vmatpush3.bf16.msra.mxu0 %v32777_v24  ;;  %v5358_v24 = vcombine.high %v5342_v19, %v5342_v19 }
 0x282   : > { %29739 = vmatprep.subr.bf16.mxu0 %v32779_v27  ;;  %29732 = vmatpush3.bf16.msra.mxu1 %v32778_v29  ;;  %v32817_v27 = vld [vmem:[%s34917_s23 + $0x12f0] sm:$0xff]  }
 0x283   : > { %29761 = vmatprep.subr.bf16.mxu1 %v32780_v32 }
 0x284   : > { %v29447_v42 = vpop.f32.mrf.mxu0  ;;  %22109 = vmatmul.mubr.bf16.vlgmr.msra.gmra.mxu0 %v5335_v31  ;;  %v32819_v31 = vld [vmem:[%s34917_s23 + $0x12b0] sm:$0xff]  }
 0x285   : > { %v29469_v46 = vpop.f32.mrf.mxu1  ;;  %29740 = vmatpush3.bf16.msra.mxu0 %v32781_v34  ;;  %22149 = vmatmul.mubr.bf16.vlgmr.msra.gmra.mxu1 %v5357_v39 }
 0x286   : > { %v29448_v47 = vpop.f32.mrf.mxu0  ;;  %29741 = vmatprep.subr.bf16.mxu0 %v32783_v40  ;;  %29762 = vmatpush3.bf16.msra.mxu1 %v32782_v37  ;;  %v32821_v37 = vld [vmem:[%s34917_s23 + $0x12e8] sm:$0xff]  }
 0x287   : > { %v29449_v50 = vadd.f32 %v29448_v47, %v29447_v42  ;;  %v29470_v52 = vpop.f32.mrf.mxu1  ;;  %22188 = vmatprep.mubr.bf16.mxu0 %v5356_v44  ;;  %29763 = vmatprep.subr.bf16.mxu1 %v32784_v43  ;;  %v32822_v40 = vld [vmem:[%s34917_s23 + $0x1228] sm:$0xff]   ;;  %v32825_v47 = vld [vmem:[%s34917_s23 + $0x12e0] sm:$0xff]  }
 0x288   : > { %v29450_v53 = vpop.f32.mrf.mxu0  ;;  %v29471_v56 = vadd.f32 %v29470_v52, %v29469_v46  ;;  %22228 = vmatprep.mubr.bf16.mxu1 %v5360_v49  ;;  %v32823_v43 = vld [vmem:[%s34917_s23 + $0x12a8] sm:$0xff]   ;;  %v32827_v49 = vld [vmem:[%s34917_s23 + $0x12a0] sm:$0xff]   ;;  %v32830_v52 = vld [vmem:[%s34917_s23 + $0x1218] sm:$0xff]  }
 0x289   : > { %v21631_v55 = vadd.f32 %v29449_v50, %v35565_v4  ;;  %v29472_v58 = vpop.f32.mrf.mxu1  ;;  %29742 = vmatpush3.bf16.msra.mxu0 %v32785_v45  ;;  %v32796_v4 = vld [vmem:[%s34917_s23 + $0x11d8] sm:$0xff]   ;;  %v32824_v45 = vld [vmem:[%s34917_s23 + $0x1260] sm:$0xff]  }
 0x28a   : > { %v29451_v59 = vpop.f32.mrf.mxu0  ;;  %29743 = vmatprep.subr.bf16.mxu0 %v32787_v51  ;;  %29764 = vmatpush3.bf16.msra.mxu1 %v32786_v48  ;;  %v32826_v48 = vld [vmem:[%s34917_s23 + $0x1220] sm:$0xff]   ;;  %v32828_v50 = vld [vmem:[%s34917_s23 + $0x1258] sm:$0xff]   ;;  %v32836_v58 = vld [vmem:[%s34917_s23 + $0x1248] sm:$0xff]  }
 0x28b   : > { %v35609_v61 = vadd.f32 %v29471_v56, %v21631_v55  ;;  %v29473_v63 = vpop.f32.mrf.mxu1  ;;  %29765 = vmatprep.subr.bf16.mxu1 %v32788_v54  ;;  %v32829_v51 = vld [vmem:[%s34917_s23 + $0x12d8] sm:$0xff]   ;;  %v32832_v54 = vld [vmem:[%s34917_s23 + $0x1250] sm:$0xff]   ;;  %v32837_v59 = vld [vmem:[%s34917_s23 + $0x12c8] sm:$0xff]  }
 0x28c   : > { %v32831_v53 = vld [vmem:[%s34917_s23 + $0x1298] sm:$0xff]   ;;  %v32833_v55 = vld [vmem:[%s34917_s23 + $0x12d0] sm:$0xff]   ;;  %v32841_v63 = vld [vmem:[%s34917_s23 + $0x12c0] sm:$0xff]  }
 0x28d   : > { %29744 = vmatpush3.bf16.msra.mxu0 %v32789_v57  ;;  %v32834_v56 = vld [vmem:[%s34917_s23 + $0x1210] sm:$0xff]  }
 0x28e   : > { %29745 = vmatprep.subr.bf16.mxu0 %v32791_v62  ;;  %29766 = vmatpush3.bf16.msra.mxu1 %v32790_v60  ;;  %v32835_v57 = vld [vmem:[%s34917_s23 + $0x1290] sm:$0xff]   ;;  %v32838_v60 = vld [vmem:[%s34917_s23 + $0x1208] sm:$0xff]   ;;  %v32840_v62 = vld [vmem:[%s34917_s23 + $0x1240] sm:$0xff]  }
 0x28f   : > { %29767 = vmatprep.subr.bf16.mxu1 %v32792_v0  ;;  %v32842_v0 = vld [vmem:[%s34917_s23 + $0x1200] sm:$0xff]  }
 0x291   : > { %29746 = vmatpush3.bf16.msra.mxu0 %v32793_v1  ;;  %v242_v1 = vld [vmem:[#allocation2 + $0x48] sm:$0xff] }
 0x292   : > { %29747 = vmatprep.subr.bf16.mxu0 %v32795_v3  ;;  %29768 = vmatpush3.bf16.msra.mxu1 %v32794_v2  ;;  %v32843_v2 = vld [vmem:[%s34917_s23 + $0x1280] sm:$0xff]   ;;  %v5368_v3 = vrot.slane %v242_v1, %v34953_v35 }
 0x293   : > { %29769 = vmatprep.subr.bf16.mxu1 %v32796_v4  ;;  %v5361_v4 = vcombine.high %v242_v1, %v242_v1  ;;  %v32881_v1 = vld [vmem:[%s34917_s23 + $0x1470] sm:$0xff]  }
 0x295   : > { %29748 = vmatpush3.bf16.msra.mxu0 %v32797_v5  ;;  %v32844_v5 = vld [vmem:[%s34917_s23 + $0x1378] sm:$0xff]  }
 0x296   : > { %29749 = vmatprep.subr.bf16.mxu0 %v32799_v7  ;;  %29770 = vmatpush3.bf16.msra.mxu1 %v32798_v6  ;;  %v5376_v6 = vcombine.high %v5368_v3, %v5368_v3  ;;  %v5384_v7 = vrot.slane %v5368_v3, %v34953_v35  ;;  %v32882_v3 = vld [vmem:[%s34917_s23 + $0x14f0] sm:$0xff]  }
 0x297   : > { %29771 = vmatprep.subr.bf16.mxu1 %v32800_v8  ;;  %v32845_v8 = vld [vmem:[%s34917_s23 + $0x13f8] sm:$0xff]  }
 0x299   : > { %29750 = vmatpush3.bf16.msra.mxu0 %v32801_v9  ;;  %v35673_v9 = vrot.slane %v5361_v4, %v34953_v35  ;;  %v32883_v4 = vld [vmem:[%s34917_s23 + $0x1430] sm:$0xff]  }
 0x29a   : > { %29751 = vmatprep.subr.bf16.mxu0 %v32803_v11  ;;  %29772 = vmatpush3.bf16.msra.mxu1 %v32802_v10  ;;  %v32846_v10 = vld [vmem:[%s34917_s23 + $0x1338] sm:$0xff]   ;;  %v5398_v11 = vrot.slane %v5376_v6, %v34953_v35 }
 0x29b   : > { %29773 = vmatprep.subr.bf16.mxu1 %v32804_v12  ;;  %v32847_v12 = vld [vmem:[%s34917_s23 + $0x13b8] sm:$0xff]  }
 0x29d   : > { %29752 = vmatpush3.bf16.msra.mxu0 %v32805_v13  ;;  %v5377_v13 = vcombine.high %v35673_v9, %v35673_v9 }
 0x29e   : > { %29753 = vmatprep.subr.bf16.mxu0 %v32807_v15  ;;  %29774 = vmatpush3.bf16.msra.mxu1 %v32806_v14  ;;  %v5406_v14 = vcombine.high %v5384_v7, %v5384_v7  ;;  %v32848_v15 = vld [vmem:[%s34917_s23 + $0x1370] sm:$0xff]  }
 0x29f   : > { %29775 = vmatprep.subr.bf16.mxu1 %v32808_v16  ;;  %v5408_v16 = vcombine.high %v5398_v11, %v5398_v11 }
 0x2a1   : > { %29754 = vmatpush3.bf16.msra.mxu0 %v32809_v17 }
 0x2a2   : > { %29783 = vmatprep.subr.bf16.mxu0 %v32812_v20  ;;  %29776 = vmatpush3.bf16.msra.mxu1 %v32810_v18  ;;  %v32849_v18 = vld [vmem:[%s34917_s23 + $0x13f0] sm:$0xff]  }
 0x2a3   : > { %29805 = vmatprep.subr.bf16.mxu1 %v32813_v21  ;;  %v32850_v20 = vld [vmem:[%s34917_s23 + $0x1330] sm:$0xff]  }
 0x2a4   : > { %v29491_v26 = vpop.f32.mrf.mxu0  ;;  %22189 = vmatmul.mubr.bf16.vlgmr.msra.gmra.mxu0 %v5342_v19  ;;  %v5405_v19 = vrot.slane %v5377_v13, %v34953_v35 }
 0x2a5   : > { %v29513_v29 = vpop.f32.mrf.mxu1  ;;  %29784 = vmatpush3.bf16.msra.mxu0 %v32814_v22  ;;  %22229 = vmatmul.mubr.bf16.vlgmr.msra.gmra.mxu1 %v5358_v24 }
 0x2a6   : > { %v29492_v30 = vpop.f32.mrf.mxu0  ;;  %29785 = vmatprep.subr.bf16.mxu0 %v32816_v25  ;;  %29806 = vmatpush3.bf16.msra.mxu1 %v32815_v23  ;;  %v32851_v23 = vld [vmem:[%s34917_s23 + $0x13b0] sm:$0xff]   ;;  %v5409_v24 = vcombine.high %v5405_v19, %v5405_v19 }
 0x2a7   : > { %v29493_v32 = vadd.f32 %v29492_v30, %v29491_v26  ;;  %v29514_v34 = vpop.f32.mrf.mxu1  ;;  %29807 = vmatprep.subr.bf16.mxu1 %v32817_v27  ;;  %22268 = vmatprep.mubr.bf16.mxu0 %v5398_v11  ;;  %v32852_v26 = vld [vmem:[%s34917_s23 + $0x1368] sm:$0xff]  }
 0x2a8   : > { %v29494_v36 = vpop.f32.mrf.mxu0  ;;  %v29515_v39 = vadd.f32 %v29514_v34, %v29513_v29  ;;  %22308 = vmatprep.mubr.bf16.mxu1 %v5408_v16  ;;  %v32853_v29 = vld [vmem:[%s34917_s23 + $0x13e8] sm:$0xff]  }
 0x2a9   : > { %v21711_v38 = vadd.f32 %v29493_v32, %v35609_v61  ;;  %v29516_v41 = vpop.f32.mrf.mxu1  ;;  %29786 = vmatpush3.bf16.msra.mxu0 %v32818_v28  ;;  %v32839_v61 = vld [vmem:[%s34917_s23 + $0x1288] sm:$0xff]  }
 0x2aa   : > { %v29495_v42 = vpop.f32.mrf.mxu0  ;;  %29787 = vmatprep.subr.bf16.mxu0 %v32820_v33  ;;  %29808 = vmatpush3.bf16.msra.mxu1 %v32819_v31  ;;  %v32854_v32 = vld [vmem:[%s34917_s23 + $0x1328] sm:$0xff]   ;;  %v32858_v41 = vld [vmem:[%s34917_s23 + $0x1320] sm:$0xff]  }
 0x2ab   : > { %v35646_v44 = vadd.f32 %v29515_v39, %v21711_v38  ;;  %v29517_v46 = vpop.f32.mrf.mxu1  ;;  %29809 = vmatprep.subr.bf16.mxu1 %v32821_v37  ;;  %v32855_v36 = vld [vmem:[%s34917_s23 + $0x13a8] sm:$0xff]   ;;  %v32856_v38 = vld [vmem:[%s34917_s23 + $0x1360] sm:$0xff]  }
 0x2ac   : > { %v32859_v42 = vld [vmem:[%s34917_s23 + $0x13a0] sm:$0xff]   ;;  %v32863_v46 = vld [vmem:[%s34917_s23 + $0x1398] sm:$0xff]  }
 0x2ad   : > { %29788 = vmatpush3.bf16.msra.mxu0 %v32822_v40  ;;  %v32857_v40 = vld [vmem:[%s34917_s23 + $0x13e0] sm:$0xff]  }
 0x2ae   : > { %29789 = vmatprep.subr.bf16.mxu0 %v32824_v45  ;;  %29810 = vmatpush3.bf16.msra.mxu1 %v32823_v43  ;;  %v32860_v43 = vld [vmem:[%s34917_s23 + $0x1358] sm:$0xff]  }
 0x2af   : > { %29811 = vmatprep.subr.bf16.mxu1 %v32825_v47  ;;  %v32862_v45 = vld [vmem:[%s34917_s23 + $0x1318] sm:$0xff]   ;;  %v32864_v47 = vld [vmem:[%s34917_s23 + $0x1350] sm:$0xff]  }
 0x2b1   : > { %29790 = vmatpush3.bf16.msra.mxu0 %v32826_v48  ;;  %v32865_v48 = vld [vmem:[%s34917_s23 + $0x13d0] sm:$0xff]  }
 0x2b2   : > { %29791 = vmatprep.subr.bf16.mxu0 %v32828_v50  ;;  %29812 = vmatpush3.bf16.msra.mxu1 %v32827_v49  ;;  %v32866_v49 = vld [vmem:[%s34917_s23 + $0x1310] sm:$0xff]  }
 0x2b3   : > { %29813 = vmatprep.subr.bf16.mxu1 %v32829_v51  ;;  %v32867_v50 = vld [vmem:[%s34917_s23 + $0x1390] sm:$0xff]   ;;  %v32868_v51 = vld [vmem:[%s34917_s23 + $0x1348] sm:$0xff]  }
 0x2b5   : > { %29792 = vmatpush3.bf16.msra.mxu0 %v32830_v52  ;;  %v32869_v52 = vld [vmem:[%s34917_s23 + $0x13c8] sm:$0xff]  }
 0x2b6   : > { %29793 = vmatprep.subr.bf16.mxu0 %v32832_v54  ;;  %29814 = vmatpush3.bf16.msra.mxu1 %v32831_v53  ;;  %v32870_v53 = vld [vmem:[%s34917_s23 + $0x1308] sm:$0xff]  }
 0x2b7   : > { %29815 = vmatprep.subr.bf16.mxu1 %v32833_v55  ;;  %v32871_v54 = vld [vmem:[%s34917_s23 + $0x1388] sm:$0xff]   ;;  %v32872_v55 = vld [vmem:[%s34917_s23 + $0x1340] sm:$0xff]  }
 0x2b9   : > { %29794 = vmatpush3.bf16.msra.mxu0 %v32834_v56  ;;  %v32873_v56 = vld [vmem:[%s34917_s23 + $0x13c0] sm:$0xff]  }
 0x2ba   : > { %29795 = vmatprep.subr.bf16.mxu0 %v32836_v58  ;;  %29816 = vmatpush3.bf16.msra.mxu1 %v32835_v57  ;;  %v32874_v57 = vld [vmem:[%s34917_s23 + $0x1300] sm:$0xff]  }
 0x2bb   : > { %29817 = vmatprep.subr.bf16.mxu1 %v32837_v59  ;;  %v32875_v58 = vld [vmem:[%s34917_s23 + $0x1380] sm:$0xff]   ;;  %v5391_v59 = vrot.slane %v35673_v9, %v34953_v35  ;;  %v32885_v9 = vld [vmem:[%s34917_s23 + $0x1468] sm:$0xff]  }
 0x2bd   : > { %29796 = vmatpush3.bf16.msra.mxu0 %v32838_v60  ;;  %v32877_v60 = vld [vmem:[%s34917_s23 + $0x1478] sm:$0xff]  }
 0x2be   : > { %29797 = vmatprep.subr.bf16.mxu0 %v32840_v62  ;;  %29818 = vmatpush3.bf16.msra.mxu1 %v32839_v61  ;;  %v32878_v61 = vld [vmem:[%s34917_s23 + $0x14f8] sm:$0xff]  }
 0x2bf   : > { %29819 = vmatprep.subr.bf16.mxu1 %v32841_v63  ;;  %v32879_v62 = vld [vmem:[%s34917_s23 + $0x1438] sm:$0xff]  }
 0x2c0   : > { %v32880_v63 = vld [vmem:[%s34917_s23 + $0x14b8] sm:$0xff]  }
 0x2c1   : > { %29798 = vmatpush3.bf16.msra.mxu0 %v32842_v0  ;;  %v5407_v0 = vcombine.high %v5391_v59, %v5391_v59 }
 0x2c2   : > { %29827 = vmatprep.subr.bf16.mxu0 %v32844_v5  ;;  %29820 = vmatpush3.bf16.msra.mxu1 %v32843_v2 }
 0x2c3   : > { %29849 = vmatprep.subr.bf16.mxu1 %v32845_v8 }
 0x2c4   : > { %v29535_v17 = vpop.f32.mrf.mxu0  ;;  %22269 = vmatmul.mubr.bf16.vlgmr.msra.gmra.mxu0 %v5384_v7  ;;  %v32884_v7 = vld [vmem:[%s34917_s23 + $0x14b0] sm:$0xff]  }
 0x2c5   : > { %v29557_v21 = vpop.f32.mrf.mxu1  ;;  %29828 = vmatpush3.bf16.msra.mxu0 %v32846_v10  ;;  %22309 = vmatmul.mubr.bf16.vlgmr.msra.gmra.mxu1 %v5406_v14 }
 0x2c6   : > { %v29536_v22 = vpop.f32.mrf.mxu0  ;;  %29829 = vmatprep.subr.bf16.mxu0 %v32848_v15  ;;  %29850 = vmatpush3.bf16.msra.mxu1 %v32847_v12  ;;  %v32886_v12 = vld [vmem:[%s34917_s23 + $0x14e8] sm:$0xff]  }
 0x2c7   : > { %v29537_v25 = vadd.f32 %v29536_v22, %v29535_v17  ;;  %v29558_v27 = vpop.f32.mrf.mxu1  ;;  %22348 = vmatprep.mubr.bf16.mxu0 %v5405_v19  ;;  %29851 = vmatprep.subr.bf16.mxu1 %v32849_v18  ;;  %v32887_v15 = vld [vmem:[%s34917_s23 + $0x1428] sm:$0xff]   ;;  %v32890_v22 = vld [vmem:[%s34917_s23 + $0x14e0] sm:$0xff]  }
 0x2c8   : > { %v29538_v28 = vpop.f32.mrf.mxu0  ;;  %v29559_v31 = vadd.f32 %v29558_v27, %v29557_v21  ;;  %22388 = vmatprep.mubr.bf16.mxu1 %v5409_v24  ;;  %v32888_v18 = vld [vmem:[%s34917_s23 + $0x14a8] sm:$0xff]   ;;  %v32892_v24 = vld [vmem:[%s34917_s23 + $0x14a0] sm:$0xff]   ;;  %v32895_v27 = vld [vmem:[%s34917_s23 + $0x1418] sm:$0xff]  }
 0x2c9   : > { %v21791_v30 = vadd.f32 %v29537_v25, %v35646_v44  ;;  %v29560_v33 = vpop.f32.mrf.mxu1  ;;  %29830 = vmatpush3.bf16.msra.mxu0 %v32850_v20  ;;  %v32861_v44 = vld [vmem:[%s34917_s23 + $0x13d8] sm:$0xff]   ;;  %v32889_v20 = vld [vmem:[%s34917_s23 + $0x1460] sm:$0xff]  }
 0x2ca   : > { %v29539_v34 = vpop.f32.mrf.mxu0  ;;  %29831 = vmatprep.subr.bf16.mxu0 %v32852_v26  ;;  %29852 = vmatpush3.bf16.msra.mxu1 %v32851_v23  ;;  %v32891_v23 = vld [vmem:[%s34917_s23 + $0x1420] sm:$0xff]   ;;  %v32893_v25 = vld [vmem:[%s34917_s23 + $0x1458] sm:$0xff]   ;;  %v32901_v33 = vld [vmem:[%s34917_s23 + $0x1448] sm:$0xff]  }
 0x2cb   : > { %v35690_v37 = vadd.f32 %v29559_v31, %v21791_v30  ;;  %v29561_v39 = vpop.f32.mrf.mxu1  ;;  %29853 = vmatprep.subr.bf16.mxu1 %v32853_v29  ;;  %v32894_v26 = vld [vmem:[%s34917_s23 + $0x14d8] sm:$0xff]   ;;  %v32897_v29 = vld [vmem:[%s34917_s23 + $0x1450] sm:$0xff]   ;;  %v32902_v34 = vld [vmem:[%s34917_s23 + $0x14c8] sm:$0xff]  }
 0x2cc   : > { %v32896_v28 = vld [vmem:[%s34917_s23 + $0x1498] sm:$0xff]   ;;  %v32898_v30 = vld [vmem:[%s34917_s23 + $0x14d0] sm:$0xff]   ;;  %v32906_v39 = vld [vmem:[%s34917_s23 + $0x14c0] sm:$0xff]  }
 0x2cd   : > { %29832 = vmatpush3.bf16.msra.mxu0 %v32854_v32  ;;  %v32899_v31 = vld [vmem:[%s34917_s23 + $0x1410] sm:$0xff]  }
 0x2ce   : > { %29833 = vmatprep.subr.bf16.mxu0 %v32856_v38  ;;  %29854 = vmatpush3.bf16.msra.mxu1 %v32855_v36  ;;  %v32900_v32 = vld [vmem:[%s34917_s23 + $0x1490] sm:$0xff]   ;;  %v32903_v36 = vld [vmem:[%s34917_s23 + $0x1408] sm:$0xff]   ;;  %v32905_v38 = vld [vmem:[%s34917_s23 + $0x1440] sm:$0xff]  }
 0x2cf   : > { %29855 = vmatprep.subr.bf16.mxu1 %v32857_v40  ;;  %v32907_v40 = vld [vmem:[%s34917_s23 + $0x1400] sm:$0xff]  }
 0x2d1   : > { %29834 = vmatpush3.bf16.msra.mxu0 %v32858_v41  ;;  %v243_v41 = vld [vmem:[#allocation2 + $0x50] sm:$0xff] }
 0x2d2   : > { %29835 = vmatprep.subr.bf16.mxu0 %v32860_v43  ;;  %29856 = vmatpush3.bf16.msra.mxu1 %v32859_v42  ;;  %v32908_v42 = vld [vmem:[%s34917_s23 + $0x1480] sm:$0xff]   ;;  %v5417_v43 = vrot.slane %v243_v41, %v34953_v35 }
 0x2d3   : > { %29857 = vmatprep.subr.bf16.mxu1 %v32861_v44  ;;  %v5410_v44 = vcombine.high %v243_v41, %v243_v41  ;;  %v32946_v41 = vld [vmem:[%s34917_s23 + $0x1670] sm:$0xff]  }
 0x2d5   : > { %29836 = vmatpush3.bf16.msra.mxu0 %v32862_v45  ;;  %v32909_v45 = vld [vmem:[%s34917_s23 + $0x1578] sm:$0xff]  }
 0x2d6   : > { %29837 = vmatprep.subr.bf16.mxu0 %v32864_v47  ;;  %29858 = vmatpush3.bf16.msra.mxu1 %v32863_v46  ;;  %v5425_v46 = vcombine.high %v5417_v43, %v5417_v43  ;;  %v5433_v47 = vrot.slane %v5417_v43, %v34953_v35  ;;  %v32947_v43 = vld [vmem:[%s34917_s23 + $0x16f0] sm:$0xff]  }
 0x2d7   : > { %29859 = vmatprep.subr.bf16.mxu1 %v32865_v48  ;;  %v32910_v48 = vld [vmem:[%s34917_s23 + $0x15f8] sm:$0xff]  }
 0x2d9   : > { %29838 = vmatpush3.bf16.msra.mxu0 %v32866_v49  ;;  %v35754_v49 = vrot.slane %v5410_v44, %v34953_v35  ;;  %v32948_v44 = vld [vmem:[%s34917_s23 + $0x1630] sm:$0xff]  }
 0x2da   : > { %29839 = vmatprep.subr.bf16.mxu0 %v32868_v51  ;;  %29860 = vmatpush3.bf16.msra.mxu1 %v32867_v50  ;;  %v32911_v50 = vld [vmem:[%s34917_s23 + $0x1538] sm:$0xff]   ;;  %v5447_v51 = vrot.slane %v5425_v46, %v34953_v35 }
 0x2db   : > { %29861 = vmatprep.subr.bf16.mxu1 %v32869_v52  ;;  %v32912_v52 = vld [vmem:[%s34917_s23 + $0x15b8] sm:$0xff]  }
 0x2dd   : > { %29840 = vmatpush3.bf16.msra.mxu0 %v32870_v53  ;;  %v5426_v53 = vcombine.high %v35754_v49, %v35754_v49 }
 0x2de   : > { %29841 = vmatprep.subr.bf16.mxu0 %v32872_v55  ;;  %29862 = vmatpush3.bf16.msra.mxu1 %v32871_v54  ;;  %v5455_v54 = vcombine.high %v5433_v47, %v5433_v47  ;;  %v32913_v55 = vld [vmem:[%s34917_s23 + $0x1570] sm:$0xff]  }
 0x2df   : > { %29863 = vmatprep.subr.bf16.mxu1 %v32873_v56  ;;  %v5457_v56 = vcombine.high %v5447_v51, %v5447_v51 }
 0x2e1   : > { %29842 = vmatpush3.bf16.msra.mxu0 %v32874_v57 }
 0x2e2   : > { %29871 = vmatprep.subr.bf16.mxu0 %v32877_v60  ;;  %29864 = vmatpush3.bf16.msra.mxu1 %v32875_v58  ;;  %v32914_v58 = vld [vmem:[%s34917_s23 + $0x15f0] sm:$0xff]  }
 0x2e3   : > { %29893 = vmatprep.subr.bf16.mxu1 %v32878_v61  ;;  %v32915_v60 = vld [vmem:[%s34917_s23 + $0x1530] sm:$0xff]  }
 0x2e4   : > { %v29579_v2 = vpop.f32.mrf.mxu0  ;;  %22349 = vmatmul.mubr.bf16.vlgmr.msra.gmra.mxu0 %v5391_v59  ;;  %v5454_v59 = vrot.slane %v5426_v53, %v34953_v35 }
 0x2e5   : > { %v29601_v5 = vpop.f32.mrf.mxu1  ;;  %29872 = vmatpush3.bf16.msra.mxu0 %v32879_v62  ;;  %22389 = vmatmul.mubr.bf16.vlgmr.msra.gmra.mxu1 %v5407_v0 }
 0x2e6   : > { %v29580_v6 = vpop.f32.mrf.mxu0  ;;  %29873 = vmatprep.subr.bf16.mxu0 %v32881_v1  ;;  %29894 = vmatpush3.bf16.msra.mxu1 %v32880_v63  ;;  %v32916_v63 = vld [vmem:[%s34917_s23 + $0x15b0] sm:$0xff]   ;;  %v5458_v0 = vcombine.high %v5454_v59, %v5454_v59 }
 0x2e7   : > { %v29581_v8 = vadd.f32 %v29580_v6, %v29579_v2  ;;  %v29602_v10 = vpop.f32.mrf.mxu1  ;;  %29895 = vmatprep.subr.bf16.mxu1 %v32882_v3  ;;  %22428 = vmatprep.mubr.bf16.mxu0 %v5447_v51  ;;  %v32917_v2 = vld [vmem:[%s34917_s23 + $0x1568] sm:$0xff]  }
 0x2e8   : > { %v29582_v11 = vpop.f32.mrf.mxu0  ;;  %v29603_v14 = vadd.f32 %v29602_v10, %v29601_v5  ;;  %22468 = vmatprep.mubr.bf16.mxu1 %v5457_v56  ;;  %v32918_v5 = vld [vmem:[%s34917_s23 + $0x15e8] sm:$0xff]  }
 0x2e9   : > { %v21871_v13 = vadd.f32 %v29581_v8, %v35690_v37  ;;  %v29604_v16 = vpop.f32.mrf.mxu1  ;;  %29874 = vmatpush3.bf16.msra.mxu0 %v32883_v4  ;;  %v32904_v37 = vld [vmem:[%s34917_s23 + $0x1488] sm:$0xff]  }
 0x2ea   : > { %v29583_v17 = vpop.f32.mrf.mxu0  ;;  %29875 = vmatprep.subr.bf16.mxu0 %v32885_v9  ;;  %29896 = vmatpush3.bf16.msra.mxu1 %v32884_v7  ;;  %v32919_v8 = vld [vmem:[%s34917_s23 + $0x1528] sm:$0xff]   ;;  %v32923_v16 = vld [vmem:[%s34917_s23 + $0x1520] sm:$0xff]  }
 0x2eb   : > { %v35727_v19 = vadd.f32 %v29603_v14, %v21871_v13  ;;  %v29605_v21 = vpop.f32.mrf.mxu1  ;;  %29897 = vmatprep.subr.bf16.mxu1 %v32886_v12  ;;  %v32920_v11 = vld [vmem:[%s34917_s23 + $0x15a8] sm:$0xff]   ;;  %v32921_v13 = vld [vmem:[%s34917_s23 + $0x1560] sm:$0xff]  }
 0x2ec   : > { %v32924_v17 = vld [vmem:[%s34917_s23 + $0x15a0] sm:$0xff]   ;;  %v32928_v21 = vld [vmem:[%s34917_s23 + $0x1598] sm:$0xff]  }
 0x2ed   : > { %29876 = vmatpush3.bf16.msra.mxu0 %v32887_v15  ;;  %v32922_v15 = vld [vmem:[%s34917_s23 + $0x15e0] sm:$0xff]  }
 0x2ee   : > { %29877 = vmatprep.subr.bf16.mxu0 %v32889_v20  ;;  %29898 = vmatpush3.bf16.msra.mxu1 %v32888_v18  ;;  %v32925_v18 = vld [vmem:[%s34917_s23 + $0x1558] sm:$0xff]  }
 0x2ef   : > { %29899 = vmatprep.subr.bf16.mxu1 %v32890_v22  ;;  %v32927_v20 = vld [vmem:[%s34917_s23 + $0x1518] sm:$0xff]   ;;  %v32929_v22 = vld [vmem:[%s34917_s23 + $0x1550] sm:$0xff]  }
 0x2f1   : > { %29878 = vmatpush3.bf16.msra.mxu0 %v32891_v23  ;;  %v32930_v23 = vld [vmem:[%s34917_s23 + $0x15d0] sm:$0xff]  }
 0x2f2   : > { %29879 = vmatprep.subr.bf16.mxu0 %v32893_v25  ;;  %29900 = vmatpush3.bf16.msra.mxu1 %v32892_v24  ;;  %v32931_v24 = vld [vmem:[%s34917_s23 + $0x1510] sm:$0xff]  }
 0x2f3   : > { %29901 = vmatprep.subr.bf16.mxu1 %v32894_v26  ;;  %v32932_v25 = vld [vmem:[%s34917_s23 + $0x1590] sm:$0xff]   ;;  %v32933_v26 = vld [vmem:[%s34917_s23 + $0x1548] sm:$0xff]  }
 0x2f5   : > { %29880 = vmatpush3.bf16.msra.mxu0 %v32895_v27  ;;  %v32934_v27 = vld [vmem:[%s34917_s23 + $0x15c8] sm:$0xff]  }
 0x2f6   : > { %29881 = vmatprep.subr.bf16.mxu0 %v32897_v29  ;;  %29902 = vmatpush3.bf16.msra.mxu1 %v32896_v28  ;;  %v32935_v28 = vld [vmem:[%s34917_s23 + $0x1508] sm:$0xff]  }
 0x2f7   : > { %29903 = vmatprep.subr.bf16.mxu1 %v32898_v30  ;;  %v32936_v29 = vld [vmem:[%s34917_s23 + $0x1588] sm:$0xff]   ;;  %v32937_v30 = vld [vmem:[%s34917_s23 + $0x1540] sm:$0xff]  }
 0x2f9   : > { %29882 = vmatpush3.bf16.msra.mxu0 %v32899_v31  ;;  %v32938_v31 = vld [vmem:[%s34917_s23 + $0x15c0] sm:$0xff]  }
 0x2fa   : > { %29883 = vmatprep.subr.bf16.mxu0 %v32901_v33  ;;  %29904 = vmatpush3.bf16.msra.mxu1 %v32900_v32  ;;  %v32939_v32 = vld [vmem:[%s34917_s23 + $0x1500] sm:$0xff]  }
 0x2fb   : > { %29905 = vmatprep.subr.bf16.mxu1 %v32902_v34  ;;  %v32940_v33 = vld [vmem:[%s34917_s23 + $0x1580] sm:$0xff]   ;;  %v5440_v34 = vrot.slane %v35754_v49, %v34953_v35  ;;  %v32950_v49 = vld [vmem:[%s34917_s23 + $0x1668] sm:$0xff]  }
 0x2fd   : > { %29884 = vmatpush3.bf16.msra.mxu0 %v32903_v36  ;;  %v32942_v36 = vld [vmem:[%s34917_s23 + $0x1678] sm:$0xff]  }
 0x2fe   : > { %29885 = vmatprep.subr.bf16.mxu0 %v32905_v38  ;;  %29906 = vmatpush3.bf16.msra.mxu1 %v32904_v37  ;;  %v32943_v37 = vld [vmem:[%s34917_s23 + $0x16f8] sm:$0xff]  }
 0x2ff   : > { %29907 = vmatprep.subr.bf16.mxu1 %v32906_v39  ;;  %v32944_v38 = vld [vmem:[%s34917_s23 + $0x1638] sm:$0xff]  }
 0x300   : > { %v32945_v39 = vld [vmem:[%s34917_s23 + $0x16b8] sm:$0xff]  }
 0x301   : > { %29886 = vmatpush3.bf16.msra.mxu0 %v32907_v40  ;;  %v5456_v40 = vcombine.high %v5440_v34, %v5440_v34 }
 0x302   : > { %29915 = vmatprep.subr.bf16.mxu0 %v32909_v45  ;;  %29908 = vmatpush3.bf16.msra.mxu1 %v32908_v42 }
 0x303   : > { %29937 = vmatprep.subr.bf16.mxu1 %v32910_v48 }
 0x304   : > { %v29623_v57 = vpop.f32.mrf.mxu0  ;;  %22429 = vmatmul.mubr.bf16.vlgmr.msra.gmra.mxu0 %v5433_v47  ;;  %v32949_v47 = vld [vmem:[%s34917_s23 + $0x16b0] sm:$0xff]  }
 0x305   : > { %v29645_v61 = vpop.f32.mrf.mxu1  ;;  %29916 = vmatpush3.bf16.msra.mxu0 %v32911_v50  ;;  %22469 = vmatmul.mubr.bf16.vlgmr.msra.gmra.mxu1 %v5455_v54 }
 0x306   : > { %v29624_v62 = vpop.f32.mrf.mxu0  ;;  %29917 = vmatprep.subr.bf16.mxu0 %v32913_v55  ;;  %29938 = vmatpush3.bf16.msra.mxu1 %v32912_v52  ;;  %v32951_v52 = vld [vmem:[%s34917_s23 + $0x16e8] sm:$0xff]  }
 0x307   : > { %v29625_v1 = vadd.f32 %v29624_v62, %v29623_v57  ;;  %v29646_v3 = vpop.f32.mrf.mxu1  ;;  %22508 = vmatprep.mubr.bf16.mxu0 %v5454_v59  ;;  %29939 = vmatprep.subr.bf16.mxu1 %v32914_v58  ;;  %v32952_v55 = vld [vmem:[%s34917_s23 + $0x1628] sm:$0xff]   ;;  %v32955_v62 = vld [vmem:[%s34917_s23 + $0x16e0] sm:$0xff]  }
 0x308   : > { %v29626_v4 = vpop.f32.mrf.mxu0  ;;  %v29647_v7 = vadd.f32 %v29646_v3, %v29645_v61  ;;  %22548 = vmatprep.mubr.bf16.mxu1 %v5458_v0  ;;  %v32953_v58 = vld [vmem:[%s34917_s23 + $0x16a8] sm:$0xff]   ;;  %v32957_v0 = vld [vmem:[%s34917_s23 + $0x16a0] sm:$0xff]   ;;  %v32960_v3 = vld [vmem:[%s34917_s23 + $0x1618] sm:$0xff]  }
 0x309   : > { %v21951_v6 = vadd.f32 %v29625_v1, %v35727_v19  ;;  %v29648_v9 = vpop.f32.mrf.mxu1  ;;  %29918 = vmatpush3.bf16.msra.mxu0 %v32915_v60  ;;  %v32926_v19 = vld [vmem:[%s34917_s23 + $0x15d8] sm:$0xff]   ;;  %v32954_v60 = vld [vmem:[%s34917_s23 + $0x1660] sm:$0xff]  }
 0x30a   : > { %v29627_v10 = vpop.f32.mrf.mxu0  ;;  %29919 = vmatprep.subr.bf16.mxu0 %v32917_v2  ;;  %29940 = vmatpush3.bf16.msra.mxu1 %v32916_v63  ;;  %v32956_v63 = vld [vmem:[%s34917_s23 + $0x1620] sm:$0xff]   ;;  %v32958_v1 = vld [vmem:[%s34917_s23 + $0x1658] sm:$0xff]   ;;  %v32966_v9 = vld [vmem:[%s34917_s23 + $0x1648] sm:$0xff]  }
 0x30b   : > { %v35771_v12 = vadd.f32 %v29647_v7, %v21951_v6  ;;  %v29649_v14 = vpop.f32.mrf.mxu1  ;;  %29941 = vmatprep.subr.bf16.mxu1 %v32918_v5  ;;  %v32959_v2 = vld [vmem:[%s34917_s23 + $0x16d8] sm:$0xff]   ;;  %v32962_v5 = vld [vmem:[%s34917_s23 + $0x1650] sm:$0xff]   ;;  %v32967_v10 = vld [vmem:[%s34917_s23 + $0x16c8] sm:$0xff]  }
 0x30c   : > { %v32961_v4 = vld [vmem:[%s34917_s23 + $0x1698] sm:$0xff]   ;;  %v32963_v6 = vld [vmem:[%s34917_s23 + $0x16d0] sm:$0xff]   ;;  %v32971_v14 = vld [vmem:[%s34917_s23 + $0x16c0] sm:$0xff]  }
 0x30d   : > { %29920 = vmatpush3.bf16.msra.mxu0 %v32919_v8  ;;  %v32964_v7 = vld [vmem:[%s34917_s23 + $0x1610] sm:$0xff]  }
 0x30e   : > { %29921 = vmatprep.subr.bf16.mxu0 %v32921_v13  ;;  %29942 = vmatpush3.bf16.msra.mxu1 %v32920_v11  ;;  %v32965_v8 = vld [vmem:[%s34917_s23 + $0x1690] sm:$0xff]   ;;  %v32968_v11 = vld [vmem:[%s34917_s23 + $0x1608] sm:$0xff]   ;;  %v32970_v13 = vld [vmem:[%s34917_s23 + $0x1640] sm:$0xff]  }
 0x30f   : > { %29943 = vmatprep.subr.bf16.mxu1 %v32922_v15  ;;  %v32972_v15 = vld [vmem:[%s34917_s23 + $0x1600] sm:$0xff]  }
 0x311   : > { %29922 = vmatpush3.bf16.msra.mxu0 %v32923_v16  ;;  %v244_v16 = vld [vmem:[#allocation2 + $0x58] sm:$0xff] }
 0x312   : > { %29923 = vmatprep.subr.bf16.mxu0 %v32925_v18  ;;  %29944 = vmatpush3.bf16.msra.mxu1 %v32924_v17  ;;  %v5466_v17 = vrot.slane %v244_v16, %v34953_v35  ;;  %v32974_v18 = vld [vmem:[%s34917_s23 + $0x1778] sm:$0xff]  }
 0x313   : > { %29945 = vmatprep.subr.bf16.mxu1 %v32926_v19  ;;  %v5459_v19 = vcombine.high %v244_v16, %v244_v16  ;;  %v33011_v16 = vld [vmem:[%s34917_s23 + $0x1870] sm:$0xff]  }
 0x315   : > { %29924 = vmatpush3.bf16.msra.mxu0 %v32927_v20  ;;  %v32973_v20 = vld [vmem:[%s34917_s23 + $0x1680] sm:$0xff]  }
 0x316   : > { %29925 = vmatprep.subr.bf16.mxu0 %v32929_v22  ;;  %29946 = vmatpush3.bf16.msra.mxu1 %v32928_v21  ;;  %v5474_v21 = vcombine.high %v5466_v17, %v5466_v17  ;;  %v5482_v22 = vrot.slane %v5466_v17, %v34953_v35 }
 0x317   : > { %29947 = vmatprep.subr.bf16.mxu1 %v32930_v23  ;;  %v32975_v23 = vld [vmem:[%s34917_s23 + $0x17f8] sm:$0xff]  }
 0x319   : > { %29926 = vmatpush3.bf16.msra.mxu0 %v32931_v24  ;;  %v35835_v24 = vrot.slane %v5459_v19, %v34953_v35  ;;  %v33013_v19 = vld [vmem:[%s34917_s23 + $0x1830] sm:$0xff]  }
 0x31a   : > { %29927 = vmatprep.subr.bf16.mxu0 %v32933_v26  ;;  %29948 = vmatpush3.bf16.msra.mxu1 %v32932_v25  ;;  %v32976_v25 = vld [vmem:[%s34917_s23 + $0x1738] sm:$0xff]   ;;  %v5496_v26 = vrot.slane %v5474_v21, %v34953_v35 }
 0x31b   : > { %29949 = vmatprep.subr.bf16.mxu1 %v32934_v27  ;;  %v32977_v27 = vld [vmem:[%s34917_s23 + $0x17b8] sm:$0xff]  }
 0x31d   : > { %29928 = vmatpush3.bf16.msra.mxu0 %v32935_v28  ;;  %v5475_v28 = vcombine.high %v35835_v24, %v35835_v24 }
 0x31e   : > { %29929 = vmatprep.subr.bf16.mxu0 %v32937_v30  ;;  %29950 = vmatpush3.bf16.msra.mxu1 %v32936_v29  ;;  %v5504_v29 = vcombine.high %v5482_v22, %v5482_v22  ;;  %v32978_v30 = vld [vmem:[%s34917_s23 + $0x1770] sm:$0xff]  }
 0x31f   : > { %29951 = vmatprep.subr.bf16.mxu1 %v32938_v31  ;;  %v5506_v31 = vcombine.high %v5496_v26, %v5496_v26 }
 0x321   : > { %29930 = vmatpush3.bf16.msra.mxu0 %v32939_v32 }
 0x322   : > { %29959 = vmatprep.subr.bf16.mxu0 %v32942_v36  ;;  %29952 = vmatpush3.bf16.msra.mxu1 %v32940_v33  ;;  %v32979_v33 = vld [vmem:[%s34917_s23 + $0x17f0] sm:$0xff]  }
 0x323   : > { %29981 = vmatprep.subr.bf16.mxu1 %v32943_v37  ;;  %v32980_v36 = vld [vmem:[%s34917_s23 + $0x1730] sm:$0xff]  }
 0x324   : > { %v29667_v42 = vpop.f32.mrf.mxu0  ;;  %22509 = vmatmul.mubr.bf16.vlgmr.msra.gmra.mxu0 %v5440_v34  ;;  %v5503_v34 = vrot.slane %v5475_v28, %v34953_v35 }
 0x325   : > { %v29689_v45 = vpop.f32.mrf.mxu1  ;;  %29960 = vmatpush3.bf16.msra.mxu0 %v32944_v38  ;;  %22549 = vmatmul.mubr.bf16.vlgmr.msra.gmra.mxu1 %v5456_v40 }
 0x326   : > { %v29668_v46 = vpop.f32.mrf.mxu0  ;;  %29961 = vmatprep.subr.bf16.mxu0 %v32946_v41  ;;  %29982 = vmatpush3.bf16.msra.mxu1 %v32945_v39  ;;  %v32981_v39 = vld [vmem:[%s34917_s23 + $0x17b0] sm:$0xff]   ;;  %v5507_v40 = vcombine.high %v5503_v34, %v5503_v34 }
 0x327   : > { %v29669_v48 = vadd.f32 %v29668_v46, %v29667_v42  ;;  %v29690_v50 = vpop.f32.mrf.mxu1  ;;  %29983 = vmatprep.subr.bf16.mxu1 %v32947_v43  ;;  %22588 = vmatprep.mubr.bf16.mxu0 %v5496_v26  ;;  %v32982_v42 = vld [vmem:[%s34917_s23 + $0x1768] sm:$0xff]  }
 0x328   : > { %v29670_v51 = vpop.f32.mrf.mxu0  ;;  %v29691_v54 = vadd.f32 %v29690_v50, %v29689_v45  ;;  %22628 = vmatprep.mubr.bf16.mxu1 %v5506_v31  ;;  %v32983_v45 = vld [vmem:[%s34917_s23 + $0x17e8] sm:$0xff]  }
 0x329   : > { %v22031_v53 = vadd.f32 %v29669_v48, %v35771_v12  ;;  %v29692_v56 = vpop.f32.mrf.mxu1  ;;  %29962 = vmatpush3.bf16.msra.mxu0 %v32948_v44  ;;  %v32969_v12 = vld [vmem:[%s34917_s23 + $0x1688] sm:$0xff]  }
 0x32a   : > { %v29671_v57 = vpop.f32.mrf.mxu0  ;;  %29963 = vmatprep.subr.bf16.mxu0 %v32950_v49  ;;  %29984 = vmatpush3.bf16.msra.mxu1 %v32949_v47  ;;  %v32984_v48 = vld [vmem:[%s34917_s23 + $0x1728] sm:$0xff]   ;;  %v32988_v56 = vld [vmem:[%s34917_s23 + $0x1720] sm:$0xff]  }
 0x32b   : > { %v35808_v59 = vadd.f32 %v29691_v54, %v22031_v53  ;;  %v29693_v61 = vpop.f32.mrf.mxu1  ;;  %29985 = vmatprep.subr.bf16.mxu1 %v32951_v52  ;;  %v32985_v51 = vld [vmem:[%s34917_s23 + $0x17a8] sm:$0xff]   ;;  %v32986_v53 = vld [vmem:[%s34917_s23 + $0x1760] sm:$0xff]  }
 0x32c   : > { %v32989_v57 = vld [vmem:[%s34917_s23 + $0x17a0] sm:$0xff]   ;;  %v32993_v61 = vld [vmem:[%s34917_s23 + $0x1798] sm:$0xff]  }
 0x32d   : > { %29964 = vmatpush3.bf16.msra.mxu0 %v32952_v55  ;;  %v32987_v55 = vld [vmem:[%s34917_s23 + $0x17e0] sm:$0xff]  }
 0x32e   : > { %29965 = vmatprep.subr.bf16.mxu0 %v32954_v60  ;;  %29986 = vmatpush3.bf16.msra.mxu1 %v32953_v58  ;;  %v32990_v58 = vld [vmem:[%s34917_s23 + $0x1758] sm:$0xff]  }
 0x32f   : > { %29987 = vmatprep.subr.bf16.mxu1 %v32955_v62  ;;  %v32992_v60 = vld [vmem:[%s34917_s23 + $0x1718] sm:$0xff]   ;;  %v32994_v62 = vld [vmem:[%s34917_s23 + $0x1750] sm:$0xff]  }
 0x331   : > { %29966 = vmatpush3.bf16.msra.mxu0 %v32956_v63  ;;  %v32995_v63 = vld [vmem:[%s34917_s23 + $0x17d0] sm:$0xff]  }
 0x332   : > { %29967 = vmatprep.subr.bf16.mxu0 %v32958_v1  ;;  %29988 = vmatpush3.bf16.msra.mxu1 %v32957_v0  ;;  %v32996_v0 = vld [vmem:[%s34917_s23 + $0x1710] sm:$0xff]  }
 0x333   : > { %29989 = vmatprep.subr.bf16.mxu1 %v32959_v2  ;;  %v32997_v1 = vld [vmem:[%s34917_s23 + $0x1790] sm:$0xff]   ;;  %v32998_v2 = vld [vmem:[%s34917_s23 + $0x1748] sm:$0xff]  }
 0x335   : > { %29968 = vmatpush3.bf16.msra.mxu0 %v32960_v3  ;;  %v32999_v3 = vld [vmem:[%s34917_s23 + $0x17c8] sm:$0xff]  }
 0x336   : > { %29969 = vmatprep.subr.bf16.mxu0 %v32962_v5  ;;  %29990 = vmatpush3.bf16.msra.mxu1 %v32961_v4  ;;  %v33000_v4 = vld [vmem:[%s34917_s23 + $0x1708] sm:$0xff]  }
 0x337   : > { %29991 = vmatprep.subr.bf16.mxu1 %v32963_v6  ;;  %v33001_v5 = vld [vmem:[%s34917_s23 + $0x1788] sm:$0xff]   ;;  %v33002_v6 = vld [vmem:[%s34917_s23 + $0x1740] sm:$0xff]  }
 0x339   : > { %29970 = vmatpush3.bf16.msra.mxu0 %v32964_v7  ;;  %v33003_v7 = vld [vmem:[%s34917_s23 + $0x17c0] sm:$0xff]  }
 0x33a   : > { %29971 = vmatprep.subr.bf16.mxu0 %v32966_v9  ;;  %29992 = vmatpush3.bf16.msra.mxu1 %v32965_v8  ;;  %v33004_v8 = vld [vmem:[%s34917_s23 + $0x1700] sm:$0xff]  }
 0x33b   : > { %29993 = vmatprep.subr.bf16.mxu1 %v32967_v10  ;;  %v33005_v9 = vld [vmem:[%s34917_s23 + $0x1780] sm:$0xff]   ;;  %v5489_v10 = vrot.slane %v35835_v24, %v34953_v35  ;;  %v33015_v24 = vld [vmem:[%s34917_s23 + $0x1868] sm:$0xff]  }
 0x33d   : > { %29972 = vmatpush3.bf16.msra.mxu0 %v32968_v11  ;;  %v33007_v11 = vld [vmem:[%s34917_s23 + $0x1878] sm:$0xff]  }
 0x33e   : > { %29973 = vmatprep.subr.bf16.mxu0 %v32970_v13  ;;  %29994 = vmatpush3.bf16.msra.mxu1 %v32969_v12  ;;  %v33008_v12 = vld [vmem:[%s34917_s23 + $0x18f8] sm:$0xff]  }
 0x33f   : > { %29995 = vmatprep.subr.bf16.mxu1 %v32971_v14  ;;  %v33009_v13 = vld [vmem:[%s34917_s23 + $0x1838] sm:$0xff]  }
 0x340   : > { %v33010_v14 = vld [vmem:[%s34917_s23 + $0x18b8] sm:$0xff]  }
 0x341   : > { %29974 = vmatpush3.bf16.msra.mxu0 %v32972_v15  ;;  %v5505_v15 = vcombine.high %v5489_v10, %v5489_v10 }
 0x342   : > { %30003 = vmatprep.subr.bf16.mxu0 %v32974_v18  ;;  %29996 = vmatpush3.bf16.msra.mxu1 %v32973_v20  ;;  %v33012_v18 = vld [vmem:[%s34917_s23 + $0x18f0] sm:$0xff]  }
 0x343   : > { %30025 = vmatprep.subr.bf16.mxu1 %v32975_v23 }
 0x344   : > { %v29711_v32 = vpop.f32.mrf.mxu0  ;;  %22589 = vmatmul.mubr.bf16.vlgmr.msra.gmra.mxu0 %v5482_v22  ;;  %v33014_v22 = vld [vmem:[%s34917_s23 + $0x18b0] sm:$0xff]  }
 0x345   : > { %v29733_v37 = vpop.f32.mrf.mxu1  ;;  %30004 = vmatpush3.bf16.msra.mxu0 %v32976_v25  ;;  %22629 = vmatmul.mubr.bf16.vlgmr.msra.gmra.mxu1 %v5504_v29 }
 0x346   : > { %v29712_v38 = vpop.f32.mrf.mxu0  ;;  %30005 = vmatprep.subr.bf16.mxu0 %v32978_v30  ;;  %30026 = vmatpush3.bf16.msra.mxu1 %v32977_v27  ;;  %v33016_v27 = vld [vmem:[%s34917_s23 + $0x18e8] sm:$0xff]  }
 0x347   : > { %v29713_v41 = vadd.f32 %v29712_v38, %v29711_v32  ;;  %v29734_v43 = vpop.f32.mrf.mxu1  ;;  %22668 = vmatprep.mubr.bf16.mxu0 %v5503_v34  ;;  %30027 = vmatprep.subr.bf16.mxu1 %v32979_v33  ;;  %v33017_v30 = vld [vmem:[%s34917_s23 + $0x1828] sm:$0xff]   ;;  %v33020_v38 = vld [vmem:[%s34917_s23 + $0x18e0] sm:$0xff]  }
 0x348   : > { %v29714_v44 = vpop.f32.mrf.mxu0  ;;  %v29735_v47 = vadd.f32 %v29734_v43, %v29733_v37  ;;  %22708 = vmatprep.mubr.bf16.mxu1 %v5507_v40  ;;  %v33018_v33 = vld [vmem:[%s34917_s23 + $0x18a8] sm:$0xff]   ;;  %v33022_v40 = vld [vmem:[%s34917_s23 + $0x18a0] sm:$0xff]   ;;  %v33025_v43 = vld [vmem:[%s34917_s23 + $0x1818] sm:$0xff]  }
 0x349   : > { %v22111_v46 = vadd.f32 %v29713_v41, %v35808_v59  ;;  %v29736_v49 = vpop.f32.mrf.mxu1  ;;  %30006 = vmatpush3.bf16.msra.mxu0 %v32980_v36  ;;  %v32991_v59 = vld [vmem:[%s34917_s23 + $0x17d8] sm:$0xff]   ;;  %v33019_v36 = vld [vmem:[%s34917_s23 + $0x1860] sm:$0xff]  }
 0x34a   : > { %v29715_v50 = vpop.f32.mrf.mxu0  ;;  %30007 = vmatprep.subr.bf16.mxu0 %v32982_v42  ;;  %30028 = vmatpush3.bf16.msra.mxu1 %v32981_v39  ;;  %v33021_v39 = vld [vmem:[%s34917_s23 + $0x1820] sm:$0xff]   ;;  %v33023_v41 = vld [vmem:[%s34917_s23 + $0x1858] sm:$0xff]   ;;  %v33031_v49 = vld [vmem:[%s34917_s23 + $0x1848] sm:$0xff]  }
 0x34b   : > { %v35852_v52 = vadd.f32 %v29735_v47, %v22111_v46  ;;  %v29737_v54 = vpop.f32.mrf.mxu1  ;;  %30029 = vmatprep.subr.bf16.mxu1 %v32983_v45  ;;  %v33024_v42 = vld [vmem:[%s34917_s23 + $0x18d8] sm:$0xff]   ;;  %v33027_v45 = vld [vmem:[%s34917_s23 + $0x1850] sm:$0xff]   ;;  %v33032_v50 = vld [vmem:[%s34917_s23 + $0x18c8] sm:$0xff]  }
 0x34c   : > { %v33026_v44 = vld [vmem:[%s34917_s23 + $0x1898] sm:$0xff]   ;;  %v33028_v46 = vld [vmem:[%s34917_s23 + $0x18d0] sm:$0xff]   ;;  %v33036_v54 = vld [vmem:[%s34917_s23 + $0x18c0] sm:$0xff]  }
 0x34d   : > { %30008 = vmatpush3.bf16.msra.mxu0 %v32984_v48  ;;  %v33029_v47 = vld [vmem:[%s34917_s23 + $0x1810] sm:$0xff]  }
 0x34e   : > { %30009 = vmatprep.subr.bf16.mxu0 %v32986_v53  ;;  %30030 = vmatpush3.bf16.msra.mxu1 %v32985_v51  ;;  %v33030_v48 = vld [vmem:[%s34917_s23 + $0x1890] sm:$0xff]   ;;  %v33033_v51 = vld [vmem:[%s34917_s23 + $0x1808] sm:$0xff]   ;;  %v33035_v53 = vld [vmem:[%s34917_s23 + $0x1840] sm:$0xff]  }
 0x34f   : > { %30031 = vmatprep.subr.bf16.mxu1 %v32987_v55  ;;  %v33037_v55 = vld [vmem:[%s34917_s23 + $0x1800] sm:$0xff]  }
 0x351   : > { %30010 = vmatpush3.bf16.msra.mxu0 %v32988_v56  ;;  %v245_v56 = vld [vmem:[#allocation2 + $0x60] sm:$0xff] }
 0x352   : > { %30011 = vmatprep.subr.bf16.mxu0 %v32990_v58  ;;  %30032 = vmatpush3.bf16.msra.mxu1 %v32989_v57  ;;  %v33038_v57 = vld [vmem:[%s34917_s23 + $0x1880] sm:$0xff]   ;;  %v5515_v58 = vrot.slane %v245_v56, %v34953_v35 }
 0x353   : > { %30033 = vmatprep.subr.bf16.mxu1 %v32991_v59  ;;  %v5508_v59 = vcombine.high %v245_v56, %v245_v56  ;;  %v33076_v56 = vld [vmem:[%s34917_s23 + $0x1a70] sm:$0xff]  }
 0x355   : > { %30012 = vmatpush3.bf16.msra.mxu0 %v32992_v60  ;;  %v33039_v60 = vld [vmem:[%s34917_s23 + $0x1978] sm:$0xff]  }
 0x356   : > { %30013 = vmatprep.subr.bf16.mxu0 %v32994_v62  ;;  %30034 = vmatpush3.bf16.msra.mxu1 %v32993_v61  ;;  %v5523_v61 = vcombine.high %v5515_v58, %v5515_v58  ;;  %v5531_v62 = vrot.slane %v5515_v58, %v34953_v35  ;;  %v33077_v58 = vld [vmem:[%s34917_s23 + $0x1af0] sm:$0xff]  }
 0x357   : > { %30035 = vmatprep.subr.bf16.mxu1 %v32995_v63  ;;  %v33040_v63 = vld [vmem:[%s34917_s23 + $0x19f8] sm:$0xff]  }
 0x359   : > { %30014 = vmatpush3.bf16.msra.mxu0 %v32996_v0  ;;  %v35916_v0 = vrot.slane %v5508_v59, %v34953_v35  ;;  %v33078_v59 = vld [vmem:[%s34917_s23 + $0x1a30] sm:$0xff]  }
 0x35a   : > { %30015 = vmatprep.subr.bf16.mxu0 %v32998_v2  ;;  %30036 = vmatpush3.bf16.msra.mxu1 %v32997_v1  ;;  %v33041_v1 = vld [vmem:[%s34917_s23 + $0x1938] sm:$0xff]   ;;  %v5545_v2 = vrot.slane %v5523_v61, %v34953_v35 }
 0x35b   : > { %30037 = vmatprep.subr.bf16.mxu1 %v32999_v3  ;;  %v33042_v3 = vld [vmem:[%s34917_s23 + $0x19b8] sm:$0xff]  }
 0x35d   : > { %30016 = vmatpush3.bf16.msra.mxu0 %v33000_v4  ;;  %v5524_v4 = vcombine.high %v35916_v0, %v35916_v0 }
 0x35e   : > { %30017 = vmatprep.subr.bf16.mxu0 %v33002_v6  ;;  %30038 = vmatpush3.bf16.msra.mxu1 %v33001_v5  ;;  %v5553_v5 = vcombine.high %v5531_v62, %v5531_v62  ;;  %v33043_v6 = vld [vmem:[%s34917_s23 + $0x1970] sm:$0xff]  }
 0x35f   : > { %30039 = vmatprep.subr.bf16.mxu1 %v33003_v7  ;;  %v5555_v7 = vcombine.high %v5545_v2, %v5545_v2 }
 0x361   : > { %30018 = vmatpush3.bf16.msra.mxu0 %v33004_v8 }
 0x362   : > { %30047 = vmatprep.subr.bf16.mxu0 %v33007_v11  ;;  %30040 = vmatpush3.bf16.msra.mxu1 %v33005_v9  ;;  %v33044_v9 = vld [vmem:[%s34917_s23 + $0x19f0] sm:$0xff]  }
 0x363   : > { %30069 = vmatprep.subr.bf16.mxu1 %v33008_v12  ;;  %v33045_v11 = vld [vmem:[%s34917_s23 + $0x1930] sm:$0xff]  }
 0x364   : > { %v29755_v17 = vpop.f32.mrf.mxu0  ;;  %22669 = vmatmul.mubr.bf16.vlgmr.msra.gmra.mxu0 %v5489_v10  ;;  %v5552_v10 = vrot.slane %v5524_v4, %v34953_v35 }
 0x365   : > { %v29777_v20 = vpop.f32.mrf.mxu1  ;;  %30048 = vmatpush3.bf16.msra.mxu0 %v33009_v13  ;;  %22709 = vmatmul.mubr.bf16.vlgmr.msra.gmra.mxu1 %v5505_v15 }
 0x366   : > { %v29756_v21 = vpop.f32.mrf.mxu0  ;;  %30049 = vmatprep.subr.bf16.mxu0 %v33011_v16  ;;  %30070 = vmatpush3.bf16.msra.mxu1 %v33010_v14  ;;  %v33046_v14 = vld [vmem:[%s34917_s23 + $0x19b0] sm:$0xff]   ;;  %v5556_v15 = vcombine.high %v5552_v10, %v5552_v10 }
 0x367   : > { %v29757_v23 = vadd.f32 %v29756_v21, %v29755_v17  ;;  %v29778_v25 = vpop.f32.mrf.mxu1  ;;  %30071 = vmatprep.subr.bf16.mxu1 %v33012_v18  ;;  %22748 = vmatprep.mubr.bf16.mxu0 %v5545_v2  ;;  %v33047_v17 = vld [vmem:[%s34917_s23 + $0x1968] sm:$0xff]  }
 0x368   : > { %v29758_v26 = vpop.f32.mrf.mxu0  ;;  %v29779_v29 = vadd.f32 %v29778_v25, %v29777_v20  ;;  %22788 = vmatprep.mubr.bf16.mxu1 %v5555_v7  ;;  %v33048_v20 = vld [vmem:[%s34917_s23 + $0x19e8] sm:$0xff]  }
 0x369   : > { %v22191_v28 = vadd.f32 %v29757_v23, %v35852_v52  ;;  %v29780_v31 = vpop.f32.mrf.mxu1  ;;  %30050 = vmatpush3.bf16.msra.mxu0 %v33013_v19  ;;  %v33034_v52 = vld [vmem:[%s34917_s23 + $0x1888] sm:$0xff]  }
 0x36a   : > { %v29759_v32 = vpop.f32.mrf.mxu0  ;;  %30051 = vmatprep.subr.bf16.mxu0 %v33015_v24  ;;  %30072 = vmatpush3.bf16.msra.mxu1 %v33014_v22  ;;  %v33049_v23 = vld [vmem:[%s34917_s23 + $0x1928] sm:$0xff]   ;;  %v33053_v31 = vld [vmem:[%s34917_s23 + $0x1920] sm:$0xff]  }
 0x36b   : > { %v35889_v34 = vadd.f32 %v29779_v29, %v22191_v28  ;;  %v29781_v37 = vpop.f32.mrf.mxu1  ;;  %30073 = vmatprep.subr.bf16.mxu1 %v33016_v27  ;;  %v33050_v26 = vld [vmem:[%s34917_s23 + $0x19a8] sm:$0xff]   ;;  %v33051_v28 = vld [vmem:[%s34917_s23 + $0x1960] sm:$0xff]  }
 0x36c   : > { %v33054_v32 = vld [vmem:[%s34917_s23 + $0x19a0] sm:$0xff]   ;;  %v33058_v37 = vld [vmem:[%s34917_s23 + $0x1998] sm:$0xff]  }
 0x36d   : > { %30052 = vmatpush3.bf16.msra.mxu0 %v33017_v30  ;;  %v33052_v30 = vld [vmem:[%s34917_s23 + $0x19e0] sm:$0xff]  }
 0x36e   : > { %30053 = vmatprep.subr.bf16.mxu0 %v33019_v36  ;;  %30074 = vmatpush3.bf16.msra.mxu1 %v33018_v33  ;;  %v33055_v33 = vld [vmem:[%s34917_s23 + $0x1958] sm:$0xff]  }
 0x36f   : > { %30075 = vmatprep.subr.bf16.mxu1 %v33020_v38  ;;  %v33057_v36 = vld [vmem:[%s34917_s23 + $0x1918] sm:$0xff]   ;;  %v33059_v38 = vld [vmem:[%s34917_s23 + $0x1950] sm:$0xff]  }
 0x371   : > { %30054 = vmatpush3.bf16.msra.mxu0 %v33021_v39  ;;  %v33060_v39 = vld [vmem:[%s34917_s23 + $0x19d0] sm:$0xff]  }
 0x372   : > { %30055 = vmatprep.subr.bf16.mxu0 %v33023_v41  ;;  %30076 = vmatpush3.bf16.msra.mxu1 %v33022_v40  ;;  %v33061_v40 = vld [vmem:[%s34917_s23 + $0x1910] sm:$0xff]  }
 0x373   : > { %30077 = vmatprep.subr.bf16.mxu1 %v33024_v42  ;;  %v33062_v41 = vld [vmem:[%s34917_s23 + $0x1990] sm:$0xff]   ;;  %v33063_v42 = vld [vmem:[%s34917_s23 + $0x1948] sm:$0xff]  }
 0x375   : > { %30056 = vmatpush3.bf16.msra.mxu0 %v33025_v43  ;;  %v33064_v43 = vld [vmem:[%s34917_s23 + $0x19c8] sm:$0xff]  }
 0x376   : > { %30057 = vmatprep.subr.bf16.mxu0 %v33027_v45  ;;  %30078 = vmatpush3.bf16.msra.mxu1 %v33026_v44  ;;  %v33065_v44 = vld [vmem:[%s34917_s23 + $0x1908] sm:$0xff]  }
 0x377   : > { %30079 = vmatprep.subr.bf16.mxu1 %v33028_v46  ;;  %v33066_v45 = vld [vmem:[%s34917_s23 + $0x1988] sm:$0xff]   ;;  %v33067_v46 = vld [vmem:[%s34917_s23 + $0x1940] sm:$0xff]  }
 0x379   : > { %30058 = vmatpush3.bf16.msra.mxu0 %v33029_v47  ;;  %v33068_v47 = vld [vmem:[%s34917_s23 + $0x19c0] sm:$0xff]  }
 0x37a   : > { %30059 = vmatprep.subr.bf16.mxu0 %v33031_v49  ;;  %30080 = vmatpush3.bf16.msra.mxu1 %v33030_v48  ;;  %v33069_v48 = vld [vmem:[%s34917_s23 + $0x1900] sm:$0xff]  }
 0x37b   : > { %30081 = vmatprep.subr.bf16.mxu1 %v33032_v50  ;;  %v33070_v49 = vld [vmem:[%s34917_s23 + $0x1980] sm:$0xff]   ;;  %v5538_v50 = vrot.slane %v35916_v0, %v34953_v35  ;;  %v33080_v0 = vld [vmem:[%s34917_s23 + $0x1a68] sm:$0xff]  }
 0x37d   : > { %30060 = vmatpush3.bf16.msra.mxu0 %v33033_v51  ;;  %v33072_v51 = vld [vmem:[%s34917_s23 + $0x1a78] sm:$0xff]  }
 0x37e   : > { %30061 = vmatprep.subr.bf16.mxu0 %v33035_v53  ;;  %30082 = vmatpush3.bf16.msra.mxu1 %v33034_v52  ;;  %v33073_v52 = vld [vmem:[%s34917_s23 + $0x1af8] sm:$0xff]  }
 0x37f   : > { %30083 = vmatprep.subr.bf16.mxu1 %v33036_v54  ;;  %v33074_v53 = vld [vmem:[%s34917_s23 + $0x1a38] sm:$0xff]  }
 0x380   : > { %v33075_v54 = vld [vmem:[%s34917_s23 + $0x1ab8] sm:$0xff]  }
 0x381   : > { %30062 = vmatpush3.bf16.msra.mxu0 %v33037_v55  ;;  %v5554_v55 = vcombine.high %v5538_v50, %v5538_v50 }
 0x382   : > { %30091 = vmatprep.subr.bf16.mxu0 %v33039_v60  ;;  %30084 = vmatpush3.bf16.msra.mxu1 %v33038_v57 }
 0x383   : > { %30113 = vmatprep.subr.bf16.mxu1 %v33040_v63 }
 0x384   : > { %v29799_v8 = vpop.f32.mrf.mxu0  ;;  %22749 = vmatmul.mubr.bf16.vlgmr.msra.gmra.mxu0 %v5531_v62  ;;  %v33079_v62 = vld [vmem:[%s34917_s23 + $0x1ab0] sm:$0xff]  }
 0x385   : > { %v29821_v12 = vpop.f32.mrf.mxu1  ;;  %30092 = vmatpush3.bf16.msra.mxu0 %v33041_v1  ;;  %22789 = vmatmul.mubr.bf16.vlgmr.msra.gmra.mxu1 %v5553_v5 }
 0x386   : > { %v29800_v13 = vpop.f32.mrf.mxu0  ;;  %30093 = vmatprep.subr.bf16.mxu0 %v33043_v6  ;;  %30114 = vmatpush3.bf16.msra.mxu1 %v33042_v3  ;;  %v33081_v3 = vld [vmem:[%s34917_s23 + $0x1ae8] sm:$0xff]  }
 0x387   : > { %v29801_v16 = vadd.f32 %v29800_v13, %v29799_v8  ;;  %v29822_v18 = vpop.f32.mrf.mxu1  ;;  %22828 = vmatprep.mubr.bf16.mxu0 %v5552_v10  ;;  %30115 = vmatprep.subr.bf16.mxu1 %v33044_v9  ;;  %v33082_v6 = vld [vmem:[%s34917_s23 + $0x1a28] sm:$0xff]   ;;  %v33085_v13 = vld [vmem:[%s34917_s23 + $0x1ae0] sm:$0xff]  }
 0x388   : > { %v29802_v19 = vpop.f32.mrf.mxu0  ;;  %v29823_v22 = vadd.f32 %v29822_v18, %v29821_v12  ;;  %22868 = vmatprep.mubr.bf16.mxu1 %v5556_v15  ;;  %v33083_v9 = vld [vmem:[%s34917_s23 + $0x1aa8] sm:$0xff]   ;;  %v33087_v15 = vld [vmem:[%s34917_s23 + $0x1aa0] sm:$0xff]   ;;  %v33090_v18 = vld [vmem:[%s34917_s23 + $0x1a18] sm:$0xff]  }
 0x389   : > { %v22271_v21 = vadd.f32 %v29801_v16, %v35889_v34  ;;  %v29824_v24 = vpop.f32.mrf.mxu1  ;;  %30094 = vmatpush3.bf16.msra.mxu0 %v33045_v11  ;;  %v33056_v34 = vld [vmem:[%s34917_s23 + $0x19d8] sm:$0xff]   ;;  %v33084_v11 = vld [vmem:[%s34917_s23 + $0x1a60] sm:$0xff]  }
 0x38a   : > { %v29803_v25 = vpop.f32.mrf.mxu0  ;;  %30095 = vmatprep.subr.bf16.mxu0 %v33047_v17  ;;  %30116 = vmatpush3.bf16.msra.mxu1 %v33046_v14  ;;  %v33086_v14 = vld [vmem:[%s34917_s23 + $0x1a20] sm:$0xff]   ;;  %v33088_v16 = vld [vmem:[%s34917_s23 + $0x1a58] sm:$0xff]   ;;  %v33096_v24 = vld [vmem:[%s34917_s23 + $0x1a48] sm:$0xff]  }
 0x38b   : > { %v35933_v27 = vadd.f32 %v29823_v22, %v22271_v21  ;;  %v29825_v29 = vpop.f32.mrf.mxu1  ;;  %30117 = vmatprep.subr.bf16.mxu1 %v33048_v20  ;;  %v33089_v17 = vld [vmem:[%s34917_s23 + $0x1ad8] sm:$0xff]   ;;  %v33092_v20 = vld [vmem:[%s34917_s23 + $0x1a50] sm:$0xff]   ;;  %v33097_v25 = vld [vmem:[%s34917_s23 + $0x1ac8] sm:$0xff]  }
 0x38c   : > { %v33091_v19 = vld [vmem:[%s34917_s23 + $0x1a98] sm:$0xff]   ;;  %v33093_v21 = vld [vmem:[%s34917_s23 + $0x1ad0] sm:$0xff]   ;;  %v33101_v29 = vld [vmem:[%s34917_s23 + $0x1ac0] sm:$0xff]  }
 0x38d   : > { %30096 = vmatpush3.bf16.msra.mxu0 %v33049_v23  ;;  %v33094_v22 = vld [vmem:[%s34917_s23 + $0x1a10] sm:$0xff]  }
 0x38e   : > { %30097 = vmatprep.subr.bf16.mxu0 %v33051_v28  ;;  %30118 = vmatpush3.bf16.msra.mxu1 %v33050_v26  ;;  %v33095_v23 = vld [vmem:[%s34917_s23 + $0x1a90] sm:$0xff]   ;;  %v33098_v26 = vld [vmem:[%s34917_s23 + $0x1a08] sm:$0xff]   ;;  %v33100_v28 = vld [vmem:[%s34917_s23 + $0x1a40] sm:$0xff]  }
 0x38f   : > { %30119 = vmatprep.subr.bf16.mxu1 %v33052_v30  ;;  %v33102_v30 = vld [vmem:[%s34917_s23 + $0x1a00] sm:$0xff]  }
 0x391   : > { %30098 = vmatpush3.bf16.msra.mxu0 %v33053_v31  ;;  %v246_v31 = vld [vmem:[#allocation2 + $0x68] sm:$0xff] }
 0x392   : > { %30099 = vmatprep.subr.bf16.mxu0 %v33055_v33  ;;  %30120 = vmatpush3.bf16.msra.mxu1 %v33054_v32  ;;  %v33103_v32 = vld [vmem:[%s34917_s23 + $0x1a80] sm:$0xff]   ;;  %v5564_v33 = vrot.slane %v246_v31, %v34953_v35 }
 0x393   : > { %30121 = vmatprep.subr.bf16.mxu1 %v33056_v34  ;;  %v5557_v34 = vcombine.high %v246_v31, %v246_v31  ;;  %v33141_v31 = vld [vmem:[%s34917_s23 + $0x1c70] sm:$0xff]  }
 0x395   : > { %30100 = vmatpush3.bf16.msra.mxu0 %v33057_v36  ;;  %v33104_v36 = vld [vmem:[%s34917_s23 + $0x1b78] sm:$0xff]  }
 0x396   : > { %30101 = vmatprep.subr.bf16.mxu0 %v33059_v38  ;;  %30122 = vmatpush3.bf16.msra.mxu1 %v33058_v37  ;;  %v5572_v37 = vcombine.high %v5564_v33, %v5564_v33  ;;  %v5580_v38 = vrot.slane %v5564_v33, %v34953_v35  ;;  %v33142_v33 = vld [vmem:[%s34917_s23 + $0x1cf0] sm:$0xff]  }
 0x397   : > { %30123 = vmatprep.subr.bf16.mxu1 %v33060_v39  ;;  %v33105_v39 = vld [vmem:[%s34917_s23 + $0x1bf8] sm:$0xff]  }
 0x399   : > { %30102 = vmatpush3.bf16.msra.mxu0 %v33061_v40  ;;  %v35997_v40 = vrot.slane %v5557_v34, %v34953_v35  ;;  %v33143_v34 = vld [vmem:[%s34917_s23 + $0x1c30] sm:$0xff]  }
 0x39a   : > { %30103 = vmatprep.subr.bf16.mxu0 %v33063_v42  ;;  %30124 = vmatpush3.bf16.msra.mxu1 %v33062_v41  ;;  %v33106_v41 = vld [vmem:[%s34917_s23 + $0x1b38] sm:$0xff]   ;;  %v5594_v42 = vrot.slane %v5572_v37, %v34953_v35 }
 0x39b   : > { %30125 = vmatprep.subr.bf16.mxu1 %v33064_v43  ;;  %v33107_v43 = vld [vmem:[%s34917_s23 + $0x1bb8] sm:$0xff]  }
 0x39d   : > { %30104 = vmatpush3.bf16.msra.mxu0 %v33065_v44  ;;  %v5573_v44 = vcombine.high %v35997_v40, %v35997_v40 }
 0x39e   : > { %30105 = vmatprep.subr.bf16.mxu0 %v33067_v46  ;;  %30126 = vmatpush3.bf16.msra.mxu1 %v33066_v45  ;;  %v5602_v45 = vcombine.high %v5580_v38, %v5580_v38  ;;  %v33108_v46 = vld [vmem:[%s34917_s23 + $0x1b70] sm:$0xff]  }
 0x39f   : > { %30127 = vmatprep.subr.bf16.mxu1 %v33068_v47  ;;  %v5604_v47 = vcombine.high %v5594_v42, %v5594_v42 }
 0x3a1   : > { %30106 = vmatpush3.bf16.msra.mxu0 %v33069_v48 }
 0x3a2   : > { %30135 = vmatprep.subr.bf16.mxu0 %v33072_v51  ;;  %30128 = vmatpush3.bf16.msra.mxu1 %v33070_v49  ;;  %v33109_v49 = vld [vmem:[%s34917_s23 + $0x1bf0] sm:$0xff]  }
 0x3a3   : > { %30157 = vmatprep.subr.bf16.mxu1 %v33073_v52  ;;  %v33110_v51 = vld [vmem:[%s34917_s23 + $0x1b30] sm:$0xff]  }
 0x3a4   : > { %v29843_v57 = vpop.f32.mrf.mxu0  ;;  %22829 = vmatmul.mubr.bf16.vlgmr.msra.gmra.mxu0 %v5538_v50  ;;  %v5601_v50 = vrot.slane %v5573_v44, %v34953_v35 }
 0x3a5   : > { %v29865_v60 = vpop.f32.mrf.mxu1  ;;  %30136 = vmatpush3.bf16.msra.mxu0 %v33074_v53  ;;  %22869 = vmatmul.mubr.bf16.vlgmr.msra.gmra.mxu1 %v5554_v55 }
 0x3a6   : > { %v29844_v61 = vpop.f32.mrf.mxu0  ;;  %30137 = vmatprep.subr.bf16.mxu0 %v33076_v56  ;;  %30158 = vmatpush3.bf16.msra.mxu1 %v33075_v54  ;;  %v33111_v54 = vld [vmem:[%s34917_s23 + $0x1bb0] sm:$0xff]   ;;  %v5605_v55 = vcombine.high %v5601_v50, %v5601_v50 }
 0x3a7   : > { %v29845_v63 = vadd.f32 %v29844_v61, %v29843_v57  ;;  %v29866_v1 = vpop.f32.mrf.mxu1  ;;  %30159 = vmatprep.subr.bf16.mxu1 %v33077_v58  ;;  %22908 = vmatprep.mubr.bf16.mxu0 %v5594_v42  ;;  %v33112_v57 = vld [vmem:[%s34917_s23 + $0x1b68] sm:$0xff]  }
 0x3a8   : > { %v29846_v2 = vpop.f32.mrf.mxu0  ;;  %v29867_v5 = vadd.f32 %v29866_v1, %v29865_v60  ;;  %22948 = vmatprep.mubr.bf16.mxu1 %v5604_v47  ;;  %v33113_v60 = vld [vmem:[%s34917_s23 + $0x1be8] sm:$0xff]  }
 0x3a9   : > { %v22351_v4 = vadd.f32 %v29845_v63, %v35933_v27  ;;  %v29868_v7 = vpop.f32.mrf.mxu1  ;;  %30138 = vmatpush3.bf16.msra.mxu0 %v33078_v59  ;;  %v33099_v27 = vld [vmem:[%s34917_s23 + $0x1a88] sm:$0xff]  }
 0x3aa   : > { %v29847_v8 = vpop.f32.mrf.mxu0  ;;  %30139 = vmatprep.subr.bf16.mxu0 %v33080_v0  ;;  %30160 = vmatpush3.bf16.msra.mxu1 %v33079_v62  ;;  %v33114_v63 = vld [vmem:[%s34917_s23 + $0x1b28] sm:$0xff]   ;;  %v33118_v7 = vld [vmem:[%s34917_s23 + $0x1b20] sm:$0xff]  }
 0x3ab   : > { %v35970_v10 = vadd.f32 %v29867_v5, %v22351_v4  ;;  %v29869_v12 = vpop.f32.mrf.mxu1  ;;  %30161 = vmatprep.subr.bf16.mxu1 %v33081_v3  ;;  %v33115_v2 = vld [vmem:[%s34917_s23 + $0x1ba8] sm:$0xff]   ;;  %v33116_v4 = vld [vmem:[%s34917_s23 + $0x1b60] sm:$0xff]  }
 0x3ac   : > { %v33119_v8 = vld [vmem:[%s34917_s23 + $0x1ba0] sm:$0xff]   ;;  %v33123_v12 = vld [vmem:[%s34917_s23 + $0x1b98] sm:$0xff]  }
 0x3ad   : > { %30140 = vmatpush3.bf16.msra.mxu0 %v33082_v6  ;;  %v33117_v6 = vld [vmem:[%s34917_s23 + $0x1be0] sm:$0xff]  }
 0x3ae   : > { %30141 = vmatprep.subr.bf16.mxu0 %v33084_v11  ;;  %30162 = vmatpush3.bf16.msra.mxu1 %v33083_v9  ;;  %v33120_v9 = vld [vmem:[%s34917_s23 + $0x1b58] sm:$0xff]  }
 0x3af   : > { %30163 = vmatprep.subr.bf16.mxu1 %v33085_v13  ;;  %v33122_v11 = vld [vmem:[%s34917_s23 + $0x1b18] sm:$0xff]   ;;  %v33124_v13 = vld [vmem:[%s34917_s23 + $0x1b50] sm:$0xff]  }
 0x3b1   : > { %30142 = vmatpush3.bf16.msra.mxu0 %v33086_v14  ;;  %v33125_v14 = vld [vmem:[%s34917_s23 + $0x1bd0] sm:$0xff]  }
 0x3b2   : > { %30143 = vmatprep.subr.bf16.mxu0 %v33088_v16  ;;  %30164 = vmatpush3.bf16.msra.mxu1 %v33087_v15  ;;  %v33126_v15 = vld [vmem:[%s34917_s23 + $0x1b10] sm:$0xff]  }
 0x3b3   : > { %30165 = vmatprep.subr.bf16.mxu1 %v33089_v17  ;;  %v33127_v16 = vld [vmem:[%s34917_s23 + $0x1b90] sm:$0xff]   ;;  %v33128_v17 = vld [vmem:[%s34917_s23 + $0x1b48] sm:$0xff]  }
 0x3b5   : > { %30144 = vmatpush3.bf16.msra.mxu0 %v33090_v18  ;;  %v33129_v18 = vld [vmem:[%s34917_s23 + $0x1bc8] sm:$0xff]  }
 0x3b6   : > { %30145 = vmatprep.subr.bf16.mxu0 %v33092_v20  ;;  %30166 = vmatpush3.bf16.msra.mxu1 %v33091_v19  ;;  %v33130_v19 = vld [vmem:[%s34917_s23 + $0x1b08] sm:$0xff]  }
 0x3b7   : > { %30167 = vmatprep.subr.bf16.mxu1 %v33093_v21  ;;  %v33131_v20 = vld [vmem:[%s34917_s23 + $0x1b88] sm:$0xff]   ;;  %v33132_v21 = vld [vmem:[%s34917_s23 + $0x1b40] sm:$0xff]  }
 0x3b9   : > { %30146 = vmatpush3.bf16.msra.mxu0 %v33094_v22  ;;  %v33133_v22 = vld [vmem:[%s34917_s23 + $0x1bc0] sm:$0xff]  }
 0x3ba   : > { %30147 = vmatprep.subr.bf16.mxu0 %v33096_v24  ;;  %30168 = vmatpush3.bf16.msra.mxu1 %v33095_v23  ;;  %v33134_v23 = vld [vmem:[%s34917_s23 + $0x1b00] sm:$0xff]  }
 0x3bb   : > { %30169 = vmatprep.subr.bf16.mxu1 %v33097_v25  ;;  %v33135_v24 = vld [vmem:[%s34917_s23 + $0x1b80] sm:$0xff]   ;;  %v5587_v25 = vrot.slane %v35997_v40, %v34953_v35  ;;  %v33145_v40 = vld [vmem:[%s34917_s23 + $0x1c68] sm:$0xff]  }
 0x3bd   : > { %30148 = vmatpush3.bf16.msra.mxu0 %v33098_v26  ;;  %v33137_v26 = vld [vmem:[%s34917_s23 + $0x1c78] sm:$0xff]  }
 0x3be   : > { %30149 = vmatprep.subr.bf16.mxu0 %v33100_v28  ;;  %30170 = vmatpush3.bf16.msra.mxu1 %v33099_v27  ;;  %v33138_v27 = vld [vmem:[%s34917_s23 + $0x1cf8] sm:$0xff]  }
 0x3bf   : > { %30171 = vmatprep.subr.bf16.mxu1 %v33101_v29  ;;  %v33139_v28 = vld [vmem:[%s34917_s23 + $0x1c38] sm:$0xff]  }
 0x3c0   : > { %v33140_v29 = vld [vmem:[%s34917_s23 + $0x1cb8] sm:$0xff]  }
 0x3c1   : > { %30150 = vmatpush3.bf16.msra.mxu0 %v33102_v30  ;;  %v5603_v30 = vcombine.high %v5587_v25, %v5587_v25 }
 0x3c2   : > { %30179 = vmatprep.subr.bf16.mxu0 %v33104_v36  ;;  %30172 = vmatpush3.bf16.msra.mxu1 %v33103_v32 }
 0x3c3   : > { %30201 = vmatprep.subr.bf16.mxu1 %v33105_v39 }
 0x3c4   : > { %v29887_v48 = vpop.f32.mrf.mxu0  ;;  %22909 = vmatmul.mubr.bf16.vlgmr.msra.gmra.mxu0 %v5580_v38  ;;  %v33144_v38 = vld [vmem:[%s34917_s23 + $0x1cb0] sm:$0xff]  }
 0x3c5   : > { %v29909_v52 = vpop.f32.mrf.mxu1  ;;  %30180 = vmatpush3.bf16.msra.mxu0 %v33106_v41  ;;  %22949 = vmatmul.mubr.bf16.vlgmr.msra.gmra.mxu1 %v5602_v45 }
 0x3c6   : > { %v29888_v53 = vpop.f32.mrf.mxu0  ;;  %30181 = vmatprep.subr.bf16.mxu0 %v33108_v46  ;;  %30202 = vmatpush3.bf16.msra.mxu1 %v33107_v43  ;;  %v33146_v43 = vld [vmem:[%s34917_s23 + $0x1ce8] sm:$0xff]  }
 0x3c7   : > { %v29889_v56 = vadd.f32 %v29888_v53, %v29887_v48  ;;  %v29910_v58 = vpop.f32.mrf.mxu1  ;;  %22988 = vmatprep.mubr.bf16.mxu0 %v5601_v50  ;;  %30203 = vmatprep.subr.bf16.mxu1 %v33109_v49  ;;  %v33147_v46 = vld [vmem:[%s34917_s23 + $0x1c28] sm:$0xff]   ;;  %v33150_v53 = vld [vmem:[%s34917_s23 + $0x1ce0] sm:$0xff]  }
 0x3c8   : > { %v29890_v59 = vpop.f32.mrf.mxu0  ;;  %v29911_v62 = vadd.f32 %v29910_v58, %v29909_v52  ;;  %23028 = vmatprep.mubr.bf16.mxu1 %v5605_v55  ;;  %v33148_v49 = vld [vmem:[%s34917_s23 + $0x1ca8] sm:$0xff]   ;;  %v33152_v55 = vld [vmem:[%s34917_s23 + $0x1ca0] sm:$0xff]   ;;  %v33155_v58 = vld [vmem:[%s34917_s23 + $0x1c18] sm:$0xff]  }
 0x3c9   : > { %v22431_v61 = vadd.f32 %v29889_v56, %v35970_v10  ;;  %v29912_v0 = vpop.f32.mrf.mxu1  ;;  %30182 = vmatpush3.bf16.msra.mxu0 %v33110_v51  ;;  %v33121_v10 = vld [vmem:[%s34917_s23 + $0x1bd8] sm:$0xff]   ;;  %v33149_v51 = vld [vmem:[%s34917_s23 + $0x1c60] sm:$0xff]  }
 0x3ca   : > { %v29891_v1 = vpop.f32.mrf.mxu0  ;;  %30183 = vmatprep.subr.bf16.mxu0 %v33112_v57  ;;  %30204 = vmatpush3.bf16.msra.mxu1 %v33111_v54  ;;  %v33151_v54 = vld [vmem:[%s34917_s23 + $0x1c20] sm:$0xff]   ;;  %v33153_v56 = vld [vmem:[%s34917_s23 + $0x1c58] sm:$0xff]   ;;  %v33161_v0 = vld [vmem:[%s34917_s23 + $0x1c48] sm:$0xff]  }
 0x3cb   : > { %v36014_v3 = vadd.f32 %v29911_v62, %v22431_v61  ;;  %v29913_v5 = vpop.f32.mrf.mxu1  ;;  %30205 = vmatprep.subr.bf16.mxu1 %v33113_v60  ;;  %v33154_v57 = vld [vmem:[%s34917_s23 + $0x1cd8] sm:$0xff]   ;;  %v33157_v60 = vld [vmem:[%s34917_s23 + $0x1c50] sm:$0xff]   ;;  %v33162_v1 = vld [vmem:[%s34917_s23 + $0x1cc8] sm:$0xff]  }
 0x3cc   : > { %v33156_v59 = vld [vmem:[%s34917_s23 + $0x1c98] sm:$0xff]   ;;  %v33158_v61 = vld [vmem:[%s34917_s23 + $0x1cd0] sm:$0xff]   ;;  %v33166_v5 = vld [vmem:[%s34917_s23 + $0x1cc0] sm:$0xff]  }
 0x3cd   : > { %30184 = vmatpush3.bf16.msra.mxu0 %v33114_v63  ;;  %v33159_v62 = vld [vmem:[%s34917_s23 + $0x1c10] sm:$0xff]  }
 0x3ce   : > { %30185 = vmatprep.subr.bf16.mxu0 %v33116_v4  ;;  %30206 = vmatpush3.bf16.msra.mxu1 %v33115_v2  ;;  %v33160_v63 = vld [vmem:[%s34917_s23 + $0x1c90] sm:$0xff]   ;;  %v33163_v2 = vld [vmem:[%s34917_s23 + $0x1c08] sm:$0xff]   ;;  %v33165_v4 = vld [vmem:[%s34917_s23 + $0x1c40] sm:$0xff]  }
 0x3cf   : > { %30207 = vmatprep.subr.bf16.mxu1 %v33117_v6  ;;  %v33167_v6 = vld [vmem:[%s34917_s23 + $0x1c00] sm:$0xff]  }
 0x3d1   : > { %30186 = vmatpush3.bf16.msra.mxu0 %v33118_v7  ;;  %v247_v7 = vld [vmem:[#allocation2 + $0x70] sm:$0xff] }
 0x3d2   : > { %30187 = vmatprep.subr.bf16.mxu0 %v33120_v9  ;;  %30208 = vmatpush3.bf16.msra.mxu1 %v33119_v8  ;;  %v5613_v8 = vrot.slane %v247_v7, %v34953_v35  ;;  %v33169_v9 = vld [vmem:[%s34917_s23 + $0x1d78] sm:$0xff]  }
 0x3d3   : > { %30209 = vmatprep.subr.bf16.mxu1 %v33121_v10  ;;  %v5606_v10 = vcombine.high %v247_v7, %v247_v7  ;;  %v33206_v7 = vld [vmem:[%s34917_s23 + $0x1e70] sm:$0xff]  }
 0x3d5   : > { %30188 = vmatpush3.bf16.msra.mxu0 %v33122_v11  ;;  %v33168_v11 = vld [vmem:[%s34917_s23 + $0x1c80] sm:$0xff]  }
 0x3d6   : > { %30189 = vmatprep.subr.bf16.mxu0 %v33124_v13  ;;  %30210 = vmatpush3.bf16.msra.mxu1 %v33123_v12  ;;  %v5621_v12 = vcombine.high %v5613_v8, %v5613_v8  ;;  %v5629_v13 = vrot.slane %v5613_v8, %v34953_v35 }
 0x3d7   : > { %30211 = vmatprep.subr.bf16.mxu1 %v33125_v14  ;;  %v33170_v14 = vld [vmem:[%s34917_s23 + $0x1df8] sm:$0xff]  }
 0x3d9   : > { %30190 = vmatpush3.bf16.msra.mxu0 %v33126_v15  ;;  %v36078_v15 = vrot.slane %v5606_v10, %v34953_v35  ;;  %v33208_v10 = vld [vmem:[%s34917_s23 + $0x1e30] sm:$0xff]  }
 0x3da   : > { %30191 = vmatprep.subr.bf16.mxu0 %v33128_v17  ;;  %30212 = vmatpush3.bf16.msra.mxu1 %v33127_v16  ;;  %v33171_v16 = vld [vmem:[%s34917_s23 + $0x1d38] sm:$0xff]   ;;  %v5643_v17 = vrot.slane %v5621_v12, %v34953_v35 }
 0x3db   : > { %30213 = vmatprep.subr.bf16.mxu1 %v33129_v18  ;;  %v33172_v18 = vld [vmem:[%s34917_s23 + $0x1db8] sm:$0xff]  }
 0x3dd   : > { %30192 = vmatpush3.bf16.msra.mxu0 %v33130_v19  ;;  %v5622_v19 = vcombine.high %v36078_v15, %v36078_v15 }
 0x3de   : > { %30193 = vmatprep.subr.bf16.mxu0 %v33132_v21  ;;  %30214 = vmatpush3.bf16.msra.mxu1 %v33131_v20  ;;  %v5651_v20 = vcombine.high %v5629_v13, %v5629_v13  ;;  %v33173_v21 = vld [vmem:[%s34917_s23 + $0x1d70] sm:$0xff]  }
 0x3df   : > { %30215 = vmatprep.subr.bf16.mxu1 %v33133_v22  ;;  %v5653_v22 = vcombine.high %v5643_v17, %v5643_v17 }
 0x3e1   : > { %30194 = vmatpush3.bf16.msra.mxu0 %v33134_v23 }
 0x3e2   : > { %30223 = vmatprep.subr.bf16.mxu0 %v33137_v26  ;;  %30216 = vmatpush3.bf16.msra.mxu1 %v33135_v24  ;;  %v33174_v24 = vld [vmem:[%s34917_s23 + $0x1df0] sm:$0xff]  }
 0x3e3   : > { %30245 = vmatprep.subr.bf16.mxu1 %v33138_v27  ;;  %v33175_v26 = vld [vmem:[%s34917_s23 + $0x1d30] sm:$0xff]  }
 0x3e4   : > { %v29931_v32 = vpop.f32.mrf.mxu0  ;;  %22989 = vmatmul.mubr.bf16.vlgmr.msra.gmra.mxu0 %v5587_v25  ;;  %v5650_v25 = vrot.slane %v5622_v19, %v34953_v35 }
 0x3e5   : > { %v29953_v36 = vpop.f32.mrf.mxu1  ;;  %30224 = vmatpush3.bf16.msra.mxu0 %v33139_v28  ;;  %23029 = vmatmul.mubr.bf16.vlgmr.msra.gmra.mxu1 %v5603_v30 }
 0x3e6   : > { %v29932_v37 = vpop.f32.mrf.mxu0  ;;  %30225 = vmatprep.subr.bf16.mxu0 %v33141_v31  ;;  %30246 = vmatpush3.bf16.msra.mxu1 %v33140_v29  ;;  %v33176_v29 = vld [vmem:[%s34917_s23 + $0x1db0] sm:$0xff]   ;;  %v5654_v30 = vcombine.high %v5650_v25, %v5650_v25 }
 0x3e7   : > { %v29933_v39 = vadd.f32 %v29932_v37, %v29931_v32  ;;  %v29954_v41 = vpop.f32.mrf.mxu1  ;;  %30247 = vmatprep.subr.bf16.mxu1 %v33142_v33  ;;  %23068 = vmatprep.mubr.bf16.mxu0 %v5643_v17  ;;  %v33177_v32 = vld [vmem:[%s34917_s23 + $0x1d68] sm:$0xff]  }
 0x3e8   : > { %v29934_v42 = vpop.f32.mrf.mxu0  ;;  %v29955_v45 = vadd.f32 %v29954_v41, %v29953_v36  ;;  %23108 = vmatprep.mubr.bf16.mxu1 %v5653_v22  ;;  %v33178_v36 = vld [vmem:[%s34917_s23 + $0x1de8] sm:$0xff]  }
 0x3e9   : > { %v22511_v44 = vadd.f32 %v29933_v39, %v36014_v3  ;;  %v29956_v47 = vpop.f32.mrf.mxu1  ;;  %30226 = vmatpush3.bf16.msra.mxu0 %v33143_v34  ;;  %v33164_v3 = vld [vmem:[%s34917_s23 + $0x1c88] sm:$0xff]  }
 0x3ea   : > { %v29935_v48 = vpop.f32.mrf.mxu0  ;;  %30227 = vmatprep.subr.bf16.mxu0 %v33145_v40  ;;  %30248 = vmatpush3.bf16.msra.mxu1 %v33144_v38  ;;  %v33179_v39 = vld [vmem:[%s34917_s23 + $0x1d28] sm:$0xff]   ;;  %v33183_v47 = vld [vmem:[%s34917_s23 + $0x1d20] sm:$0xff]  }
 0x3eb   : > { %v36051_v50 = vadd.f32 %v29955_v45, %v22511_v44  ;;  %v29957_v52 = vpop.f32.mrf.mxu1  ;;  %30249 = vmatprep.subr.bf16.mxu1 %v33146_v43  ;;  %v33180_v42 = vld [vmem:[%s34917_s23 + $0x1da8] sm:$0xff]   ;;  %v33181_v44 = vld [vmem:[%s34917_s23 + $0x1d60] sm:$0xff]  }
 0x3ec   : > { %v33184_v48 = vld [vmem:[%s34917_s23 + $0x1da0] sm:$0xff]   ;;  %v33188_v52 = vld [vmem:[%s34917_s23 + $0x1d98] sm:$0xff]  }
 0x3ed   : > { %30228 = vmatpush3.bf16.msra.mxu0 %v33147_v46  ;;  %v33182_v46 = vld [vmem:[%s34917_s23 + $0x1de0] sm:$0xff]  }
 0x3ee   : > { %30229 = vmatprep.subr.bf16.mxu0 %v33149_v51  ;;  %30250 = vmatpush3.bf16.msra.mxu1 %v33148_v49  ;;  %v33185_v49 = vld [vmem:[%s34917_s23 + $0x1d58] sm:$0xff]  }
 0x3ef   : > { %30251 = vmatprep.subr.bf16.mxu1 %v33150_v53  ;;  %v33187_v51 = vld [vmem:[%s34917_s23 + $0x1d18] sm:$0xff]   ;;  %v33189_v53 = vld [vmem:[%s34917_s23 + $0x1d50] sm:$0xff]  }
 0x3f1   : > { %30230 = vmatpush3.bf16.msra.mxu0 %v33151_v54  ;;  %v33190_v54 = vld [vmem:[%s34917_s23 + $0x1dd0] sm:$0xff]  }
 0x3f2   : > { %30231 = vmatprep.subr.bf16.mxu0 %v33153_v56  ;;  %30252 = vmatpush3.bf16.msra.mxu1 %v33152_v55  ;;  %v33191_v55 = vld [vmem:[%s34917_s23 + $0x1d10] sm:$0xff]  }
 0x3f3   : > { %30253 = vmatprep.subr.bf16.mxu1 %v33154_v57  ;;  %v33192_v56 = vld [vmem:[%s34917_s23 + $0x1d90] sm:$0xff]   ;;  %v33193_v57 = vld [vmem:[%s34917_s23 + $0x1d48] sm:$0xff]  }
 0x3f5   : > { %30232 = vmatpush3.bf16.msra.mxu0 %v33155_v58  ;;  %v33194_v58 = vld [vmem:[%s34917_s23 + $0x1dc8] sm:$0xff]  }
 0x3f6   : > { %30233 = vmatprep.subr.bf16.mxu0 %v33157_v60  ;;  %30254 = vmatpush3.bf16.msra.mxu1 %v33156_v59  ;;  %v33195_v59 = vld [vmem:[%s34917_s23 + $0x1d08] sm:$0xff]  }
 0x3f7   : > { %30255 = vmatprep.subr.bf16.mxu1 %v33158_v61  ;;  %v33196_v60 = vld [vmem:[%s34917_s23 + $0x1d88] sm:$0xff]   ;;  %v33197_v61 = vld [vmem:[%s34917_s23 + $0x1d40] sm:$0xff]  }
 0x3f9   : > { %30234 = vmatpush3.bf16.msra.mxu0 %v33159_v62  ;;  %v33198_v62 = vld [vmem:[%s34917_s23 + $0x1dc0] sm:$0xff]  }
 0x3fa   : > { %30235 = vmatprep.subr.bf16.mxu0 %v33161_v0  ;;  %30256 = vmatpush3.bf16.msra.mxu1 %v33160_v63  ;;  %v33199_v63 = vld [vmem:[%s34917_s23 + $0x1d00] sm:$0xff]  }
 0x3fb   : > { %30257 = vmatprep.subr.bf16.mxu1 %v33162_v1  ;;  %v33200_v0 = vld [vmem:[%s34917_s23 + $0x1d80] sm:$0xff]   ;;  %v5636_v1 = vrot.slane %v36078_v15, %v34953_v35  ;;  %v33210_v15 = vld [vmem:[%s34917_s23 + $0x1e68] sm:$0xff]  }
 0x3fd   : > { %30236 = vmatpush3.bf16.msra.mxu0 %v33163_v2  ;;  %v33202_v2 = vld [vmem:[%s34917_s23 + $0x1e78] sm:$0xff]  }
 0x3fe   : > { %30237 = vmatprep.subr.bf16.mxu0 %v33165_v4  ;;  %30258 = vmatpush3.bf16.msra.mxu1 %v33164_v3  ;;  %v33203_v3 = vld [vmem:[%s34917_s23 + $0x1ef8] sm:$0xff]  }
 0x3ff   : > { %30259 = vmatprep.subr.bf16.mxu1 %v33166_v5  ;;  %v33204_v4 = vld [vmem:[%s34917_s23 + $0x1e38] sm:$0xff]  }
 0x400   : > { %v33205_v5 = vld [vmem:[%s34917_s23 + $0x1eb8] sm:$0xff]  }
 0x401   : > { %30238 = vmatpush3.bf16.msra.mxu0 %v33167_v6  ;;  %v5652_v6 = vcombine.high %v5636_v1, %v5636_v1 }
 0x402   : > { %30267 = vmatprep.subr.bf16.mxu0 %v33169_v9  ;;  %30260 = vmatpush3.bf16.msra.mxu1 %v33168_v11  ;;  %v33207_v9 = vld [vmem:[%s34917_s23 + $0x1ef0] sm:$0xff]  }
 0x403   : > { %30289 = vmatprep.subr.bf16.mxu1 %v33170_v14 }
 0x404   : > { %v29975_v23 = vpop.f32.mrf.mxu0  ;;  %23069 = vmatmul.mubr.bf16.vlgmr.msra.gmra.mxu0 %v5629_v13  ;;  %v33209_v13 = vld [vmem:[%s34917_s23 + $0x1eb0] sm:$0xff]  }
 0x405   : > { %v29997_v27 = vpop.f32.mrf.mxu1  ;;  %30268 = vmatpush3.bf16.msra.mxu0 %v33171_v16  ;;  %23109 = vmatmul.mubr.bf16.vlgmr.msra.gmra.mxu1 %v5651_v20 }
 0x406   : > { %v29976_v28 = vpop.f32.mrf.mxu0  ;;  %30269 = vmatprep.subr.bf16.mxu0 %v33173_v21  ;;  %30290 = vmatpush3.bf16.msra.mxu1 %v33172_v18  ;;  %v33211_v18 = vld [vmem:[%s34917_s23 + $0x1ee8] sm:$0xff]  }
 0x407   : > { %v29977_v31 = vadd.f32 %v29976_v28, %v29975_v23  ;;  %v29998_v33 = vpop.f32.mrf.mxu1  ;;  %23148 = vmatprep.mubr.bf16.mxu0 %v5650_v25  ;;  %30291 = vmatprep.subr.bf16.mxu1 %v33174_v24  ;;  %v33212_v21 = vld [vmem:[%s34917_s23 + $0x1e28] sm:$0xff]   ;;  %v33215_v28 = vld [vmem:[%s34917_s23 + $0x1ee0] sm:$0xff]  }
 0x408   : > { %v29978_v34 = vpop.f32.mrf.mxu0  ;;  %v29999_v38 = vadd.f32 %v29998_v33, %v29997_v27  ;;  %23188 = vmatprep.mubr.bf16.mxu1 %v5654_v30  ;;  %v33213_v24 = vld [vmem:[%s34917_s23 + $0x1ea8] sm:$0xff]   ;;  %v33217_v30 = vld [vmem:[%s34917_s23 + $0x1ea0] sm:$0xff]   ;;  %v33220_v33 = vld [vmem:[%s34917_s23 + $0x1e18] sm:$0xff]  }
 0x409   : > { %v22591_v37 = vadd.f32 %v29977_v31, %v36051_v50  ;;  %v30000_v40 = vpop.f32.mrf.mxu1  ;;  %30270 = vmatpush3.bf16.msra.mxu0 %v33175_v26  ;;  %v33186_v50 = vld [vmem:[%s34917_s23 + $0x1dd8] sm:$0xff]   ;;  %v33214_v26 = vld [vmem:[%s34917_s23 + $0x1e60] sm:$0xff]  }
 0x40a   : > { %v29979_v41 = vpop.f32.mrf.mxu0  ;;  %30271 = vmatprep.subr.bf16.mxu0 %v33177_v32  ;;  %30292 = vmatpush3.bf16.msra.mxu1 %v33176_v29  ;;  %v33216_v29 = vld [vmem:[%s34917_s23 + $0x1e20] sm:$0xff]   ;;  %v33218_v31 = vld [vmem:[%s34917_s23 + $0x1e58] sm:$0xff]   ;;  %v33226_v40 = vld [vmem:[%s34917_s23 + $0x1e48] sm:$0xff]  }
 0x40b   : > { %v36095_v43 = vadd.f32 %v29999_v38, %v22591_v37  ;;  %v30001_v45 = vpop.f32.mrf.mxu1  ;;  %30293 = vmatprep.subr.bf16.mxu1 %v33178_v36  ;;  %v33219_v32 = vld [vmem:[%s34917_s23 + $0x1ed8] sm:$0xff]   ;;  %v33222_v36 = vld [vmem:[%s34917_s23 + $0x1e50] sm:$0xff]   ;;  %v33227_v41 = vld [vmem:[%s34917_s23 + $0x1ec8] sm:$0xff]  }
 0x40c   : > { %v33221_v34 = vld [vmem:[%s34917_s23 + $0x1e98] sm:$0xff]   ;;  %v33223_v37 = vld [vmem:[%s34917_s23 + $0x1ed0] sm:$0xff]   ;;  %v33231_v45 = vld [vmem:[%s34917_s23 + $0x1ec0] sm:$0xff]  }
 0x40d   : > { %30272 = vmatpush3.bf16.msra.mxu0 %v33179_v39  ;;  %v33224_v38 = vld [vmem:[%s34917_s23 + $0x1e10] sm:$0xff]  }
 0x40e   : > { %30273 = vmatprep.subr.bf16.mxu0 %v33181_v44  ;;  %30294 = vmatpush3.bf16.msra.mxu1 %v33180_v42  ;;  %v33225_v39 = vld [vmem:[%s34917_s23 + $0x1e90] sm:$0xff]   ;;  %v33228_v42 = vld [vmem:[%s34917_s23 + $0x1e08] sm:$0xff]   ;;  %v33230_v44 = vld [vmem:[%s34917_s23 + $0x1e40] sm:$0xff]  }
 0x40f   : > { %30295 = vmatprep.subr.bf16.mxu1 %v33182_v46  ;;  %v33232_v46 = vld [vmem:[%s34917_s23 + $0x1e00] sm:$0xff]  }
 0x411   : > { %30274 = vmatpush3.bf16.msra.mxu0 %v33183_v47  ;;  %v248_v47 = vld [vmem:[#allocation2 + $0x78] sm:$0xff] }
 0x412   : > { %30275 = vmatprep.subr.bf16.mxu0 %v33185_v49  ;;  %30296 = vmatpush3.bf16.msra.mxu1 %v33184_v48  ;;  %v33233_v48 = vld [vmem:[%s34917_s23 + $0x1e80] sm:$0xff]   ;;  %v5662_v49 = vrot.slane %v248_v47, %v34953_v35 }
 0x413   : > { %30297 = vmatprep.subr.bf16.mxu1 %v33186_v50  ;;  %v5655_v50 = vcombine.high %v248_v47, %v248_v47  ;;  %v33271_v47 = vld [vmem:[%s34917_s23 + $0x2070] sm:$0xff]  }
 0x415   : > { %30276 = vmatpush3.bf16.msra.mxu0 %v33187_v51  ;;  %v33234_v51 = vld [vmem:[%s34917_s23 + $0x1f78] sm:$0xff]  }
 0x416   : > { %30277 = vmatprep.subr.bf16.mxu0 %v33189_v53  ;;  %30298 = vmatpush3.bf16.msra.mxu1 %v33188_v52  ;;  %v5670_v52 = vcombine.high %v5662_v49, %v5662_v49  ;;  %v5678_v53 = vrot.slane %v5662_v49, %v34953_v35  ;;  %v33272_v49 = vld [vmem:[%s34917_s23 + $0x20f0] sm:$0xff]  }
 0x417   : > { %30299 = vmatprep.subr.bf16.mxu1 %v33190_v54  ;;  %v33235_v54 = vld [vmem:[%s34917_s23 + $0x1ff8] sm:$0xff]  }
 0x419   : > { %30278 = vmatpush3.bf16.msra.mxu0 %v33191_v55  ;;  %v36159_v55 = vrot.slane %v5655_v50, %v34953_v35  ;;  %v33273_v50 = vld [vmem:[%s34917_s23 + $0x2030] sm:$0xff]  }
 0x41a   : > { %30279 = vmatprep.subr.bf16.mxu0 %v33193_v57  ;;  %30300 = vmatpush3.bf16.msra.mxu1 %v33192_v56  ;;  %v33236_v56 = vld [vmem:[%s34917_s23 + $0x1f38] sm:$0xff]   ;;  %v5692_v57 = vrot.slane %v5670_v52, %v34953_v35 }
 0x41b   : > { %30301 = vmatprep.subr.bf16.mxu1 %v33194_v58  ;;  %v33237_v58 = vld [vmem:[%s34917_s23 + $0x1fb8] sm:$0xff]  }
 0x41d   : > { %30280 = vmatpush3.bf16.msra.mxu0 %v33195_v59  ;;  %v5671_v59 = vcombine.high %v36159_v55, %v36159_v55 }
 0x41e   : > { %30281 = vmatprep.subr.bf16.mxu0 %v33197_v61  ;;  %30302 = vmatpush3.bf16.msra.mxu1 %v33196_v60  ;;  %v5700_v60 = vcombine.high %v5678_v53, %v5678_v53  ;;  %v33238_v61 = vld [vmem:[%s34917_s23 + $0x1f70] sm:$0xff]  }
 0x41f   : > { %30303 = vmatprep.subr.bf16.mxu1 %v33198_v62  ;;  %v5702_v62 = vcombine.high %v5692_v57, %v5692_v57 }
 0x421   : > { %30282 = vmatpush3.bf16.msra.mxu0 %v33199_v63 }
 0x422   : > { %30311 = vmatprep.subr.bf16.mxu0 %v33202_v2  ;;  %30304 = vmatpush3.bf16.msra.mxu1 %v33200_v0  ;;  %v33239_v0 = vld [vmem:[%s34917_s23 + $0x1ff0] sm:$0xff]  }
 0x423   : > { %30333 = vmatprep.subr.bf16.mxu1 %v33203_v3  ;;  %v33240_v2 = vld [vmem:[%s34917_s23 + $0x1f30] sm:$0xff]  }
 0x424   : > { %v30019_v8 = vpop.f32.mrf.mxu0  ;;  %23149 = vmatmul.mubr.bf16.vlgmr.msra.gmra.mxu0 %v5636_v1  ;;  %v5699_v1 = vrot.slane %v5671_v59, %v34953_v35 }
 0x425   : > { %v30041_v11 = vpop.f32.mrf.mxu1  ;;  %30312 = vmatpush3.bf16.msra.mxu0 %v33204_v4  ;;  %23189 = vmatmul.mubr.bf16.vlgmr.msra.gmra.mxu1 %v5652_v6 }
 0x426   : > { %v30020_v12 = vpop.f32.mrf.mxu0  ;;  %30313 = vmatprep.subr.bf16.mxu0 %v33206_v7  ;;  %30334 = vmatpush3.bf16.msra.mxu1 %v33205_v5  ;;  %v33241_v5 = vld [vmem:[%s34917_s23 + $0x1fb0] sm:$0xff]   ;;  %v5703_v6 = vcombine.high %v5699_v1, %v5699_v1 }
 0x427   : > { %v30021_v14 = vadd.f32 %v30020_v12, %v30019_v8  ;;  %v30042_v16 = vpop.f32.mrf.mxu1  ;;  %30335 = vmatprep.subr.bf16.mxu1 %v33207_v9  ;;  %23228 = vmatprep.mubr.bf16.mxu0 %v5692_v57  ;;  %v33242_v8 = vld [vmem:[%s34917_s23 + $0x1f68] sm:$0xff]  }
 0x428   : > { %v30022_v17 = vpop.f32.mrf.mxu0  ;;  %v30043_v20 = vadd.f32 %v30042_v16, %v30041_v11  ;;  %23268 = vmatprep.mubr.bf16.mxu1 %v5702_v62  ;;  %v33243_v11 = vld [vmem:[%s34917_s23 + $0x1fe8] sm:$0xff]  }
 0x429   : > { %v22671_v19 = vadd.f32 %v30021_v14, %v36095_v43  ;;  %v30044_v22 = vpop.f32.mrf.mxu1  ;;  %30314 = vmatpush3.bf16.msra.mxu0 %v33208_v10  ;;  %v33229_v43 = vld [vmem:[%s34917_s23 + $0x1e88] sm:$0xff]  }
 0x42a   : > { %v30023_v23 = vpop.f32.mrf.mxu0  ;;  %30315 = vmatprep.subr.bf16.mxu0 %v33210_v15  ;;  %30336 = vmatpush3.bf16.msra.mxu1 %v33209_v13  ;;  %v33244_v14 = vld [vmem:[%s34917_s23 + $0x1f28] sm:$0xff]   ;;  %v33248_v22 = vld [vmem:[%s34917_s23 + $0x1f20] sm:$0xff]  }
 0x42b   : > { %v36132_v25 = vadd.f32 %v30043_v20, %v22671_v19  ;;  %v30045_v27 = vpop.f32.mrf.mxu1  ;;  %30337 = vmatprep.subr.bf16.mxu1 %v33211_v18  ;;  %v33245_v17 = vld [vmem:[%s34917_s23 + $0x1fa8] sm:$0xff]   ;;  %v33246_v19 = vld [vmem:[%s34917_s23 + $0x1f60] sm:$0xff]  }
 0x42c   : > { %v33249_v23 = vld [vmem:[%s34917_s23 + $0x1fa0] sm:$0xff]   ;;  %v33253_v27 = vld [vmem:[%s34917_s23 + $0x1f98] sm:$0xff]  }
 0x42d   : > { %30316 = vmatpush3.bf16.msra.mxu0 %v33212_v21  ;;  %v33247_v21 = vld [vmem:[%s34917_s23 + $0x1fe0] sm:$0xff]  }
 0x42e   : > { %30317 = vmatprep.subr.bf16.mxu0 %v33214_v26  ;;  %30338 = vmatpush3.bf16.msra.mxu1 %v33213_v24  ;;  %v33250_v24 = vld [vmem:[%s34917_s23 + $0x1f58] sm:$0xff]  }
 0x42f   : > { %30339 = vmatprep.subr.bf16.mxu1 %v33215_v28  ;;  %v33252_v26 = vld [vmem:[%s34917_s23 + $0x1f18] sm:$0xff]   ;;  %v33254_v28 = vld [vmem:[%s34917_s23 + $0x1f50] sm:$0xff]  }
 0x431   : > { %30318 = vmatpush3.bf16.msra.mxu0 %v33216_v29  ;;  %v33255_v29 = vld [vmem:[%s34917_s23 + $0x1fd0] sm:$0xff]  }
 0x432   : > { %30319 = vmatprep.subr.bf16.mxu0 %v33218_v31  ;;  %30340 = vmatpush3.bf16.msra.mxu1 %v33217_v30  ;;  %v33256_v30 = vld [vmem:[%s34917_s23 + $0x1f10] sm:$0xff]  }
 0x433   : > { %30341 = vmatprep.subr.bf16.mxu1 %v33219_v32  ;;  %v33257_v31 = vld [vmem:[%s34917_s23 + $0x1f90] sm:$0xff]   ;;  %v33258_v32 = vld [vmem:[%s34917_s23 + $0x1f48] sm:$0xff]  }
 0x435   : > { %30320 = vmatpush3.bf16.msra.mxu0 %v33220_v33  ;;  %v33259_v33 = vld [vmem:[%s34917_s23 + $0x1fc8] sm:$0xff]  }
 0x436   : > { %30321 = vmatprep.subr.bf16.mxu0 %v33222_v36  ;;  %30342 = vmatpush3.bf16.msra.mxu1 %v33221_v34  ;;  %v33260_v34 = vld [vmem:[%s34917_s23 + $0x1f08] sm:$0xff]  }
 0x437   : > { %30343 = vmatprep.subr.bf16.mxu1 %v33223_v37  ;;  %v33261_v36 = vld [vmem:[%s34917_s23 + $0x1f88] sm:$0xff]   ;;  %v33262_v37 = vld [vmem:[%s34917_s23 + $0x1f40] sm:$0xff]  }
 0x439   : > { %30322 = vmatpush3.bf16.msra.mxu0 %v33224_v38  ;;  %v33263_v38 = vld [vmem:[%s34917_s23 + $0x1fc0] sm:$0xff]  }
 0x43a   : > { %30323 = vmatprep.subr.bf16.mxu0 %v33226_v40  ;;  %30344 = vmatpush3.bf16.msra.mxu1 %v33225_v39  ;;  %v33264_v39 = vld [vmem:[%s34917_s23 + $0x1f00] sm:$0xff]  }
 0x43b   : > { %30345 = vmatprep.subr.bf16.mxu1 %v33227_v41  ;;  %v33265_v40 = vld [vmem:[%s34917_s23 + $0x1f80] sm:$0xff]   ;;  %v5685_v41 = vrot.slane %v36159_v55, %v34953_v35  ;;  %v33275_v55 = vld [vmem:[%s34917_s23 + $0x2068] sm:$0xff]  }
 0x43d   : > { %30324 = vmatpush3.bf16.msra.mxu0 %v33228_v42  ;;  %v33267_v42 = vld [vmem:[%s34917_s23 + $0x2078] sm:$0xff]  }
 0x43e   : > { %30325 = vmatprep.subr.bf16.mxu0 %v33230_v44  ;;  %30346 = vmatpush3.bf16.msra.mxu1 %v33229_v43  ;;  %v33268_v43 = vld [vmem:[%s34917_s23 + $0x20f8] sm:$0xff]  }
 0x43f   : > { %30347 = vmatprep.subr.bf16.mxu1 %v33231_v45  ;;  %v33269_v44 = vld [vmem:[%s34917_s23 + $0x2038] sm:$0xff]  }
 0x440   : > { %v33270_v45 = vld [vmem:[%s34917_s23 + $0x20b8] sm:$0xff]  }
 0x441   : > { %30326 = vmatpush3.bf16.msra.mxu0 %v33232_v46  ;;  %v5701_v46 = vcombine.high %v5685_v41, %v5685_v41 }
 0x442   : > { %30355 = vmatprep.subr.bf16.mxu0 %v33234_v51  ;;  %30348 = vmatpush3.bf16.msra.mxu1 %v33233_v48 }
 0x443   : > { %30377 = vmatprep.subr.bf16.mxu1 %v33235_v54 }
 0x444   : > { %v30063_v63 = vpop.f32.mrf.mxu0  ;;  %23229 = vmatmul.mubr.bf16.vlgmr.msra.gmra.mxu0 %v5678_v53  ;;  %v33274_v53 = vld [vmem:[%s34917_s23 + $0x20b0] sm:$0xff]  }
 0x445   : > { %v30085_v3 = vpop.f32.mrf.mxu1  ;;  %30356 = vmatpush3.bf16.msra.mxu0 %v33236_v56  ;;  %23269 = vmatmul.mubr.bf16.vlgmr.msra.gmra.mxu1 %v5700_v60 }
 0x446   : > { %v30064_v4 = vpop.f32.mrf.mxu0  ;;  %30357 = vmatprep.subr.bf16.mxu0 %v33238_v61  ;;  %30378 = vmatpush3.bf16.msra.mxu1 %v33237_v58  ;;  %v33276_v58 = vld [vmem:[%s34917_s23 + $0x20e8] sm:$0xff]  }
 0x447   : > { %v30065_v7 = vadd.f32 %v30064_v4, %v30063_v63  ;;  %v30086_v9 = vpop.f32.mrf.mxu1  ;;  %23308 = vmatprep.mubr.bf16.mxu0 %v5699_v1  ;;  %30379 = vmatprep.subr.bf16.mxu1 %v33239_v0  ;;  %v33277_v61 = vld [vmem:[%s34917_s23 + $0x2028] sm:$0xff]   ;;  %v33280_v4 = vld [vmem:[%s34917_s23 + $0x20e0] sm:$0xff]  }
 0x448   : > { %v30066_v10 = vpop.f32.mrf.mxu0  ;;  %v30087_v13 = vadd.f32 %v30086_v9, %v30085_v3  ;;  %23348 = vmatprep.mubr.bf16.mxu1 %v5703_v6  ;;  %v33278_v0 = vld [vmem:[%s34917_s23 + $0x20a8] sm:$0xff]   ;;  %v33282_v6 = vld [vmem:[%s34917_s23 + $0x20a0] sm:$0xff]   ;;  %v33285_v9 = vld [vmem:[%s34917_s23 + $0x2018] sm:$0xff]  }
 0x449   : > { %v22751_v12 = vadd.f32 %v30065_v7, %v36132_v25  ;;  %v30088_v15 = vpop.f32.mrf.mxu1  ;;  %30358 = vmatpush3.bf16.msra.mxu0 %v33240_v2  ;;  %v33251_v25 = vld [vmem:[%s34917_s23 + $0x1fd8] sm:$0xff]   ;;  %v33279_v2 = vld [vmem:[%s34917_s23 + $0x2060] sm:$0xff]  }
 0x44a   : > { %v30067_v16 = vpop.f32.mrf.mxu0  ;;  %30359 = vmatprep.subr.bf16.mxu0 %v33242_v8  ;;  %30380 = vmatpush3.bf16.msra.mxu1 %v33241_v5  ;;  %v33281_v5 = vld [vmem:[%s34917_s23 + $0x2020] sm:$0xff]   ;;  %v33283_v7 = vld [vmem:[%s34917_s23 + $0x2058] sm:$0xff]   ;;  %v33291_v15 = vld [vmem:[%s34917_s23 + $0x2048] sm:$0xff]  }
 0x44b   : > { %v36176_v18 = vadd.f32 %v30087_v13, %v22751_v12  ;;  %v30089_v20 = vpop.f32.mrf.mxu1  ;;  %30381 = vmatprep.subr.bf16.mxu1 %v33243_v11  ;;  %v33284_v8 = vld [vmem:[%s34917_s23 + $0x20d8] sm:$0xff]   ;;  %v33287_v11 = vld [vmem:[%s34917_s23 + $0x2050] sm:$0xff]   ;;  %v33292_v16 = vld [vmem:[%s34917_s23 + $0x20c8] sm:$0xff]  }
 0x44c   : > { %v33286_v10 = vld [vmem:[%s34917_s23 + $0x2098] sm:$0xff]   ;;  %v33288_v12 = vld [vmem:[%s34917_s23 + $0x20d0] sm:$0xff]   ;;  %v33296_v20 = vld [vmem:[%s34917_s23 + $0x20c0] sm:$0xff]  }
 0x44d   : > { %30360 = vmatpush3.bf16.msra.mxu0 %v33244_v14  ;;  %v33289_v13 = vld [vmem:[%s34917_s23 + $0x2010] sm:$0xff]  }
 0x44e   : > { %30361 = vmatprep.subr.bf16.mxu0 %v33246_v19  ;;  %30382 = vmatpush3.bf16.msra.mxu1 %v33245_v17  ;;  %v33290_v14 = vld [vmem:[%s34917_s23 + $0x2090] sm:$0xff]   ;;  %v33293_v17 = vld [vmem:[%s34917_s23 + $0x2008] sm:$0xff]   ;;  %v33295_v19 = vld [vmem:[%s34917_s23 + $0x2040] sm:$0xff]  }
 0x44f   : > { %30383 = vmatprep.subr.bf16.mxu1 %v33247_v21  ;;  %v33297_v21 = vld [vmem:[%s34917_s23 + $0x2000] sm:$0xff]  }
 0x451   : > { %30362 = vmatpush3.bf16.msra.mxu0 %v33248_v22  ;;  %v249_v22 = vld [vmem:[#allocation2 + $0x80] sm:$0xff] }
 0x452   : > { %30363 = vmatprep.subr.bf16.mxu0 %v33250_v24  ;;  %30384 = vmatpush3.bf16.msra.mxu1 %v33249_v23  ;;  %v33298_v23 = vld [vmem:[%s34917_s23 + $0x2080] sm:$0xff]   ;;  %v5711_v24 = vrot.slane %v249_v22, %v34953_v35 }
 0x453   : > { %30385 = vmatprep.subr.bf16.mxu1 %v33251_v25  ;;  %v5704_v25 = vcombine.high %v249_v22, %v249_v22  ;;  %v33336_v22 = vld [vmem:[%s34917_s23 + $0x2270] sm:$0xff]  }
 0x455   : > { %30364 = vmatpush3.bf16.msra.mxu0 %v33252_v26  ;;  %v33299_v26 = vld [vmem:[%s34917_s23 + $0x2178] sm:$0xff]  }
 0x456   : > { %30365 = vmatprep.subr.bf16.mxu0 %v33254_v28  ;;  %30386 = vmatpush3.bf16.msra.mxu1 %v33253_v27  ;;  %v5719_v27 = vcombine.high %v5711_v24, %v5711_v24  ;;  %v5727_v28 = vrot.slane %v5711_v24, %v34953_v35  ;;  %v33337_v24 = vld [vmem:[%s34917_s23 + $0x22f0] sm:$0xff]  }
 0x457   : > { %30387 = vmatprep.subr.bf16.mxu1 %v33255_v29  ;;  %v33300_v29 = vld [vmem:[%s34917_s23 + $0x21f8] sm:$0xff]  }
 0x459   : > { %30366 = vmatpush3.bf16.msra.mxu0 %v33256_v30  ;;  %v36240_v30 = vrot.slane %v5704_v25, %v34953_v35  ;;  %v33338_v25 = vld [vmem:[%s34917_s23 + $0x2230] sm:$0xff]  }
 0x45a   : > { %30367 = vmatprep.subr.bf16.mxu0 %v33258_v32  ;;  %30388 = vmatpush3.bf16.msra.mxu1 %v33257_v31  ;;  %v33301_v31 = vld [vmem:[%s34917_s23 + $0x2138] sm:$0xff]   ;;  %v5741_v32 = vrot.slane %v5719_v27, %v34953_v35 }
 0x45b   : > { %30389 = vmatprep.subr.bf16.mxu1 %v33259_v33  ;;  %v33302_v33 = vld [vmem:[%s34917_s23 + $0x21b8] sm:$0xff]  }
 0x45d   : > { %30368 = vmatpush3.bf16.msra.mxu0 %v33260_v34  ;;  %v5720_v34 = vcombine.high %v36240_v30, %v36240_v30 }
 0x45e   : > { %30369 = vmatprep.subr.bf16.mxu0 %v33262_v37  ;;  %30390 = vmatpush3.bf16.msra.mxu1 %v33261_v36  ;;  %v5749_v36 = vcombine.high %v5727_v28, %v5727_v28  ;;  %v33303_v37 = vld [vmem:[%s34917_s23 + $0x2170] sm:$0xff]  }
 0x45f   : > { %30391 = vmatprep.subr.bf16.mxu1 %v33263_v38  ;;  %v5751_v38 = vcombine.high %v5741_v32, %v5741_v32 }
 0x461   : > { %30370 = vmatpush3.bf16.msra.mxu0 %v33264_v39 }
 0x462   : > { %30399 = vmatprep.subr.bf16.mxu0 %v33267_v42  ;;  %30392 = vmatpush3.bf16.msra.mxu1 %v33265_v40  ;;  %v33304_v40 = vld [vmem:[%s34917_s23 + $0x21f0] sm:$0xff]  }
 0x463   : > { %30421 = vmatprep.subr.bf16.mxu1 %v33268_v43  ;;  %v33305_v42 = vld [vmem:[%s34917_s23 + $0x2130] sm:$0xff]  }
 0x464   : > { %v30107_v48 = vpop.f32.mrf.mxu0  ;;  %23309 = vmatmul.mubr.bf16.vlgmr.msra.gmra.mxu0 %v5685_v41  ;;  %v5748_v41 = vrot.slane %v5720_v34, %v34953_v35 }
 0x465   : > { %v30129_v51 = vpop.f32.mrf.mxu1  ;;  %30400 = vmatpush3.bf16.msra.mxu0 %v33269_v44  ;;  %23349 = vmatmul.mubr.bf16.vlgmr.msra.gmra.mxu1 %v5701_v46 }
 0x466   : > { %v30108_v52 = vpop.f32.mrf.mxu0  ;;  %30401 = vmatprep.subr.bf16.mxu0 %v33271_v47  ;;  %30422 = vmatpush3.bf16.msra.mxu1 %v33270_v45  ;;  %v33306_v45 = vld [vmem:[%s34917_s23 + $0x21b0] sm:$0xff]   ;;  %v5752_v46 = vcombine.high %v5748_v41, %v5748_v41 }
 0x467   : > { %v30109_v54 = vadd.f32 %v30108_v52, %v30107_v48  ;;  %v30130_v56 = vpop.f32.mrf.mxu1  ;;  %30423 = vmatprep.subr.bf16.mxu1 %v33272_v49  ;;  %23388 = vmatprep.mubr.bf16.mxu0 %v5741_v32  ;;  %v33307_v48 = vld [vmem:[%s34917_s23 + $0x2168] sm:$0xff]  }
 0x468   : > { %v30110_v57 = vpop.f32.mrf.mxu0  ;;  %v30131_v60 = vadd.f32 %v30130_v56, %v30129_v51  ;;  %23428 = vmatprep.mubr.bf16.mxu1 %v5751_v38  ;;  %v33308_v51 = vld [vmem:[%s34917_s23 + $0x21e8] sm:$0xff]  }
 0x469   : > { %v22831_v59 = vadd.f32 %v30109_v54, %v36176_v18  ;;  %v30132_v62 = vpop.f32.mrf.mxu1  ;;  %30402 = vmatpush3.bf16.msra.mxu0 %v33273_v50  ;;  %v33294_v18 = vld [vmem:[%s34917_s23 + $0x2088] sm:$0xff]  }
 0x46a   : > { %v30111_v63 = vpop.f32.mrf.mxu0  ;;  %30403 = vmatprep.subr.bf16.mxu0 %v33275_v55  ;;  %30424 = vmatpush3.bf16.msra.mxu1 %v33274_v53  ;;  %v33309_v54 = vld [vmem:[%s34917_s23 + $0x2128] sm:$0xff]   ;;  %v33313_v62 = vld [vmem:[%s34917_s23 + $0x2120] sm:$0xff]  }
 0x46b   : > { %v36213_v1 = vadd.f32 %v30131_v60, %v22831_v59  ;;  %v30133_v3 = vpop.f32.mrf.mxu1  ;;  %30425 = vmatprep.subr.bf16.mxu1 %v33276_v58  ;;  %v33310_v57 = vld [vmem:[%s34917_s23 + $0x21a8] sm:$0xff]   ;;  %v33311_v59 = vld [vmem:[%s34917_s23 + $0x2160] sm:$0xff]  }
 0x46c   : > { %v33314_v63 = vld [vmem:[%s34917_s23 + $0x21a0] sm:$0xff]   ;;  %v33318_v3 = vld [vmem:[%s34917_s23 + $0x2198] sm:$0xff]  }
 0x46d   : > { %30404 = vmatpush3.bf16.msra.mxu0 %v33277_v61  ;;  %v33312_v61 = vld [vmem:[%s34917_s23 + $0x21e0] sm:$0xff]  }
 0x46e   : > { %30405 = vmatprep.subr.bf16.mxu0 %v33279_v2  ;;  %30426 = vmatpush3.bf16.msra.mxu1 %v33278_v0  ;;  %v33315_v0 = vld [vmem:[%s34917_s23 + $0x2158] sm:$0xff]  }
 0x46f   : > { %30427 = vmatprep.subr.bf16.mxu1 %v33280_v4  ;;  %v33317_v2 = vld [vmem:[%s34917_s23 + $0x2118] sm:$0xff]   ;;  %v33319_v4 = vld [vmem:[%s34917_s23 + $0x2150] sm:$0xff]  }
 0x471   : > { %30406 = vmatpush3.bf16.msra.mxu0 %v33281_v5  ;;  %v33320_v5 = vld [vmem:[%s34917_s23 + $0x21d0] sm:$0xff]  }
 0x472   : > { %30407 = vmatprep.subr.bf16.mxu0 %v33283_v7  ;;  %30428 = vmatpush3.bf16.msra.mxu1 %v33282_v6  ;;  %v33321_v6 = vld [vmem:[%s34917_s23 + $0x2110] sm:$0xff]  }
 0x473   : > { %30429 = vmatprep.subr.bf16.mxu1 %v33284_v8  ;;  %v33322_v7 = vld [vmem:[%s34917_s23 + $0x2190] sm:$0xff]   ;;  %v33323_v8 = vld [vmem:[%s34917_s23 + $0x2148] sm:$0xff]  }
 0x475   : > { %30408 = vmatpush3.bf16.msra.mxu0 %v33285_v9  ;;  %v33324_v9 = vld [vmem:[%s34917_s23 + $0x21c8] sm:$0xff]  }
 0x476   : > { %30409 = vmatprep.subr.bf16.mxu0 %v33287_v11  ;;  %30430 = vmatpush3.bf16.msra.mxu1 %v33286_v10  ;;  %v33325_v10 = vld [vmem:[%s34917_s23 + $0x2108] sm:$0xff]  }
 0x477   : > { %30431 = vmatprep.subr.bf16.mxu1 %v33288_v12  ;;  %v33326_v11 = vld [vmem:[%s34917_s23 + $0x2188] sm:$0xff]   ;;  %v33327_v12 = vld [vmem:[%s34917_s23 + $0x2140] sm:$0xff]  }
 0x479   : > { %30410 = vmatpush3.bf16.msra.mxu0 %v33289_v13  ;;  %v33328_v13 = vld [vmem:[%s34917_s23 + $0x21c0] sm:$0xff]  }
 0x47a   : > { %30411 = vmatprep.subr.bf16.mxu0 %v33291_v15  ;;  %30432 = vmatpush3.bf16.msra.mxu1 %v33290_v14  ;;  %v33329_v14 = vld [vmem:[%s34917_s23 + $0x2100] sm:$0xff]  }
 0x47b   : > { %30433 = vmatprep.subr.bf16.mxu1 %v33292_v16  ;;  %v33330_v15 = vld [vmem:[%s34917_s23 + $0x2180] sm:$0xff]   ;;  %v5734_v16 = vrot.slane %v36240_v30, %v34953_v35  ;;  %v33340_v30 = vld [vmem:[%s34917_s23 + $0x2268] sm:$0xff]  }
 0x47d   : > { %30412 = vmatpush3.bf16.msra.mxu0 %v33293_v17  ;;  %v33332_v17 = vld [vmem:[%s34917_s23 + $0x2278] sm:$0xff]  }
 0x47e   : > { %30413 = vmatprep.subr.bf16.mxu0 %v33295_v19  ;;  %30434 = vmatpush3.bf16.msra.mxu1 %v33294_v18  ;;  %v33333_v18 = vld [vmem:[%s34917_s23 + $0x22f8] sm:$0xff]  }
 0x47f   : > { %30435 = vmatprep.subr.bf16.mxu1 %v33296_v20  ;;  %v33334_v19 = vld [vmem:[%s34917_s23 + $0x2238] sm:$0xff]  }
 0x480   : > { %v33335_v20 = vld [vmem:[%s34917_s23 + $0x22b8] sm:$0xff]  }
 0x481   : > { %30414 = vmatpush3.bf16.msra.mxu0 %v33297_v21  ;;  %v5750_v21 = vcombine.high %v5734_v16, %v5734_v16 }
 0x482   : > { %30443 = vmatprep.subr.bf16.mxu0 %v33299_v26  ;;  %30436 = vmatpush3.bf16.msra.mxu1 %v33298_v23 }
 0x483   : > { %30465 = vmatprep.subr.bf16.mxu1 %v33300_v29 }
 0x484   : > { %v30151_v39 = vpop.f32.mrf.mxu0  ;;  %23389 = vmatmul.mubr.bf16.vlgmr.msra.gmra.mxu0 %v5727_v28  ;;  %v33339_v28 = vld [vmem:[%s34917_s23 + $0x22b0] sm:$0xff]  }
 0x485   : > { %v30173_v43 = vpop.f32.mrf.mxu1  ;;  %30444 = vmatpush3.bf16.msra.mxu0 %v33301_v31  ;;  %23429 = vmatmul.mubr.bf16.vlgmr.msra.gmra.mxu1 %v5749_v36 }
 0x486   : > { %v30152_v44 = vpop.f32.mrf.mxu0  ;;  %30445 = vmatprep.subr.bf16.mxu0 %v33303_v37  ;;  %30466 = vmatpush3.bf16.msra.mxu1 %v33302_v33  ;;  %v33341_v33 = vld [vmem:[%s34917_s23 + $0x22e8] sm:$0xff]  }
 0x487   : > { %v30153_v47 = vadd.f32 %v30152_v44, %v30151_v39  ;;  %v30174_v49 = vpop.f32.mrf.mxu1  ;;  %23468 = vmatprep.mubr.bf16.mxu0 %v5748_v41  ;;  %30467 = vmatprep.subr.bf16.mxu1 %v33304_v40  ;;  %v33342_v37 = vld [vmem:[%s34917_s23 + $0x2228] sm:$0xff]   ;;  %v33345_v44 = vld [vmem:[%s34917_s23 + $0x22e0] sm:$0xff]  }
 0x488   : > { %v30154_v50 = vpop.f32.mrf.mxu0  ;;  %v30175_v53 = vadd.f32 %v30174_v49, %v30173_v43  ;;  %23508 = vmatprep.mubr.bf16.mxu1 %v5752_v46  ;;  %v33343_v40 = vld [vmem:[%s34917_s23 + $0x22a8] sm:$0xff]   ;;  %v33347_v46 = vld [vmem:[%s34917_s23 + $0x22a0] sm:$0xff]   ;;  %v33350_v49 = vld [vmem:[%s34917_s23 + $0x2218] sm:$0xff]  }
 0x489   : > { %v22911_v52 = vadd.f32 %v30153_v47, %v36213_v1  ;;  %v30176_v55 = vpop.f32.mrf.mxu1  ;;  %30446 = vmatpush3.bf16.msra.mxu0 %v33305_v42  ;;  %v33316_v1 = vld [vmem:[%s34917_s23 + $0x21d8] sm:$0xff]   ;;  %v33344_v42 = vld [vmem:[%s34917_s23 + $0x2260] sm:$0xff]  }
 0x48a   : > { %v30155_v56 = vpop.f32.mrf.mxu0  ;;  %30447 = vmatprep.subr.bf16.mxu0 %v33307_v48  ;;  %30468 = vmatpush3.bf16.msra.mxu1 %v33306_v45  ;;  %v33346_v45 = vld [vmem:[%s34917_s23 + $0x2220] sm:$0xff]   ;;  %v33348_v47 = vld [vmem:[%s34917_s23 + $0x2258] sm:$0xff]   ;;  %v33356_v55 = vld [vmem:[%s34917_s23 + $0x2248] sm:$0xff]  }
 0x48b   : > { %v36257_v58 = vadd.f32 %v30175_v53, %v22911_v52  ;;  %v30177_v60 = vpop.f32.mrf.mxu1  ;;  %30469 = vmatprep.subr.bf16.mxu1 %v33308_v51  ;;  %v33349_v48 = vld [vmem:[%s34917_s23 + $0x22d8] sm:$0xff]   ;;  %v33352_v51 = vld [vmem:[%s34917_s23 + $0x2250] sm:$0xff]   ;;  %v33357_v56 = vld [vmem:[%s34917_s23 + $0x22c8] sm:$0xff]  }
 0x48c   : > { %v33351_v50 = vld [vmem:[%s34917_s23 + $0x2298] sm:$0xff]   ;;  %v33353_v52 = vld [vmem:[%s34917_s23 + $0x22d0] sm:$0xff]   ;;  %v33361_v60 = vld [vmem:[%s34917_s23 + $0x22c0] sm:$0xff]  }
 0x48d   : > { %30448 = vmatpush3.bf16.msra.mxu0 %v33309_v54  ;;  %v33354_v53 = vld [vmem:[%s34917_s23 + $0x2210] sm:$0xff]  }
 0x48e   : > { %30449 = vmatprep.subr.bf16.mxu0 %v33311_v59  ;;  %30470 = vmatpush3.bf16.msra.mxu1 %v33310_v57  ;;  %v33355_v54 = vld [vmem:[%s34917_s23 + $0x2290] sm:$0xff]   ;;  %v33358_v57 = vld [vmem:[%s34917_s23 + $0x2208] sm:$0xff]   ;;  %v33360_v59 = vld [vmem:[%s34917_s23 + $0x2240] sm:$0xff]  }
 0x48f   : > { %30471 = vmatprep.subr.bf16.mxu1 %v33312_v61  ;;  %v33362_v61 = vld [vmem:[%s34917_s23 + $0x2200] sm:$0xff]  }
 0x491   : > { %30450 = vmatpush3.bf16.msra.mxu0 %v33313_v62  ;;  %v250_v62 = vld [vmem:[#allocation2 + $0x88] sm:$0xff] }
 0x492   : > { %30451 = vmatprep.subr.bf16.mxu0 %v33315_v0  ;;  %30472 = vmatpush3.bf16.msra.mxu1 %v33314_v63  ;;  %v5760_v63 = vrot.slane %v250_v62, %v34953_v35  ;;  %v33364_v0 = vld [vmem:[%s34917_s23 + $0x2378] sm:$0xff]  }
 0x493   : > { %30473 = vmatprep.subr.bf16.mxu1 %v33316_v1  ;;  %v5753_v1 = vcombine.high %v250_v62, %v250_v62  ;;  %v33401_v62 = vld [vmem:[%s34917_s23 + $0x2470] sm:$0xff]  }
 0x495   : > { %30452 = vmatpush3.bf16.msra.mxu0 %v33317_v2  ;;  %v33363_v2 = vld [vmem:[%s34917_s23 + $0x2280] sm:$0xff]  }
 0x496   : > { %30453 = vmatprep.subr.bf16.mxu0 %v33319_v4  ;;  %30474 = vmatpush3.bf16.msra.mxu1 %v33318_v3  ;;  %v5768_v3 = vcombine.high %v5760_v63, %v5760_v63  ;;  %v5776_v4 = vrot.slane %v5760_v63, %v34953_v35 }
 0x497   : > { %30475 = vmatprep.subr.bf16.mxu1 %v33320_v5  ;;  %v33365_v5 = vld [vmem:[%s34917_s23 + $0x23f8] sm:$0xff]  }
 0x499   : > { %30454 = vmatpush3.bf16.msra.mxu0 %v33321_v6  ;;  %v36321_v6 = vrot.slane %v5753_v1, %v34953_v35  ;;  %v33403_v1 = vld [vmem:[%s34917_s23 + $0x2430] sm:$0xff]  }
 0x49a   : > { %30455 = vmatprep.subr.bf16.mxu0 %v33323_v8  ;;  %30476 = vmatpush3.bf16.msra.mxu1 %v33322_v7  ;;  %v33366_v7 = vld [vmem:[%s34917_s23 + $0x2338] sm:$0xff]   ;;  %v5790_v8 = vrot.slane %v5768_v3, %v34953_v35 }
 0x49b   : > { %30477 = vmatprep.subr.bf16.mxu1 %v33324_v9  ;;  %v33367_v9 = vld [vmem:[%s34917_s23 + $0x23b8] sm:$0xff]  }
 0x49d   : > { %30456 = vmatpush3.bf16.msra.mxu0 %v33325_v10  ;;  %v5769_v10 = vcombine.high %v36321_v6, %v36321_v6 }
 0x49e   : > { %30457 = vmatprep.subr.bf16.mxu0 %v33327_v12  ;;  %30478 = vmatpush3.bf16.msra.mxu1 %v33326_v11  ;;  %v5798_v11 = vcombine.high %v5776_v4, %v5776_v4  ;;  %v33368_v12 = vld [vmem:[%s34917_s23 + $0x2370] sm:$0xff]  }
 0x49f   : > { %30479 = vmatprep.subr.bf16.mxu1 %v33328_v13  ;;  %v5800_v13 = vcombine.high %v5790_v8, %v5790_v8 }
 0x4a1   : > { %30458 = vmatpush3.bf16.msra.mxu0 %v33329_v14 }
 0x4a2   : > { %30487 = vmatprep.subr.bf16.mxu0 %v33332_v17  ;;  %30480 = vmatpush3.bf16.msra.mxu1 %v33330_v15  ;;  %v33369_v15 = vld [vmem:[%s34917_s23 + $0x23f0] sm:$0xff]  }
 0x4a3   : > { %30509 = vmatprep.subr.bf16.mxu1 %v33333_v18  ;;  %v33370_v17 = vld [vmem:[%s34917_s23 + $0x2330] sm:$0xff]  }
 0x4a4   : > { %v30195_v23 = vpop.f32.mrf.mxu0  ;;  %23469 = vmatmul.mubr.bf16.vlgmr.msra.gmra.mxu0 %v5734_v16  ;;  %v5797_v16 = vrot.slane %v5769_v10, %v34953_v35 }
 0x4a5   : > { %v30217_v26 = vpop.f32.mrf.mxu1  ;;  %30488 = vmatpush3.bf16.msra.mxu0 %v33334_v19  ;;  %23509 = vmatmul.mubr.bf16.vlgmr.msra.gmra.mxu1 %v5750_v21 }
 0x4a6   : > { %v30196_v27 = vpop.f32.mrf.mxu0  ;;  %30489 = vmatprep.subr.bf16.mxu0 %v33336_v22  ;;  %30510 = vmatpush3.bf16.msra.mxu1 %v33335_v20  ;;  %v33371_v20 = vld [vmem:[%s34917_s23 + $0x23b0] sm:$0xff]   ;;  %v5801_v21 = vcombine.high %v5797_v16, %v5797_v16 }
 0x4a7   : > { %v30197_v29 = vadd.f32 %v30196_v27, %v30195_v23  ;;  %v30218_v31 = vpop.f32.mrf.mxu1  ;;  %30511 = vmatprep.subr.bf16.mxu1 %v33337_v24  ;;  %23548 = vmatprep.mubr.bf16.mxu0 %v5790_v8  ;;  %v33372_v23 = vld [vmem:[%s34917_s23 + $0x2368] sm:$0xff]  }
 0x4a8   : > { %v30198_v32 = vpop.f32.mrf.mxu0  ;;  %v30219_v36 = vadd.f32 %v30218_v31, %v30217_v26  ;;  %23588 = vmatprep.mubr.bf16.mxu1 %v5800_v13  ;;  %v33373_v26 = vld [vmem:[%s34917_s23 + $0x23e8] sm:$0xff]  }
 0x4a9   : > { %v22991_v34 = vadd.f32 %v30197_v29, %v36257_v58  ;;  %v30220_v38 = vpop.f32.mrf.mxu1  ;;  %30490 = vmatpush3.bf16.msra.mxu0 %v33338_v25  ;;  %v33359_v58 = vld [vmem:[%s34917_s23 + $0x2288] sm:$0xff]  }
 0x4aa   : > { %v30199_v39 = vpop.f32.mrf.mxu0  ;;  %30491 = vmatprep.subr.bf16.mxu0 %v33340_v30  ;;  %30512 = vmatpush3.bf16.msra.mxu1 %v33339_v28  ;;  %v33374_v29 = vld [vmem:[%s34917_s23 + $0x2328] sm:$0xff]   ;;  %v33378_v38 = vld [vmem:[%s34917_s23 + $0x2320] sm:$0xff]  }
 0x4ab   : > { %v36294_v41 = vadd.f32 %v30219_v36, %v22991_v34  ;;  %v30221_v43 = vpop.f32.mrf.mxu1  ;;  %30513 = vmatprep.subr.bf16.mxu1 %v33341_v33  ;;  %v33375_v32 = vld [vmem:[%s34917_s23 + $0x23a8] sm:$0xff]   ;;  %v33376_v34 = vld [vmem:[%s34917_s23 + $0x2360] sm:$0xff]  }
 0x4ac   : > { %v33379_v39 = vld [vmem:[%s34917_s23 + $0x23a0] sm:$0xff]   ;;  %v33383_v43 = vld [vmem:[%s34917_s23 + $0x2398] sm:$0xff]  }
 0x4ad   : > { %30492 = vmatpush3.bf16.msra.mxu0 %v33342_v37  ;;  %v33377_v37 = vld [vmem:[%s34917_s23 + $0x23e0] sm:$0xff]  }
 0x4ae   : > { %30493 = vmatprep.subr.bf16.mxu0 %v33344_v42  ;;  %30514 = vmatpush3.bf16.msra.mxu1 %v33343_v40  ;;  %v33380_v40 = vld [vmem:[%s34917_s23 + $0x2358] sm:$0xff]  }
 0x4af   : > { %30515 = vmatprep.subr.bf16.mxu1 %v33345_v44  ;;  %v33382_v42 = vld [vmem:[%s34917_s23 + $0x2318] sm:$0xff]   ;;  %v33384_v44 = vld [vmem:[%s34917_s23 + $0x2350] sm:$0xff]  }
 0x4b1   : > { %30494 = vmatpush3.bf16.msra.mxu0 %v33346_v45  ;;  %v33385_v45 = vld [vmem:[%s34917_s23 + $0x23d0] sm:$0xff]  }
 0x4b2   : > { %30495 = vmatprep.subr.bf16.mxu0 %v33348_v47  ;;  %30516 = vmatpush3.bf16.msra.mxu1 %v33347_v46  ;;  %v33386_v46 = vld [vmem:[%s34917_s23 + $0x2310] sm:$0xff]  }
 0x4b3   : > { %30517 = vmatprep.subr.bf16.mxu1 %v33349_v48  ;;  %v33387_v47 = vld [vmem:[%s34917_s23 + $0x2390] sm:$0xff]   ;;  %v33388_v48 = vld [vmem:[%s34917_s23 + $0x2348] sm:$0xff]  }
 0x4b5   : > { %30496 = vmatpush3.bf16.msra.mxu0 %v33350_v49  ;;  %v33389_v49 = vld [vmem:[%s34917_s23 + $0x23c8] sm:$0xff]  }
 0x4b6   : > { %30497 = vmatprep.subr.bf16.mxu0 %v33352_v51  ;;  %30518 = vmatpush3.bf16.msra.mxu1 %v33351_v50  ;;  %v33390_v50 = vld [vmem:[%s34917_s23 + $0x2308] sm:$0xff]  }
 0x4b7   : > { %30519 = vmatprep.subr.bf16.mxu1 %v33353_v52  ;;  %v33391_v51 = vld [vmem:[%s34917_s23 + $0x2388] sm:$0xff]   ;;  %v33392_v52 = vld [vmem:[%s34917_s23 + $0x2340] sm:$0xff]  }
 0x4b9   : > { %30498 = vmatpush3.bf16.msra.mxu0 %v33354_v53  ;;  %v33393_v53 = vld [vmem:[%s34917_s23 + $0x23c0] sm:$0xff]  }
 0x4ba   : > { %30499 = vmatprep.subr.bf16.mxu0 %v33356_v55  ;;  %30520 = vmatpush3.bf16.msra.mxu1 %v33355_v54  ;;  %v33394_v54 = vld [vmem:[%s34917_s23 + $0x2300] sm:$0xff]  }
 0x4bb   : > { %30521 = vmatprep.subr.bf16.mxu1 %v33357_v56  ;;  %v33395_v55 = vld [vmem:[%s34917_s23 + $0x2380] sm:$0xff]   ;;  %v5783_v56 = vrot.slane %v36321_v6, %v34953_v35  ;;  %v33405_v6 = vld [vmem:[%s34917_s23 + $0x2468] sm:$0xff]  }
 0x4bd   : > { %30500 = vmatpush3.bf16.msra.mxu0 %v33358_v57  ;;  %v33397_v57 = vld [vmem:[%s34917_s23 + $0x2478] sm:$0xff]  }
 0x4be   : > { %30501 = vmatprep.subr.bf16.mxu0 %v33360_v59  ;;  %30522 = vmatpush3.bf16.msra.mxu1 %v33359_v58  ;;  %v33398_v58 = vld [vmem:[%s34917_s23 + $0x24f8] sm:$0xff]  }
 0x4bf   : > { %30523 = vmatprep.subr.bf16.mxu1 %v33361_v60  ;;  %v33399_v59 = vld [vmem:[%s34917_s23 + $0x2438] sm:$0xff]  }
 0x4c0   : > { %v33400_v60 = vld [vmem:[%s34917_s23 + $0x24b8] sm:$0xff]  }
 0x4c1   : > { %30502 = vmatpush3.bf16.msra.mxu0 %v33362_v61  ;;  %v5799_v61 = vcombine.high %v5783_v56, %v5783_v56 }
 0x4c2   : > { %30531 = vmatprep.subr.bf16.mxu0 %v33364_v0  ;;  %30524 = vmatpush3.bf16.msra.mxu1 %v33363_v2  ;;  %v33402_v0 = vld [vmem:[%s34917_s23 + $0x24f0] sm:$0xff]  }
 0x4c3   : > { %30553 = vmatprep.subr.bf16.mxu1 %v33365_v5 }
 0x4c4   : > { %v30239_v14 = vpop.f32.mrf.mxu0  ;;  %23549 = vmatmul.mubr.bf16.vlgmr.msra.gmra.mxu0 %v5776_v4  ;;  %v33404_v4 = vld [vmem:[%s34917_s23 + $0x24b0] sm:$0xff]  }
 0x4c5   : > { %v30261_v18 = vpop.f32.mrf.mxu1  ;;  %30532 = vmatpush3.bf16.msra.mxu0 %v33366_v7  ;;  %23589 = vmatmul.mubr.bf16.vlgmr.msra.gmra.mxu1 %v5798_v11 }
 0x4c6   : > { %v30240_v19 = vpop.f32.mrf.mxu0  ;;  %30533 = vmatprep.subr.bf16.mxu0 %v33368_v12  ;;  %30554 = vmatpush3.bf16.msra.mxu1 %v33367_v9  ;;  %v33406_v9 = vld [vmem:[%s34917_s23 + $0x24e8] sm:$0xff]  }
 0x4c7   : > { %v30241_v22 = vadd.f32 %v30240_v19, %v30239_v14  ;;  %v30262_v24 = vpop.f32.mrf.mxu1  ;;  %23628 = vmatprep.mubr.bf16.mxu0 %v5797_v16  ;;  %30555 = vmatprep.subr.bf16.mxu1 %v33369_v15  ;;  %v33407_v12 = vld [vmem:[%s34917_s23 + $0x2428] sm:$0xff]   ;;  %v33410_v19 = vld [vmem:[%s34917_s23 + $0x24e0] sm:$0xff]  }
 0x4c8   : > { %v30242_v25 = vpop.f32.mrf.mxu0  ;;  %v30263_v28 = vadd.f32 %v30262_v24, %v30261_v18  ;;  %23668 = vmatprep.mubr.bf16.mxu1 %v5801_v21  ;;  %v33408_v15 = vld [vmem:[%s34917_s23 + $0x24a8] sm:$0xff]   ;;  %v33412_v21 = vld [vmem:[%s34917_s23 + $0x24a0] sm:$0xff]   ;;  %v33415_v24 = vld [vmem:[%s34917_s23 + $0x2418] sm:$0xff]  }
 0x4c9   : > { %v23071_v27 = vadd.f32 %v30241_v22, %v36294_v41  ;;  %v30264_v30 = vpop.f32.mrf.mxu1  ;;  %30534 = vmatpush3.bf16.msra.mxu0 %v33370_v17  ;;  %v33381_v41 = vld [vmem:[%s34917_s23 + $0x23d8] sm:$0xff]   ;;  %v33409_v17 = vld [vmem:[%s34917_s23 + $0x2460] sm:$0xff]  }
 0x4ca   : > { %v30243_v31 = vpop.f32.mrf.mxu0  ;;  %30535 = vmatprep.subr.bf16.mxu0 %v33372_v23  ;;  %30556 = vmatpush3.bf16.msra.mxu1 %v33371_v20  ;;  %v33411_v20 = vld [vmem:[%s34917_s23 + $0x2420] sm:$0xff]   ;;  %v33413_v22 = vld [vmem:[%s34917_s23 + $0x2458] sm:$0xff]   ;;  %v33421_v30 = vld [vmem:[%s34917_s23 + $0x2448] sm:$0xff]  }
 0x4cb   : > { %v36338_v33 = vadd.f32 %v30263_v28, %v23071_v27  ;;  %v30265_v36 = vpop.f32.mrf.mxu1  ;;  %30557 = vmatprep.subr.bf16.mxu1 %v33373_v26  ;;  %v33414_v23 = vld [vmem:[%s34917_s23 + $0x24d8] sm:$0xff]   ;;  %v33417_v26 = vld [vmem:[%s34917_s23 + $0x2450] sm:$0xff]   ;;  %v33422_v31 = vld [vmem:[%s34917_s23 + $0x24c8] sm:$0xff]  }
 0x4cc   : > { %v33416_v25 = vld [vmem:[%s34917_s23 + $0x2498] sm:$0xff]   ;;  %v33418_v27 = vld [vmem:[%s34917_s23 + $0x24d0] sm:$0xff]   ;;  %v33426_v36 = vld [vmem:[%s34917_s23 + $0x24c0] sm:$0xff]  }
 0x4cd   : > { %30536 = vmatpush3.bf16.msra.mxu0 %v33374_v29  ;;  %v33419_v28 = vld [vmem:[%s34917_s23 + $0x2410] sm:$0xff]  }
 0x4ce   : > { %30537 = vmatprep.subr.bf16.mxu0 %v33376_v34  ;;  %30558 = vmatpush3.bf16.msra.mxu1 %v33375_v32  ;;  %v33420_v29 = vld [vmem:[%s34917_s23 + $0x2490] sm:$0xff]   ;;  %v33423_v32 = vld [vmem:[%s34917_s23 + $0x2408] sm:$0xff]   ;;  %v33425_v34 = vld [vmem:[%s34917_s23 + $0x2440] sm:$0xff]  }
 0x4cf   : > { %30559 = vmatprep.subr.bf16.mxu1 %v33377_v37  ;;  %v33427_v37 = vld [vmem:[%s34917_s23 + $0x2400] sm:$0xff]  }
 0x4d1   : > { %30538 = vmatpush3.bf16.msra.mxu0 %v33378_v38  ;;  %v251_v38 = vld [vmem:[#allocation2 + $0x90] sm:$0xff] }
 0x4d2   : > { %30539 = vmatprep.subr.bf16.mxu0 %v33380_v40  ;;  %30560 = vmatpush3.bf16.msra.mxu1 %v33379_v39  ;;  %v33428_v39 = vld [vmem:[%s34917_s23 + $0x2480] sm:$0xff]   ;;  %v5809_v40 = vrot.slane %v251_v38, %v34953_v35 }
 0x4d3   : > { %30561 = vmatprep.subr.bf16.mxu1 %v33381_v41  ;;  %v5802_v41 = vcombine.high %v251_v38, %v251_v38  ;;  %v33466_v38 = vld [vmem:[%s34917_s23 + $0x2670] sm:$0xff]  }
 0x4d5   : > { %30540 = vmatpush3.bf16.msra.mxu0 %v33382_v42  ;;  %v33429_v42 = vld [vmem:[%s34917_s23 + $0x2578] sm:$0xff]  }
 0x4d6   : > { %30541 = vmatprep.subr.bf16.mxu0 %v33384_v44  ;;  %30562 = vmatpush3.bf16.msra.mxu1 %v33383_v43  ;;  %v5817_v43 = vcombine.high %v5809_v40, %v5809_v40  ;;  %v5825_v44 = vrot.slane %v5809_v40, %v34953_v35  ;;  %v33467_v40 = vld [vmem:[%s34917_s23 + $0x26f0] sm:$0xff]  }
 0x4d7   : > { %30563 = vmatprep.subr.bf16.mxu1 %v33385_v45  ;;  %v33430_v45 = vld [vmem:[%s34917_s23 + $0x25f8] sm:$0xff]  }
 0x4d9   : > { %30542 = vmatpush3.bf16.msra.mxu0 %v33386_v46  ;;  %v36402_v46 = vrot.slane %v5802_v41, %v34953_v35  ;;  %v33468_v41 = vld [vmem:[%s34917_s23 + $0x2630] sm:$0xff]  }
 0x4da   : > { %30543 = vmatprep.subr.bf16.mxu0 %v33388_v48  ;;  %30564 = vmatpush3.bf16.msra.mxu1 %v33387_v47  ;;  %v33431_v47 = vld [vmem:[%s34917_s23 + $0x2538] sm:$0xff]   ;;  %v5839_v48 = vrot.slane %v5817_v43, %v34953_v35 }
 0x4db   : > { %30565 = vmatprep.subr.bf16.mxu1 %v33389_v49  ;;  %v33432_v49 = vld [vmem:[%s34917_s23 + $0x25b8] sm:$0xff]  }
 0x4dd   : > { %30544 = vmatpush3.bf16.msra.mxu0 %v33390_v50  ;;  %v5818_v50 = vcombine.high %v36402_v46, %v36402_v46 }
 0x4de   : > { %30545 = vmatprep.subr.bf16.mxu0 %v33392_v52  ;;  %30566 = vmatpush3.bf16.msra.mxu1 %v33391_v51  ;;  %v5847_v51 = vcombine.high %v5825_v44, %v5825_v44  ;;  %v33433_v52 = vld [vmem:[%s34917_s23 + $0x2570] sm:$0xff]  }
 0x4df   : > { %30567 = vmatprep.subr.bf16.mxu1 %v33393_v53  ;;  %v5849_v53 = vcombine.high %v5839_v48, %v5839_v48 }
 0x4e1   : > { %30546 = vmatpush3.bf16.msra.mxu0 %v33394_v54 }
 0x4e2   : > { %30575 = vmatprep.subr.bf16.mxu0 %v33397_v57  ;;  %30568 = vmatpush3.bf16.msra.mxu1 %v33395_v55  ;;  %v33434_v55 = vld [vmem:[%s34917_s23 + $0x25f0] sm:$0xff]  }
 0x4e3   : > { %30597 = vmatprep.subr.bf16.mxu1 %v33398_v58  ;;  %v33435_v57 = vld [vmem:[%s34917_s23 + $0x2530] sm:$0xff]  }
 0x4e4   : > { %v30283_v63 = vpop.f32.mrf.mxu0  ;;  %23629 = vmatmul.mubr.bf16.vlgmr.msra.gmra.mxu0 %v5783_v56  ;;  %v5846_v56 = vrot.slane %v5818_v50, %v34953_v35 }
 0x4e5   : > { %v30305_v2 = vpop.f32.mrf.mxu1  ;;  %30576 = vmatpush3.bf16.msra.mxu0 %v33399_v59  ;;  %23669 = vmatmul.mubr.bf16.vlgmr.msra.gmra.mxu1 %v5799_v61 }
 0x4e6   : > { %v30284_v3 = vpop.f32.mrf.mxu0  ;;  %30577 = vmatprep.subr.bf16.mxu0 %v33401_v62  ;;  %30598 = vmatpush3.bf16.msra.mxu1 %v33400_v60  ;;  %v33436_v60 = vld [vmem:[%s34917_s23 + $0x25b0] sm:$0xff]   ;;  %v5850_v61 = vcombine.high %v5846_v56, %v5846_v56 }
 0x4e7   : > { %v30285_v5 = vadd.f32 %v30284_v3, %v30283_v63  ;;  %v30306_v7 = vpop.f32.mrf.mxu1  ;;  %30599 = vmatprep.subr.bf16.mxu1 %v33402_v0  ;;  %23708 = vmatprep.mubr.bf16.mxu0 %v5839_v48  ;;  %v33437_v63 = vld [vmem:[%s34917_s23 + $0x2568] sm:$0xff]  }
 0x4e8   : > { %v30286_v8 = vpop.f32.mrf.mxu0  ;;  %v30307_v11 = vadd.f32 %v30306_v7, %v30305_v2  ;;  %23748 = vmatprep.mubr.bf16.mxu1 %v5849_v53  ;;  %v33438_v2 = vld [vmem:[%s34917_s23 + $0x25e8] sm:$0xff]  }
 0x4e9   : > { %v23151_v10 = vadd.f32 %v30285_v5, %v36338_v33  ;;  %v30308_v13 = vpop.f32.mrf.mxu1  ;;  %30578 = vmatpush3.bf16.msra.mxu0 %v33403_v1  ;;  %v33424_v33 = vld [vmem:[%s34917_s23 + $0x2488] sm:$0xff]  }
 0x4ea   : > { %v30287_v14 = vpop.f32.mrf.mxu0  ;;  %30579 = vmatprep.subr.bf16.mxu0 %v33405_v6  ;;  %30600 = vmatpush3.bf16.msra.mxu1 %v33404_v4  ;;  %v33439_v5 = vld [vmem:[%s34917_s23 + $0x2528] sm:$0xff]   ;;  %v33443_v13 = vld [vmem:[%s34917_s23 + $0x2520] sm:$0xff]  }
 0x4eb   : > { %v36375_v16 = vadd.f32 %v30307_v11, %v23151_v10  ;;  %v30309_v18 = vpop.f32.mrf.mxu1  ;;  %30601 = vmatprep.subr.bf16.mxu1 %v33406_v9  ;;  %v33440_v8 = vld [vmem:[%s34917_s23 + $0x25a8] sm:$0xff]   ;;  %v33441_v10 = vld [vmem:[%s34917_s23 + $0x2560] sm:$0xff]  }
 0x4ec   : > { %v33444_v14 = vld [vmem:[%s34917_s23 + $0x25a0] sm:$0xff]   ;;  %v33448_v18 = vld [vmem:[%s34917_s23 + $0x2598] sm:$0xff]  }
 0x4ed   : > { %30580 = vmatpush3.bf16.msra.mxu0 %v33407_v12  ;;  %v33442_v12 = vld [vmem:[%s34917_s23 + $0x25e0] sm:$0xff]  }
 0x4ee   : > { %30581 = vmatprep.subr.bf16.mxu0 %v33409_v17  ;;  %30602 = vmatpush3.bf16.msra.mxu1 %v33408_v15  ;;  %v33445_v15 = vld [vmem:[%s34917_s23 + $0x2558] sm:$0xff]  }
 0x4ef   : > { %30603 = vmatprep.subr.bf16.mxu1 %v33410_v19  ;;  %v33447_v17 = vld [vmem:[%s34917_s23 + $0x2518] sm:$0xff]   ;;  %v33449_v19 = vld [vmem:[%s34917_s23 + $0x2550] sm:$0xff]  }
 0x4f1   : > { %30582 = vmatpush3.bf16.msra.mxu0 %v33411_v20  ;;  %v33450_v20 = vld [vmem:[%s34917_s23 + $0x25d0] sm:$0xff]  }
 0x4f2   : > { %30583 = vmatprep.subr.bf16.mxu0 %v33413_v22  ;;  %30604 = vmatpush3.bf16.msra.mxu1 %v33412_v21  ;;  %v33451_v21 = vld [vmem:[%s34917_s23 + $0x2510] sm:$0xff]  }
 0x4f3   : > { %30605 = vmatprep.subr.bf16.mxu1 %v33414_v23  ;;  %v33452_v22 = vld [vmem:[%s34917_s23 + $0x2590] sm:$0xff]   ;;  %v33453_v23 = vld [vmem:[%s34917_s23 + $0x2548] sm:$0xff]  }
 0x4f5   : > { %30584 = vmatpush3.bf16.msra.mxu0 %v33415_v24  ;;  %v33454_v24 = vld [vmem:[%s34917_s23 + $0x25c8] sm:$0xff]  }
 0x4f6   : > { %30585 = vmatprep.subr.bf16.mxu0 %v33417_v26  ;;  %30606 = vmatpush3.bf16.msra.mxu1 %v33416_v25  ;;  %v33455_v25 = vld [vmem:[%s34917_s23 + $0x2508] sm:$0xff]  }
 0x4f7   : > { %30607 = vmatprep.subr.bf16.mxu1 %v33418_v27  ;;  %v33456_v26 = vld [vmem:[%s34917_s23 + $0x2588] sm:$0xff]   ;;  %v33457_v27 = vld [vmem:[%s34917_s23 + $0x2540] sm:$0xff]  }
 0x4f9   : > { %30586 = vmatpush3.bf16.msra.mxu0 %v33419_v28  ;;  %v33458_v28 = vld [vmem:[%s34917_s23 + $0x25c0] sm:$0xff]  }
 0x4fa   : > { %30587 = vmatprep.subr.bf16.mxu0 %v33421_v30  ;;  %30608 = vmatpush3.bf16.msra.mxu1 %v33420_v29  ;;  %v33459_v29 = vld [vmem:[%s34917_s23 + $0x2500] sm:$0xff]  }
 0x4fb   : > { %30609 = vmatprep.subr.bf16.mxu1 %v33422_v31  ;;  %v33460_v30 = vld [vmem:[%s34917_s23 + $0x2580] sm:$0xff]   ;;  %v5832_v31 = vrot.slane %v36402_v46, %v34953_v35  ;;  %v33470_v46 = vld [vmem:[%s34917_s23 + $0x2668] sm:$0xff]  }
 0x4fd   : > { %30588 = vmatpush3.bf16.msra.mxu0 %v33423_v32  ;;  %v33462_v32 = vld [vmem:[%s34917_s23 + $0x2678] sm:$0xff]  }
 0x4fe   : > { %30589 = vmatprep.subr.bf16.mxu0 %v33425_v34  ;;  %30610 = vmatpush3.bf16.msra.mxu1 %v33424_v33  ;;  %v33463_v33 = vld [vmem:[%s34917_s23 + $0x26f8] sm:$0xff]  }
 0x4ff   : > { %30611 = vmatprep.subr.bf16.mxu1 %v33426_v36  ;;  %v33464_v34 = vld [vmem:[%s34917_s23 + $0x2638] sm:$0xff]  }
 0x500   : > { %v33465_v36 = vld [vmem:[%s34917_s23 + $0x26b8] sm:$0xff]  }
 0x501   : > { %30590 = vmatpush3.bf16.msra.mxu0 %v33427_v37  ;;  %v5848_v37 = vcombine.high %v5832_v31, %v5832_v31 }
 0x502   : > { %30619 = vmatprep.subr.bf16.mxu0 %v33429_v42  ;;  %30612 = vmatpush3.bf16.msra.mxu1 %v33428_v39 }
 0x503   : > { %30641 = vmatprep.subr.bf16.mxu1 %v33430_v45 }
 0x504   : > { %v30327_v54 = vpop.f32.mrf.mxu0  ;;  %23709 = vmatmul.mubr.bf16.vlgmr.msra.gmra.mxu0 %v5825_v44  ;;  %v33469_v44 = vld [vmem:[%s34917_s23 + $0x26b0] sm:$0xff]  }
 0x505   : > { %v30349_v58 = vpop.f32.mrf.mxu1  ;;  %30620 = vmatpush3.bf16.msra.mxu0 %v33431_v47  ;;  %23749 = vmatmul.mubr.bf16.vlgmr.msra.gmra.mxu1 %v5847_v51 }
 0x506   : > { %v30328_v59 = vpop.f32.mrf.mxu0  ;;  %30621 = vmatprep.subr.bf16.mxu0 %v33433_v52  ;;  %30642 = vmatpush3.bf16.msra.mxu1 %v33432_v49  ;;  %v33471_v49 = vld [vmem:[%s34917_s23 + $0x26e8] sm:$0xff]  }
 0x507   : > { %v30329_v62 = vadd.f32 %v30328_v59, %v30327_v54  ;;  %v30350_v0 = vpop.f32.mrf.mxu1  ;;  %23788 = vmatprep.mubr.bf16.mxu0 %v5846_v56  ;;  %30643 = vmatprep.subr.bf16.mxu1 %v33434_v55  ;;  %v33472_v52 = vld [vmem:[%s34917_s23 + $0x2628] sm:$0xff]   ;;  %v33475_v59 = vld [vmem:[%s34917_s23 + $0x26e0] sm:$0xff]  }
 0x508   : > { %v30330_v1 = vpop.f32.mrf.mxu0  ;;  %v30351_v4 = vadd.f32 %v30350_v0, %v30349_v58  ;;  %23828 = vmatprep.mubr.bf16.mxu1 %v5850_v61  ;;  %v33473_v55 = vld [vmem:[%s34917_s23 + $0x26a8] sm:$0xff]   ;;  %v33477_v61 = vld [vmem:[%s34917_s23 + $0x26a0] sm:$0xff]   ;;  %v33480_v0 = vld [vmem:[%s34917_s23 + $0x2618] sm:$0xff]  }
 0x509   : > { %v23231_v3 = vadd.f32 %v30329_v62, %v36375_v16  ;;  %v30352_v6 = vpop.f32.mrf.mxu1  ;;  %30622 = vmatpush3.bf16.msra.mxu0 %v33435_v57  ;;  %v33446_v16 = vld [vmem:[%s34917_s23 + $0x25d8] sm:$0xff]   ;;  %v33474_v57 = vld [vmem:[%s34917_s23 + $0x2660] sm:$0xff]  }
 0x50a   : > { %v30331_v7 = vpop.f32.mrf.mxu0  ;;  %30623 = vmatprep.subr.bf16.mxu0 %v33437_v63  ;;  %30644 = vmatpush3.bf16.msra.mxu1 %v33436_v60  ;;  %v33476_v60 = vld [vmem:[%s34917_s23 + $0x2620] sm:$0xff]   ;;  %v33478_v62 = vld [vmem:[%s34917_s23 + $0x2658] sm:$0xff]   ;;  %v33486_v6 = vld [vmem:[%s34917_s23 + $0x2648] sm:$0xff]  }
 0x50b   : > { %v36419_v9 = vadd.f32 %v30351_v4, %v23231_v3  ;;  %v30353_v11 = vpop.f32.mrf.mxu1  ;;  %30645 = vmatprep.subr.bf16.mxu1 %v33438_v2  ;;  %v33479_v63 = vld [vmem:[%s34917_s23 + $0x26d8] sm:$0xff]   ;;  %v33482_v2 = vld [vmem:[%s34917_s23 + $0x2650] sm:$0xff]   ;;  %v33487_v7 = vld [vmem:[%s34917_s23 + $0x26c8] sm:$0xff]  }
 0x50c   : > { %v33481_v1 = vld [vmem:[%s34917_s23 + $0x2698] sm:$0xff]   ;;  %v33483_v3 = vld [vmem:[%s34917_s23 + $0x26d0] sm:$0xff]   ;;  %v33491_v11 = vld [vmem:[%s34917_s23 + $0x26c0] sm:$0xff]  }
 0x50d   : > { %30624 = vmatpush3.bf16.msra.mxu0 %v33439_v5  ;;  %v33484_v4 = vld [vmem:[%s34917_s23 + $0x2610] sm:$0xff]  }
 0x50e   : > { %30625 = vmatprep.subr.bf16.mxu0 %v33441_v10  ;;  %30646 = vmatpush3.bf16.msra.mxu1 %v33440_v8  ;;  %v33485_v5 = vld [vmem:[%s34917_s23 + $0x2690] sm:$0xff]   ;;  %v33488_v8 = vld [vmem:[%s34917_s23 + $0x2608] sm:$0xff]   ;;  %v33490_v10 = vld [vmem:[%s34917_s23 + $0x2640] sm:$0xff]  }
 0x50f   : > { %30647 = vmatprep.subr.bf16.mxu1 %v33442_v12  ;;  %v33492_v12 = vld [vmem:[%s34917_s23 + $0x2600] sm:$0xff]  }
 0x511   : > { %30626 = vmatpush3.bf16.msra.mxu0 %v33443_v13  ;;  %v252_v13 = vld [vmem:[#allocation2 + $0x98] sm:$0xff] }
 0x512   : > { %30627 = vmatprep.subr.bf16.mxu0 %v33445_v15  ;;  %30648 = vmatpush3.bf16.msra.mxu1 %v33444_v14  ;;  %v33493_v14 = vld [vmem:[%s34917_s23 + $0x2680] sm:$0xff]   ;;  %v5858_v15 = vrot.slane %v252_v13, %v34953_v35 }
 0x513   : > { %30649 = vmatprep.subr.bf16.mxu1 %v33446_v16  ;;  %v5851_v16 = vcombine.high %v252_v13, %v252_v13  ;;  %v33531_v13 = vld [vmem:[%s34917_s23 + $0x2870] sm:$0xff]  }
 0x515   : > { %30628 = vmatpush3.bf16.msra.mxu0 %v33447_v17  ;;  %v33494_v17 = vld [vmem:[%s34917_s23 + $0x2778] sm:$0xff]  }
 0x516   : > { %30629 = vmatprep.subr.bf16.mxu0 %v33449_v19  ;;  %30650 = vmatpush3.bf16.msra.mxu1 %v33448_v18  ;;  %v5866_v18 = vcombine.high %v5858_v15, %v5858_v15  ;;  %v5874_v19 = vrot.slane %v5858_v15, %v34953_v35  ;;  %v33532_v15 = vld [vmem:[%s34917_s23 + $0x28f0] sm:$0xff]  }
 0x517   : > { %30651 = vmatprep.subr.bf16.mxu1 %v33450_v20  ;;  %v33495_v20 = vld [vmem:[%s34917_s23 + $0x27f8] sm:$0xff]  }
 0x519   : > { %30630 = vmatpush3.bf16.msra.mxu0 %v33451_v21  ;;  %v36483_v21 = vrot.slane %v5851_v16, %v34953_v35  ;;  %v33533_v16 = vld [vmem:[%s34917_s23 + $0x2830] sm:$0xff]  }
 0x51a   : > { %30631 = vmatprep.subr.bf16.mxu0 %v33453_v23  ;;  %30652 = vmatpush3.bf16.msra.mxu1 %v33452_v22  ;;  %v33496_v22 = vld [vmem:[%s34917_s23 + $0x2738] sm:$0xff]   ;;  %v5888_v23 = vrot.slane %v5866_v18, %v34953_v35 }
 0x51b   : > { %30653 = vmatprep.subr.bf16.mxu1 %v33454_v24  ;;  %v33497_v24 = vld [vmem:[%s34917_s23 + $0x27b8] sm:$0xff]  }
 0x51d   : > { %30632 = vmatpush3.bf16.msra.mxu0 %v33455_v25  ;;  %v5867_v25 = vcombine.high %v36483_v21, %v36483_v21 }
 0x51e   : > { %30633 = vmatprep.subr.bf16.mxu0 %v33457_v27  ;;  %30654 = vmatpush3.bf16.msra.mxu1 %v33456_v26  ;;  %v5896_v26 = vcombine.high %v5874_v19, %v5874_v19  ;;  %v33498_v27 = vld [vmem:[%s34917_s23 + $0x2770] sm:$0xff]  }
 0x51f   : > { %30655 = vmatprep.subr.bf16.mxu1 %v33458_v28  ;;  %v5898_v28 = vcombine.high %v5888_v23, %v5888_v23 }
 0x521   : > { %30634 = vmatpush3.bf16.msra.mxu0 %v33459_v29 }
 0x522   : > { %30663 = vmatprep.subr.bf16.mxu0 %v33462_v32  ;;  %30656 = vmatpush3.bf16.msra.mxu1 %v33460_v30  ;;  %v33499_v30 = vld [vmem:[%s34917_s23 + $0x27f0] sm:$0xff]  }
 0x523   : > { %30685 = vmatprep.subr.bf16.mxu1 %v33463_v33  ;;  %v33500_v32 = vld [vmem:[%s34917_s23 + $0x2730] sm:$0xff]  }
 0x524   : > { %v30371_v39 = vpop.f32.mrf.mxu0  ;;  %23789 = vmatmul.mubr.bf16.vlgmr.msra.gmra.mxu0 %v5832_v31  ;;  %v5895_v31 = vrot.slane %v5867_v25, %v34953_v35 }
 0x525   : > { %v30393_v42 = vpop.f32.mrf.mxu1  ;;  %30664 = vmatpush3.bf16.msra.mxu0 %v33464_v34  ;;  %23829 = vmatmul.mubr.bf16.vlgmr.msra.gmra.mxu1 %v5848_v37 }
 0x526   : > { %v30372_v43 = vpop.f32.mrf.mxu0  ;;  %30665 = vmatprep.subr.bf16.mxu0 %v33466_v38  ;;  %30686 = vmatpush3.bf16.msra.mxu1 %v33465_v36  ;;  %v33501_v36 = vld [vmem:[%s34917_s23 + $0x27b0] sm:$0xff]   ;;  %v5899_v37 = vcombine.high %v5895_v31, %v5895_v31 }
 0x527   : > { %v30373_v45 = vadd.f32 %v30372_v43, %v30371_v39  ;;  %v30394_v47 = vpop.f32.mrf.mxu1  ;;  %30687 = vmatprep.subr.bf16.mxu1 %v33467_v40  ;;  %23868 = vmatprep.mubr.bf16.mxu0 %v5888_v23  ;;  %v33502_v39 = vld [vmem:[%s34917_s23 + $0x2768] sm:$0xff]  }
 0x528   : > { %v30374_v48 = vpop.f32.mrf.mxu0  ;;  %v30395_v51 = vadd.f32 %v30394_v47, %v30393_v42  ;;  %23908 = vmatprep.mubr.bf16.mxu1 %v5898_v28  ;;  %v33503_v42 = vld [vmem:[%s34917_s23 + $0x27e8] sm:$0xff]  }
 0x529   : > { %v23311_v50 = vadd.f32 %v30373_v45, %v36419_v9  ;;  %v30396_v53 = vpop.f32.mrf.mxu1  ;;  %30666 = vmatpush3.bf16.msra.mxu0 %v33468_v41  ;;  %v33489_v9 = vld [vmem:[%s34917_s23 + $0x2688] sm:$0xff]  }
 0x52a   : > { %v30375_v54 = vpop.f32.mrf.mxu0  ;;  %30667 = vmatprep.subr.bf16.mxu0 %v33470_v46  ;;  %30688 = vmatpush3.bf16.msra.mxu1 %v33469_v44  ;;  %v33504_v45 = vld [vmem:[%s34917_s23 + $0x2728] sm:$0xff]   ;;  %v33508_v53 = vld [vmem:[%s34917_s23 + $0x2720] sm:$0xff]  }
 0x52b   : > { %v36456_v56 = vadd.f32 %v30395_v51, %v23311_v50  ;;  %v30397_v58 = vpop.f32.mrf.mxu1  ;;  %30689 = vmatprep.subr.bf16.mxu1 %v33471_v49  ;;  %v33505_v48 = vld [vmem:[%s34917_s23 + $0x27a8] sm:$0xff]   ;;  %v33506_v50 = vld [vmem:[%s34917_s23 + $0x2760] sm:$0xff]  }
 0x52c   : > { %v33509_v54 = vld [vmem:[%s34917_s23 + $0x27a0] sm:$0xff]   ;;  %v33513_v58 = vld [vmem:[%s34917_s23 + $0x2798] sm:$0xff]  }
 0x52d   : > { %30668 = vmatpush3.bf16.msra.mxu0 %v33472_v52  ;;  %v33507_v52 = vld [vmem:[%s34917_s23 + $0x27e0] sm:$0xff]  }
 0x52e   : > { %30669 = vmatprep.subr.bf16.mxu0 %v33474_v57  ;;  %30690 = vmatpush3.bf16.msra.mxu1 %v33473_v55  ;;  %v33510_v55 = vld [vmem:[%s34917_s23 + $0x2758] sm:$0xff]  }
 0x52f   : > { %30691 = vmatprep.subr.bf16.mxu1 %v33475_v59  ;;  %v33512_v57 = vld [vmem:[%s34917_s23 + $0x2718] sm:$0xff]   ;;  %v33514_v59 = vld [vmem:[%s34917_s23 + $0x2750] sm:$0xff]  }
 0x531   : > { %30670 = vmatpush3.bf16.msra.mxu0 %v33476_v60  ;;  %v33515_v60 = vld [vmem:[%s34917_s23 + $0x27d0] sm:$0xff]  }
 0x532   : > { %30671 = vmatprep.subr.bf16.mxu0 %v33478_v62  ;;  %30692 = vmatpush3.bf16.msra.mxu1 %v33477_v61  ;;  %v33516_v61 = vld [vmem:[%s34917_s23 + $0x2710] sm:$0xff]  }
 0x533   : > { %30693 = vmatprep.subr.bf16.mxu1 %v33479_v63  ;;  %v33517_v62 = vld [vmem:[%s34917_s23 + $0x2790] sm:$0xff]   ;;  %v33518_v63 = vld [vmem:[%s34917_s23 + $0x2748] sm:$0xff]  }
 0x535   : > { %30672 = vmatpush3.bf16.msra.mxu0 %v33480_v0  ;;  %v33519_v0 = vld [vmem:[%s34917_s23 + $0x27c8] sm:$0xff]  }
 0x536   : > { %30673 = vmatprep.subr.bf16.mxu0 %v33482_v2  ;;  %30694 = vmatpush3.bf16.msra.mxu1 %v33481_v1  ;;  %v33520_v1 = vld [vmem:[%s34917_s23 + $0x2708] sm:$0xff]  }
 0x537   : > { %30695 = vmatprep.subr.bf16.mxu1 %v33483_v3  ;;  %v33521_v2 = vld [vmem:[%s34917_s23 + $0x2788] sm:$0xff]   ;;  %v33522_v3 = vld [vmem:[%s34917_s23 + $0x2740] sm:$0xff]  }
 0x539   : > { %30674 = vmatpush3.bf16.msra.mxu0 %v33484_v4  ;;  %v33523_v4 = vld [vmem:[%s34917_s23 + $0x27c0] sm:$0xff]  }
 0x53a   : > { %30675 = vmatprep.subr.bf16.mxu0 %v33486_v6  ;;  %30696 = vmatpush3.bf16.msra.mxu1 %v33485_v5  ;;  %v33524_v5 = vld [vmem:[%s34917_s23 + $0x2700] sm:$0xff]  }
 0x53b   : > { %30697 = vmatprep.subr.bf16.mxu1 %v33487_v7  ;;  %v33525_v6 = vld [vmem:[%s34917_s23 + $0x2780] sm:$0xff]   ;;  %v5881_v7 = vrot.slane %v36483_v21, %v34953_v35  ;;  %v33535_v21 = vld [vmem:[%s34917_s23 + $0x2868] sm:$0xff]  }
 0x53d   : > { %30676 = vmatpush3.bf16.msra.mxu0 %v33488_v8  ;;  %v33527_v8 = vld [vmem:[%s34917_s23 + $0x2878] sm:$0xff]  }
 0x53e   : > { %30677 = vmatprep.subr.bf16.mxu0 %v33490_v10  ;;  %30698 = vmatpush3.bf16.msra.mxu1 %v33489_v9  ;;  %v33528_v9 = vld [vmem:[%s34917_s23 + $0x28f8] sm:$0xff]  }
 0x53f   : > { %30699 = vmatprep.subr.bf16.mxu1 %v33491_v11  ;;  %v33529_v10 = vld [vmem:[%s34917_s23 + $0x2838] sm:$0xff]  }
 0x540   : > { %v33530_v11 = vld [vmem:[%s34917_s23 + $0x28b8] sm:$0xff]  }
 0x541   : > { %30678 = vmatpush3.bf16.msra.mxu0 %v33492_v12  ;;  %v5897_v12 = vcombine.high %v5881_v7, %v5881_v7 }
 0x542   : > { %30707 = vmatprep.subr.bf16.mxu0 %v33494_v17  ;;  %30700 = vmatpush3.bf16.msra.mxu1 %v33493_v14 }
 0x543   : > { %30729 = vmatprep.subr.bf16.mxu1 %v33495_v20 }
 0x544   : > { %v30415_v29 = vpop.f32.mrf.mxu0  ;;  %23869 = vmatmul.mubr.bf16.vlgmr.msra.gmra.mxu0 %v5874_v19  ;;  %v33534_v19 = vld [vmem:[%s34917_s23 + $0x28b0] sm:$0xff]  }
 0x545   : > { %v30437_v33 = vpop.f32.mrf.mxu1  ;;  %30708 = vmatpush3.bf16.msra.mxu0 %v33496_v22  ;;  %23909 = vmatmul.mubr.bf16.vlgmr.msra.gmra.mxu1 %v5896_v26 }
 0x546   : > { %v30416_v34 = vpop.f32.mrf.mxu0  ;;  %30709 = vmatprep.subr.bf16.mxu0 %v33498_v27  ;;  %30730 = vmatpush3.bf16.msra.mxu1 %v33497_v24  ;;  %v33536_v24 = vld [vmem:[%s34917_s23 + $0x28e8] sm:$0xff]  }
 0x547   : > { %v30417_v38 = vadd.f32 %v30416_v34, %v30415_v29  ;;  %v30438_v40 = vpop.f32.mrf.mxu1  ;;  %23948 = vmatprep.mubr.bf16.mxu0 %v5895_v31  ;;  %30731 = vmatprep.subr.bf16.mxu1 %v33499_v30  ;;  %v33537_v27 = vld [vmem:[%s34917_s23 + $0x2828] sm:$0xff]   ;;  %v33540_v34 = vld [vmem:[%s34917_s23 + $0x28e0] sm:$0xff]  }
 0x548   : > { %v30418_v41 = vpop.f32.mrf.mxu0  ;;  %v30439_v44 = vadd.f32 %v30438_v40, %v30437_v33  ;;  %23988 = vmatprep.mubr.bf16.mxu1 %v5899_v37  ;;  %v33538_v30 = vld [vmem:[%s34917_s23 + $0x28a8] sm:$0xff]   ;;  %v33542_v37 = vld [vmem:[%s34917_s23 + $0x28a0] sm:$0xff]   ;;  %v33545_v40 = vld [vmem:[%s34917_s23 + $0x2818] sm:$0xff]  }
 0x549   : > { %v23391_v43 = vadd.f32 %v30417_v38, %v36456_v56  ;;  %v30440_v46 = vpop.f32.mrf.mxu1  ;;  %30710 = vmatpush3.bf16.msra.mxu0 %v33500_v32  ;;  %v33511_v56 = vld [vmem:[%s34917_s23 + $0x27d8] sm:$0xff]   ;;  %v33539_v32 = vld [vmem:[%s34917_s23 + $0x2860] sm:$0xff]  }
 0x54a   : > { %v30419_v47 = vpop.f32.mrf.mxu0  ;;  %30711 = vmatprep.subr.bf16.mxu0 %v33502_v39  ;;  %30732 = vmatpush3.bf16.msra.mxu1 %v33501_v36  ;;  %v33541_v36 = vld [vmem:[%s34917_s23 + $0x2820] sm:$0xff]   ;;  %v33543_v38 = vld [vmem:[%s34917_s23 + $0x2858] sm:$0xff]   ;;  %v33551_v46 = vld [vmem:[%s34917_s23 + $0x2848] sm:$0xff]  }
 0x54b   : > { %v36500_v49 = vadd.f32 %v30439_v44, %v23391_v43  ;;  %v30441_v51 = vpop.f32.mrf.mxu1  ;;  %30733 = vmatprep.subr.bf16.mxu1 %v33503_v42  ;;  %v33544_v39 = vld [vmem:[%s34917_s23 + $0x28d8] sm:$0xff]   ;;  %v33547_v42 = vld [vmem:[%s34917_s23 + $0x2850] sm:$0xff]   ;;  %v33552_v47 = vld [vmem:[%s34917_s23 + $0x28c8] sm:$0xff]  }
 0x54c   : > { %v33546_v41 = vld [vmem:[%s34917_s23 + $0x2898] sm:$0xff]   ;;  %v33548_v43 = vld [vmem:[%s34917_s23 + $0x28d0] sm:$0xff]   ;;  %v33556_v51 = vld [vmem:[%s34917_s23 + $0x28c0] sm:$0xff]  }
 0x54d   : > { %30712 = vmatpush3.bf16.msra.mxu0 %v33504_v45  ;;  %v33549_v44 = vld [vmem:[%s34917_s23 + $0x2810] sm:$0xff]  }
 0x54e   : > { %30713 = vmatprep.subr.bf16.mxu0 %v33506_v50  ;;  %30734 = vmatpush3.bf16.msra.mxu1 %v33505_v48  ;;  %v33550_v45 = vld [vmem:[%s34917_s23 + $0x2890] sm:$0xff]   ;;  %v33553_v48 = vld [vmem:[%s34917_s23 + $0x2808] sm:$0xff]   ;;  %v33555_v50 = vld [vmem:[%s34917_s23 + $0x2840] sm:$0xff]  }
 0x54f   : > { %30735 = vmatprep.subr.bf16.mxu1 %v33507_v52  ;;  %v33557_v52 = vld [vmem:[%s34917_s23 + $0x2800] sm:$0xff]  }
 0x551   : > { %30714 = vmatpush3.bf16.msra.mxu0 %v33508_v53  ;;  %v253_v53 = vld [vmem:[#allocation2 + $0xa0] sm:$0xff] }
 0x552   : > { %30715 = vmatprep.subr.bf16.mxu0 %v33510_v55  ;;  %30736 = vmatpush3.bf16.msra.mxu1 %v33509_v54  ;;  %v5907_v54 = vrot.slane %v253_v53, %v34953_v35  ;;  %v33559_v55 = vld [vmem:[%s34917_s23 + $0x2978] sm:$0xff]  }
 0x553   : > { %30737 = vmatprep.subr.bf16.mxu1 %v33511_v56  ;;  %v5900_v56 = vcombine.high %v253_v53, %v253_v53  ;;  %v33596_v53 = vld [vmem:[%s34917_s23 + $0x2a70] sm:$0xff]  }
 0x555   : > { %30716 = vmatpush3.bf16.msra.mxu0 %v33512_v57  ;;  %v33558_v57 = vld [vmem:[%s34917_s23 + $0x2880] sm:$0xff]  }
 0x556   : > { %30717 = vmatprep.subr.bf16.mxu0 %v33514_v59  ;;  %30738 = vmatpush3.bf16.msra.mxu1 %v33513_v58  ;;  %v5915_v58 = vcombine.high %v5907_v54, %v5907_v54  ;;  %v5923_v59 = vrot.slane %v5907_v54, %v34953_v35 }
 0x557   : > { %30739 = vmatprep.subr.bf16.mxu1 %v33515_v60  ;;  %v33560_v60 = vld [vmem:[%s34917_s23 + $0x29f8] sm:$0xff]  }
 0x559   : > { %30718 = vmatpush3.bf16.msra.mxu0 %v33516_v61  ;;  %v36564_v61 = vrot.slane %v5900_v56, %v34953_v35  ;;  %v33598_v56 = vld [vmem:[%s34917_s23 + $0x2a30] sm:$0xff]  }
 0x55a   : > { %30719 = vmatprep.subr.bf16.mxu0 %v33518_v63  ;;  %30740 = vmatpush3.bf16.msra.mxu1 %v33517_v62  ;;  %v33561_v62 = vld [vmem:[%s34917_s23 + $0x2938] sm:$0xff]   ;;  %v5937_v63 = vrot.slane %v5915_v58, %v34953_v35 }
 0x55b   : > { %30741 = vmatprep.subr.bf16.mxu1 %v33519_v0  ;;  %v33562_v0 = vld [vmem:[%s34917_s23 + $0x29b8] sm:$0xff]  }
 0x55d   : > { %30720 = vmatpush3.bf16.msra.mxu0 %v33520_v1  ;;  %v5916_v1 = vcombine.high %v36564_v61, %v36564_v61 }
 0x55e   : > { %30721 = vmatprep.subr.bf16.mxu0 %v33522_v3  ;;  %30742 = vmatpush3.bf16.msra.mxu1 %v33521_v2  ;;  %v5945_v2 = vcombine.high %v5923_v59, %v5923_v59  ;;  %v33563_v3 = vld [vmem:[%s34917_s23 + $0x2970] sm:$0xff]  }
 0x55f   : > { %30743 = vmatprep.subr.bf16.mxu1 %v33523_v4  ;;  %v5947_v4 = vcombine.high %v5937_v63, %v5937_v63 }
 0x561   : > { %30722 = vmatpush3.bf16.msra.mxu0 %v33524_v5 }
 0x562   : > { %30751 = vmatprep.subr.bf16.mxu0 %v33527_v8  ;;  %30744 = vmatpush3.bf16.msra.mxu1 %v33525_v6  ;;  %v33564_v6 = vld [vmem:[%s34917_s23 + $0x29f0] sm:$0xff]  }
 0x563   : > { %30773 = vmatprep.subr.bf16.mxu1 %v33528_v9  ;;  %v33565_v8 = vld [vmem:[%s34917_s23 + $0x2930] sm:$0xff]  }
 0x564   : > { %v30459_v14 = vpop.f32.mrf.mxu0  ;;  %23949 = vmatmul.mubr.bf16.vlgmr.msra.gmra.mxu0 %v5881_v7  ;;  %v5944_v7 = vrot.slane %v5916_v1, %v34953_v35 }
 0x565   : > { %v30481_v17 = vpop.f32.mrf.mxu1  ;;  %30752 = vmatpush3.bf16.msra.mxu0 %v33529_v10  ;;  %23989 = vmatmul.mubr.bf16.vlgmr.msra.gmra.mxu1 %v5897_v12 }
 0x566   : > { %v30460_v18 = vpop.f32.mrf.mxu0  ;;  %30753 = vmatprep.subr.bf16.mxu0 %v33531_v13  ;;  %30774 = vmatpush3.bf16.msra.mxu1 %v33530_v11  ;;  %v33566_v11 = vld [vmem:[%s34917_s23 + $0x29b0] sm:$0xff]   ;;  %v5948_v12 = vcombine.high %v5944_v7, %v5944_v7 }
 0x567   : > { %v30461_v20 = vadd.f32 %v30460_v18, %v30459_v14  ;;  %v30482_v22 = vpop.f32.mrf.mxu1  ;;  %30775 = vmatprep.subr.bf16.mxu1 %v33532_v15  ;;  %24028 = vmatprep.mubr.bf16.mxu0 %v5937_v63  ;;  %v33567_v14 = vld [vmem:[%s34917_s23 + $0x2968] sm:$0xff]  }
 0x568   : > { %v30462_v23 = vpop.f32.mrf.mxu0  ;;  %v30483_v26 = vadd.f32 %v30482_v22, %v30481_v17  ;;  %24068 = vmatprep.mubr.bf16.mxu1 %v5947_v4  ;;  %v33568_v17 = vld [vmem:[%s34917_s23 + $0x29e8] sm:$0xff]  }
 0x569   : > { %v23471_v25 = vadd.f32 %v30461_v20, %v36500_v49  ;;  %v30484_v28 = vpop.f32.mrf.mxu1  ;;  %30754 = vmatpush3.bf16.msra.mxu0 %v33533_v16  ;;  %v33554_v49 = vld [vmem:[%s34917_s23 + $0x2888] sm:$0xff]  }
 0x56a   : > { %v30463_v29 = vpop.f32.mrf.mxu0  ;;  %30755 = vmatprep.subr.bf16.mxu0 %v33535_v21  ;;  %30776 = vmatpush3.bf16.msra.mxu1 %v33534_v19  ;;  %v33569_v20 = vld [vmem:[%s34917_s23 + $0x2928] sm:$0xff]   ;;  %v33573_v28 = vld [vmem:[%s34917_s23 + $0x2920] sm:$0xff]  }
 0x56b   : > { %v36537_v31 = vadd.f32 %v30483_v26, %v23471_v25  ;;  %v30485_v33 = vpop.f32.mrf.mxu1  ;;  %30777 = vmatprep.subr.bf16.mxu1 %v33536_v24  ;;  %v33570_v23 = vld [vmem:[%s34917_s23 + $0x29a8] sm:$0xff]   ;;  %v33571_v25 = vld [vmem:[%s34917_s23 + $0x2960] sm:$0xff]  }
 0x56c   : > { %v33574_v29 = vld [vmem:[%s34917_s23 + $0x29a0] sm:$0xff]   ;;  %v33578_v33 = vld [vmem:[%s34917_s23 + $0x2998] sm:$0xff]  }
 0x56d   : > { %30756 = vmatpush3.bf16.msra.mxu0 %v33537_v27  ;;  %v33572_v27 = vld [vmem:[%s34917_s23 + $0x29e0] sm:$0xff]  }
 0x56e   : > { %30757 = vmatprep.subr.bf16.mxu0 %v33539_v32  ;;  %30778 = vmatpush3.bf16.msra.mxu1 %v33538_v30  ;;  %v33575_v30 = vld [vmem:[%s34917_s23 + $0x2958] sm:$0xff]  }
 0x56f   : > { %30779 = vmatprep.subr.bf16.mxu1 %v33540_v34  ;;  %v33577_v32 = vld [vmem:[%s34917_s23 + $0x2918] sm:$0xff]   ;;  %v33579_v34 = vld [vmem:[%s34917_s23 + $0x2950] sm:$0xff]  }
 0x571   : > { %30758 = vmatpush3.bf16.msra.mxu0 %v33541_v36  ;;  %v33580_v36 = vld [vmem:[%s34917_s23 + $0x29d0] sm:$0xff]  }
 0x572   : > { %30759 = vmatprep.subr.bf16.mxu0 %v33543_v38  ;;  %30780 = vmatpush3.bf16.msra.mxu1 %v33542_v37  ;;  %v33581_v37 = vld [vmem:[%s34917_s23 + $0x2910] sm:$0xff]  }
 0x573   : > { %30781 = vmatprep.subr.bf16.mxu1 %v33544_v39  ;;  %v33582_v38 = vld [vmem:[%s34917_s23 + $0x2990] sm:$0xff]   ;;  %v33583_v39 = vld [vmem:[%s34917_s23 + $0x2948] sm:$0xff]  }
 0x575   : > { %30760 = vmatpush3.bf16.msra.mxu0 %v33545_v40  ;;  %v33584_v40 = vld [vmem:[%s34917_s23 + $0x29c8] sm:$0xff]  }
 0x576   : > { %30761 = vmatprep.subr.bf16.mxu0 %v33547_v42  ;;  %30782 = vmatpush3.bf16.msra.mxu1 %v33546_v41  ;;  %v33585_v41 = vld [vmem:[%s34917_s23 + $0x2908] sm:$0xff]  }
 0x577   : > { %30783 = vmatprep.subr.bf16.mxu1 %v33548_v43  ;;  %v33586_v42 = vld [vmem:[%s34917_s23 + $0x2988] sm:$0xff]   ;;  %v33587_v43 = vld [vmem:[%s34917_s23 + $0x2940] sm:$0xff]  }
 0x579   : > { %30762 = vmatpush3.bf16.msra.mxu0 %v33549_v44  ;;  %v33588_v44 = vld [vmem:[%s34917_s23 + $0x29c0] sm:$0xff]  }
 0x57a   : > { %30763 = vmatprep.subr.bf16.mxu0 %v33551_v46  ;;  %30784 = vmatpush3.bf16.msra.mxu1 %v33550_v45  ;;  %v33589_v45 = vld [vmem:[%s34917_s23 + $0x2900] sm:$0xff]  }
 0x57b   : > { %30785 = vmatprep.subr.bf16.mxu1 %v33552_v47  ;;  %v33590_v46 = vld [vmem:[%s34917_s23 + $0x2980] sm:$0xff]   ;;  %v5930_v47 = vrot.slane %v36564_v61, %v34953_v35  ;;  %v33600_v61 = vld [vmem:[%s34917_s23 + $0x2a68] sm:$0xff]  }
 0x57d   : > { %30764 = vmatpush3.bf16.msra.mxu0 %v33553_v48  ;;  %v33592_v48 = vld [vmem:[%s34917_s23 + $0x2a78] sm:$0xff]  }
 0x57e   : > { %30765 = vmatprep.subr.bf16.mxu0 %v33555_v50  ;;  %30786 = vmatpush3.bf16.msra.mxu1 %v33554_v49  ;;  %v33593_v49 = vld [vmem:[%s34917_s23 + $0x2af8] sm:$0xff]  }
 0x57f   : > { %30787 = vmatprep.subr.bf16.mxu1 %v33556_v51  ;;  %v33594_v50 = vld [vmem:[%s34917_s23 + $0x2a38] sm:$0xff]  }
 0x580   : > { %v33595_v51 = vld [vmem:[%s34917_s23 + $0x2ab8] sm:$0xff]  }
 0x581   : > { %30766 = vmatpush3.bf16.msra.mxu0 %v33557_v52  ;;  %v5946_v52 = vcombine.high %v5930_v47, %v5930_v47 }
 0x582   : > { %30795 = vmatprep.subr.bf16.mxu0 %v33559_v55  ;;  %30788 = vmatpush3.bf16.msra.mxu1 %v33558_v57  ;;  %v33597_v55 = vld [vmem:[%s34917_s23 + $0x2af0] sm:$0xff]  }
 0x583   : > { %30817 = vmatprep.subr.bf16.mxu1 %v33560_v60 }
 0x584   : > { %v30503_v5 = vpop.f32.mrf.mxu0  ;;  %24029 = vmatmul.mubr.bf16.vlgmr.msra.gmra.mxu0 %v5923_v59  ;;  %v33599_v59 = vld [vmem:[%s34917_s23 + $0x2ab0] sm:$0xff]  }
 0x585   : > { %v30525_v9 = vpop.f32.mrf.mxu1  ;;  %30796 = vmatpush3.bf16.msra.mxu0 %v33561_v62  ;;  %24069 = vmatmul.mubr.bf16.vlgmr.msra.gmra.mxu1 %v5945_v2 }
 0x586   : > { %v30504_v10 = vpop.f32.mrf.mxu0  ;;  %30797 = vmatprep.subr.bf16.mxu0 %v33563_v3  ;;  %30818 = vmatpush3.bf16.msra.mxu1 %v33562_v0  ;;  %v33601_v0 = vld [vmem:[%s34917_s23 + $0x2ae8] sm:$0xff]  }
 0x587   : > { %v30505_v13 = vadd.f32 %v30504_v10, %v30503_v5  ;;  %v30526_v15 = vpop.f32.mrf.mxu1  ;;  %24108 = vmatprep.mubr.bf16.mxu0 %v5944_v7  ;;  %30819 = vmatprep.subr.bf16.mxu1 %v33564_v6  ;;  %v33602_v3 = vld [vmem:[%s34917_s23 + $0x2a28] sm:$0xff]   ;;  %v33605_v10 = vld [vmem:[%s34917_s23 + $0x2ae0] sm:$0xff]  }
 0x588   : > { %v30506_v16 = vpop.f32.mrf.mxu0  ;;  %v30527_v19 = vadd.f32 %v30526_v15, %v30525_v9  ;;  %24148 = vmatprep.mubr.bf16.mxu1 %v5948_v12  ;;  %v33603_v6 = vld [vmem:[%s34917_s23 + $0x2aa8] sm:$0xff]   ;;  %v33607_v12 = vld [vmem:[%s34917_s23 + $0x2aa0] sm:$0xff]   ;;  %v33610_v15 = vld [vmem:[%s34917_s23 + $0x2a18] sm:$0xff]  }
 0x589   : > { %v23551_v18 = vadd.f32 %v30505_v13, %v36537_v31  ;;  %v30528_v21 = vpop.f32.mrf.mxu1  ;;  %30798 = vmatpush3.bf16.msra.mxu0 %v33565_v8  ;;  %v33576_v31 = vld [vmem:[%s34917_s23 + $0x29d8] sm:$0xff]   ;;  %v33604_v8 = vld [vmem:[%s34917_s23 + $0x2a60] sm:$0xff]  }
 0x58a   : > { %v30507_v22 = vpop.f32.mrf.mxu0  ;;  %30799 = vmatprep.subr.bf16.mxu0 %v33567_v14  ;;  %30820 = vmatpush3.bf16.msra.mxu1 %v33566_v11  ;;  %v33606_v11 = vld [vmem:[%s34917_s23 + $0x2a20] sm:$0xff]   ;;  %v33608_v13 = vld [vmem:[%s34917_s23 + $0x2a58] sm:$0xff]   ;;  %v33616_v21 = vld [vmem:[%s34917_s23 + $0x2a48] sm:$0xff]  }
 0x58b   : > { %v36581_v24 = vadd.f32 %v30527_v19, %v23551_v18  ;;  %v30529_v26 = vpop.f32.mrf.mxu1  ;;  %30821 = vmatprep.subr.bf16.mxu1 %v33568_v17  ;;  %v33609_v14 = vld [vmem:[%s34917_s23 + $0x2ad8] sm:$0xff]   ;;  %v33612_v17 = vld [vmem:[%s34917_s23 + $0x2a50] sm:$0xff]   ;;  %v33617_v22 = vld [vmem:[%s34917_s23 + $0x2ac8] sm:$0xff]  }
 0x58c   : > { %v33611_v16 = vld [vmem:[%s34917_s23 + $0x2a98] sm:$0xff]   ;;  %v33613_v18 = vld [vmem:[%s34917_s23 + $0x2ad0] sm:$0xff]   ;;  %v33621_v26 = vld [vmem:[%s34917_s23 + $0x2ac0] sm:$0xff]  }
 0x58d   : > { %30800 = vmatpush3.bf16.msra.mxu0 %v33569_v20  ;;  %v33614_v19 = vld [vmem:[%s34917_s23 + $0x2a10] sm:$0xff]  }
 0x58e   : > { %30801 = vmatprep.subr.bf16.mxu0 %v33571_v25  ;;  %30822 = vmatpush3.bf16.msra.mxu1 %v33570_v23  ;;  %v33615_v20 = vld [vmem:[%s34917_s23 + $0x2a90] sm:$0xff]   ;;  %v33618_v23 = vld [vmem:[%s34917_s23 + $0x2a08] sm:$0xff]   ;;  %v33620_v25 = vld [vmem:[%s34917_s23 + $0x2a40] sm:$0xff]  }
 0x58f   : > { %30823 = vmatprep.subr.bf16.mxu1 %v33572_v27  ;;  %v33622_v27 = vld [vmem:[%s34917_s23 + $0x2a00] sm:$0xff]  }
 0x591   : > { %30802 = vmatpush3.bf16.msra.mxu0 %v33573_v28  ;;  %v254_v28 = vld [vmem:[#allocation2 + $0xa8] sm:$0xff] }
 0x592   : > { %30803 = vmatprep.subr.bf16.mxu0 %v33575_v30  ;;  %30824 = vmatpush3.bf16.msra.mxu1 %v33574_v29  ;;  %v33623_v29 = vld [vmem:[%s34917_s23 + $0x2a80] sm:$0xff]   ;;  %v5956_v30 = vrot.slane %v254_v28, %v34953_v35 }
 0x593   : > { %30825 = vmatprep.subr.bf16.mxu1 %v33576_v31  ;;  %v5949_v31 = vcombine.high %v254_v28, %v254_v28  ;;  %v33661_v28 = vld [vmem:[%s34917_s23 + $0x2c70] sm:$0xff]  }
 0x595   : > { %30804 = vmatpush3.bf16.msra.mxu0 %v33577_v32  ;;  %v33624_v32 = vld [vmem:[%s34917_s23 + $0x2b78] sm:$0xff]  }
 0x596   : > { %30805 = vmatprep.subr.bf16.mxu0 %v33579_v34  ;;  %30826 = vmatpush3.bf16.msra.mxu1 %v33578_v33  ;;  %v5964_v33 = vcombine.high %v5956_v30, %v5956_v30  ;;  %v5972_v34 = vrot.slane %v5956_v30, %v34953_v35  ;;  %v33662_v30 = vld [vmem:[%s34917_s23 + $0x2cf0] sm:$0xff]  }
 0x597   : > { %30827 = vmatprep.subr.bf16.mxu1 %v33580_v36  ;;  %v33625_v36 = vld [vmem:[%s34917_s23 + $0x2bf8] sm:$0xff]  }
 0x599   : > { %30806 = vmatpush3.bf16.msra.mxu0 %v33581_v37  ;;  %v36645_v37 = vrot.slane %v5949_v31, %v34953_v35  ;;  %v33663_v31 = vld [vmem:[%s34917_s23 + $0x2c30] sm:$0xff]  }
 0x59a   : > { %30807 = vmatprep.subr.bf16.mxu0 %v33583_v39  ;;  %30828 = vmatpush3.bf16.msra.mxu1 %v33582_v38  ;;  %v33626_v38 = vld [vmem:[%s34917_s23 + $0x2b38] sm:$0xff]   ;;  %v5986_v39 = vrot.slane %v5964_v33, %v34953_v35 }
 0x59b   : > { %30829 = vmatprep.subr.bf16.mxu1 %v33584_v40  ;;  %v33627_v40 = vld [vmem:[%s34917_s23 + $0x2bb8] sm:$0xff]  }
 0x59d   : > { %30808 = vmatpush3.bf16.msra.mxu0 %v33585_v41  ;;  %v5965_v41 = vcombine.high %v36645_v37, %v36645_v37 }
 0x59e   : > { %30809 = vmatprep.subr.bf16.mxu0 %v33587_v43  ;;  %30830 = vmatpush3.bf16.msra.mxu1 %v33586_v42  ;;  %v5994_v42 = vcombine.high %v5972_v34, %v5972_v34  ;;  %v33628_v43 = vld [vmem:[%s34917_s23 + $0x2b70] sm:$0xff]  }
 0x59f   : > { %30831 = vmatprep.subr.bf16.mxu1 %v33588_v44  ;;  %v5996_v44 = vcombine.high %v5986_v39, %v5986_v39 }
 0x5a1   : > { %30810 = vmatpush3.bf16.msra.mxu0 %v33589_v45 }
 0x5a2   : > { %30839 = vmatprep.subr.bf16.mxu0 %v33592_v48  ;;  %30832 = vmatpush3.bf16.msra.mxu1 %v33590_v46  ;;  %v33629_v46 = vld [vmem:[%s34917_s23 + $0x2bf0] sm:$0xff]  }
 0x5a3   : > { %30861 = vmatprep.subr.bf16.mxu1 %v33593_v49  ;;  %v33630_v48 = vld [vmem:[%s34917_s23 + $0x2b30] sm:$0xff]  }
 0x5a4   : > { %v30547_v54 = vpop.f32.mrf.mxu0  ;;  %24109 = vmatmul.mubr.bf16.vlgmr.msra.gmra.mxu0 %v5930_v47  ;;  %v5993_v47 = vrot.slane %v5965_v41, %v34953_v35 }
 0x5a5   : > { %v30569_v57 = vpop.f32.mrf.mxu1  ;;  %30840 = vmatpush3.bf16.msra.mxu0 %v33594_v50  ;;  %24149 = vmatmul.mubr.bf16.vlgmr.msra.gmra.mxu1 %v5946_v52 }
 0x5a6   : > { %v30548_v58 = vpop.f32.mrf.mxu0  ;;  %30841 = vmatprep.subr.bf16.mxu0 %v33596_v53  ;;  %30862 = vmatpush3.bf16.msra.mxu1 %v33595_v51  ;;  %v33631_v51 = vld [vmem:[%s34917_s23 + $0x2bb0] sm:$0xff]   ;;  %v5997_v52 = vcombine.high %v5993_v47, %v5993_v47 }
 0x5a7   : > { %v30549_v60 = vadd.f32 %v30548_v58, %v30547_v54  ;;  %v30570_v62 = vpop.f32.mrf.mxu1  ;;  %30863 = vmatprep.subr.bf16.mxu1 %v33597_v55  ;;  %24188 = vmatprep.mubr.bf16.mxu0 %v5986_v39  ;;  %v33632_v54 = vld [vmem:[%s34917_s23 + $0x2b68] sm:$0xff]  }
 0x5a8   : > { %v30550_v63 = vpop.f32.mrf.mxu0  ;;  %v30571_v2 = vadd.f32 %v30570_v62, %v30569_v57  ;;  %24228 = vmatprep.mubr.bf16.mxu1 %v5996_v44  ;;  %v33633_v57 = vld [vmem:[%s34917_s23 + $0x2be8] sm:$0xff]  }
 0x5a9   : > { %v23631_v1 = vadd.f32 %v30549_v60, %v36581_v24  ;;  %v30572_v4 = vpop.f32.mrf.mxu1  ;;  %30842 = vmatpush3.bf16.msra.mxu0 %v33598_v56  ;;  %v33619_v24 = vld [vmem:[%s34917_s23 + $0x2a88] sm:$0xff]  }
 0x5aa   : > { %v30551_v5 = vpop.f32.mrf.mxu0  ;;  %30843 = vmatprep.subr.bf16.mxu0 %v33600_v61  ;;  %30864 = vmatpush3.bf16.msra.mxu1 %v33599_v59  ;;  %v33634_v60 = vld [vmem:[%s34917_s23 + $0x2b28] sm:$0xff]   ;;  %v33638_v4 = vld [vmem:[%s34917_s23 + $0x2b20] sm:$0xff]  }
 0x5ab   : > { %v36618_v7 = vadd.f32 %v30571_v2, %v23631_v1  ;;  %v30573_v9 = vpop.f32.mrf.mxu1  ;;  %30865 = vmatprep.subr.bf16.mxu1 %v33601_v0  ;;  %v33635_v63 = vld [vmem:[%s34917_s23 + $0x2ba8] sm:$0xff]   ;;  %v33636_v1 = vld [vmem:[%s34917_s23 + $0x2b60] sm:$0xff]  }
 0x5ac   : > { %v33639_v5 = vld [vmem:[%s34917_s23 + $0x2ba0] sm:$0xff]   ;;  %v33643_v9 = vld [vmem:[%s34917_s23 + $0x2b98] sm:$0xff]  }
 0x5ad   : > { %30844 = vmatpush3.bf16.msra.mxu0 %v33602_v3  ;;  %v33637_v3 = vld [vmem:[%s34917_s23 + $0x2be0] sm:$0xff]  }
 0x5ae   : > { %30845 = vmatprep.subr.bf16.mxu0 %v33604_v8  ;;  %30866 = vmatpush3.bf16.msra.mxu1 %v33603_v6  ;;  %v33640_v6 = vld [vmem:[%s34917_s23 + $0x2b58] sm:$0xff]  }
 0x5af   : > { %30867 = vmatprep.subr.bf16.mxu1 %v33605_v10  ;;  %v33642_v8 = vld [vmem:[%s34917_s23 + $0x2b18] sm:$0xff]   ;;  %v33644_v10 = vld [vmem:[%s34917_s23 + $0x2b50] sm:$0xff]  }
 0x5b1   : > { %30846 = vmatpush3.bf16.msra.mxu0 %v33606_v11  ;;  %v33645_v11 = vld [vmem:[%s34917_s23 + $0x2bd0] sm:$0xff]  }
 0x5b2   : > { %30847 = vmatprep.subr.bf16.mxu0 %v33608_v13  ;;  %30868 = vmatpush3.bf16.msra.mxu1 %v33607_v12  ;;  %v33646_v12 = vld [vmem:[%s34917_s23 + $0x2b10] sm:$0xff]  }
 0x5b3   : > { %30869 = vmatprep.subr.bf16.mxu1 %v33609_v14  ;;  %v33647_v13 = vld [vmem:[%s34917_s23 + $0x2b90] sm:$0xff]   ;;  %v33648_v14 = vld [vmem:[%s34917_s23 + $0x2b48] sm:$0xff]  }
 0x5b5   : > { %30848 = vmatpush3.bf16.msra.mxu0 %v33610_v15  ;;  %v33649_v15 = vld [vmem:[%s34917_s23 + $0x2bc8] sm:$0xff]  }
 0x5b6   : > { %30849 = vmatprep.subr.bf16.mxu0 %v33612_v17  ;;  %30870 = vmatpush3.bf16.msra.mxu1 %v33611_v16  ;;  %v33650_v16 = vld [vmem:[%s34917_s23 + $0x2b08] sm:$0xff]  }
 0x5b7   : > { %30871 = vmatprep.subr.bf16.mxu1 %v33613_v18  ;;  %v33651_v17 = vld [vmem:[%s34917_s23 + $0x2b88] sm:$0xff]   ;;  %v33652_v18 = vld [vmem:[%s34917_s23 + $0x2b40] sm:$0xff]  }
 0x5b9   : > { %30850 = vmatpush3.bf16.msra.mxu0 %v33614_v19  ;;  %v33653_v19 = vld [vmem:[%s34917_s23 + $0x2bc0] sm:$0xff]  }
 0x5ba   : > { %30851 = vmatprep.subr.bf16.mxu0 %v33616_v21  ;;  %30872 = vmatpush3.bf16.msra.mxu1 %v33615_v20  ;;  %v33654_v20 = vld [vmem:[%s34917_s23 + $0x2b00] sm:$0xff]  }
 0x5bb   : > { %30873 = vmatprep.subr.bf16.mxu1 %v33617_v22  ;;  %v33655_v21 = vld [vmem:[%s34917_s23 + $0x2b80] sm:$0xff]   ;;  %v5979_v22 = vrot.slane %v36645_v37, %v34953_v35  ;;  %v33665_v37 = vld [vmem:[%s34917_s23 + $0x2c68] sm:$0xff]  }
 0x5bd   : > { %30852 = vmatpush3.bf16.msra.mxu0 %v33618_v23  ;;  %v33657_v23 = vld [vmem:[%s34917_s23 + $0x2c78] sm:$0xff]  }
 0x5be   : > { %30853 = vmatprep.subr.bf16.mxu0 %v33620_v25  ;;  %30874 = vmatpush3.bf16.msra.mxu1 %v33619_v24  ;;  %v33658_v24 = vld [vmem:[%s34917_s23 + $0x2cf8] sm:$0xff]  }
 0x5bf   : > { %30875 = vmatprep.subr.bf16.mxu1 %v33621_v26  ;;  %v33659_v25 = vld [vmem:[%s34917_s23 + $0x2c38] sm:$0xff]  }
 0x5c0   : > { %v33660_v26 = vld [vmem:[%s34917_s23 + $0x2cb8] sm:$0xff]  }
 0x5c1   : > { %30854 = vmatpush3.bf16.msra.mxu0 %v33622_v27  ;;  %v5995_v27 = vcombine.high %v5979_v22, %v5979_v22 }
 0x5c2   : > { %30883 = vmatprep.subr.bf16.mxu0 %v33624_v32  ;;  %30876 = vmatpush3.bf16.msra.mxu1 %v33623_v29 }
 0x5c3   : > { %30905 = vmatprep.subr.bf16.mxu1 %v33625_v36 }
 0x5c4   : > { %v30591_v45 = vpop.f32.mrf.mxu0  ;;  %24189 = vmatmul.mubr.bf16.vlgmr.msra.gmra.mxu0 %v5972_v34  ;;  %v33664_v34 = vld [vmem:[%s34917_s23 + $0x2cb0] sm:$0xff]  }
 0x5c5   : > { %v30613_v49 = vpop.f32.mrf.mxu1  ;;  %30884 = vmatpush3.bf16.msra.mxu0 %v33626_v38  ;;  %24229 = vmatmul.mubr.bf16.vlgmr.msra.gmra.mxu1 %v5994_v42 }
 0x5c6   : > { %v30592_v50 = vpop.f32.mrf.mxu0  ;;  %30885 = vmatprep.subr.bf16.mxu0 %v33628_v43  ;;  %30906 = vmatpush3.bf16.msra.mxu1 %v33627_v40  ;;  %v33666_v40 = vld [vmem:[%s34917_s23 + $0x2ce8] sm:$0xff]  }
 0x5c7   : > { %v30593_v53 = vadd.f32 %v30592_v50, %v30591_v45  ;;  %v30614_v55 = vpop.f32.mrf.mxu1  ;;  %24268 = vmatprep.mubr.bf16.mxu0 %v5993_v47  ;;  %30907 = vmatprep.subr.bf16.mxu1 %v33629_v46  ;;  %v33667_v43 = vld [vmem:[%s34917_s23 + $0x2c28] sm:$0xff]   ;;  %v33670_v50 = vld [vmem:[%s34917_s23 + $0x2ce0] sm:$0xff]  }
 0x5c8   : > { %v30594_v56 = vpop.f32.mrf.mxu0  ;;  %v30615_v59 = vadd.f32 %v30614_v55, %v30613_v49  ;;  %24308 = vmatprep.mubr.bf16.mxu1 %v5997_v52  ;;  %v33668_v46 = vld [vmem:[%s34917_s23 + $0x2ca8] sm:$0xff]   ;;  %v33672_v52 = vld [vmem:[%s34917_s23 + $0x2ca0] sm:$0xff]   ;;  %v33675_v55 = vld [vmem:[%s34917_s23 + $0x2c18] sm:$0xff]  }
 0x5c9   : > { %v23711_v58 = vadd.f32 %v30593_v53, %v36618_v7  ;;  %v30616_v61 = vpop.f32.mrf.mxu1  ;;  %30886 = vmatpush3.bf16.msra.mxu0 %v33630_v48  ;;  %v33641_v7 = vld [vmem:[%s34917_s23 + $0x2bd8] sm:$0xff]   ;;  %v33669_v48 = vld [vmem:[%s34917_s23 + $0x2c60] sm:$0xff]  }
 0x5ca   : > { %v30595_v62 = vpop.f32.mrf.mxu0  ;;  %30887 = vmatprep.subr.bf16.mxu0 %v33632_v54  ;;  %30908 = vmatpush3.bf16.msra.mxu1 %v33631_v51  ;;  %v33671_v51 = vld [vmem:[%s34917_s23 + $0x2c20] sm:$0xff]   ;;  %v33673_v53 = vld [vmem:[%s34917_s23 + $0x2c58] sm:$0xff]   ;;  %v33681_v61 = vld [vmem:[%s34917_s23 + $0x2c48] sm:$0xff]  }
 0x5cb   : > { %v36662_v0 = vadd.f32 %v30615_v59, %v23711_v58  ;;  %v30617_v2 = vpop.f32.mrf.mxu1  ;;  %30909 = vmatprep.subr.bf16.mxu1 %v33633_v57  ;;  %v33674_v54 = vld [vmem:[%s34917_s23 + $0x2cd8] sm:$0xff]   ;;  %v33677_v57 = vld [vmem:[%s34917_s23 + $0x2c50] sm:$0xff]   ;;  %v33682_v62 = vld [vmem:[%s34917_s23 + $0x2cc8] sm:$0xff]  }
 0x5cc   : > { %v33676_v56 = vld [vmem:[%s34917_s23 + $0x2c98] sm:$0xff]   ;;  %v33678_v58 = vld [vmem:[%s34917_s23 + $0x2cd0] sm:$0xff]   ;;  %v33686_v2 = vld [vmem:[%s34917_s23 + $0x2cc0] sm:$0xff]  }
 0x5cd   : > { %30888 = vmatpush3.bf16.msra.mxu0 %v33634_v60  ;;  %v33679_v59 = vld [vmem:[%s34917_s23 + $0x2c10] sm:$0xff]  }
 0x5ce   : > { %30889 = vmatprep.subr.bf16.mxu0 %v33636_v1  ;;  %30910 = vmatpush3.bf16.msra.mxu1 %v33635_v63  ;;  %v33680_v60 = vld [vmem:[%s34917_s23 + $0x2c90] sm:$0xff]   ;;  %v33683_v63 = vld [vmem:[%s34917_s23 + $0x2c08] sm:$0xff]   ;;  %v33685_v1 = vld [vmem:[%s34917_s23 + $0x2c40] sm:$0xff]  }
 0x5cf   : > { %30911 = vmatprep.subr.bf16.mxu1 %v33637_v3  ;;  %v33687_v3 = vld [vmem:[%s34917_s23 + $0x2c00] sm:$0xff]  }
 0x5d1   : > { %30890 = vmatpush3.bf16.msra.mxu0 %v33638_v4  ;;  %v255_v4 = vld [vmem:[#allocation2 + $0xb0] sm:$0xff] }
 0x5d2   : > { %30891 = vmatprep.subr.bf16.mxu0 %v33640_v6  ;;  %30912 = vmatpush3.bf16.msra.mxu1 %v33639_v5  ;;  %v33688_v5 = vld [vmem:[%s34917_s23 + $0x2c80] sm:$0xff]   ;;  %v6005_v6 = vrot.slane %v255_v4, %v34953_v35 }
 0x5d3   : > { %30913 = vmatprep.subr.bf16.mxu1 %v33641_v7  ;;  %v5998_v7 = vcombine.high %v255_v4, %v255_v4  ;;  %v33726_v4 = vld [vmem:[%s34917_s23 + $0x2e70] sm:$0xff]  }
 0x5d5   : > { %30892 = vmatpush3.bf16.msra.mxu0 %v33642_v8  ;;  %v33689_v8 = vld [vmem:[%s34917_s23 + $0x2d78] sm:$0xff]  }
 0x5d6   : > { %30893 = vmatprep.subr.bf16.mxu0 %v33644_v10  ;;  %30914 = vmatpush3.bf16.msra.mxu1 %v33643_v9  ;;  %v6013_v9 = vcombine.high %v6005_v6, %v6005_v6  ;;  %v6021_v10 = vrot.slane %v6005_v6, %v34953_v35  ;;  %v33727_v6 = vld [vmem:[%s34917_s23 + $0x2ef0] sm:$0xff]  }
 0x5d7   : > { %30915 = vmatprep.subr.bf16.mxu1 %v33645_v11  ;;  %v33690_v11 = vld [vmem:[%s34917_s23 + $0x2df8] sm:$0xff]  }
 0x5d9   : > { %30894 = vmatpush3.bf16.msra.mxu0 %v33646_v12  ;;  %v36726_v12 = vrot.slane %v5998_v7, %v34953_v35  ;;  %v33728_v7 = vld [vmem:[%s34917_s23 + $0x2e30] sm:$0xff]  }
 0x5da   : > { %30895 = vmatprep.subr.bf16.mxu0 %v33648_v14  ;;  %30916 = vmatpush3.bf16.msra.mxu1 %v33647_v13  ;;  %v33691_v13 = vld [vmem:[%s34917_s23 + $0x2d38] sm:$0xff]   ;;  %v6035_v14 = vrot.slane %v6013_v9, %v34953_v35 }
 0x5db   : > { %30917 = vmatprep.subr.bf16.mxu1 %v33649_v15  ;;  %v33692_v15 = vld [vmem:[%s34917_s23 + $0x2db8] sm:$0xff]  }
 0x5dd   : > { %30896 = vmatpush3.bf16.msra.mxu0 %v33650_v16  ;;  %v6014_v16 = vcombine.high %v36726_v12, %v36726_v12 }
 0x5de   : > { %30897 = vmatprep.subr.bf16.mxu0 %v33652_v18  ;;  %30918 = vmatpush3.bf16.msra.mxu1 %v33651_v17  ;;  %v6043_v17 = vcombine.high %v6021_v10, %v6021_v10  ;;  %v33693_v18 = vld [vmem:[%s34917_s23 + $0x2d70] sm:$0xff]  }
 0x5df   : > { %30919 = vmatprep.subr.bf16.mxu1 %v33653_v19  ;;  %v6045_v19 = vcombine.high %v6035_v14, %v6035_v14 }
 0x5e1   : > { %30898 = vmatpush3.bf16.msra.mxu0 %v33654_v20 }
 0x5e2   : > { %30927 = vmatprep.subr.bf16.mxu0 %v33657_v23  ;;  %30920 = vmatpush3.bf16.msra.mxu1 %v33655_v21  ;;  %v33694_v21 = vld [vmem:[%s34917_s23 + $0x2df0] sm:$0xff]  }
 0x5e3   : > { %30949 = vmatprep.subr.bf16.mxu1 %v33658_v24  ;;  %v33695_v23 = vld [vmem:[%s34917_s23 + $0x2d30] sm:$0xff]  }
 0x5e4   : > { %v30635_v29 = vpop.f32.mrf.mxu0  ;;  %24269 = vmatmul.mubr.bf16.vlgmr.msra.gmra.mxu0 %v5979_v22  ;;  %v6042_v22 = vrot.slane %v6014_v16, %v34953_v35 }
 0x5e5   : > { %v30657_v32 = vpop.f32.mrf.mxu1  ;;  %30928 = vmatpush3.bf16.msra.mxu0 %v33659_v25  ;;  %24309 = vmatmul.mubr.bf16.vlgmr.msra.gmra.mxu1 %v5995_v27 }
 0x5e6   : > { %v30636_v33 = vpop.f32.mrf.mxu0  ;;  %30929 = vmatprep.subr.bf16.mxu0 %v33661_v28  ;;  %30950 = vmatpush3.bf16.msra.mxu1 %v33660_v26  ;;  %v33696_v26 = vld [vmem:[%s34917_s23 + $0x2db0] sm:$0xff]   ;;  %v6046_v27 = vcombine.high %v6042_v22, %v6042_v22 }
 0x5e7   : > { %v30637_v36 = vadd.f32 %v30636_v33, %v30635_v29  ;;  %v30658_v38 = vpop.f32.mrf.mxu1  ;;  %30951 = vmatprep.subr.bf16.mxu1 %v33662_v30  ;;  %24348 = vmatprep.mubr.bf16.mxu0 %v6035_v14  ;;  %v33697_v29 = vld [vmem:[%s34917_s23 + $0x2d68] sm:$0xff]  }
 0x5e8   : > { %v30638_v39 = vpop.f32.mrf.mxu0  ;;  %v30659_v42 = vadd.f32 %v30658_v38, %v30657_v32  ;;  %24388 = vmatprep.mubr.bf16.mxu1 %v6045_v19  ;;  %v33698_v32 = vld [vmem:[%s34917_s23 + $0x2de8] sm:$0xff]  }
 0x5e9   : > { %v23791_v41 = vadd.f32 %v30637_v36, %v36662_v0  ;;  %v30660_v44 = vpop.f32.mrf.mxu1  ;;  %30930 = vmatpush3.bf16.msra.mxu0 %v33663_v31  ;;  %v33684_v0 = vld [vmem:[%s34917_s23 + $0x2c88] sm:$0xff]  }
 0x5ea   : > { %v30639_v45 = vpop.f32.mrf.mxu0  ;;  %30931 = vmatprep.subr.bf16.mxu0 %v33665_v37  ;;  %30952 = vmatpush3.bf16.msra.mxu1 %v33664_v34  ;;  %v33699_v36 = vld [vmem:[%s34917_s23 + $0x2d28] sm:$0xff]   ;;  %v33703_v44 = vld [vmem:[%s34917_s23 + $0x2d20] sm:$0xff]  }
 0x5eb   : > { %v36699_v47 = vadd.f32 %v30659_v42, %v23791_v41  ;;  %v30661_v49 = vpop.f32.mrf.mxu1  ;;  %30953 = vmatprep.subr.bf16.mxu1 %v33666_v40  ;;  %v33700_v39 = vld [vmem:[%s34917_s23 + $0x2da8] sm:$0xff]   ;;  %v33701_v41 = vld [vmem:[%s34917_s23 + $0x2d60] sm:$0xff]  }
 0x5ec   : > { %v33704_v45 = vld [vmem:[%s34917_s23 + $0x2da0] sm:$0xff]   ;;  %v33708_v49 = vld [vmem:[%s34917_s23 + $0x2d98] sm:$0xff]  }
 0x5ed   : > { %30932 = vmatpush3.bf16.msra.mxu0 %v33667_v43  ;;  %v33702_v43 = vld [vmem:[%s34917_s23 + $0x2de0] sm:$0xff]  }
 0x5ee   : > { %30933 = vmatprep.subr.bf16.mxu0 %v33669_v48  ;;  %30954 = vmatpush3.bf16.msra.mxu1 %v33668_v46  ;;  %v33705_v46 = vld [vmem:[%s34917_s23 + $0x2d58] sm:$0xff]  }
 0x5ef   : > { %30955 = vmatprep.subr.bf16.mxu1 %v33670_v50  ;;  %v33707_v48 = vld [vmem:[%s34917_s23 + $0x2d18] sm:$0xff]   ;;  %v33709_v50 = vld [vmem:[%s34917_s23 + $0x2d50] sm:$0xff]  }
 0x5f1   : > { %30934 = vmatpush3.bf16.msra.mxu0 %v33671_v51  ;;  %v33710_v51 = vld [vmem:[%s34917_s23 + $0x2dd0] sm:$0xff]  }
 0x5f2   : > { %30935 = vmatprep.subr.bf16.mxu0 %v33673_v53  ;;  %30956 = vmatpush3.bf16.msra.mxu1 %v33672_v52  ;;  %v33711_v52 = vld [vmem:[%s34917_s23 + $0x2d10] sm:$0xff]  }
 0x5f3   : > { %30957 = vmatprep.subr.bf16.mxu1 %v33674_v54  ;;  %v33712_v53 = vld [vmem:[%s34917_s23 + $0x2d90] sm:$0xff]   ;;  %v33713_v54 = vld [vmem:[%s34917_s23 + $0x2d48] sm:$0xff]  }
 0x5f5   : > { %30936 = vmatpush3.bf16.msra.mxu0 %v33675_v55  ;;  %v33714_v55 = vld [vmem:[%s34917_s23 + $0x2dc8] sm:$0xff]  }
 0x5f6   : > { %30937 = vmatprep.subr.bf16.mxu0 %v33677_v57  ;;  %30958 = vmatpush3.bf16.msra.mxu1 %v33676_v56  ;;  %v33715_v56 = vld [vmem:[%s34917_s23 + $0x2d08] sm:$0xff]  }
 0x5f7   : > { %30959 = vmatprep.subr.bf16.mxu1 %v33678_v58  ;;  %v33716_v57 = vld [vmem:[%s34917_s23 + $0x2d88] sm:$0xff]   ;;  %v33717_v58 = vld [vmem:[%s34917_s23 + $0x2d40] sm:$0xff]  }
 0x5f9   : > { %30938 = vmatpush3.bf16.msra.mxu0 %v33679_v59  ;;  %v33718_v59 = vld [vmem:[%s34917_s23 + $0x2dc0] sm:$0xff]  }
 0x5fa   : > { %30939 = vmatprep.subr.bf16.mxu0 %v33681_v61  ;;  %30960 = vmatpush3.bf16.msra.mxu1 %v33680_v60  ;;  %v33719_v60 = vld [vmem:[%s34917_s23 + $0x2d00] sm:$0xff]  }
 0x5fb   : > { %30961 = vmatprep.subr.bf16.mxu1 %v33682_v62  ;;  %v33720_v61 = vld [vmem:[%s34917_s23 + $0x2d80] sm:$0xff]   ;;  %v6028_v62 = vrot.slane %v36726_v12, %v34953_v35  ;;  %v33730_v12 = vld [vmem:[%s34917_s23 + $0x2e68] sm:$0xff]  }
 0x5fd   : > { %30940 = vmatpush3.bf16.msra.mxu0 %v33683_v63  ;;  %v33722_v63 = vld [vmem:[%s34917_s23 + $0x2e78] sm:$0xff]  }
 0x5fe   : > { %30941 = vmatprep.subr.bf16.mxu0 %v33685_v1  ;;  %30962 = vmatpush3.bf16.msra.mxu1 %v33684_v0  ;;  %v33723_v0 = vld [vmem:[%s34917_s23 + $0x2ef8] sm:$0xff]  }
 0x5ff   : > { %30963 = vmatprep.subr.bf16.mxu1 %v33686_v2  ;;  %v33724_v1 = vld [vmem:[%s34917_s23 + $0x2e38] sm:$0xff]  }
 0x600   : > { %v33725_v2 = vld [vmem:[%s34917_s23 + $0x2eb8] sm:$0xff]  }
 0x601   : > { %30942 = vmatpush3.bf16.msra.mxu0 %v33687_v3  ;;  %v6044_v3 = vcombine.high %v6028_v62, %v6028_v62 }
 0x602   : > { %30971 = vmatprep.subr.bf16.mxu0 %v33689_v8  ;;  %30964 = vmatpush3.bf16.msra.mxu1 %v33688_v5 }
 0x603   : > { %30993 = vmatprep.subr.bf16.mxu1 %v33690_v11 }
 0x604   : > { %v30679_v20 = vpop.f32.mrf.mxu0  ;;  %24349 = vmatmul.mubr.bf16.vlgmr.msra.gmra.mxu0 %v6021_v10  ;;  %v33729_v10 = vld [vmem:[%s34917_s23 + $0x2eb0] sm:$0xff]  }
 0x605   : > { %v30701_v24 = vpop.f32.mrf.mxu1  ;;  %30972 = vmatpush3.bf16.msra.mxu0 %v33691_v13  ;;  %24389 = vmatmul.mubr.bf16.vlgmr.msra.gmra.mxu1 %v6043_v17 }
 0x606   : > { %v30680_v25 = vpop.f32.mrf.mxu0  ;;  %30973 = vmatprep.subr.bf16.mxu0 %v33693_v18  ;;  %30994 = vmatpush3.bf16.msra.mxu1 %v33692_v15  ;;  %v33731_v15 = vld [vmem:[%s34917_s23 + $0x2ee8] sm:$0xff]  }
 0x607   : > { %v30681_v28 = vadd.f32 %v30680_v25, %v30679_v20  ;;  %v30702_v30 = vpop.f32.mrf.mxu1  ;;  %24428 = vmatprep.mubr.bf16.mxu0 %v6042_v22  ;;  %30995 = vmatprep.subr.bf16.mxu1 %v33694_v21  ;;  %v33732_v18 = vld [vmem:[%s34917_s23 + $0x2e28] sm:$0xff]   ;;  %v33735_v25 = vld [vmem:[%s34917_s23 + $0x2ee0] sm:$0xff]  }
 0x608   : > { %v30682_v31 = vpop.f32.mrf.mxu0  ;;  %v30703_v34 = vadd.f32 %v30702_v30, %v30701_v24  ;;  %24468 = vmatprep.mubr.bf16.mxu1 %v6046_v27  ;;  %v33733_v21 = vld [vmem:[%s34917_s23 + $0x2ea8] sm:$0xff]   ;;  %v33737_v27 = vld [vmem:[%s34917_s23 + $0x2ea0] sm:$0xff]   ;;  %v33740_v30 = vld [vmem:[%s34917_s23 + $0x2e18] sm:$0xff]  }
 0x609   : > { %v23871_v33 = vadd.f32 %v30681_v28, %v36699_v47  ;;  %v30704_v37 = vpop.f32.mrf.mxu1  ;;  %30974 = vmatpush3.bf16.msra.mxu0 %v33695_v23  ;;  %v33706_v47 = vld [vmem:[%s34917_s23 + $0x2dd8] sm:$0xff]   ;;  %v33734_v23 = vld [vmem:[%s34917_s23 + $0x2e60] sm:$0xff]  }
 0x60a   : > { %v30683_v38 = vpop.f32.mrf.mxu0  ;;  %30975 = vmatprep.subr.bf16.mxu0 %v33697_v29  ;;  %30996 = vmatpush3.bf16.msra.mxu1 %v33696_v26  ;;  %v33736_v26 = vld [vmem:[%s34917_s23 + $0x2e20] sm:$0xff]   ;;  %v33738_v28 = vld [vmem:[%s34917_s23 + $0x2e58] sm:$0xff]   ;;  %v33746_v37 = vld [vmem:[%s34917_s23 + $0x2e48] sm:$0xff]  }
 0x60b   : > { %v36743_v40 = vadd.f32 %v30703_v34, %v23871_v33  ;;  %v30705_v42 = vpop.f32.mrf.mxu1  ;;  %30997 = vmatprep.subr.bf16.mxu1 %v33698_v32  ;;  %v33739_v29 = vld [vmem:[%s34917_s23 + $0x2ed8] sm:$0xff]   ;;  %v33742_v32 = vld [vmem:[%s34917_s23 + $0x2e50] sm:$0xff]   ;;  %v33747_v38 = vld [vmem:[%s34917_s23 + $0x2ec8] sm:$0xff]  }
 0x60c   : > { %v33741_v31 = vld [vmem:[%s34917_s23 + $0x2e98] sm:$0xff]   ;;  %v33743_v33 = vld [vmem:[%s34917_s23 + $0x2ed0] sm:$0xff]   ;;  %v33751_v42 = vld [vmem:[%s34917_s23 + $0x2ec0] sm:$0xff]  }
 0x60d   : > { %30976 = vmatpush3.bf16.msra.mxu0 %v33699_v36  ;;  %v33744_v34 = vld [vmem:[%s34917_s23 + $0x2e10] sm:$0xff]  }
 0x60e   : > { %30977 = vmatprep.subr.bf16.mxu0 %v33701_v41  ;;  %30998 = vmatpush3.bf16.msra.mxu1 %v33700_v39  ;;  %v33745_v36 = vld [vmem:[%s34917_s23 + $0x2e90] sm:$0xff]   ;;  %v33748_v39 = vld [vmem:[%s34917_s23 + $0x2e08] sm:$0xff]   ;;  %v33750_v41 = vld [vmem:[%s34917_s23 + $0x2e40] sm:$0xff]  }
 0x60f   : > { %30999 = vmatprep.subr.bf16.mxu1 %v33702_v43  ;;  %v33752_v43 = vld [vmem:[%s34917_s23 + $0x2e00] sm:$0xff]  }
 0x611   : > { %30978 = vmatpush3.bf16.msra.mxu0 %v33703_v44  ;;  %v256_v44 = vld [vmem:[#allocation2 + $0xb8] sm:$0xff] }
 0x612   : > { %30979 = vmatprep.subr.bf16.mxu0 %v33705_v46  ;;  %31000 = vmatpush3.bf16.msra.mxu1 %v33704_v45  ;;  %v6054_v45 = vrot.slane %v256_v44, %v34953_v35  ;;  %v33754_v46 = vld [vmem:[%s34917_s23 + $0x2f78] sm:$0xff]  }
 0x613   : > { %31001 = vmatprep.subr.bf16.mxu1 %v33706_v47  ;;  %v6047_v47 = vcombine.high %v256_v44, %v256_v44  ;;  %v33791_v44 = vld [vmem:[%s34917_s23 + $0x3070] sm:$0xff]  }
 0x615   : > { %30980 = vmatpush3.bf16.msra.mxu0 %v33707_v48  ;;  %v33753_v48 = vld [vmem:[%s34917_s23 + $0x2e80] sm:$0xff]  }
 0x616   : > { %30981 = vmatprep.subr.bf16.mxu0 %v33709_v50  ;;  %31002 = vmatpush3.bf16.msra.mxu1 %v33708_v49  ;;  %v6062_v49 = vcombine.high %v6054_v45, %v6054_v45  ;;  %v6070_v50 = vrot.slane %v6054_v45, %v34953_v35 }
 0x617   : > { %31003 = vmatprep.subr.bf16.mxu1 %v33710_v51  ;;  %v33755_v51 = vld [vmem:[%s34917_s23 + $0x2ff8] sm:$0xff]  }
 0x619   : > { %30982 = vmatpush3.bf16.msra.mxu0 %v33711_v52  ;;  %v36807_v52 = vrot.slane %v6047_v47, %v34953_v35  ;;  %v33793_v47 = vld [vmem:[%s34917_s23 + $0x3030] sm:$0xff]  }
 0x61a   : > { %30983 = vmatprep.subr.bf16.mxu0 %v33713_v54  ;;  %31004 = vmatpush3.bf16.msra.mxu1 %v33712_v53  ;;  %v33756_v53 = vld [vmem:[%s34917_s23 + $0x2f38] sm:$0xff]   ;;  %v6084_v54 = vrot.slane %v6062_v49, %v34953_v35 }
 0x61b   : > { %31005 = vmatprep.subr.bf16.mxu1 %v33714_v55  ;;  %v33757_v55 = vld [vmem:[%s34917_s23 + $0x2fb8] sm:$0xff]  }
 0x61d   : > { %30984 = vmatpush3.bf16.msra.mxu0 %v33715_v56  ;;  %v6063_v56 = vcombine.high %v36807_v52, %v36807_v52 }
 0x61e   : > { %30985 = vmatprep.subr.bf16.mxu0 %v33717_v58  ;;  %31006 = vmatpush3.bf16.msra.mxu1 %v33716_v57  ;;  %v6092_v57 = vcombine.high %v6070_v50, %v6070_v50  ;;  %v33758_v58 = vld [vmem:[%s34917_s23 + $0x2f70] sm:$0xff]  }
 0x61f   : > { %31007 = vmatprep.subr.bf16.mxu1 %v33718_v59  ;;  %v6094_v59 = vcombine.high %v6084_v54, %v6084_v54 }
 0x621   : > { %30986 = vmatpush3.bf16.msra.mxu0 %v33719_v60 }
 0x622   : > { %31015 = vmatprep.subr.bf16.mxu0 %v33722_v63  ;;  %31008 = vmatpush3.bf16.msra.mxu1 %v33720_v61  ;;  %v33759_v61 = vld [vmem:[%s34917_s23 + $0x2ff0] sm:$0xff]  }
 0x623   : > { %31037 = vmatprep.subr.bf16.mxu1 %v33723_v0  ;;  %v33760_v63 = vld [vmem:[%s34917_s23 + $0x2f30] sm:$0xff]  }
 0x624   : > { %v30723_v5 = vpop.f32.mrf.mxu0  ;;  %24429 = vmatmul.mubr.bf16.vlgmr.msra.gmra.mxu0 %v6028_v62  ;;  %v6091_v62 = vrot.slane %v6063_v56, %v34953_v35 }
 0x625   : > { %v30745_v8 = vpop.f32.mrf.mxu1  ;;  %31016 = vmatpush3.bf16.msra.mxu0 %v33724_v1  ;;  %24469 = vmatmul.mubr.bf16.vlgmr.msra.gmra.mxu1 %v6044_v3 }
 0x626   : > { %v30724_v9 = vpop.f32.mrf.mxu0  ;;  %31017 = vmatprep.subr.bf16.mxu0 %v33726_v4  ;;  %31038 = vmatpush3.bf16.msra.mxu1 %v33725_v2  ;;  %v33761_v2 = vld [vmem:[%s34917_s23 + $0x2fb0] sm:$0xff]   ;;  %v6095_v3 = vcombine.high %v6091_v62, %v6091_v62 }
 0x627   : > { %v30725_v11 = vadd.f32 %v30724_v9, %v30723_v5  ;;  %v30746_v13 = vpop.f32.mrf.mxu1  ;;  %31039 = vmatprep.subr.bf16.mxu1 %v33727_v6  ;;  %24508 = vmatprep.mubr.bf16.mxu0 %v6084_v54  ;;  %v33762_v5 = vld [vmem:[%s34917_s23 + $0x2f68] sm:$0xff]  }
 0x628   : > { %v30726_v14 = vpop.f32.mrf.mxu0  ;;  %v30747_v17 = vadd.f32 %v30746_v13, %v30745_v8  ;;  %24548 = vmatprep.mubr.bf16.mxu1 %v6094_v59  ;;  %v33763_v8 = vld [vmem:[%s34917_s23 + $0x2fe8] sm:$0xff]  }
 0x629   : > { %v23951_v16 = vadd.f32 %v30725_v11, %v36743_v40  ;;  %v30748_v19 = vpop.f32.mrf.mxu1  ;;  %31018 = vmatpush3.bf16.msra.mxu0 %v33728_v7  ;;  %v33749_v40 = vld [vmem:[%s34917_s23 + $0x2e88] sm:$0xff]  }
 0x62a   : > { %v30727_v20 = vpop.f32.mrf.mxu0  ;;  %31019 = vmatprep.subr.bf16.mxu0 %v33730_v12  ;;  %31040 = vmatpush3.bf16.msra.mxu1 %v33729_v10  ;;  %v33764_v11 = vld [vmem:[%s34917_s23 + $0x2f28] sm:$0xff]   ;;  %v33768_v19 = vld [vmem:[%s34917_s23 + $0x2f20] sm:$0xff]  }
 0x62b   : > { %v36780_v22 = vadd.f32 %v30747_v17, %v23951_v16  ;;  %v30749_v24 = vpop.f32.mrf.mxu1  ;;  %31041 = vmatprep.subr.bf16.mxu1 %v33731_v15  ;;  %v33765_v14 = vld [vmem:[%s34917_s23 + $0x2fa8] sm:$0xff]   ;;  %v33766_v16 = vld [vmem:[%s34917_s23 + $0x2f60] sm:$0xff]  }
 0x62c   : > { %v33769_v20 = vld [vmem:[%s34917_s23 + $0x2fa0] sm:$0xff]   ;;  %v33773_v24 = vld [vmem:[%s34917_s23 + $0x2f98] sm:$0xff]  }
 0x62d   : > { %31020 = vmatpush3.bf16.msra.mxu0 %v33732_v18  ;;  %v33767_v18 = vld [vmem:[%s34917_s23 + $0x2fe0] sm:$0xff]  }
 0x62e   : > { %31021 = vmatprep.subr.bf16.mxu0 %v33734_v23  ;;  %31042 = vmatpush3.bf16.msra.mxu1 %v33733_v21  ;;  %v33770_v21 = vld [vmem:[%s34917_s23 + $0x2f58] sm:$0xff]  }
 0x62f   : > { %31043 = vmatprep.subr.bf16.mxu1 %v33735_v25  ;;  %v33772_v23 = vld [vmem:[%s34917_s23 + $0x2f18] sm:$0xff]   ;;  %v33774_v25 = vld [vmem:[%s34917_s23 + $0x2f50] sm:$0xff]  }
 0x631   : > { %31022 = vmatpush3.bf16.msra.mxu0 %v33736_v26  ;;  %v33775_v26 = vld [vmem:[%s34917_s23 + $0x2fd0] sm:$0xff]  }
 0x632   : > { %31023 = vmatprep.subr.bf16.mxu0 %v33738_v28  ;;  %31044 = vmatpush3.bf16.msra.mxu1 %v33737_v27  ;;  %v33776_v27 = vld [vmem:[%s34917_s23 + $0x2f10] sm:$0xff]  }
 0x633   : > { %31045 = vmatprep.subr.bf16.mxu1 %v33739_v29  ;;  %v33777_v28 = vld [vmem:[%s34917_s23 + $0x2f90] sm:$0xff]   ;;  %v33778_v29 = vld [vmem:[%s34917_s23 + $0x2f48] sm:$0xff]  }
 0x635   : > { %31024 = vmatpush3.bf16.msra.mxu0 %v33740_v30  ;;  %v33779_v30 = vld [vmem:[%s34917_s23 + $0x2fc8] sm:$0xff]  }
 0x636   : > { %31025 = vmatprep.subr.bf16.mxu0 %v33742_v32  ;;  %31046 = vmatpush3.bf16.msra.mxu1 %v33741_v31  ;;  %v33780_v31 = vld [vmem:[%s34917_s23 + $0x2f08] sm:$0xff]  }
 0x637   : > { %31047 = vmatprep.subr.bf16.mxu1 %v33743_v33  ;;  %v33781_v32 = vld [vmem:[%s34917_s23 + $0x2f88] sm:$0xff]   ;;  %v33782_v33 = vld [vmem:[%s34917_s23 + $0x2f40] sm:$0xff]  }
 0x639   : > { %31026 = vmatpush3.bf16.msra.mxu0 %v33744_v34  ;;  %v33783_v34 = vld [vmem:[%s34917_s23 + $0x2fc0] sm:$0xff]  }
 0x63a   : > { %31027 = vmatprep.subr.bf16.mxu0 %v33746_v37  ;;  %31048 = vmatpush3.bf16.msra.mxu1 %v33745_v36  ;;  %v33784_v36 = vld [vmem:[%s34917_s23 + $0x2f00] sm:$0xff]  }
 0x63b   : > { %31049 = vmatprep.subr.bf16.mxu1 %v33747_v38  ;;  %v33785_v37 = vld [vmem:[%s34917_s23 + $0x2f80] sm:$0xff]   ;;  %v6077_v38 = vrot.slane %v36807_v52, %v34953_v35  ;;  %v33795_v52 = vld [vmem:[%s34917_s23 + $0x3068] sm:$0xff]  }
 0x63d   : > { %31028 = vmatpush3.bf16.msra.mxu0 %v33748_v39  ;;  %v33787_v39 = vld [vmem:[%s34917_s23 + $0x3078] sm:$0xff]  }
 0x63e   : > { %31029 = vmatprep.subr.bf16.mxu0 %v33750_v41  ;;  %31050 = vmatpush3.bf16.msra.mxu1 %v33749_v40  ;;  %v33788_v40 = vld [vmem:[%s34917_s23 + $0x30f8] sm:$0xff]  }
 0x63f   : > { %31051 = vmatprep.subr.bf16.mxu1 %v33751_v42  ;;  %v33789_v41 = vld [vmem:[%s34917_s23 + $0x3038] sm:$0xff]  }
 0x640   : > { %v33790_v42 = vld [vmem:[%s34917_s23 + $0x30b8] sm:$0xff]  }
 0x641   : > { %31030 = vmatpush3.bf16.msra.mxu0 %v33752_v43  ;;  %v6093_v43 = vcombine.high %v6077_v38, %v6077_v38 }
 0x642   : > { %31059 = vmatprep.subr.bf16.mxu0 %v33754_v46  ;;  %31052 = vmatpush3.bf16.msra.mxu1 %v33753_v48  ;;  %v33792_v46 = vld [vmem:[%s34917_s23 + $0x30f0] sm:$0xff]  }
 0x643   : > { %31081 = vmatprep.subr.bf16.mxu1 %v33755_v51 }
 0x644   : > { %v30767_v60 = vpop.f32.mrf.mxu0  ;;  %24509 = vmatmul.mubr.bf16.vlgmr.msra.gmra.mxu0 %v6070_v50  ;;  %v33794_v50 = vld [vmem:[%s34917_s23 + $0x30b0] sm:$0xff]  }
 0x645   : > { %v30789_v0 = vpop.f32.mrf.mxu1  ;;  %31060 = vmatpush3.bf16.msra.mxu0 %v33756_v53  ;;  %24549 = vmatmul.mubr.bf16.vlgmr.msra.gmra.mxu1 %v6092_v57 }
 0x646   : > { %v30768_v1 = vpop.f32.mrf.mxu0  ;;  %31061 = vmatprep.subr.bf16.mxu0 %v33758_v58  ;;  %31082 = vmatpush3.bf16.msra.mxu1 %v33757_v55  ;;  %v33796_v55 = vld [vmem:[%s34917_s23 + $0x30e8] sm:$0xff]  }
 0x647   : > { %v30769_v4 = vadd.f32 %v30768_v1, %v30767_v60  ;;  %v30790_v6 = vpop.f32.mrf.mxu1  ;;  %24588 = vmatprep.mubr.bf16.mxu0 %v6091_v62  ;;  %31083 = vmatprep.subr.bf16.mxu1 %v33759_v61  ;;  %v33797_v58 = vld [vmem:[%s34917_s23 + $0x3028] sm:$0xff]   ;;  %v33800_v1 = vld [vmem:[%s34917_s23 + $0x30e0] sm:$0xff]  }
 0x648   : > { %v30770_v7 = vpop.f32.mrf.mxu0  ;;  %v30791_v10 = vadd.f32 %v30790_v6, %v30789_v0  ;;  %24628 = vmatprep.mubr.bf16.mxu1 %v6095_v3  ;;  %v33798_v61 = vld [vmem:[%s34917_s23 + $0x30a8] sm:$0xff]   ;;  %v33802_v3 = vld [vmem:[%s34917_s23 + $0x30a0] sm:$0xff]   ;;  %v33805_v6 = vld [vmem:[%s34917_s23 + $0x3018] sm:$0xff]  }
 0x649   : > { %v24031_v9 = vadd.f32 %v30769_v4, %v36780_v22  ;;  %v30792_v12 = vpop.f32.mrf.mxu1  ;;  %31062 = vmatpush3.bf16.msra.mxu0 %v33760_v63  ;;  %v33771_v22 = vld [vmem:[%s34917_s23 + $0x2fd8] sm:$0xff]   ;;  %v33799_v63 = vld [vmem:[%s34917_s23 + $0x3060] sm:$0xff]  }
 0x64a   : > { %v30771_v13 = vpop.f32.mrf.mxu0  ;;  %31063 = vmatprep.subr.bf16.mxu0 %v33762_v5  ;;  %31084 = vmatpush3.bf16.msra.mxu1 %v33761_v2  ;;  %v33801_v2 = vld [vmem:[%s34917_s23 + $0x3020] sm:$0xff]   ;;  %v33803_v4 = vld [vmem:[%s34917_s23 + $0x3058] sm:$0xff]   ;;  %v33811_v12 = vld [vmem:[%s34917_s23 + $0x3048] sm:$0xff]  }
 0x64b   : > { %v36824_v15 = vadd.f32 %v30791_v10, %v24031_v9  ;;  %v30793_v17 = vpop.f32.mrf.mxu1  ;;  %31085 = vmatprep.subr.bf16.mxu1 %v33763_v8  ;;  %v33804_v5 = vld [vmem:[%s34917_s23 + $0x30d8] sm:$0xff]   ;;  %v33807_v8 = vld [vmem:[%s34917_s23 + $0x3050] sm:$0xff]   ;;  %v33812_v13 = vld [vmem:[%s34917_s23 + $0x30c8] sm:$0xff]  }
 0x64c   : > { %v33806_v7 = vld [vmem:[%s34917_s23 + $0x3098] sm:$0xff]   ;;  %v33808_v9 = vld [vmem:[%s34917_s23 + $0x30d0] sm:$0xff]   ;;  %v33816_v17 = vld [vmem:[%s34917_s23 + $0x30c0] sm:$0xff]  }
 0x64d   : > { %31064 = vmatpush3.bf16.msra.mxu0 %v33764_v11  ;;  %v33809_v10 = vld [vmem:[%s34917_s23 + $0x3010] sm:$0xff]  }
 0x64e   : > { %31065 = vmatprep.subr.bf16.mxu0 %v33766_v16  ;;  %31086 = vmatpush3.bf16.msra.mxu1 %v33765_v14  ;;  %v33810_v11 = vld [vmem:[%s34917_s23 + $0x3090] sm:$0xff]   ;;  %v33813_v14 = vld [vmem:[%s34917_s23 + $0x3008] sm:$0xff]   ;;  %v33815_v16 = vld [vmem:[%s34917_s23 + $0x3040] sm:$0xff]  }
 0x64f   : > { %31087 = vmatprep.subr.bf16.mxu1 %v33767_v18  ;;  %v33817_v18 = vld [vmem:[%s34917_s23 + $0x3000] sm:$0xff]  }
 0x651   : > { %31066 = vmatpush3.bf16.msra.mxu0 %v33768_v19  ;;  %v257_v19 = vld [vmem:[#allocation2 + $0xc0] sm:$0xff] }
 0x652   : > { %31067 = vmatprep.subr.bf16.mxu0 %v33770_v21  ;;  %31088 = vmatpush3.bf16.msra.mxu1 %v33769_v20  ;;  %v33818_v20 = vld [vmem:[%s34917_s23 + $0x3080] sm:$0xff]   ;;  %v6103_v21 = vrot.slane %v257_v19, %v34953_v35 }
 0x653   : > { %31089 = vmatprep.subr.bf16.mxu1 %v33771_v22  ;;  %v6096_v22 = vcombine.high %v257_v19, %v257_v19  ;;  %v33856_v19 = vld [vmem:[%s34917_s23 + $0x3270] sm:$0xff]  }
 0x655   : > { %31068 = vmatpush3.bf16.msra.mxu0 %v33772_v23  ;;  %v33819_v23 = vld [vmem:[%s34917_s23 + $0x3178] sm:$0xff]  }
 0x656   : > { %31069 = vmatprep.subr.bf16.mxu0 %v33774_v25  ;;  %31090 = vmatpush3.bf16.msra.mxu1 %v33773_v24  ;;  %v6111_v24 = vcombine.high %v6103_v21, %v6103_v21  ;;  %v6119_v25 = vrot.slane %v6103_v21, %v34953_v35  ;;  %v33857_v21 = vld [vmem:[%s34917_s23 + $0x32f0] sm:$0xff]  }
 0x657   : > { %31091 = vmatprep.subr.bf16.mxu1 %v33775_v26  ;;  %v33820_v26 = vld [vmem:[%s34917_s23 + $0x31f8] sm:$0xff]  }
 0x659   : > { %31070 = vmatpush3.bf16.msra.mxu0 %v33776_v27  ;;  %v36888_v27 = vrot.slane %v6096_v22, %v34953_v35  ;;  %v33858_v22 = vld [vmem:[%s34917_s23 + $0x3230] sm:$0xff]  }
 0x65a   : > { %31071 = vmatprep.subr.bf16.mxu0 %v33778_v29  ;;  %31092 = vmatpush3.bf16.msra.mxu1 %v33777_v28  ;;  %v33821_v28 = vld [vmem:[%s34917_s23 + $0x3138] sm:$0xff]   ;;  %v6133_v29 = vrot.slane %v6111_v24, %v34953_v35 }
 0x65b   : > { %31093 = vmatprep.subr.bf16.mxu1 %v33779_v30  ;;  %v33822_v30 = vld [vmem:[%s34917_s23 + $0x31b8] sm:$0xff]  }
 0x65d   : > { %31072 = vmatpush3.bf16.msra.mxu0 %v33780_v31  ;;  %v6112_v31 = vcombine.high %v36888_v27, %v36888_v27 }
 0x65e   : > { %31073 = vmatprep.subr.bf16.mxu0 %v33782_v33  ;;  %31094 = vmatpush3.bf16.msra.mxu1 %v33781_v32  ;;  %v6141_v32 = vcombine.high %v6119_v25, %v6119_v25  ;;  %v33823_v33 = vld [vmem:[%s34917_s23 + $0x3170] sm:$0xff]  }
 0x65f   : > { %31095 = vmatprep.subr.bf16.mxu1 %v33783_v34  ;;  %v6143_v34 = vcombine.high %v6133_v29, %v6133_v29 }
 0x661   : > { %31074 = vmatpush3.bf16.msra.mxu0 %v33784_v36 }
 0x662   : > { %31103 = vmatprep.subr.bf16.mxu0 %v33787_v39  ;;  %31096 = vmatpush3.bf16.msra.mxu1 %v33785_v37  ;;  %v33824_v37 = vld [vmem:[%s34917_s23 + $0x31f0] sm:$0xff]  }
 0x663   : > { %31125 = vmatprep.subr.bf16.mxu1 %v33788_v40  ;;  %v33825_v39 = vld [vmem:[%s34917_s23 + $0x3130] sm:$0xff]  }
 0x664   : > { %v30811_v45 = vpop.f32.mrf.mxu0  ;;  %24589 = vmatmul.mubr.bf16.vlgmr.msra.gmra.mxu0 %v6077_v38  ;;  %v6140_v38 = vrot.slane %v6112_v31, %v34953_v35 }
 0x665   : > { %v30833_v48 = vpop.f32.mrf.mxu1  ;;  %31104 = vmatpush3.bf16.msra.mxu0 %v33789_v41  ;;  %24629 = vmatmul.mubr.bf16.vlgmr.msra.gmra.mxu1 %v6093_v43 }
 0x666   : > { %v30812_v49 = vpop.f32.mrf.mxu0  ;;  %31105 = vmatprep.subr.bf16.mxu0 %v33791_v44  ;;  %31126 = vmatpush3.bf16.msra.mxu1 %v33790_v42  ;;  %v33826_v42 = vld [vmem:[%s34917_s23 + $0x31b0] sm:$0xff]   ;;  %v6144_v43 = vcombine.high %v6140_v38, %v6140_v38 }
 0x667   : > { %v30813_v51 = vadd.f32 %v30812_v49, %v30811_v45  ;;  %v30834_v53 = vpop.f32.mrf.mxu1  ;;  %31127 = vmatprep.subr.bf16.mxu1 %v33792_v46  ;;  %24668 = vmatprep.mubr.bf16.mxu0 %v6133_v29  ;;  %v33827_v45 = vld [vmem:[%s34917_s23 + $0x3168] sm:$0xff]  }
 0x668   : > { %v30814_v54 = vpop.f32.mrf.mxu0  ;;  %v30835_v57 = vadd.f32 %v30834_v53, %v30833_v48  ;;  %24708 = vmatprep.mubr.bf16.mxu1 %v6143_v34  ;;  %v33828_v48 = vld [vmem:[%s34917_s23 + $0x31e8] sm:$0xff]  }
 0x669   : > { %v24111_v56 = vadd.f32 %v30813_v51, %v36824_v15  ;;  %v30836_v59 = vpop.f32.mrf.mxu1  ;;  %31106 = vmatpush3.bf16.msra.mxu0 %v33793_v47  ;;  %v33814_v15 = vld [vmem:[%s34917_s23 + $0x3088] sm:$0xff]  }
 0x66a   : > { %v30815_v60 = vpop.f32.mrf.mxu0  ;;  %31107 = vmatprep.subr.bf16.mxu0 %v33795_v52  ;;  %31128 = vmatpush3.bf16.msra.mxu1 %v33794_v50  ;;  %v33829_v51 = vld [vmem:[%s34917_s23 + $0x3128] sm:$0xff]   ;;  %v33833_v59 = vld [vmem:[%s34917_s23 + $0x3120] sm:$0xff]  }
 0x66b   : > { %v36861_v62 = vadd.f32 %v30835_v57, %v24111_v56  ;;  %v30837_v0 = vpop.f32.mrf.mxu1  ;;  %31129 = vmatprep.subr.bf16.mxu1 %v33796_v55  ;;  %v33830_v54 = vld [vmem:[%s34917_s23 + $0x31a8] sm:$0xff]   ;;  %v33831_v56 = vld [vmem:[%s34917_s23 + $0x3160] sm:$0xff]  }
 0x66c   : > { %v33834_v60 = vld [vmem:[%s34917_s23 + $0x31a0] sm:$0xff]   ;;  %v33838_v0 = vld [vmem:[%s34917_s23 + $0x3198] sm:$0xff]  }
 0x66d   : > { %31108 = vmatpush3.bf16.msra.mxu0 %v33797_v58  ;;  %v33832_v58 = vld [vmem:[%s34917_s23 + $0x31e0] sm:$0xff]  }
 0x66e   : > { %31109 = vmatprep.subr.bf16.mxu0 %v33799_v63  ;;  %31130 = vmatpush3.bf16.msra.mxu1 %v33798_v61  ;;  %v33835_v61 = vld [vmem:[%s34917_s23 + $0x3158] sm:$0xff]  }
 0x66f   : > { %31131 = vmatprep.subr.bf16.mxu1 %v33800_v1  ;;  %v33837_v63 = vld [vmem:[%s34917_s23 + $0x3118] sm:$0xff]   ;;  %v33839_v1 = vld [vmem:[%s34917_s23 + $0x3150] sm:$0xff]  }
 0x671   : > { %31110 = vmatpush3.bf16.msra.mxu0 %v33801_v2  ;;  %v33840_v2 = vld [vmem:[%s34917_s23 + $0x31d0] sm:$0xff]  }
 0x672   : > { %31111 = vmatprep.subr.bf16.mxu0 %v33803_v4  ;;  %31132 = vmatpush3.bf16.msra.mxu1 %v33802_v3  ;;  %v33841_v3 = vld [vmem:[%s34917_s23 + $0x3110] sm:$0xff]  }
 0x673   : > { %31133 = vmatprep.subr.bf16.mxu1 %v33804_v5  ;;  %v33842_v4 = vld [vmem:[%s34917_s23 + $0x3190] sm:$0xff]   ;;  %v33843_v5 = vld [vmem:[%s34917_s23 + $0x3148] sm:$0xff]  }
 0x675   : > { %31112 = vmatpush3.bf16.msra.mxu0 %v33805_v6  ;;  %v33844_v6 = vld [vmem:[%s34917_s23 + $0x31c8] sm:$0xff]  }
 0x676   : > { %31113 = vmatprep.subr.bf16.mxu0 %v33807_v8  ;;  %31134 = vmatpush3.bf16.msra.mxu1 %v33806_v7  ;;  %v33845_v7 = vld [vmem:[%s34917_s23 + $0x3108] sm:$0xff]  }
 0x677   : > { %31135 = vmatprep.subr.bf16.mxu1 %v33808_v9  ;;  %v33846_v8 = vld [vmem:[%s34917_s23 + $0x3188] sm:$0xff]   ;;  %v33847_v9 = vld [vmem:[%s34917_s23 + $0x3140] sm:$0xff]  }
 0x679   : > { %31114 = vmatpush3.bf16.msra.mxu0 %v33809_v10  ;;  %v33848_v10 = vld [vmem:[%s34917_s23 + $0x31c0] sm:$0xff]  }
 0x67a   : > { %31115 = vmatprep.subr.bf16.mxu0 %v33811_v12  ;;  %31136 = vmatpush3.bf16.msra.mxu1 %v33810_v11  ;;  %v33849_v11 = vld [vmem:[%s34917_s23 + $0x3100] sm:$0xff]  }
 0x67b   : > { %31137 = vmatprep.subr.bf16.mxu1 %v33812_v13  ;;  %v33850_v12 = vld [vmem:[%s34917_s23 + $0x3180] sm:$0xff]   ;;  %v6126_v13 = vrot.slane %v36888_v27, %v34953_v35  ;;  %v33860_v27 = vld [vmem:[%s34917_s23 + $0x3268] sm:$0xff]  }
 0x67d   : > { %31116 = vmatpush3.bf16.msra.mxu0 %v33813_v14  ;;  %v33852_v14 = vld [vmem:[%s34917_s23 + $0x3278] sm:$0xff]  }
 0x67e   : > { %31117 = vmatprep.subr.bf16.mxu0 %v33815_v16  ;;  %31138 = vmatpush3.bf16.msra.mxu1 %v33814_v15  ;;  %v33853_v15 = vld [vmem:[%s34917_s23 + $0x32f8] sm:$0xff]  }
 0x67f   : > { %31139 = vmatprep.subr.bf16.mxu1 %v33816_v17  ;;  %v33854_v16 = vld [vmem:[%s34917_s23 + $0x3238] sm:$0xff]  }
 0x680   : > { %v33855_v17 = vld [vmem:[%s34917_s23 + $0x32b8] sm:$0xff]  }
 0x681   : > { %31118 = vmatpush3.bf16.msra.mxu0 %v33817_v18  ;;  %v6142_v18 = vcombine.high %v6126_v13, %v6126_v13 }
 0x682   : > { %31147 = vmatprep.subr.bf16.mxu0 %v33819_v23  ;;  %31140 = vmatpush3.bf16.msra.mxu1 %v33818_v20 }
 0x683   : > { %31169 = vmatprep.subr.bf16.mxu1 %v33820_v26 }
 0x684   : > { %v30855_v36 = vpop.f32.mrf.mxu0  ;;  %24669 = vmatmul.mubr.bf16.vlgmr.msra.gmra.mxu0 %v6119_v25  ;;  %v33859_v25 = vld [vmem:[%s34917_s23 + $0x32b0] sm:$0xff]  }
 0x685   : > { %v30877_v40 = vpop.f32.mrf.mxu1  ;;  %31148 = vmatpush3.bf16.msra.mxu0 %v33821_v28  ;;  %24709 = vmatmul.mubr.bf16.vlgmr.msra.gmra.mxu1 %v6141_v32 }
 0x686   : > { %v30856_v41 = vpop.f32.mrf.mxu0  ;;  %31149 = vmatprep.subr.bf16.mxu0 %v33823_v33  ;;  %31170 = vmatpush3.bf16.msra.mxu1 %v33822_v30  ;;  %v33861_v30 = vld [vmem:[%s34917_s23 + $0x32e8] sm:$0xff]  }
 0x687   : > { %v30857_v44 = vadd.f32 %v30856_v41, %v30855_v36  ;;  %v30878_v46 = vpop.f32.mrf.mxu1  ;;  %24748 = vmatprep.mubr.bf16.mxu0 %v6140_v38  ;;  %31171 = vmatprep.subr.bf16.mxu1 %v33824_v37  ;;  %v33862_v33 = vld [vmem:[%s34917_s23 + $0x3228] sm:$0xff]   ;;  %v33865_v41 = vld [vmem:[%s34917_s23 + $0x32e0] sm:$0xff]  }
 0x688   : > { %v30858_v47 = vpop.f32.mrf.mxu0  ;;  %v30879_v50 = vadd.f32 %v30878_v46, %v30877_v40  ;;  %24788 = vmatprep.mubr.bf16.mxu1 %v6144_v43  ;;  %v33863_v37 = vld [vmem:[%s34917_s23 + $0x32a8] sm:$0xff]   ;;  %v33867_v43 = vld [vmem:[%s34917_s23 + $0x32a0] sm:$0xff]   ;;  %v33870_v46 = vld [vmem:[%s34917_s23 + $0x3218] sm:$0xff]  }
 0x689   : > { %v24191_v49 = vadd.f32 %v30857_v44, %v36861_v62  ;;  %v30880_v52 = vpop.f32.mrf.mxu1  ;;  %31150 = vmatpush3.bf16.msra.mxu0 %v33825_v39  ;;  %v33836_v62 = vld [vmem:[%s34917_s23 + $0x31d8] sm:$0xff]   ;;  %v33864_v39 = vld [vmem:[%s34917_s23 + $0x3260] sm:$0xff]  }
 0x68a   : > { %v30859_v53 = vpop.f32.mrf.mxu0  ;;  %31151 = vmatprep.subr.bf16.mxu0 %v33827_v45  ;;  %31172 = vmatpush3.bf16.msra.mxu1 %v33826_v42  ;;  %v33866_v42 = vld [vmem:[%s34917_s23 + $0x3220] sm:$0xff]   ;;  %v33868_v44 = vld [vmem:[%s34917_s23 + $0x3258] sm:$0xff]   ;;  %v33876_v52 = vld [vmem:[%s34917_s23 + $0x3248] sm:$0xff]  }
 0x68b   : > { %v36905_v55 = vadd.f32 %v30879_v50, %v24191_v49  ;;  %v30881_v57 = vpop.f32.mrf.mxu1  ;;  %31173 = vmatprep.subr.bf16.mxu1 %v33828_v48  ;;  %v33869_v45 = vld [vmem:[%s34917_s23 + $0x32d8] sm:$0xff]   ;;  %v33872_v48 = vld [vmem:[%s34917_s23 + $0x3250] sm:$0xff]   ;;  %v33877_v53 = vld [vmem:[%s34917_s23 + $0x32c8] sm:$0xff]  }
 0x68c   : > { %v33871_v47 = vld [vmem:[%s34917_s23 + $0x3298] sm:$0xff]   ;;  %v33873_v49 = vld [vmem:[%s34917_s23 + $0x32d0] sm:$0xff]   ;;  %v33881_v57 = vld [vmem:[%s34917_s23 + $0x32c0] sm:$0xff]  }
 0x68d   : > { %31152 = vmatpush3.bf16.msra.mxu0 %v33829_v51  ;;  %v33874_v50 = vld [vmem:[%s34917_s23 + $0x3210] sm:$0xff]  }
 0x68e   : > { %31153 = vmatprep.subr.bf16.mxu0 %v33831_v56  ;;  %31174 = vmatpush3.bf16.msra.mxu1 %v33830_v54  ;;  %v33875_v51 = vld [vmem:[%s34917_s23 + $0x3290] sm:$0xff]   ;;  %v33878_v54 = vld [vmem:[%s34917_s23 + $0x3208] sm:$0xff]   ;;  %v33880_v56 = vld [vmem:[%s34917_s23 + $0x3240] sm:$0xff]  }
 0x68f   : > { %31175 = vmatprep.subr.bf16.mxu1 %v33832_v58  ;;  %v33882_v58 = vld [vmem:[%s34917_s23 + $0x3200] sm:$0xff]  }
 0x691   : > { %31154 = vmatpush3.bf16.msra.mxu0 %v33833_v59  ;;  %v258_v59 = vld [vmem:[#allocation2 + $0xc8] sm:$0xff] }
 0x692   : > { %31155 = vmatprep.subr.bf16.mxu0 %v33835_v61  ;;  %31176 = vmatpush3.bf16.msra.mxu1 %v33834_v60  ;;  %v33883_v60 = vld [vmem:[%s34917_s23 + $0x3280] sm:$0xff]   ;;  %v6152_v61 = vrot.slane %v258_v59, %v34953_v35 }
 0x693   : > { %31177 = vmatprep.subr.bf16.mxu1 %v33836_v62  ;;  %v6145_v62 = vcombine.high %v258_v59, %v258_v59  ;;  %v33921_v59 = vld [vmem:[%s34917_s23 + $0x3470] sm:$0xff]  }
 0x695   : > { %31156 = vmatpush3.bf16.msra.mxu0 %v33837_v63  ;;  %v33884_v63 = vld [vmem:[%s34917_s23 + $0x3378] sm:$0xff]  }
 0x696   : > { %31157 = vmatprep.subr.bf16.mxu0 %v33839_v1  ;;  %31178 = vmatpush3.bf16.msra.mxu1 %v33838_v0  ;;  %v6160_v0 = vcombine.high %v6152_v61, %v6152_v61  ;;  %v6168_v1 = vrot.slane %v6152_v61, %v34953_v35  ;;  %v33922_v61 = vld [vmem:[%s34917_s23 + $0x34f0] sm:$0xff]  }
 0x697   : > { %31179 = vmatprep.subr.bf16.mxu1 %v33840_v2  ;;  %v33885_v2 = vld [vmem:[%s34917_s23 + $0x33f8] sm:$0xff]  }
 0x699   : > { %31158 = vmatpush3.bf16.msra.mxu0 %v33841_v3  ;;  %v36969_v3 = vrot.slane %v6145_v62, %v34953_v35  ;;  %v33923_v62 = vld [vmem:[%s34917_s23 + $0x3430] sm:$0xff]  }
 0x69a   : > { %31159 = vmatprep.subr.bf16.mxu0 %v33843_v5  ;;  %31180 = vmatpush3.bf16.msra.mxu1 %v33842_v4  ;;  %v33886_v4 = vld [vmem:[%s34917_s23 + $0x3338] sm:$0xff]   ;;  %v6182_v5 = vrot.slane %v6160_v0, %v34953_v35 }
 0x69b   : > { %31181 = vmatprep.subr.bf16.mxu1 %v33844_v6  ;;  %v33887_v6 = vld [vmem:[%s34917_s23 + $0x33b8] sm:$0xff]  }
 0x69d   : > { %31160 = vmatpush3.bf16.msra.mxu0 %v33845_v7  ;;  %v6161_v7 = vcombine.high %v36969_v3, %v36969_v3 }
 0x69e   : > { %31161 = vmatprep.subr.bf16.mxu0 %v33847_v9  ;;  %31182 = vmatpush3.bf16.msra.mxu1 %v33846_v8  ;;  %v6190_v8 = vcombine.high %v6168_v1, %v6168_v1  ;;  %v33888_v9 = vld [vmem:[%s34917_s23 + $0x3370] sm:$0xff]  }
 0x69f   : > { %31183 = vmatprep.subr.bf16.mxu1 %v33848_v10  ;;  %v6192_v10 = vcombine.high %v6182_v5, %v6182_v5 }
 0x6a1   : > { %31162 = vmatpush3.bf16.msra.mxu0 %v33849_v11 }
 0x6a2   : > { %31191 = vmatprep.subr.bf16.mxu0 %v33852_v14  ;;  %31184 = vmatpush3.bf16.msra.mxu1 %v33850_v12  ;;  %v33889_v12 = vld [vmem:[%s34917_s23 + $0x33f0] sm:$0xff]  }
 0x6a3   : > { %31213 = vmatprep.subr.bf16.mxu1 %v33853_v15  ;;  %v33890_v14 = vld [vmem:[%s34917_s23 + $0x3330] sm:$0xff]  }
 0x6a4   : > { %v30899_v20 = vpop.f32.mrf.mxu0  ;;  %24749 = vmatmul.mubr.bf16.vlgmr.msra.gmra.mxu0 %v6126_v13  ;;  %v6189_v13 = vrot.slane %v6161_v7, %v34953_v35 }
 0x6a5   : > { %v30921_v23 = vpop.f32.mrf.mxu1  ;;  %31192 = vmatpush3.bf16.msra.mxu0 %v33854_v16  ;;  %24789 = vmatmul.mubr.bf16.vlgmr.msra.gmra.mxu1 %v6142_v18 }
 0x6a6   : > { %v30900_v24 = vpop.f32.mrf.mxu0  ;;  %31193 = vmatprep.subr.bf16.mxu0 %v33856_v19  ;;  %31214 = vmatpush3.bf16.msra.mxu1 %v33855_v17  ;;  %v33891_v17 = vld [vmem:[%s34917_s23 + $0x33b0] sm:$0xff]   ;;  %v6193_v18 = vcombine.high %v6189_v13, %v6189_v13 }
 0x6a7   : > { %v30901_v26 = vadd.f32 %v30900_v24, %v30899_v20  ;;  %v30922_v28 = vpop.f32.mrf.mxu1  ;;  %31215 = vmatprep.subr.bf16.mxu1 %v33857_v21  ;;  %24828 = vmatprep.mubr.bf16.mxu0 %v6182_v5  ;;  %v33892_v20 = vld [vmem:[%s34917_s23 + $0x3368] sm:$0xff]  }
 0x6a8   : > { %v30902_v29 = vpop.f32.mrf.mxu0  ;;  %v30923_v32 = vadd.f32 %v30922_v28, %v30921_v23  ;;  %24868 = vmatprep.mubr.bf16.mxu1 %v6192_v10  ;;  %v33893_v23 = vld [vmem:[%s34917_s23 + $0x33e8] sm:$0xff]  }
 0x6a9   : > { %v24271_v31 = vadd.f32 %v30901_v26, %v36905_v55  ;;  %v30924_v34 = vpop.f32.mrf.mxu1  ;;  %31194 = vmatpush3.bf16.msra.mxu0 %v33858_v22  ;;  %v33879_v55 = vld [vmem:[%s34917_s23 + $0x3288] sm:$0xff]  }
 0x6aa   : > { %v30903_v36 = vpop.f32.mrf.mxu0  ;;  %31195 = vmatprep.subr.bf16.mxu0 %v33860_v27  ;;  %31216 = vmatpush3.bf16.msra.mxu1 %v33859_v25  ;;  %v33894_v26 = vld [vmem:[%s34917_s23 + $0x3328] sm:$0xff]   ;;  %v33898_v34 = vld [vmem:[%s34917_s23 + $0x3320] sm:$0xff]  }
 0x6ab   : > { %v36942_v38 = vadd.f32 %v30923_v32, %v24271_v31  ;;  %v30925_v40 = vpop.f32.mrf.mxu1  ;;  %31217 = vmatprep.subr.bf16.mxu1 %v33861_v30  ;;  %v33895_v29 = vld [vmem:[%s34917_s23 + $0x33a8] sm:$0xff]   ;;  %v33896_v31 = vld [vmem:[%s34917_s23 + $0x3360] sm:$0xff]  }
 0x6ac   : > { %v33899_v36 = vld [vmem:[%s34917_s23 + $0x33a0] sm:$0xff]   ;;  %v33903_v40 = vld [vmem:[%s34917_s23 + $0x3398] sm:$0xff]  }
 0x6ad   : > { %31196 = vmatpush3.bf16.msra.mxu0 %v33862_v33  ;;  %v33897_v33 = vld [vmem:[%s34917_s23 + $0x33e0] sm:$0xff]  }
 0x6ae   : > { %31197 = vmatprep.subr.bf16.mxu0 %v33864_v39  ;;  %31218 = vmatpush3.bf16.msra.mxu1 %v33863_v37  ;;  %v33900_v37 = vld [vmem:[%s34917_s23 + $0x3358] sm:$0xff]  }
 0x6af   : > { %31219 = vmatprep.subr.bf16.mxu1 %v33865_v41  ;;  %v33902_v39 = vld [vmem:[%s34917_s23 + $0x3318] sm:$0xff]   ;;  %v33904_v41 = vld [vmem:[%s34917_s23 + $0x3350] sm:$0xff]  }
 0x6b1   : > { %31198 = vmatpush3.bf16.msra.mxu0 %v33866_v42  ;;  %v33905_v42 = vld [vmem:[%s34917_s23 + $0x33d0] sm:$0xff]  }
 0x6b2   : > { %31199 = vmatprep.subr.bf16.mxu0 %v33868_v44  ;;  %31220 = vmatpush3.bf16.msra.mxu1 %v33867_v43  ;;  %v33906_v43 = vld [vmem:[%s34917_s23 + $0x3310] sm:$0xff]  }
 0x6b3   : > { %31221 = vmatprep.subr.bf16.mxu1 %v33869_v45  ;;  %v33907_v44 = vld [vmem:[%s34917_s23 + $0x3390] sm:$0xff]   ;;  %v33908_v45 = vld [vmem:[%s34917_s23 + $0x3348] sm:$0xff]  }
 0x6b5   : > { %31200 = vmatpush3.bf16.msra.mxu0 %v33870_v46  ;;  %v33909_v46 = vld [vmem:[%s34917_s23 + $0x33c8] sm:$0xff]  }
 0x6b6   : > { %31201 = vmatprep.subr.bf16.mxu0 %v33872_v48  ;;  %31222 = vmatpush3.bf16.msra.mxu1 %v33871_v47  ;;  %v33910_v47 = vld [vmem:[%s34917_s23 + $0x3308] sm:$0xff]  }
 0x6b7   : > { %31223 = vmatprep.subr.bf16.mxu1 %v33873_v49  ;;  %v33911_v48 = vld [vmem:[%s34917_s23 + $0x3388] sm:$0xff]   ;;  %v33912_v49 = vld [vmem:[%s34917_s23 + $0x3340] sm:$0xff]  }
 0x6b9   : > { %31202 = vmatpush3.bf16.msra.mxu0 %v33874_v50  ;;  %v33913_v50 = vld [vmem:[%s34917_s23 + $0x33c0] sm:$0xff]  }
 0x6ba   : > { %31203 = vmatprep.subr.bf16.mxu0 %v33876_v52  ;;  %31224 = vmatpush3.bf16.msra.mxu1 %v33875_v51  ;;  %v33914_v51 = vld [vmem:[%s34917_s23 + $0x3300] sm:$0xff]  }
 0x6bb   : > { %31225 = vmatprep.subr.bf16.mxu1 %v33877_v53  ;;  %v33915_v52 = vld [vmem:[%s34917_s23 + $0x3380] sm:$0xff]   ;;  %v6175_v53 = vrot.slane %v36969_v3, %v34953_v35  ;;  %v33925_v3 = vld [vmem:[%s34917_s23 + $0x3468] sm:$0xff]  }
 0x6bd   : > { %31204 = vmatpush3.bf16.msra.mxu0 %v33878_v54  ;;  %v33917_v54 = vld [vmem:[%s34917_s23 + $0x3478] sm:$0xff]  }
 0x6be   : > { %31205 = vmatprep.subr.bf16.mxu0 %v33880_v56  ;;  %31226 = vmatpush3.bf16.msra.mxu1 %v33879_v55  ;;  %v33918_v55 = vld [vmem:[%s34917_s23 + $0x34f8] sm:$0xff]  }
 0x6bf   : > { %31227 = vmatprep.subr.bf16.mxu1 %v33881_v57  ;;  %v33919_v56 = vld [vmem:[%s34917_s23 + $0x3438] sm:$0xff]  }
 0x6c0   : > { %v33920_v57 = vld [vmem:[%s34917_s23 + $0x34b8] sm:$0xff]  }
 0x6c1   : > { %31206 = vmatpush3.bf16.msra.mxu0 %v33882_v58  ;;  %v6191_v58 = vcombine.high %v6175_v53, %v6175_v53 }
 0x6c2   : > { %31235 = vmatprep.subr.bf16.mxu0 %v33884_v63  ;;  %31228 = vmatpush3.bf16.msra.mxu1 %v33883_v60 }
 0x6c3   : > { %31257 = vmatprep.subr.bf16.mxu1 %v33885_v2 }
 0x6c4   : > { %v30943_v11 = vpop.f32.mrf.mxu0  ;;  %24829 = vmatmul.mubr.bf16.vlgmr.msra.gmra.mxu0 %v6168_v1  ;;  %v33924_v1 = vld [vmem:[%s34917_s23 + $0x34b0] sm:$0xff]  }
 0x6c5   : > { %v30965_v15 = vpop.f32.mrf.mxu1  ;;  %31236 = vmatpush3.bf16.msra.mxu0 %v33886_v4  ;;  %24869 = vmatmul.mubr.bf16.vlgmr.msra.gmra.mxu1 %v6190_v8 }
 0x6c6   : > { %v30944_v16 = vpop.f32.mrf.mxu0  ;;  %31237 = vmatprep.subr.bf16.mxu0 %v33888_v9  ;;  %31258 = vmatpush3.bf16.msra.mxu1 %v33887_v6  ;;  %v33926_v6 = vld [vmem:[%s34917_s23 + $0x34e8] sm:$0xff]  }
 0x6c7   : > { %v30945_v19 = vadd.f32 %v30944_v16, %v30943_v11  ;;  %v30966_v21 = vpop.f32.mrf.mxu1  ;;  %24908 = vmatprep.mubr.bf16.mxu0 %v6189_v13  ;;  %31259 = vmatprep.subr.bf16.mxu1 %v33889_v12  ;;  %v33927_v9 = vld [vmem:[%s34917_s23 + $0x3428] sm:$0xff]   ;;  %v33930_v16 = vld [vmem:[%s34917_s23 + $0x34e0] sm:$0xff]  }
 0x6c8   : > { %v30946_v22 = vpop.f32.mrf.mxu0  ;;  %v30967_v25 = vadd.f32 %v30966_v21, %v30965_v15  ;;  %24948 = vmatprep.mubr.bf16.mxu1 %v6193_v18  ;;  %v33928_v12 = vld [vmem:[%s34917_s23 + $0x34a8] sm:$0xff]   ;;  %v33932_v18 = vld [vmem:[%s34917_s23 + $0x34a0] sm:$0xff]   ;;  %v33935_v21 = vld [vmem:[%s34917_s23 + $0x3418] sm:$0xff]  }
 0x6c9   : > { %v24351_v24 = vadd.f32 %v30945_v19, %v36942_v38  ;;  %v30968_v27 = vpop.f32.mrf.mxu1  ;;  %31238 = vmatpush3.bf16.msra.mxu0 %v33890_v14  ;;  %v33901_v38 = vld [vmem:[%s34917_s23 + $0x33d8] sm:$0xff]   ;;  %v33929_v14 = vld [vmem:[%s34917_s23 + $0x3460] sm:$0xff]  }
 0x6ca   : > { %v30947_v28 = vpop.f32.mrf.mxu0  ;;  %31239 = vmatprep.subr.bf16.mxu0 %v33892_v20  ;;  %31260 = vmatpush3.bf16.msra.mxu1 %v33891_v17  ;;  %v33931_v17 = vld [vmem:[%s34917_s23 + $0x3420] sm:$0xff]   ;;  %v33933_v19 = vld [vmem:[%s34917_s23 + $0x3458] sm:$0xff]   ;;  %v33941_v27 = vld [vmem:[%s34917_s23 + $0x3448] sm:$0xff]  }
 0x6cb   : > { %v36986_v30 = vadd.f32 %v30967_v25, %v24351_v24  ;;  %v30969_v32 = vpop.f32.mrf.mxu1  ;;  %31261 = vmatprep.subr.bf16.mxu1 %v33893_v23  ;;  %v33934_v20 = vld [vmem:[%s34917_s23 + $0x34d8] sm:$0xff]   ;;  %v33937_v23 = vld [vmem:[%s34917_s23 + $0x3450] sm:$0xff]   ;;  %v33942_v28 = vld [vmem:[%s34917_s23 + $0x34c8] sm:$0xff]  }
 0x6cc   : > { %v33936_v22 = vld [vmem:[%s34917_s23 + $0x3498] sm:$0xff]   ;;  %v33938_v24 = vld [vmem:[%s34917_s23 + $0x34d0] sm:$0xff]   ;;  %v33946_v32 = vld [vmem:[%s34917_s23 + $0x34c0] sm:$0xff]  }
 0x6cd   : > { %31240 = vmatpush3.bf16.msra.mxu0 %v33894_v26  ;;  %v33939_v25 = vld [vmem:[%s34917_s23 + $0x3410] sm:$0xff]  }
 0x6ce   : > { %31241 = vmatprep.subr.bf16.mxu0 %v33896_v31  ;;  %31262 = vmatpush3.bf16.msra.mxu1 %v33895_v29  ;;  %v33940_v26 = vld [vmem:[%s34917_s23 + $0x3490] sm:$0xff]   ;;  %v33943_v29 = vld [vmem:[%s34917_s23 + $0x3408] sm:$0xff]   ;;  %v33945_v31 = vld [vmem:[%s34917_s23 + $0x3440] sm:$0xff]  }
 0x6cf   : > { %31263 = vmatprep.subr.bf16.mxu1 %v33897_v33  ;;  %v33947_v33 = vld [vmem:[%s34917_s23 + $0x3400] sm:$0xff]  }
 0x6d1   : > { %31242 = vmatpush3.bf16.msra.mxu0 %v33898_v34  ;;  %v259_v34 = vld [vmem:[#allocation2 + $0xd0] sm:$0xff] }
 0x6d2   : > { %31243 = vmatprep.subr.bf16.mxu0 %v33900_v37  ;;  %31264 = vmatpush3.bf16.msra.mxu1 %v33899_v36  ;;  %v6201_v36 = vrot.slane %v259_v34, %v34953_v35  ;;  %v33949_v37 = vld [vmem:[%s34917_s23 + $0x3578] sm:$0xff]  }
 0x6d3   : > { %31265 = vmatprep.subr.bf16.mxu1 %v33901_v38  ;;  %v6194_v38 = vcombine.high %v259_v34, %v259_v34  ;;  %v33986_v34 = vld [vmem:[%s34917_s23 + $0x3670] sm:$0xff]  }
 0x6d5   : > { %31244 = vmatpush3.bf16.msra.mxu0 %v33902_v39  ;;  %v33948_v39 = vld [vmem:[%s34917_s23 + $0x3480] sm:$0xff]  }
 0x6d6   : > { %31245 = vmatprep.subr.bf16.mxu0 %v33904_v41  ;;  %31266 = vmatpush3.bf16.msra.mxu1 %v33903_v40  ;;  %v6209_v40 = vcombine.high %v6201_v36, %v6201_v36  ;;  %v6217_v41 = vrot.slane %v6201_v36, %v34953_v35 }
 0x6d7   : > { %31267 = vmatprep.subr.bf16.mxu1 %v33905_v42  ;;  %v33950_v42 = vld [vmem:[%s34917_s23 + $0x35f8] sm:$0xff]  }
 0x6d9   : > { %31246 = vmatpush3.bf16.msra.mxu0 %v33906_v43  ;;  %v37050_v43 = vrot.slane %v6194_v38, %v34953_v35  ;;  %v33988_v38 = vld [vmem:[%s34917_s23 + $0x3630] sm:$0xff]  }
 0x6da   : > { %31247 = vmatprep.subr.bf16.mxu0 %v33908_v45  ;;  %31268 = vmatpush3.bf16.msra.mxu1 %v33907_v44  ;;  %v33951_v44 = vld [vmem:[%s34917_s23 + $0x3538] sm:$0xff]   ;;  %v6231_v45 = vrot.slane %v6209_v40, %v34953_v35 }
 0x6db   : > { %31269 = vmatprep.subr.bf16.mxu1 %v33909_v46  ;;  %v33952_v46 = vld [vmem:[%s34917_s23 + $0x35b8] sm:$0xff]  }
 0x6dd   : > { %31248 = vmatpush3.bf16.msra.mxu0 %v33910_v47  ;;  %v6210_v47 = vcombine.high %v37050_v43, %v37050_v43 }
 0x6de   : > { %31249 = vmatprep.subr.bf16.mxu0 %v33912_v49  ;;  %31270 = vmatpush3.bf16.msra.mxu1 %v33911_v48  ;;  %v6239_v48 = vcombine.high %v6217_v41, %v6217_v41  ;;  %v33953_v49 = vld [vmem:[%s34917_s23 + $0x3570] sm:$0xff]  }
 0x6df   : > { %31271 = vmatprep.subr.bf16.mxu1 %v33913_v50  ;;  %v6241_v50 = vcombine.high %v6231_v45, %v6231_v45 }
 0x6e1   : > { %31250 = vmatpush3.bf16.msra.mxu0 %v33914_v51 }
 0x6e2   : > { %31279 = vmatprep.subr.bf16.mxu0 %v33917_v54  ;;  %31272 = vmatpush3.bf16.msra.mxu1 %v33915_v52  ;;  %v33954_v52 = vld [vmem:[%s34917_s23 + $0x35f0] sm:$0xff]  }
 0x6e3   : > { %31301 = vmatprep.subr.bf16.mxu1 %v33918_v55  ;;  %v33955_v54 = vld [vmem:[%s34917_s23 + $0x3530] sm:$0xff]  }
 0x6e4   : > { %v30987_v60 = vpop.f32.mrf.mxu0  ;;  %24909 = vmatmul.mubr.bf16.vlgmr.msra.gmra.mxu0 %v6175_v53  ;;  %v6238_v53 = vrot.slane %v6210_v47, %v34953_v35 }
 0x6e5   : > { %v31009_v63 = vpop.f32.mrf.mxu1  ;;  %31280 = vmatpush3.bf16.msra.mxu0 %v33919_v56  ;;  %24949 = vmatmul.mubr.bf16.vlgmr.msra.gmra.mxu1 %v6191_v58 }
 0x6e6   : > { %v30988_v0 = vpop.f32.mrf.mxu0  ;;  %31281 = vmatprep.subr.bf16.mxu0 %v33921_v59  ;;  %31302 = vmatpush3.bf16.msra.mxu1 %v33920_v57  ;;  %v33956_v57 = vld [vmem:[%s34917_s23 + $0x35b0] sm:$0xff]   ;;  %v6242_v58 = vcombine.high %v6238_v53, %v6238_v53 }
 0x6e7   : > { %v30989_v2 = vadd.f32 %v30988_v0, %v30987_v60  ;;  %v31010_v4 = vpop.f32.mrf.mxu1  ;;  %31303 = vmatprep.subr.bf16.mxu1 %v33922_v61  ;;  %24988 = vmatprep.mubr.bf16.mxu0 %v6231_v45  ;;  %v33957_v60 = vld [vmem:[%s34917_s23 + $0x3568] sm:$0xff]  }
 0x6e8   : > { %v30990_v5 = vpop.f32.mrf.mxu0  ;;  %v31011_v8 = vadd.f32 %v31010_v4, %v31009_v63  ;;  %25028 = vmatprep.mubr.bf16.mxu1 %v6241_v50  ;;  %v33958_v63 = vld [vmem:[%s34917_s23 + $0x35e8] sm:$0xff]  }
 0x6e9   : > { %v24431_v7 = vadd.f32 %v30989_v2, %v36986_v30  ;;  %v31012_v10 = vpop.f32.mrf.mxu1  ;;  %31282 = vmatpush3.bf16.msra.mxu0 %v33923_v62  ;;  %v33944_v30 = vld [vmem:[%s34917_s23 + $0x3488] sm:$0xff]  }
 0x6ea   : > { %v30991_v11 = vpop.f32.mrf.mxu0  ;;  %31283 = vmatprep.subr.bf16.mxu0 %v33925_v3  ;;  %31304 = vmatpush3.bf16.msra.mxu1 %v33924_v1  ;;  %v33959_v2 = vld [vmem:[%s34917_s23 + $0x3528] sm:$0xff]   ;;  %v33963_v10 = vld [vmem:[%s34917_s23 + $0x3520] sm:$0xff]  }
 0x6eb   : > { %v37023_v13 = vadd.f32 %v31011_v8, %v24431_v7  ;;  %v31013_v15 = vpop.f32.mrf.mxu1  ;;  %31305 = vmatprep.subr.bf16.mxu1 %v33926_v6  ;;  %v33960_v5 = vld [vmem:[%s34917_s23 + $0x35a8] sm:$0xff]   ;;  %v33961_v7 = vld [vmem:[%s34917_s23 + $0x3560] sm:$0xff]  }
 0x6ec   : > { %v33964_v11 = vld [vmem:[%s34917_s23 + $0x35a0] sm:$0xff]   ;;  %v33968_v15 = vld [vmem:[%s34917_s23 + $0x3598] sm:$0xff]  }
 0x6ed   : > { %31284 = vmatpush3.bf16.msra.mxu0 %v33927_v9  ;;  %v33962_v9 = vld [vmem:[%s34917_s23 + $0x35e0] sm:$0xff]  }
 0x6ee   : > { %31285 = vmatprep.subr.bf16.mxu0 %v33929_v14  ;;  %31306 = vmatpush3.bf16.msra.mxu1 %v33928_v12  ;;  %v33965_v12 = vld [vmem:[%s34917_s23 + $0x3558] sm:$0xff]  }
 0x6ef   : > { %31307 = vmatprep.subr.bf16.mxu1 %v33930_v16  ;;  %v33967_v14 = vld [vmem:[%s34917_s23 + $0x3518] sm:$0xff]   ;;  %v33969_v16 = vld [vmem:[%s34917_s23 + $0x3550] sm:$0xff]  }
 0x6f1   : > { %31286 = vmatpush3.bf16.msra.mxu0 %v33931_v17  ;;  %v33970_v17 = vld [vmem:[%s34917_s23 + $0x35d0] sm:$0xff]  }
 0x6f2   : > { %31287 = vmatprep.subr.bf16.mxu0 %v33933_v19  ;;  %31308 = vmatpush3.bf16.msra.mxu1 %v33932_v18  ;;  %v33971_v18 = vld [vmem:[%s34917_s23 + $0x3510] sm:$0xff]  }
 0x6f3   : > { %31309 = vmatprep.subr.bf16.mxu1 %v33934_v20  ;;  %v33972_v19 = vld [vmem:[%s34917_s23 + $0x3590] sm:$0xff]   ;;  %v33973_v20 = vld [vmem:[%s34917_s23 + $0x3548] sm:$0xff]  }
 0x6f5   : > { %31288 = vmatpush3.bf16.msra.mxu0 %v33935_v21  ;;  %v33974_v21 = vld [vmem:[%s34917_s23 + $0x35c8] sm:$0xff]  }
 0x6f6   : > { %31289 = vmatprep.subr.bf16.mxu0 %v33937_v23  ;;  %31310 = vmatpush3.bf16.msra.mxu1 %v33936_v22  ;;  %v33975_v22 = vld [vmem:[%s34917_s23 + $0x3508] sm:$0xff]  }
 0x6f7   : > { %31311 = vmatprep.subr.bf16.mxu1 %v33938_v24  ;;  %v33976_v23 = vld [vmem:[%s34917_s23 + $0x3588] sm:$0xff]   ;;  %v33977_v24 = vld [vmem:[%s34917_s23 + $0x3540] sm:$0xff]  }
 0x6f9   : > { %31290 = vmatpush3.bf16.msra.mxu0 %v33939_v25  ;;  %v33978_v25 = vld [vmem:[%s34917_s23 + $0x35c0] sm:$0xff]  }
 0x6fa   : > { %31291 = vmatprep.subr.bf16.mxu0 %v33941_v27  ;;  %31312 = vmatpush3.bf16.msra.mxu1 %v33940_v26  ;;  %v33979_v26 = vld [vmem:[%s34917_s23 + $0x3500] sm:$0xff]  }
 0x6fb   : > { %31313 = vmatprep.subr.bf16.mxu1 %v33942_v28  ;;  %v33980_v27 = vld [vmem:[%s34917_s23 + $0x3580] sm:$0xff]   ;;  %v6224_v28 = vrot.slane %v37050_v43, %v34953_v35  ;;  %v33990_v43 = vld [vmem:[%s34917_s23 + $0x3668] sm:$0xff]  }
 0x6fd   : > { %31292 = vmatpush3.bf16.msra.mxu0 %v33943_v29  ;;  %v33982_v29 = vld [vmem:[%s34917_s23 + $0x3678] sm:$0xff]  }
 0x6fe   : > { %31293 = vmatprep.subr.bf16.mxu0 %v33945_v31  ;;  %31314 = vmatpush3.bf16.msra.mxu1 %v33944_v30  ;;  %v33983_v30 = vld [vmem:[%s34917_s23 + $0x36f8] sm:$0xff]  }
 0x6ff   : > { %31315 = vmatprep.subr.bf16.mxu1 %v33946_v32  ;;  %v33984_v31 = vld [vmem:[%s34917_s23 + $0x3638] sm:$0xff]  }
 0x700   : > { %v33985_v32 = vld [vmem:[%s34917_s23 + $0x36b8] sm:$0xff]  }
 0x701   : > { %31294 = vmatpush3.bf16.msra.mxu0 %v33947_v33  ;;  %v6240_v33 = vcombine.high %v6224_v28, %v6224_v28 }
 0x702   : > { %31323 = vmatprep.subr.bf16.mxu0 %v33949_v37  ;;  %31316 = vmatpush3.bf16.msra.mxu1 %v33948_v39  ;;  %v33987_v37 = vld [vmem:[%s34917_s23 + $0x36f0] sm:$0xff]  }
 0x703   : > { %31345 = vmatprep.subr.bf16.mxu1 %v33950_v42 }
 0x704   : > { %v31031_v51 = vpop.f32.mrf.mxu0  ;;  %24989 = vmatmul.mubr.bf16.vlgmr.msra.gmra.mxu0 %v6217_v41  ;;  %v33989_v41 = vld [vmem:[%s34917_s23 + $0x36b0] sm:$0xff]  }
 0x705   : > { %v31053_v55 = vpop.f32.mrf.mxu1  ;;  %31324 = vmatpush3.bf16.msra.mxu0 %v33951_v44  ;;  %25029 = vmatmul.mubr.bf16.vlgmr.msra.gmra.mxu1 %v6239_v48 }
 0x706   : > { %v31032_v56 = vpop.f32.mrf.mxu0  ;;  %31325 = vmatprep.subr.bf16.mxu0 %v33953_v49  ;;  %31346 = vmatpush3.bf16.msra.mxu1 %v33952_v46  ;;  %v33991_v46 = vld [vmem:[%s34917_s23 + $0x36e8] sm:$0xff]  }
 0x707   : > { %v31033_v59 = vadd.f32 %v31032_v56, %v31031_v51  ;;  %v31054_v61 = vpop.f32.mrf.mxu1  ;;  %25068 = vmatprep.mubr.bf16.mxu0 %v6238_v53  ;;  %31347 = vmatprep.subr.bf16.mxu1 %v33954_v52  ;;  %v33992_v49 = vld [vmem:[%s34917_s23 + $0x3628] sm:$0xff]   ;;  %v33995_v56 = vld [vmem:[%s34917_s23 + $0x36e0] sm:$0xff]  }
 0x708   : > { %v31034_v62 = vpop.f32.mrf.mxu0  ;;  %v31055_v1 = vadd.f32 %v31054_v61, %v31053_v55  ;;  %25108 = vmatprep.mubr.bf16.mxu1 %v6242_v58  ;;  %v33993_v52 = vld [vmem:[%s34917_s23 + $0x36a8] sm:$0xff]   ;;  %v33997_v58 = vld [vmem:[%s34917_s23 + $0x36a0] sm:$0xff]   ;;  %v34000_v61 = vld [vmem:[%s34917_s23 + $0x3618] sm:$0xff]  }
 0x709   : > { %v24511_v0 = vadd.f32 %v31033_v59, %v37023_v13  ;;  %v31056_v3 = vpop.f32.mrf.mxu1  ;;  %31326 = vmatpush3.bf16.msra.mxu0 %v33955_v54  ;;  %v33966_v13 = vld [vmem:[%s34917_s23 + $0x35d8] sm:$0xff]   ;;  %v33994_v54 = vld [vmem:[%s34917_s23 + $0x3660] sm:$0xff]  }
 0x70a   : > { %v31035_v4 = vpop.f32.mrf.mxu0  ;;  %31327 = vmatprep.subr.bf16.mxu0 %v33957_v60  ;;  %31348 = vmatpush3.bf16.msra.mxu1 %v33956_v57  ;;  %v33996_v57 = vld [vmem:[%s34917_s23 + $0x3620] sm:$0xff]   ;;  %v33998_v59 = vld [vmem:[%s34917_s23 + $0x3658] sm:$0xff]   ;;  %v34006_v3 = vld [vmem:[%s34917_s23 + $0x3648] sm:$0xff]  }
 0x70b   : > { %v37067_v6 = vadd.f32 %v31055_v1, %v24511_v0  ;;  %v31057_v8 = vpop.f32.mrf.mxu1  ;;  %31349 = vmatprep.subr.bf16.mxu1 %v33958_v63  ;;  %v33999_v60 = vld [vmem:[%s34917_s23 + $0x36d8] sm:$0xff]   ;;  %v34002_v63 = vld [vmem:[%s34917_s23 + $0x3650] sm:$0xff]   ;;  %v34007_v4 = vld [vmem:[%s34917_s23 + $0x36c8] sm:$0xff]  }
 0x70c   : > { %v34001_v62 = vld [vmem:[%s34917_s23 + $0x3698] sm:$0xff]   ;;  %v34003_v0 = vld [vmem:[%s34917_s23 + $0x36d0] sm:$0xff]   ;;  %v34011_v8 = vld [vmem:[%s34917_s23 + $0x36c0] sm:$0xff]  }
 0x70d   : > { %31328 = vmatpush3.bf16.msra.mxu0 %v33959_v2  ;;  %v34004_v1 = vld [vmem:[%s34917_s23 + $0x3610] sm:$0xff]  }
 0x70e   : > { %31329 = vmatprep.subr.bf16.mxu0 %v33961_v7  ;;  %31350 = vmatpush3.bf16.msra.mxu1 %v33960_v5  ;;  %v34005_v2 = vld [vmem:[%s34917_s23 + $0x3690] sm:$0xff]   ;;  %v34008_v5 = vld [vmem:[%s34917_s23 + $0x3608] sm:$0xff]   ;;  %v34010_v7 = vld [vmem:[%s34917_s23 + $0x3640] sm:$0xff]  }
 0x70f   : > { %31351 = vmatprep.subr.bf16.mxu1 %v33962_v9  ;;  %v34012_v9 = vld [vmem:[%s34917_s23 + $0x3600] sm:$0xff]  }
 0x711   : > { %31330 = vmatpush3.bf16.msra.mxu0 %v33963_v10  ;;  %v260_v10 = vld [vmem:[#allocation2 + $0xd8] sm:$0xff] }
 0x712   : > { %31331 = vmatprep.subr.bf16.mxu0 %v33965_v12  ;;  %31352 = vmatpush3.bf16.msra.mxu1 %v33964_v11  ;;  %v34013_v11 = vld [vmem:[%s34917_s23 + $0x3680] sm:$0xff]   ;;  %v6250_v12 = vrot.slane %v260_v10, %v34953_v35 }
 0x713   : > { %31353 = vmatprep.subr.bf16.mxu1 %v33966_v13  ;;  %v6243_v13 = vcombine.high %v260_v10, %v260_v10  ;;  %v34051_v10 = vld [vmem:[%s34917_s23 + $0x3870] sm:$0xff]  }
 0x715   : > { %31332 = vmatpush3.bf16.msra.mxu0 %v33967_v14  ;;  %v34014_v14 = vld [vmem:[%s34917_s23 + $0x3778] sm:$0xff]  }
 0x716   : > { %31333 = vmatprep.subr.bf16.mxu0 %v33969_v16  ;;  %31354 = vmatpush3.bf16.msra.mxu1 %v33968_v15  ;;  %v6258_v15 = vcombine.high %v6250_v12, %v6250_v12  ;;  %v6266_v16 = vrot.slane %v6250_v12, %v34953_v35  ;;  %v34052_v12 = vld [vmem:[%s34917_s23 + $0x38f0] sm:$0xff]  }
 0x717   : > { %31355 = vmatprep.subr.bf16.mxu1 %v33970_v17  ;;  %v34015_v17 = vld [vmem:[%s34917_s23 + $0x37f8] sm:$0xff]  }
 0x719   : > { %31334 = vmatpush3.bf16.msra.mxu0 %v33971_v18  ;;  %v37131_v18 = vrot.slane %v6243_v13, %v34953_v35  ;;  %v34053_v13 = vld [vmem:[%s34917_s23 + $0x3830] sm:$0xff]  }
 0x71a   : > { %31335 = vmatprep.subr.bf16.mxu0 %v33973_v20  ;;  %31356 = vmatpush3.bf16.msra.mxu1 %v33972_v19  ;;  %v34016_v19 = vld [vmem:[%s34917_s23 + $0x3738] sm:$0xff]   ;;  %v6280_v20 = vrot.slane %v6258_v15, %v34953_v35 }
 0x71b   : > { %31357 = vmatprep.subr.bf16.mxu1 %v33974_v21  ;;  %v34017_v21 = vld [vmem:[%s34917_s23 + $0x37b8] sm:$0xff]  }
 0x71d   : > { %31336 = vmatpush3.bf16.msra.mxu0 %v33975_v22  ;;  %v6259_v22 = vcombine.high %v37131_v18, %v37131_v18 }
 0x71e   : > { %31337 = vmatprep.subr.bf16.mxu0 %v33977_v24  ;;  %31358 = vmatpush3.bf16.msra.mxu1 %v33976_v23  ;;  %v6288_v23 = vcombine.high %v6266_v16, %v6266_v16  ;;  %v34018_v24 = vld [vmem:[%s34917_s23 + $0x3770] sm:$0xff]  }
 0x71f   : > { %31359 = vmatprep.subr.bf16.mxu1 %v33978_v25  ;;  %v6290_v25 = vcombine.high %v6280_v20, %v6280_v20 }
 0x721   : > { %31338 = vmatpush3.bf16.msra.mxu0 %v33979_v26 }
 0x722   : > { %31367 = vmatprep.subr.bf16.mxu0 %v33982_v29  ;;  %31360 = vmatpush3.bf16.msra.mxu1 %v33980_v27  ;;  %v34019_v27 = vld [vmem:[%s34917_s23 + $0x37f0] sm:$0xff]  }
 0x723   : > { %31389 = vmatprep.subr.bf16.mxu1 %v33983_v30  ;;  %v34020_v29 = vld [vmem:[%s34917_s23 + $0x3730] sm:$0xff]  }
 0x724   : > { %v31075_v36 = vpop.f32.mrf.mxu0  ;;  %25069 = vmatmul.mubr.bf16.vlgmr.msra.gmra.mxu0 %v6224_v28  ;;  %v6287_v28 = vrot.slane %v6259_v22, %v34953_v35 }
 0x725   : > { %v31097_v39 = vpop.f32.mrf.mxu1  ;;  %31368 = vmatpush3.bf16.msra.mxu0 %v33984_v31  ;;  %25109 = vmatmul.mubr.bf16.vlgmr.msra.gmra.mxu1 %v6240_v33 }
 0x726   : > { %v31076_v40 = vpop.f32.mrf.mxu0  ;;  %31369 = vmatprep.subr.bf16.mxu0 %v33986_v34  ;;  %31390 = vmatpush3.bf16.msra.mxu1 %v33985_v32  ;;  %v34021_v32 = vld [vmem:[%s34917_s23 + $0x37b0] sm:$0xff]   ;;  %v6291_v33 = vcombine.high %v6287_v28, %v6287_v28 }
 0x727   : > { %v31077_v42 = vadd.f32 %v31076_v40, %v31075_v36  ;;  %v31098_v44 = vpop.f32.mrf.mxu1  ;;  %31391 = vmatprep.subr.bf16.mxu1 %v33987_v37  ;;  %25148 = vmatprep.mubr.bf16.mxu0 %v6280_v20  ;;  %v34022_v36 = vld [vmem:[%s34917_s23 + $0x3768] sm:$0xff]  }
 0x728   : > { %v31078_v45 = vpop.f32.mrf.mxu0  ;;  %v31099_v48 = vadd.f32 %v31098_v44, %v31097_v39  ;;  %25188 = vmatprep.mubr.bf16.mxu1 %v6290_v25  ;;  %v34023_v39 = vld [vmem:[%s34917_s23 + $0x37e8] sm:$0xff]  }
 0x729   : > { %v24591_v47 = vadd.f32 %v31077_v42, %v37067_v6  ;;  %v31100_v50 = vpop.f32.mrf.mxu1  ;;  %31370 = vmatpush3.bf16.msra.mxu0 %v33988_v38  ;;  %v34009_v6 = vld [vmem:[%s34917_s23 + $0x3688] sm:$0xff]  }
 0x72a   : > { %v31079_v51 = vpop.f32.mrf.mxu0  ;;  %31371 = vmatprep.subr.bf16.mxu0 %v33990_v43  ;;  %31392 = vmatpush3.bf16.msra.mxu1 %v33989_v41  ;;  %v34024_v42 = vld [vmem:[%s34917_s23 + $0x3728] sm:$0xff]   ;;  %v34028_v50 = vld [vmem:[%s34917_s23 + $0x3720] sm:$0xff]  }
 0x72b   : > { %v37104_v53 = vadd.f32 %v31099_v48, %v24591_v47  ;;  %v31101_v55 = vpop.f32.mrf.mxu1  ;;  %31393 = vmatprep.subr.bf16.mxu1 %v33991_v46  ;;  %v34025_v45 = vld [vmem:[%s34917_s23 + $0x37a8] sm:$0xff]   ;;  %v34026_v47 = vld [vmem:[%s34917_s23 + $0x3760] sm:$0xff]  }
 0x72c   : > { %v34029_v51 = vld [vmem:[%s34917_s23 + $0x37a0] sm:$0xff]   ;;  %v34033_v55 = vld [vmem:[%s34917_s23 + $0x3798] sm:$0xff]  }
 0x72d   : > { %31372 = vmatpush3.bf16.msra.mxu0 %v33992_v49  ;;  %v34027_v49 = vld [vmem:[%s34917_s23 + $0x37e0] sm:$0xff]  }
 0x72e   : > { %31373 = vmatprep.subr.bf16.mxu0 %v33994_v54  ;;  %31394 = vmatpush3.bf16.msra.mxu1 %v33993_v52  ;;  %v34030_v52 = vld [vmem:[%s34917_s23 + $0x3758] sm:$0xff]  }
 0x72f   : > { %31395 = vmatprep.subr.bf16.mxu1 %v33995_v56  ;;  %v34032_v54 = vld [vmem:[%s34917_s23 + $0x3718] sm:$0xff]   ;;  %v34034_v56 = vld [vmem:[%s34917_s23 + $0x3750] sm:$0xff]  }
 0x731   : > { %31374 = vmatpush3.bf16.msra.mxu0 %v33996_v57  ;;  %v34035_v57 = vld [vmem:[%s34917_s23 + $0x37d0] sm:$0xff]  }
 0x732   : > { %31375 = vmatprep.subr.bf16.mxu0 %v33998_v59  ;;  %31396 = vmatpush3.bf16.msra.mxu1 %v33997_v58  ;;  %v34036_v58 = vld [vmem:[%s34917_s23 + $0x3710] sm:$0xff]  }
 0x733   : > { %31397 = vmatprep.subr.bf16.mxu1 %v33999_v60  ;;  %v34037_v59 = vld [vmem:[%s34917_s23 + $0x3790] sm:$0xff]   ;;  %v34038_v60 = vld [vmem:[%s34917_s23 + $0x3748] sm:$0xff]  }
 0x735   : > { %31376 = vmatpush3.bf16.msra.mxu0 %v34000_v61  ;;  %v34039_v61 = vld [vmem:[%s34917_s23 + $0x37c8] sm:$0xff]  }
 0x736   : > { %31377 = vmatprep.subr.bf16.mxu0 %v34002_v63  ;;  %31398 = vmatpush3.bf16.msra.mxu1 %v34001_v62  ;;  %v34040_v62 = vld [vmem:[%s34917_s23 + $0x3708] sm:$0xff]  }
 0x737   : > { %31399 = vmatprep.subr.bf16.mxu1 %v34003_v0  ;;  %v34041_v63 = vld [vmem:[%s34917_s23 + $0x3788] sm:$0xff]   ;;  %v34042_v0 = vld [vmem:[%s34917_s23 + $0x3740] sm:$0xff]  }
 0x739   : > { %31378 = vmatpush3.bf16.msra.mxu0 %v34004_v1  ;;  %v34043_v1 = vld [vmem:[%s34917_s23 + $0x37c0] sm:$0xff]  }
 0x73a   : > { %31379 = vmatprep.subr.bf16.mxu0 %v34006_v3  ;;  %31400 = vmatpush3.bf16.msra.mxu1 %v34005_v2  ;;  %v34044_v2 = vld [vmem:[%s34917_s23 + $0x3700] sm:$0xff]  }
 0x73b   : > { %31401 = vmatprep.subr.bf16.mxu1 %v34007_v4  ;;  %v34045_v3 = vld [vmem:[%s34917_s23 + $0x3780] sm:$0xff]   ;;  %v6273_v4 = vrot.slane %v37131_v18, %v34953_v35  ;;  %v34055_v18 = vld [vmem:[%s34917_s23 + $0x3868] sm:$0xff]  }
 0x73d   : > { %31380 = vmatpush3.bf16.msra.mxu0 %v34008_v5  ;;  %v34047_v5 = vld [vmem:[%s34917_s23 + $0x3878] sm:$0xff]  }
 0x73e   : > { %31381 = vmatprep.subr.bf16.mxu0 %v34010_v7  ;;  %31402 = vmatpush3.bf16.msra.mxu1 %v34009_v6  ;;  %v34048_v6 = vld [vmem:[%s34917_s23 + $0x38f8] sm:$0xff]  }
 0x73f   : > { %31403 = vmatprep.subr.bf16.mxu1 %v34011_v8  ;;  %v34049_v7 = vld [vmem:[%s34917_s23 + $0x3838] sm:$0xff]  }
 0x740   : > { %v34050_v8 = vld [vmem:[%s34917_s23 + $0x38b8] sm:$0xff]  }
 0x741   : > { %31382 = vmatpush3.bf16.msra.mxu0 %v34012_v9  ;;  %v6289_v9 = vcombine.high %v6273_v4, %v6273_v4 }
 0x742   : > { %31411 = vmatprep.subr.bf16.mxu0 %v34014_v14  ;;  %31404 = vmatpush3.bf16.msra.mxu1 %v34013_v11 }
 0x743   : > { %31433 = vmatprep.subr.bf16.mxu1 %v34015_v17 }
 0x744   : > { %v31119_v26 = vpop.f32.mrf.mxu0  ;;  %25149 = vmatmul.mubr.bf16.vlgmr.msra.gmra.mxu0 %v6266_v16  ;;  %v34054_v16 = vld [vmem:[%s34917_s23 + $0x38b0] sm:$0xff]  }
 0x745   : > { %v31141_v30 = vpop.f32.mrf.mxu1  ;;  %31412 = vmatpush3.bf16.msra.mxu0 %v34016_v19  ;;  %25189 = vmatmul.mubr.bf16.vlgmr.msra.gmra.mxu1 %v6288_v23 }
 0x746   : > { %v31120_v31 = vpop.f32.mrf.mxu0  ;;  %31413 = vmatprep.subr.bf16.mxu0 %v34018_v24  ;;  %31434 = vmatpush3.bf16.msra.mxu1 %v34017_v21  ;;  %v34056_v21 = vld [vmem:[%s34917_s23 + $0x38e8] sm:$0xff]  }
 0x747   : > { %v31121_v34 = vadd.f32 %v31120_v31, %v31119_v26  ;;  %v31142_v37 = vpop.f32.mrf.mxu1  ;;  %25228 = vmatprep.mubr.bf16.mxu0 %v6287_v28  ;;  %31435 = vmatprep.subr.bf16.mxu1 %v34019_v27  ;;  %v34057_v24 = vld [vmem:[%s34917_s23 + $0x3828] sm:$0xff]   ;;  %v34060_v31 = vld [vmem:[%s34917_s23 + $0x38e0] sm:$0xff]  }
 0x748   : > { %v31122_v38 = vpop.f32.mrf.mxu0  ;;  %v31143_v41 = vadd.f32 %v31142_v37, %v31141_v30  ;;  %25268 = vmatprep.mubr.bf16.mxu1 %v6291_v33  ;;  %v34058_v27 = vld [vmem:[%s34917_s23 + $0x38a8] sm:$0xff]   ;;  %v34062_v33 = vld [vmem:[%s34917_s23 + $0x38a0] sm:$0xff]   ;;  %v34065_v37 = vld [vmem:[%s34917_s23 + $0x3818] sm:$0xff]  }
 0x749   : > { %v24671_v40 = vadd.f32 %v31121_v34, %v37104_v53  ;;  %v31144_v43 = vpop.f32.mrf.mxu1  ;;  %31414 = vmatpush3.bf16.msra.mxu0 %v34020_v29  ;;  %v34031_v53 = vld [vmem:[%s34917_s23 + $0x37d8] sm:$0xff]   ;;  %v34059_v29 = vld [vmem:[%s34917_s23 + $0x3860] sm:$0xff]  }
 0x74a   : > { %v31123_v44 = vpop.f32.mrf.mxu0  ;;  %31415 = vmatprep.subr.bf16.mxu0 %v34022_v36  ;;  %31436 = vmatpush3.bf16.msra.mxu1 %v34021_v32  ;;  %v34061_v32 = vld [vmem:[%s34917_s23 + $0x3820] sm:$0xff]   ;;  %v34063_v34 = vld [vmem:[%s34917_s23 + $0x3858] sm:$0xff]   ;;  %v34071_v43 = vld [vmem:[%s34917_s23 + $0x3848] sm:$0xff]  }
 0x74b   : > { %v37148_v46 = vadd.f32 %v31143_v41, %v24671_v40  ;;  %v31145_v48 = vpop.f32.mrf.mxu1  ;;  %31437 = vmatprep.subr.bf16.mxu1 %v34023_v39  ;;  %v34064_v36 = vld [vmem:[%s34917_s23 + $0x38d8] sm:$0xff]   ;;  %v34067_v39 = vld [vmem:[%s34917_s23 + $0x3850] sm:$0xff]   ;;  %v34072_v44 = vld [vmem:[%s34917_s23 + $0x38c8] sm:$0xff]  }
 0x74c   : > { %v34066_v38 = vld [vmem:[%s34917_s23 + $0x3898] sm:$0xff]   ;;  %v34068_v40 = vld [vmem:[%s34917_s23 + $0x38d0] sm:$0xff]   ;;  %v34076_v48 = vld [vmem:[%s34917_s23 + $0x38c0] sm:$0xff]  }
 0x74d   : > { %31416 = vmatpush3.bf16.msra.mxu0 %v34024_v42  ;;  %v34069_v41 = vld [vmem:[%s34917_s23 + $0x3810] sm:$0xff]  }
 0x74e   : > { %31417 = vmatprep.subr.bf16.mxu0 %v34026_v47  ;;  %31438 = vmatpush3.bf16.msra.mxu1 %v34025_v45  ;;  %v34070_v42 = vld [vmem:[%s34917_s23 + $0x3890] sm:$0xff]   ;;  %v34073_v45 = vld [vmem:[%s34917_s23 + $0x3808] sm:$0xff]   ;;  %v34075_v47 = vld [vmem:[%s34917_s23 + $0x3840] sm:$0xff]  }
 0x74f   : > { %31439 = vmatprep.subr.bf16.mxu1 %v34027_v49  ;;  %v34077_v49 = vld [vmem:[%s34917_s23 + $0x3800] sm:$0xff]  }
 0x751   : > { %31418 = vmatpush3.bf16.msra.mxu0 %v34028_v50  ;;  %v261_v50 = vld [vmem:[#allocation2 + $0xe0] sm:$0xff] }
 0x752   : > { %31419 = vmatprep.subr.bf16.mxu0 %v34030_v52  ;;  %31440 = vmatpush3.bf16.msra.mxu1 %v34029_v51  ;;  %v34078_v51 = vld [vmem:[%s34917_s23 + $0x3880] sm:$0xff]   ;;  %v6299_v52 = vrot.slane %v261_v50, %v34953_v35 }
 0x753   : > { %31441 = vmatprep.subr.bf16.mxu1 %v34031_v53  ;;  %v6292_v53 = vcombine.high %v261_v50, %v261_v50  ;;  %v34116_v50 = vld [vmem:[%s34917_s23 + $0x3a70] sm:$0xff]  }
 0x755   : > { %31420 = vmatpush3.bf16.msra.mxu0 %v34032_v54  ;;  %v34079_v54 = vld [vmem:[%s34917_s23 + $0x3978] sm:$0xff]  }
 0x756   : > { %31421 = vmatprep.subr.bf16.mxu0 %v34034_v56  ;;  %31442 = vmatpush3.bf16.msra.mxu1 %v34033_v55  ;;  %v6307_v55 = vcombine.high %v6299_v52, %v6299_v52  ;;  %v6315_v56 = vrot.slane %v6299_v52, %v34953_v35  ;;  %v34117_v52 = vld [vmem:[%s34917_s23 + $0x3af0] sm:$0xff]  }
 0x757   : > { %31443 = vmatprep.subr.bf16.mxu1 %v34035_v57  ;;  %v34080_v57 = vld [vmem:[%s34917_s23 + $0x39f8] sm:$0xff]  }
 0x759   : > { %31422 = vmatpush3.bf16.msra.mxu0 %v34036_v58  ;;  %v37212_v58 = vrot.slane %v6292_v53, %v34953_v35  ;;  %v34118_v53 = vld [vmem:[%s34917_s23 + $0x3a30] sm:$0xff]  }
 0x75a   : > { %31423 = vmatprep.subr.bf16.mxu0 %v34038_v60  ;;  %31444 = vmatpush3.bf16.msra.mxu1 %v34037_v59  ;;  %v34081_v59 = vld [vmem:[%s34917_s23 + $0x3938] sm:$0xff]   ;;  %v6329_v60 = vrot.slane %v6307_v55, %v34953_v35 }
 0x75b   : > { %31445 = vmatprep.subr.bf16.mxu1 %v34039_v61  ;;  %v34082_v61 = vld [vmem:[%s34917_s23 + $0x39b8] sm:$0xff]  }
 0x75d   : > { %31424 = vmatpush3.bf16.msra.mxu0 %v34040_v62  ;;  %v6308_v62 = vcombine.high %v37212_v58, %v37212_v58 }
 0x75e   : > { %31425 = vmatprep.subr.bf16.mxu0 %v34042_v0  ;;  %31446 = vmatpush3.bf16.msra.mxu1 %v34041_v63  ;;  %v6337_v63 = vcombine.high %v6315_v56, %v6315_v56  ;;  %v34083_v0 = vld [vmem:[%s34917_s23 + $0x3970] sm:$0xff]  }
 0x75f   : > { %31447 = vmatprep.subr.bf16.mxu1 %v34043_v1  ;;  %v6339_v1 = vcombine.high %v6329_v60, %v6329_v60 }
 0x761   : > { %31426 = vmatpush3.bf16.msra.mxu0 %v34044_v2 }
 0x762   : > { %31455 = vmatprep.subr.bf16.mxu0 %v34047_v5  ;;  %31448 = vmatpush3.bf16.msra.mxu1 %v34045_v3  ;;  %v34084_v3 = vld [vmem:[%s34917_s23 + $0x39f0] sm:$0xff]  }
 0x763   : > { %31477 = vmatprep.subr.bf16.mxu1 %v34048_v6  ;;  %v34085_v5 = vld [vmem:[%s34917_s23 + $0x3930] sm:$0xff]  }
 0x764   : > { %v31163_v11 = vpop.f32.mrf.mxu0  ;;  %25229 = vmatmul.mubr.bf16.vlgmr.msra.gmra.mxu0 %v6273_v4  ;;  %v6336_v4 = vrot.slane %v6308_v62, %v34953_v35 }
 0x765   : > { %v31185_v14 = vpop.f32.mrf.mxu1  ;;  %31456 = vmatpush3.bf16.msra.mxu0 %v34049_v7  ;;  %25269 = vmatmul.mubr.bf16.vlgmr.msra.gmra.mxu1 %v6289_v9 }
 0x766   : > { %v31164_v15 = vpop.f32.mrf.mxu0  ;;  %31457 = vmatprep.subr.bf16.mxu0 %v34051_v10  ;;  %31478 = vmatpush3.bf16.msra.mxu1 %v34050_v8  ;;  %v34086_v8 = vld [vmem:[%s34917_s23 + $0x39b0] sm:$0xff]   ;;  %v6340_v9 = vcombine.high %v6336_v4, %v6336_v4 }
 0x767   : > { %v31165_v17 = vadd.f32 %v31164_v15, %v31163_v11  ;;  %v31186_v19 = vpop.f32.mrf.mxu1  ;;  %31479 = vmatprep.subr.bf16.mxu1 %v34052_v12  ;;  %25308 = vmatprep.mubr.bf16.mxu0 %v6329_v60  ;;  %v34087_v11 = vld [vmem:[%s34917_s23 + $0x3968] sm:$0xff]  }
 0x768   : > { %v31166_v20 = vpop.f32.mrf.mxu0  ;;  %v31187_v23 = vadd.f32 %v31186_v19, %v31185_v14  ;;  %25348 = vmatprep.mubr.bf16.mxu1 %v6339_v1  ;;  %v34088_v14 = vld [vmem:[%s34917_s23 + $0x39e8] sm:$0xff]  }
 0x769   : > { %v24751_v22 = vadd.f32 %v31165_v17, %v37148_v46  ;;  %v31188_v25 = vpop.f32.mrf.mxu1  ;;  %31458 = vmatpush3.bf16.msra.mxu0 %v34053_v13  ;;  %v34074_v46 = vld [vmem:[%s34917_s23 + $0x3888] sm:$0xff]  }
 0x76a   : > { %v31167_v26 = vpop.f32.mrf.mxu0  ;;  %31459 = vmatprep.subr.bf16.mxu0 %v34055_v18  ;;  %31480 = vmatpush3.bf16.msra.mxu1 %v34054_v16  ;;  %v34089_v17 = vld [vmem:[%s34917_s23 + $0x3928] sm:$0xff]   ;;  %v34093_v25 = vld [vmem:[%s34917_s23 + $0x3920] sm:$0xff]  }
 0x76b   : > { %v37185_v28 = vadd.f32 %v31187_v23, %v24751_v22  ;;  %v31189_v30 = vpop.f32.mrf.mxu1  ;;  %31481 = vmatprep.subr.bf16.mxu1 %v34056_v21  ;;  %v34090_v20 = vld [vmem:[%s34917_s23 + $0x39a8] sm:$0xff]   ;;  %v34091_v22 = vld [vmem:[%s34917_s23 + $0x3960] sm:$0xff]  }
 0x76c   : > { %v34094_v26 = vld [vmem:[%s34917_s23 + $0x39a0] sm:$0xff]   ;;  %v34098_v30 = vld [vmem:[%s34917_s23 + $0x3998] sm:$0xff]  }
 0x76d   : > { %31460 = vmatpush3.bf16.msra.mxu0 %v34057_v24  ;;  %v34092_v24 = vld [vmem:[%s34917_s23 + $0x39e0] sm:$0xff]  }
 0x76e   : > { %31461 = vmatprep.subr.bf16.mxu0 %v34059_v29  ;;  %31482 = vmatpush3.bf16.msra.mxu1 %v34058_v27  ;;  %v34095_v27 = vld [vmem:[%s34917_s23 + $0x3958] sm:$0xff]  }
 0x76f   : > { %31483 = vmatprep.subr.bf16.mxu1 %v34060_v31  ;;  %v34097_v29 = vld [vmem:[%s34917_s23 + $0x3918] sm:$0xff]   ;;  %v34099_v31 = vld [vmem:[%s34917_s23 + $0x3950] sm:$0xff]  }
 0x771   : > { %31462 = vmatpush3.bf16.msra.mxu0 %v34061_v32  ;;  %v34100_v32 = vld [vmem:[%s34917_s23 + $0x39d0] sm:$0xff]  }
 0x772   : > { %31463 = vmatprep.subr.bf16.mxu0 %v34063_v34  ;;  %31484 = vmatpush3.bf16.msra.mxu1 %v34062_v33  ;;  %v34101_v33 = vld [vmem:[%s34917_s23 + $0x3910] sm:$0xff]  }
 0x773   : > { %31485 = vmatprep.subr.bf16.mxu1 %v34064_v36  ;;  %v34102_v34 = vld [vmem:[%s34917_s23 + $0x3990] sm:$0xff]   ;;  %v34103_v36 = vld [vmem:[%s34917_s23 + $0x3948] sm:$0xff]  }
 0x775   : > { %31464 = vmatpush3.bf16.msra.mxu0 %v34065_v37  ;;  %v34104_v37 = vld [vmem:[%s34917_s23 + $0x39c8] sm:$0xff]  }
 0x776   : > { %31465 = vmatprep.subr.bf16.mxu0 %v34067_v39  ;;  %31486 = vmatpush3.bf16.msra.mxu1 %v34066_v38  ;;  %v34105_v38 = vld [vmem:[%s34917_s23 + $0x3908] sm:$0xff]  }
 0x777   : > { %31487 = vmatprep.subr.bf16.mxu1 %v34068_v40  ;;  %v34106_v39 = vld [vmem:[%s34917_s23 + $0x3988] sm:$0xff]   ;;  %v34107_v40 = vld [vmem:[%s34917_s23 + $0x3940] sm:$0xff]  }
 0x779   : > { %31466 = vmatpush3.bf16.msra.mxu0 %v34069_v41  ;;  %v34108_v41 = vld [vmem:[%s34917_s23 + $0x39c0] sm:$0xff]  }
 0x77a   : > { %31467 = vmatprep.subr.bf16.mxu0 %v34071_v43  ;;  %31488 = vmatpush3.bf16.msra.mxu1 %v34070_v42  ;;  %v34109_v42 = vld [vmem:[%s34917_s23 + $0x3900] sm:$0xff]  }
 0x77b   : > { %31489 = vmatprep.subr.bf16.mxu1 %v34072_v44  ;;  %v34110_v43 = vld [vmem:[%s34917_s23 + $0x3980] sm:$0xff]   ;;  %v6322_v44 = vrot.slane %v37212_v58, %v34953_v35  ;;  %v34120_v58 = vld [vmem:[%s34917_s23 + $0x3a68] sm:$0xff]  }
 0x77d   : > { %31468 = vmatpush3.bf16.msra.mxu0 %v34073_v45  ;;  %v34112_v45 = vld [vmem:[%s34917_s23 + $0x3a78] sm:$0xff]  }
 0x77e   : > { %31469 = vmatprep.subr.bf16.mxu0 %v34075_v47  ;;  %31490 = vmatpush3.bf16.msra.mxu1 %v34074_v46  ;;  %v34113_v46 = vld [vmem:[%s34917_s23 + $0x3af8] sm:$0xff]  }
 0x77f   : > { %31491 = vmatprep.subr.bf16.mxu1 %v34076_v48  ;;  %v34114_v47 = vld [vmem:[%s34917_s23 + $0x3a38] sm:$0xff]  }
 0x780   : > { %v34115_v48 = vld [vmem:[%s34917_s23 + $0x3ab8] sm:$0xff]  }
 0x781   : > { %31470 = vmatpush3.bf16.msra.mxu0 %v34077_v49  ;;  %v6338_v49 = vcombine.high %v6322_v44, %v6322_v44 }
 0x782   : > { %31499 = vmatprep.subr.bf16.mxu0 %v34079_v54  ;;  %31492 = vmatpush3.bf16.msra.mxu1 %v34078_v51 }
 0x783   : > { %31521 = vmatprep.subr.bf16.mxu1 %v34080_v57 }
 0x784   : > { %v31207_v2 = vpop.f32.mrf.mxu0  ;;  %25309 = vmatmul.mubr.bf16.vlgmr.msra.gmra.mxu0 %v6315_v56  ;;  %v34119_v56 = vld [vmem:[%s34917_s23 + $0x3ab0] sm:$0xff]  }
 0x785   : > { %v31229_v6 = vpop.f32.mrf.mxu1  ;;  %31500 = vmatpush3.bf16.msra.mxu0 %v34081_v59  ;;  %25349 = vmatmul.mubr.bf16.vlgmr.msra.gmra.mxu1 %v6337_v63 }
 0x786   : > { %v31208_v7 = vpop.f32.mrf.mxu0  ;;  %31501 = vmatprep.subr.bf16.mxu0 %v34083_v0  ;;  %31522 = vmatpush3.bf16.msra.mxu1 %v34082_v61  ;;  %v34121_v61 = vld [vmem:[%s34917_s23 + $0x3ae8] sm:$0xff]  }
 0x787   : > { %v31209_v10 = vadd.f32 %v31208_v7, %v31207_v2  ;;  %v31230_v12 = vpop.f32.mrf.mxu1  ;;  %25388 = vmatprep.mubr.bf16.mxu0 %v6336_v4  ;;  %31523 = vmatprep.subr.bf16.mxu1 %v34084_v3  ;;  %v34122_v0 = vld [vmem:[%s34917_s23 + $0x3a28] sm:$0xff]   ;;  %v34125_v7 = vld [vmem:[%s34917_s23 + $0x3ae0] sm:$0xff]  }
 0x788   : > { %v31210_v13 = vpop.f32.mrf.mxu0  ;;  %v31231_v16 = vadd.f32 %v31230_v12, %v31229_v6  ;;  %25428 = vmatprep.mubr.bf16.mxu1 %v6340_v9  ;;  %v34123_v3 = vld [vmem:[%s34917_s23 + $0x3aa8] sm:$0xff]   ;;  %v34127_v9 = vld [vmem:[%s34917_s23 + $0x3aa0] sm:$0xff]   ;;  %v34130_v12 = vld [vmem:[%s34917_s23 + $0x3a18] sm:$0xff]  }
 0x789   : > { %v24831_v15 = vadd.f32 %v31209_v10, %v37185_v28  ;;  %v31232_v18 = vpop.f32.mrf.mxu1  ;;  %31502 = vmatpush3.bf16.msra.mxu0 %v34085_v5  ;;  %v34096_v28 = vld [vmem:[%s34917_s23 + $0x39d8] sm:$0xff]   ;;  %v34124_v5 = vld [vmem:[%s34917_s23 + $0x3a60] sm:$0xff]  }
 0x78a   : > { %v31211_v19 = vpop.f32.mrf.mxu0  ;;  %31503 = vmatprep.subr.bf16.mxu0 %v34087_v11  ;;  %31524 = vmatpush3.bf16.msra.mxu1 %v34086_v8  ;;  %v34126_v8 = vld [vmem:[%s34917_s23 + $0x3a20] sm:$0xff]   ;;  %v34128_v10 = vld [vmem:[%s34917_s23 + $0x3a58] sm:$0xff]   ;;  %v34136_v18 = vld [vmem:[%s34917_s23 + $0x3a48] sm:$0xff]  }
 0x78b   : > { %v37229_v21 = vadd.f32 %v31231_v16, %v24831_v15  ;;  %v31233_v23 = vpop.f32.mrf.mxu1  ;;  %31525 = vmatprep.subr.bf16.mxu1 %v34088_v14  ;;  %v34129_v11 = vld [vmem:[%s34917_s23 + $0x3ad8] sm:$0xff]   ;;  %v34132_v14 = vld [vmem:[%s34917_s23 + $0x3a50] sm:$0xff]   ;;  %v34137_v19 = vld [vmem:[%s34917_s23 + $0x3ac8] sm:$0xff]  }
 0x78c   : > { %v34131_v13 = vld [vmem:[%s34917_s23 + $0x3a98] sm:$0xff]   ;;  %v34133_v15 = vld [vmem:[%s34917_s23 + $0x3ad0] sm:$0xff]   ;;  %v34141_v23 = vld [vmem:[%s34917_s23 + $0x3ac0] sm:$0xff]  }
 0x78d   : > { %31504 = vmatpush3.bf16.msra.mxu0 %v34089_v17  ;;  %v34134_v16 = vld [vmem:[%s34917_s23 + $0x3a10] sm:$0xff]  }
 0x78e   : > { %31505 = vmatprep.subr.bf16.mxu0 %v34091_v22  ;;  %31526 = vmatpush3.bf16.msra.mxu1 %v34090_v20  ;;  %v34135_v17 = vld [vmem:[%s34917_s23 + $0x3a90] sm:$0xff]   ;;  %v34138_v20 = vld [vmem:[%s34917_s23 + $0x3a08] sm:$0xff]   ;;  %v34140_v22 = vld [vmem:[%s34917_s23 + $0x3a40] sm:$0xff]  }
 0x78f   : > { %31527 = vmatprep.subr.bf16.mxu1 %v34092_v24  ;;  %v34142_v24 = vld [vmem:[%s34917_s23 + $0x3a00] sm:$0xff]  }
 0x791   : > { %31506 = vmatpush3.bf16.msra.mxu0 %v34093_v25  ;;  %v262_v25 = vld [vmem:[#allocation2 + $0xe8] sm:$0xff] }
 0x792   : > { %31507 = vmatprep.subr.bf16.mxu0 %v34095_v27  ;;  %31528 = vmatpush3.bf16.msra.mxu1 %v34094_v26  ;;  %v6348_v26 = vrot.slane %v262_v25, %v34953_v35  ;;  %v34144_v27 = vld [vmem:[%s34917_s23 + $0x3b78] sm:$0xff]  }
 0x793   : > { %31529 = vmatprep.subr.bf16.mxu1 %v34096_v28  ;;  %v6341_v28 = vcombine.high %v262_v25, %v262_v25  ;;  %v34181_v25 = vld [vmem:[%s34917_s23 + $0x3c70] sm:$0xff]  }
 0x795   : > { %31508 = vmatpush3.bf16.msra.mxu0 %v34097_v29  ;;  %v34143_v29 = vld [vmem:[%s34917_s23 + $0x3a80] sm:$0xff]  }
 0x796   : > { %31509 = vmatprep.subr.bf16.mxu0 %v34099_v31  ;;  %31530 = vmatpush3.bf16.msra.mxu1 %v34098_v30  ;;  %v6356_v30 = vcombine.high %v6348_v26, %v6348_v26  ;;  %v6364_v31 = vrot.slane %v6348_v26, %v34953_v35 }
 0x797   : > { %31531 = vmatprep.subr.bf16.mxu1 %v34100_v32  ;;  %v34145_v32 = vld [vmem:[%s34917_s23 + $0x3bf8] sm:$0xff]  }
 0x799   : > { %31510 = vmatpush3.bf16.msra.mxu0 %v34101_v33  ;;  %v37293_v33 = vrot.slane %v6341_v28, %v34953_v35  ;;  %v34183_v28 = vld [vmem:[%s34917_s23 + $0x3c30] sm:$0xff]  }
 0x79a   : > { %31511 = vmatprep.subr.bf16.mxu0 %v34103_v36  ;;  %31532 = vmatpush3.bf16.msra.mxu1 %v34102_v34  ;;  %v34146_v34 = vld [vmem:[%s34917_s23 + $0x3b38] sm:$0xff]   ;;  %v6378_v36 = vrot.slane %v6356_v30, %v34953_v35 }
 0x79b   : > { %31533 = vmatprep.subr.bf16.mxu1 %v34104_v37  ;;  %v34147_v37 = vld [vmem:[%s34917_s23 + $0x3bb8] sm:$0xff]  }
 0x79d   : > { %31512 = vmatpush3.bf16.msra.mxu0 %v34105_v38  ;;  %v6357_v38 = vcombine.high %v37293_v33, %v37293_v33 }
 0x79e   : > { %31513 = vmatprep.subr.bf16.mxu0 %v34107_v40  ;;  %31534 = vmatpush3.bf16.msra.mxu1 %v34106_v39  ;;  %v6386_v39 = vcombine.high %v6364_v31, %v6364_v31  ;;  %v34148_v40 = vld [vmem:[%s34917_s23 + $0x3b70] sm:$0xff]  }
 0x79f   : > { %31535 = vmatprep.subr.bf16.mxu1 %v34108_v41  ;;  %v6388_v41 = vcombine.high %v6378_v36, %v6378_v36 }
 0x7a1   : > { %31514 = vmatpush3.bf16.msra.mxu0 %v34109_v42 }
 0x7a2   : > { %31543 = vmatprep.subr.bf16.mxu0 %v34112_v45  ;;  %31536 = vmatpush3.bf16.msra.mxu1 %v34110_v43  ;;  %v34149_v43 = vld [vmem:[%s34917_s23 + $0x3bf0] sm:$0xff]  }
 0x7a3   : > { %31565 = vmatprep.subr.bf16.mxu1 %v34113_v46  ;;  %v34150_v45 = vld [vmem:[%s34917_s23 + $0x3b30] sm:$0xff]  }
 0x7a4   : > { %v31251_v51 = vpop.f32.mrf.mxu0  ;;  %25389 = vmatmul.mubr.bf16.vlgmr.msra.gmra.mxu0 %v6322_v44  ;;  %v6385_v44 = vrot.slane %v6357_v38, %v34953_v35 }
 0x7a5   : > { %v31273_v54 = vpop.f32.mrf.mxu1  ;;  %31544 = vmatpush3.bf16.msra.mxu0 %v34114_v47  ;;  %25429 = vmatmul.mubr.bf16.vlgmr.msra.gmra.mxu1 %v6338_v49 }
 0x7a6   : > { %v31252_v55 = vpop.f32.mrf.mxu0  ;;  %31545 = vmatprep.subr.bf16.mxu0 %v34116_v50  ;;  %31566 = vmatpush3.bf16.msra.mxu1 %v34115_v48  ;;  %v34151_v48 = vld [vmem:[%s34917_s23 + $0x3bb0] sm:$0xff]   ;;  %v6389_v49 = vcombine.high %v6385_v44, %v6385_v44 }
 0x7a7   : > { %v31253_v57 = vadd.f32 %v31252_v55, %v31251_v51  ;;  %v31274_v59 = vpop.f32.mrf.mxu1  ;;  %31567 = vmatprep.subr.bf16.mxu1 %v34117_v52  ;;  %25468 = vmatprep.mubr.bf16.mxu0 %v6378_v36  ;;  %v34152_v51 = vld [vmem:[%s34917_s23 + $0x3b68] sm:$0xff]  }
 0x7a8   : > { %v31254_v60 = vpop.f32.mrf.mxu0  ;;  %v31275_v63 = vadd.f32 %v31274_v59, %v31273_v54  ;;  %25508 = vmatprep.mubr.bf16.mxu1 %v6388_v41  ;;  %v34153_v54 = vld [vmem:[%s34917_s23 + $0x3be8] sm:$0xff]  }
 0x7a9   : > { %v24911_v62 = vadd.f32 %v31253_v57, %v37229_v21  ;;  %v31276_v1 = vpop.f32.mrf.mxu1  ;;  %31546 = vmatpush3.bf16.msra.mxu0 %v34118_v53  ;;  %v34139_v21 = vld [vmem:[%s34917_s23 + $0x3a88] sm:$0xff]  }
 0x7aa   : > { %v31255_v2 = vpop.f32.mrf.mxu0  ;;  %31547 = vmatprep.subr.bf16.mxu0 %v34120_v58  ;;  %31568 = vmatpush3.bf16.msra.mxu1 %v34119_v56  ;;  %v34154_v57 = vld [vmem:[%s34917_s23 + $0x3b28] sm:$0xff]   ;;  %v34158_v1 = vld [vmem:[%s34917_s23 + $0x3b20] sm:$0xff]  }
 0x7ab   : > { %v37266_v4 = vadd.f32 %v31275_v63, %v24911_v62  ;;  %v31277_v6 = vpop.f32.mrf.mxu1  ;;  %31569 = vmatprep.subr.bf16.mxu1 %v34121_v61  ;;  %v34155_v60 = vld [vmem:[%s34917_s23 + $0x3ba8] sm:$0xff]   ;;  %v34156_v62 = vld [vmem:[%s34917_s23 + $0x3b60] sm:$0xff]  }
 0x7ac   : > { %v34159_v2 = vld [vmem:[%s34917_s23 + $0x3ba0] sm:$0xff]   ;;  %v34163_v6 = vld [vmem:[%s34917_s23 + $0x3b98] sm:$0xff]  }
 0x7ad   : > { %31548 = vmatpush3.bf16.msra.mxu0 %v34122_v0  ;;  %v34157_v0 = vld [vmem:[%s34917_s23 + $0x3be0] sm:$0xff]  }
 0x7ae   : > { %31549 = vmatprep.subr.bf16.mxu0 %v34124_v5  ;;  %31570 = vmatpush3.bf16.msra.mxu1 %v34123_v3  ;;  %v34160_v3 = vld [vmem:[%s34917_s23 + $0x3b58] sm:$0xff]  }
 0x7af   : > { %31571 = vmatprep.subr.bf16.mxu1 %v34125_v7  ;;  %v34162_v5 = vld [vmem:[%s34917_s23 + $0x3b18] sm:$0xff]   ;;  %v34164_v7 = vld [vmem:[%s34917_s23 + $0x3b50] sm:$0xff]  }
 0x7b1   : > { %31550 = vmatpush3.bf16.msra.mxu0 %v34126_v8  ;;  %v34165_v8 = vld [vmem:[%s34917_s23 + $0x3bd0] sm:$0xff]  }
 0x7b2   : > { %31551 = vmatprep.subr.bf16.mxu0 %v34128_v10  ;;  %31572 = vmatpush3.bf16.msra.mxu1 %v34127_v9  ;;  %v34166_v9 = vld [vmem:[%s34917_s23 + $0x3b10] sm:$0xff]  }
 0x7b3   : > { %31573 = vmatprep.subr.bf16.mxu1 %v34129_v11  ;;  %v34167_v10 = vld [vmem:[%s34917_s23 + $0x3b90] sm:$0xff]   ;;  %v34168_v11 = vld [vmem:[%s34917_s23 + $0x3b48] sm:$0xff]  }
 0x7b5   : > { %31552 = vmatpush3.bf16.msra.mxu0 %v34130_v12  ;;  %v34169_v12 = vld [vmem:[%s34917_s23 + $0x3bc8] sm:$0xff]  }
 0x7b6   : > { %31553 = vmatprep.subr.bf16.mxu0 %v34132_v14  ;;  %31574 = vmatpush3.bf16.msra.mxu1 %v34131_v13  ;;  %v34170_v13 = vld [vmem:[%s34917_s23 + $0x3b08] sm:$0xff]  }
 0x7b7   : > { %31575 = vmatprep.subr.bf16.mxu1 %v34133_v15  ;;  %v34171_v14 = vld [vmem:[%s34917_s23 + $0x3b88] sm:$0xff]   ;;  %v34172_v15 = vld [vmem:[%s34917_s23 + $0x3b40] sm:$0xff]  }
 0x7b9   : > { %31554 = vmatpush3.bf16.msra.mxu0 %v34134_v16  ;;  %v34173_v16 = vld [vmem:[%s34917_s23 + $0x3bc0] sm:$0xff]  }
 0x7ba   : > { %31555 = vmatprep.subr.bf16.mxu0 %v34136_v18  ;;  %31576 = vmatpush3.bf16.msra.mxu1 %v34135_v17  ;;  %v34174_v17 = vld [vmem:[%s34917_s23 + $0x3b00] sm:$0xff]  }
 0x7bb   : > { %31577 = vmatprep.subr.bf16.mxu1 %v34137_v19  ;;  %v34175_v18 = vld [vmem:[%s34917_s23 + $0x3b80] sm:$0xff]   ;;  %v6371_v19 = vrot.slane %v37293_v33, %v34953_v35  ;;  %v34185_v33 = vld [vmem:[%s34917_s23 + $0x3c68] sm:$0xff]  }
 0x7bd   : > { %31556 = vmatpush3.bf16.msra.mxu0 %v34138_v20  ;;  %v34177_v20 = vld [vmem:[%s34917_s23 + $0x3c78] sm:$0xff]  }
 0x7be   : > { %31557 = vmatprep.subr.bf16.mxu0 %v34140_v22  ;;  %31578 = vmatpush3.bf16.msra.mxu1 %v34139_v21  ;;  %v34178_v21 = vld [vmem:[%s34917_s23 + $0x3cf8] sm:$0xff]  }
 0x7bf   : > { %31579 = vmatprep.subr.bf16.mxu1 %v34141_v23  ;;  %v34179_v22 = vld [vmem:[%s34917_s23 + $0x3c38] sm:$0xff]  }
 0x7c0   : > { %v34180_v23 = vld [vmem:[%s34917_s23 + $0x3cb8] sm:$0xff]  }
 0x7c1   : > { %31558 = vmatpush3.bf16.msra.mxu0 %v34142_v24  ;;  %v6387_v24 = vcombine.high %v6371_v19, %v6371_v19 }
 0x7c2   : > { %31587 = vmatprep.subr.bf16.mxu0 %v34144_v27  ;;  %31580 = vmatpush3.bf16.msra.mxu1 %v34143_v29  ;;  %v34182_v27 = vld [vmem:[%s34917_s23 + $0x3cf0] sm:$0xff]  }
 0x7c3   : > { %31609 = vmatprep.subr.bf16.mxu1 %v34145_v32 }
 0x7c4   : > { %v31295_v42 = vpop.f32.mrf.mxu0  ;;  %25469 = vmatmul.mubr.bf16.vlgmr.msra.gmra.mxu0 %v6364_v31  ;;  %v34184_v31 = vld [vmem:[%s34917_s23 + $0x3cb0] sm:$0xff]  }
 0x7c5   : > { %v31317_v46 = vpop.f32.mrf.mxu1  ;;  %31588 = vmatpush3.bf16.msra.mxu0 %v34146_v34  ;;  %25509 = vmatmul.mubr.bf16.vlgmr.msra.gmra.mxu1 %v6386_v39 }
 0x7c6   : > { %v31296_v47 = vpop.f32.mrf.mxu0  ;;  %31589 = vmatprep.subr.bf16.mxu0 %v34148_v40  ;;  %31610 = vmatpush3.bf16.msra.mxu1 %v34147_v37  ;;  %v34186_v37 = vld [vmem:[%s34917_s23 + $0x3ce8] sm:$0xff]  }
 0x7c7   : > { %v31297_v50 = vadd.f32 %v31296_v47, %v31295_v42  ;;  %v31318_v52 = vpop.f32.mrf.mxu1  ;;  %25548 = vmatprep.mubr.bf16.mxu0 %v6385_v44  ;;  %31611 = vmatprep.subr.bf16.mxu1 %v34149_v43  ;;  %v34187_v40 = vld [vmem:[%s34917_s23 + $0x3c28] sm:$0xff]   ;;  %v34190_v47 = vld [vmem:[%s34917_s23 + $0x3ce0] sm:$0xff]  }
 0x7c8   : > { %v31298_v53 = vpop.f32.mrf.mxu0  ;;  %v31319_v56 = vadd.f32 %v31318_v52, %v31317_v46  ;;  %25588 = vmatprep.mubr.bf16.mxu1 %v6389_v49  ;;  %v34188_v43 = vld [vmem:[%s34917_s23 + $0x3ca8] sm:$0xff]   ;;  %v34192_v49 = vld [vmem:[%s34917_s23 + $0x3ca0] sm:$0xff]   ;;  %v34195_v52 = vld [vmem:[%s34917_s23 + $0x3c18] sm:$0xff]  }
 0x7c9   : > { %v24991_v55 = vadd.f32 %v31297_v50, %v37266_v4  ;;  %v31320_v58 = vpop.f32.mrf.mxu1  ;;  %31590 = vmatpush3.bf16.msra.mxu0 %v34150_v45  ;;  %v34161_v4 = vld [vmem:[%s34917_s23 + $0x3bd8] sm:$0xff]   ;;  %v34189_v45 = vld [vmem:[%s34917_s23 + $0x3c60] sm:$0xff]  }
 0x7ca   : > { %v31299_v59 = vpop.f32.mrf.mxu0  ;;  %31591 = vmatprep.subr.bf16.mxu0 %v34152_v51  ;;  %31612 = vmatpush3.bf16.msra.mxu1 %v34151_v48  ;;  %v34191_v48 = vld [vmem:[%s34917_s23 + $0x3c20] sm:$0xff]   ;;  %v34193_v50 = vld [vmem:[%s34917_s23 + $0x3c58] sm:$0xff]   ;;  %v34201_v58 = vld [vmem:[%s34917_s23 + $0x3c48] sm:$0xff]  }
 0x7cb   : > { %v37310_v61 = vadd.f32 %v31319_v56, %v24991_v55  ;;  %v31321_v63 = vpop.f32.mrf.mxu1  ;;  %31613 = vmatprep.subr.bf16.mxu1 %v34153_v54  ;;  %v34194_v51 = vld [vmem:[%s34917_s23 + $0x3cd8] sm:$0xff]   ;;  %v34197_v54 = vld [vmem:[%s34917_s23 + $0x3c50] sm:$0xff]   ;;  %v34202_v59 = vld [vmem:[%s34917_s23 + $0x3cc8] sm:$0xff]  }
 0x7cc   : > { %v34196_v53 = vld [vmem:[%s34917_s23 + $0x3c98] sm:$0xff]   ;;  %v34198_v55 = vld [vmem:[%s34917_s23 + $0x3cd0] sm:$0xff]   ;;  %v34206_v63 = vld [vmem:[%s34917_s23 + $0x3cc0] sm:$0xff]  }
 0x7cd   : > { %31592 = vmatpush3.bf16.msra.mxu0 %v34154_v57  ;;  %v34199_v56 = vld [vmem:[%s34917_s23 + $0x3c10] sm:$0xff]  }
 0x7ce   : > { %31593 = vmatprep.subr.bf16.mxu0 %v34156_v62  ;;  %31614 = vmatpush3.bf16.msra.mxu1 %v34155_v60  ;;  %v34200_v57 = vld [vmem:[%s34917_s23 + $0x3c90] sm:$0xff]   ;;  %v34203_v60 = vld [vmem:[%s34917_s23 + $0x3c08] sm:$0xff]   ;;  %v34205_v62 = vld [vmem:[%s34917_s23 + $0x3c40] sm:$0xff]  }
 0x7cf   : > { %31615 = vmatprep.subr.bf16.mxu1 %v34157_v0  ;;  %v34207_v0 = vld [vmem:[%s34917_s23 + $0x3c00] sm:$0xff]  }
 0x7d1   : > { %31594 = vmatpush3.bf16.msra.mxu0 %v34158_v1  ;;  %v263_v1 = vld [vmem:[#allocation2 + $0xf0] sm:$0xff] }
 0x7d2   : > { %31595 = vmatprep.subr.bf16.mxu0 %v34160_v3  ;;  %31616 = vmatpush3.bf16.msra.mxu1 %v34159_v2  ;;  %v34208_v2 = vld [vmem:[%s34917_s23 + $0x3c80] sm:$0xff]   ;;  %v6397_v3 = vrot.slane %v263_v1, %v34953_v35 }
 0x7d3   : > { %31617 = vmatprep.subr.bf16.mxu1 %v34161_v4  ;;  %v6390_v4 = vcombine.high %v263_v1, %v263_v1  ;;  %v34246_v1 = vld [vmem:[%s34917_s23 + $0x3e70] sm:$0xff]  }
 0x7d5   : > { %31596 = vmatpush3.bf16.msra.mxu0 %v34162_v5  ;;  %v34209_v5 = vld [vmem:[%s34917_s23 + $0x3d78] sm:$0xff]  }
 0x7d6   : > { %31597 = vmatprep.subr.bf16.mxu0 %v34164_v7  ;;  %31618 = vmatpush3.bf16.msra.mxu1 %v34163_v6  ;;  %v6405_v6 = vcombine.high %v6397_v3, %v6397_v3  ;;  %v6413_v7 = vrot.slane %v6397_v3, %v34953_v35  ;;  %v34247_v3 = vld [vmem:[%s34917_s23 + $0x3ef0] sm:$0xff]  }
 0x7d7   : > { %31619 = vmatprep.subr.bf16.mxu1 %v34165_v8  ;;  %v34210_v8 = vld [vmem:[%s34917_s23 + $0x3df8] sm:$0xff]  }
 0x7d9   : > { %31598 = vmatpush3.bf16.msra.mxu0 %v34166_v9  ;;  %v37374_v9 = vrot.slane %v6390_v4, %v34953_v35  ;;  %v34248_v4 = vld [vmem:[%s34917_s23 + $0x3e30] sm:$0xff]  }
 0x7da   : > { %31599 = vmatprep.subr.bf16.mxu0 %v34168_v11  ;;  %31620 = vmatpush3.bf16.msra.mxu1 %v34167_v10  ;;  %v34211_v10 = vld [vmem:[%s34917_s23 + $0x3d38] sm:$0xff]   ;;  %v6427_v11 = vrot.slane %v6405_v6, %v34953_v35 }
 0x7db   : > { %31621 = vmatprep.subr.bf16.mxu1 %v34169_v12  ;;  %v34212_v12 = vld [vmem:[%s34917_s23 + $0x3db8] sm:$0xff]  }
 0x7dd   : > { %31600 = vmatpush3.bf16.msra.mxu0 %v34170_v13  ;;  %v6406_v13 = vcombine.high %v37374_v9, %v37374_v9 }
 0x7de   : > { %31601 = vmatprep.subr.bf16.mxu0 %v34172_v15  ;;  %31622 = vmatpush3.bf16.msra.mxu1 %v34171_v14  ;;  %v6435_v14 = vcombine.high %v6413_v7, %v6413_v7  ;;  %v34213_v15 = vld [vmem:[%s34917_s23 + $0x3d70] sm:$0xff]  }
 0x7df   : > { %31623 = vmatprep.subr.bf16.mxu1 %v34173_v16  ;;  %v6437_v16 = vcombine.high %v6427_v11, %v6427_v11 }
 0x7e1   : > { %31602 = vmatpush3.bf16.msra.mxu0 %v34174_v17 }
 0x7e2   : > { %31631 = vmatprep.subr.bf16.mxu0 %v34177_v20  ;;  %31624 = vmatpush3.bf16.msra.mxu1 %v34175_v18  ;;  %v34214_v18 = vld [vmem:[%s34917_s23 + $0x3df0] sm:$0xff]  }
 0x7e3   : > { %31653 = vmatprep.subr.bf16.mxu1 %v34178_v21  ;;  %v34215_v20 = vld [vmem:[%s34917_s23 + $0x3d30] sm:$0xff]  }
 0x7e4   : > { %v31339_v26 = vpop.f32.mrf.mxu0  ;;  %25549 = vmatmul.mubr.bf16.vlgmr.msra.gmra.mxu0 %v6371_v19  ;;  %v6434_v19 = vrot.slane %v6406_v13, %v34953_v35 }
 0x7e5   : > { %v31361_v29 = vpop.f32.mrf.mxu1  ;;  %31632 = vmatpush3.bf16.msra.mxu0 %v34179_v22  ;;  %25589 = vmatmul.mubr.bf16.vlgmr.msra.gmra.mxu1 %v6387_v24 }
 0x7e6   : > { %v31340_v30 = vpop.f32.mrf.mxu0  ;;  %31633 = vmatprep.subr.bf16.mxu0 %v34181_v25  ;;  %31654 = vmatpush3.bf16.msra.mxu1 %v34180_v23  ;;  %v34216_v23 = vld [vmem:[%s34917_s23 + $0x3db0] sm:$0xff]   ;;  %v6438_v24 = vcombine.high %v6434_v19, %v6434_v19 }
 0x7e7   : > { %v31341_v32 = vadd.f32 %v31340_v30, %v31339_v26  ;;  %v31362_v34 = vpop.f32.mrf.mxu1  ;;  %31655 = vmatprep.subr.bf16.mxu1 %v34182_v27  ;;  %25628 = vmatprep.mubr.bf16.mxu0 %v6427_v11  ;;  %v34217_v26 = vld [vmem:[%s34917_s23 + $0x3d68] sm:$0xff]  }
 0x7e8   : > { %v31342_v36 = vpop.f32.mrf.mxu0  ;;  %v31363_v39 = vadd.f32 %v31362_v34, %v31361_v29  ;;  %25668 = vmatprep.mubr.bf16.mxu1 %v6437_v16  ;;  %v34218_v29 = vld [vmem:[%s34917_s23 + $0x3de8] sm:$0xff]  }
 0x7e9   : > { %v25071_v38 = vadd.f32 %v31341_v32, %v37310_v61  ;;  %v31364_v41 = vpop.f32.mrf.mxu1  ;;  %31634 = vmatpush3.bf16.msra.mxu0 %v34183_v28  ;;  %v34204_v61 = vld [vmem:[%s34917_s23 + $0x3c88] sm:$0xff]  }
 0x7ea   : > { %v31343_v42 = vpop.f32.mrf.mxu0  ;;  %31635 = vmatprep.subr.bf16.mxu0 %v34185_v33  ;;  %31656 = vmatpush3.bf16.msra.mxu1 %v34184_v31  ;;  %v34219_v32 = vld [vmem:[%s34917_s23 + $0x3d28] sm:$0xff]   ;;  %v34223_v41 = vld [vmem:[%s34917_s23 + $0x3d20] sm:$0xff]  }
 0x7eb   : > { %v37347_v44 = vadd.f32 %v31363_v39, %v25071_v38  ;;  %v31365_v46 = vpop.f32.mrf.mxu1  ;;  %31657 = vmatprep.subr.bf16.mxu1 %v34186_v37  ;;  %v34220_v36 = vld [vmem:[%s34917_s23 + $0x3da8] sm:$0xff]   ;;  %v34221_v38 = vld [vmem:[%s34917_s23 + $0x3d60] sm:$0xff]  }
 0x7ec   : > { %v34224_v42 = vld [vmem:[%s34917_s23 + $0x3da0] sm:$0xff]   ;;  %v34228_v46 = vld [vmem:[%s34917_s23 + $0x3d98] sm:$0xff]  }
 0x7ed   : > { %31636 = vmatpush3.bf16.msra.mxu0 %v34187_v40  ;;  %v34222_v40 = vld [vmem:[%s34917_s23 + $0x3de0] sm:$0xff]  }
 0x7ee   : > { %31637 = vmatprep.subr.bf16.mxu0 %v34189_v45  ;;  %31658 = vmatpush3.bf16.msra.mxu1 %v34188_v43  ;;  %v34225_v43 = vld [vmem:[%s34917_s23 + $0x3d58] sm:$0xff]  }
 0x7ef   : > { %31659 = vmatprep.subr.bf16.mxu1 %v34190_v47  ;;  %v34227_v45 = vld [vmem:[%s34917_s23 + $0x3d18] sm:$0xff]   ;;  %v34229_v47 = vld [vmem:[%s34917_s23 + $0x3d50] sm:$0xff]  }
 0x7f1   : > { %31638 = vmatpush3.bf16.msra.mxu0 %v34191_v48  ;;  %v34230_v48 = vld [vmem:[%s34917_s23 + $0x3dd0] sm:$0xff]  }
 0x7f2   : > { %31639 = vmatprep.subr.bf16.mxu0 %v34193_v50  ;;  %31660 = vmatpush3.bf16.msra.mxu1 %v34192_v49  ;;  %v34231_v49 = vld [vmem:[%s34917_s23 + $0x3d10] sm:$0xff]  }
 0x7f3   : > { %31661 = vmatprep.subr.bf16.mxu1 %v34194_v51  ;;  %v34232_v50 = vld [vmem:[%s34917_s23 + $0x3d90] sm:$0xff]   ;;  %v34233_v51 = vld [vmem:[%s34917_s23 + $0x3d48] sm:$0xff]  }
 0x7f5   : > { %31640 = vmatpush3.bf16.msra.mxu0 %v34195_v52  ;;  %v34234_v52 = vld [vmem:[%s34917_s23 + $0x3dc8] sm:$0xff]  }
 0x7f6   : > { %31641 = vmatprep.subr.bf16.mxu0 %v34197_v54  ;;  %31662 = vmatpush3.bf16.msra.mxu1 %v34196_v53  ;;  %v34235_v53 = vld [vmem:[%s34917_s23 + $0x3d08] sm:$0xff]  }
 0x7f7   : > { %31663 = vmatprep.subr.bf16.mxu1 %v34198_v55  ;;  %v34236_v54 = vld [vmem:[%s34917_s23 + $0x3d88] sm:$0xff]   ;;  %v34237_v55 = vld [vmem:[%s34917_s23 + $0x3d40] sm:$0xff]  }
 0x7f9   : > { %31642 = vmatpush3.bf16.msra.mxu0 %v34199_v56  ;;  %v34238_v56 = vld [vmem:[%s34917_s23 + $0x3dc0] sm:$0xff]  }
 0x7fa   : > { %31643 = vmatprep.subr.bf16.mxu0 %v34201_v58  ;;  %31664 = vmatpush3.bf16.msra.mxu1 %v34200_v57  ;;  %v34239_v57 = vld [vmem:[%s34917_s23 + $0x3d00] sm:$0xff]  }
 0x7fb   : > { %31665 = vmatprep.subr.bf16.mxu1 %v34202_v59  ;;  %v34240_v58 = vld [vmem:[%s34917_s23 + $0x3d80] sm:$0xff]   ;;  %v6420_v59 = vrot.slane %v37374_v9, %v34953_v35  ;;  %v34250_v9 = vld [vmem:[%s34917_s23 + $0x3e68] sm:$0xff]  }
 0x7fd   : > { %31644 = vmatpush3.bf16.msra.mxu0 %v34203_v60  ;;  %v34242_v60 = vld [vmem:[%s34917_s23 + $0x3e78] sm:$0xff]  }
 0x7fe   : > { %31645 = vmatprep.subr.bf16.mxu0 %v34205_v62  ;;  %31666 = vmatpush3.bf16.msra.mxu1 %v34204_v61  ;;  %v34243_v61 = vld [vmem:[%s34917_s23 + $0x3ef8] sm:$0xff]  }
 0x7ff   : > { %31667 = vmatprep.subr.bf16.mxu1 %v34206_v63  ;;  %v34244_v62 = vld [vmem:[%s34917_s23 + $0x3e38] sm:$0xff]  }
 0x800   : > { %v34245_v63 = vld [vmem:[%s34917_s23 + $0x3eb8] sm:$0xff]  }
 0x801   : > { %31646 = vmatpush3.bf16.msra.mxu0 %v34207_v0  ;;  %v6436_v0 = vcombine.high %v6420_v59, %v6420_v59 }
 0x802   : > { %31675 = vmatprep.subr.bf16.mxu0 %v34209_v5  ;;  %31668 = vmatpush3.bf16.msra.mxu1 %v34208_v2 }
 0x803   : > { %31697 = vmatprep.subr.bf16.mxu1 %v34210_v8 }
 0x804   : > { %v31383_v17 = vpop.f32.mrf.mxu0  ;;  %25629 = vmatmul.mubr.bf16.vlgmr.msra.gmra.mxu0 %v6413_v7  ;;  %v34249_v7 = vld [vmem:[%s34917_s23 + $0x3eb0] sm:$0xff]  }
 0x805   : > { %v31405_v21 = vpop.f32.mrf.mxu1  ;;  %31676 = vmatpush3.bf16.msra.mxu0 %v34211_v10  ;;  %25669 = vmatmul.mubr.bf16.vlgmr.msra.gmra.mxu1 %v6435_v14 }
 0x806   : > { %v31384_v22 = vpop.f32.mrf.mxu0  ;;  %31677 = vmatprep.subr.bf16.mxu0 %v34213_v15  ;;  %31698 = vmatpush3.bf16.msra.mxu1 %v34212_v12  ;;  %v34251_v12 = vld [vmem:[%s34917_s23 + $0x3ee8] sm:$0xff]  }
 0x807   : > { %v31385_v25 = vadd.f32 %v31384_v22, %v31383_v17  ;;  %v31406_v27 = vpop.f32.mrf.mxu1  ;;  %25708 = vmatprep.mubr.bf16.mxu0 %v6434_v19  ;;  %31699 = vmatprep.subr.bf16.mxu1 %v34214_v18  ;;  %v34252_v15 = vld [vmem:[%s34917_s23 + $0x3e28] sm:$0xff]   ;;  %v34255_v22 = vld [vmem:[%s34917_s23 + $0x3ee0] sm:$0xff]  }
 0x808   : > { %v31386_v28 = vpop.f32.mrf.mxu0  ;;  %v31407_v31 = vadd.f32 %v31406_v27, %v31405_v21  ;;  %25748 = vmatprep.mubr.bf16.mxu1 %v6438_v24  ;;  %v34253_v18 = vld [vmem:[%s34917_s23 + $0x3ea8] sm:$0xff]   ;;  %v34257_v24 = vld [vmem:[%s34917_s23 + $0x3ea0] sm:$0xff]   ;;  %v34260_v27 = vld [vmem:[%s34917_s23 + $0x3e18] sm:$0xff]  }
 0x809   : > { %v25151_v30 = vadd.f32 %v31385_v25, %v37347_v44  ;;  %v31408_v33 = vpop.f32.mrf.mxu1  ;;  %31678 = vmatpush3.bf16.msra.mxu0 %v34215_v20  ;;  %v34226_v44 = vld [vmem:[%s34917_s23 + $0x3dd8] sm:$0xff]   ;;  %v34254_v20 = vld [vmem:[%s34917_s23 + $0x3e60] sm:$0xff]  }
 0x80a   : > { %v31387_v34 = vpop.f32.mrf.mxu0  ;;  %31679 = vmatprep.subr.bf16.mxu0 %v34217_v26  ;;  %31700 = vmatpush3.bf16.msra.mxu1 %v34216_v23  ;;  %v34256_v23 = vld [vmem:[%s34917_s23 + $0x3e20] sm:$0xff]   ;;  %v34258_v25 = vld [vmem:[%s34917_s23 + $0x3e58] sm:$0xff]   ;;  %v34266_v33 = vld [vmem:[%s34917_s23 + $0x3e48] sm:$0xff]  }
 0x80b   : > { %v37391_v37 = vadd.f32 %v31407_v31, %v25151_v30  ;;  %v31409_v39 = vpop.f32.mrf.mxu1  ;;  %31701 = vmatprep.subr.bf16.mxu1 %v34218_v29  ;;  %v34259_v26 = vld [vmem:[%s34917_s23 + $0x3ed8] sm:$0xff]   ;;  %v34262_v29 = vld [vmem:[%s34917_s23 + $0x3e50] sm:$0xff]   ;;  %v34267_v34 = vld [vmem:[%s34917_s23 + $0x3ec8] sm:$0xff]  }
 0x80c   : > { %v34261_v28 = vld [vmem:[%s34917_s23 + $0x3e98] sm:$0xff]   ;;  %v34263_v30 = vld [vmem:[%s34917_s23 + $0x3ed0] sm:$0xff]   ;;  %v34271_v39 = vld [vmem:[%s34917_s23 + $0x3ec0] sm:$0xff]  }
 0x80d   : > { %31680 = vmatpush3.bf16.msra.mxu0 %v34219_v32  ;;  %v34264_v31 = vld [vmem:[%s34917_s23 + $0x3e10] sm:$0xff]  }
 0x80e   : > { %31681 = vmatprep.subr.bf16.mxu0 %v34221_v38  ;;  %31702 = vmatpush3.bf16.msra.mxu1 %v34220_v36  ;;  %v34265_v32 = vld [vmem:[%s34917_s23 + $0x3e90] sm:$0xff]   ;;  %v34268_v36 = vld [vmem:[%s34917_s23 + $0x3e08] sm:$0xff]   ;;  %v34270_v38 = vld [vmem:[%s34917_s23 + $0x3e40] sm:$0xff]  }
 0x80f   : > { %31703 = vmatprep.subr.bf16.mxu1 %v34222_v40  ;;  %v34272_v40 = vld [vmem:[%s34917_s23 + $0x3e00] sm:$0xff]  }
 0x811   : > { %31682 = vmatpush3.bf16.msra.mxu0 %v34223_v41  ;;  %v264_v41 = vld [vmem:[#allocation2 + $0xf8] sm:$0xff] }
 0x812   : > { %31683 = vmatprep.subr.bf16.mxu0 %v34225_v43  ;;  %31704 = vmatpush3.bf16.msra.mxu1 %v34224_v42  ;;  %v34273_v42 = vld [vmem:[%s34917_s23 + $0x3e80] sm:$0xff]   ;;  %v6446_v43 = vrot.slane %v264_v41, %v34953_v35 }
 0x813   : > { %31705 = vmatprep.subr.bf16.mxu1 %v34226_v44  ;;  %v6439_v44 = vcombine.high %v264_v41, %v264_v41  ;;  %v34311_v41 = vld [vmem:[%s34917_s23 + $0x4070] sm:$0xff]  }
 0x815   : > { %31684 = vmatpush3.bf16.msra.mxu0 %v34227_v45  ;;  %v34274_v45 = vld [vmem:[%s34917_s23 + $0x3f78] sm:$0xff]  }
 0x816   : > { %31685 = vmatprep.subr.bf16.mxu0 %v34229_v47  ;;  %31706 = vmatpush3.bf16.msra.mxu1 %v34228_v46  ;;  %v6454_v46 = vcombine.high %v6446_v43, %v6446_v43  ;;  %v6462_v47 = vrot.slane %v6446_v43, %v34953_v35  ;;  %v34312_v43 = vld [vmem:[%s34917_s23 + $0x40f0] sm:$0xff]  }
 0x817   : > { %31707 = vmatprep.subr.bf16.mxu1 %v34230_v48  ;;  %v34275_v48 = vld [vmem:[%s34917_s23 + $0x3ff8] sm:$0xff]  }
 0x819   : > { %31686 = vmatpush3.bf16.msra.mxu0 %v34231_v49  ;;  %v37455_v49 = vrot.slane %v6439_v44, %v34953_v35  ;;  %v34313_v44 = vld [vmem:[%s34917_s23 + $0x4030] sm:$0xff]  }
 0x81a   : > { %31687 = vmatprep.subr.bf16.mxu0 %v34233_v51  ;;  %31708 = vmatpush3.bf16.msra.mxu1 %v34232_v50  ;;  %v34276_v50 = vld [vmem:[%s34917_s23 + $0x3f38] sm:$0xff]   ;;  %v6476_v51 = vrot.slane %v6454_v46, %v34953_v35 }
 0x81b   : > { %31709 = vmatprep.subr.bf16.mxu1 %v34234_v52  ;;  %v34277_v52 = vld [vmem:[%s34917_s23 + $0x3fb8] sm:$0xff]  }
 0x81d   : > { %31688 = vmatpush3.bf16.msra.mxu0 %v34235_v53  ;;  %v6455_v53 = vcombine.high %v37455_v49, %v37455_v49 }
 0x81e   : > { %31689 = vmatprep.subr.bf16.mxu0 %v34237_v55  ;;  %31710 = vmatpush3.bf16.msra.mxu1 %v34236_v54  ;;  %v6484_v54 = vcombine.high %v6462_v47, %v6462_v47  ;;  %v34278_v55 = vld [vmem:[%s34917_s23 + $0x3f70] sm:$0xff]  }
 0x81f   : > { %31711 = vmatprep.subr.bf16.mxu1 %v34238_v56  ;;  %v6486_v56 = vcombine.high %v6476_v51, %v6476_v51 }
 0x821   : > { %31690 = vmatpush3.bf16.msra.mxu0 %v34239_v57 }
 0x822   : > { %31719 = vmatprep.subr.bf16.mxu0 %v34242_v60  ;;  %31712 = vmatpush3.bf16.msra.mxu1 %v34240_v58  ;;  %v34279_v58 = vld [vmem:[%s34917_s23 + $0x3ff0] sm:$0xff]  }
 0x823   : > { %31741 = vmatprep.subr.bf16.mxu1 %v34243_v61  ;;  %v34280_v60 = vld [vmem:[%s34917_s23 + $0x3f30] sm:$0xff]  }
 0x824   : > { %v31427_v2 = vpop.f32.mrf.mxu0  ;;  %25709 = vmatmul.mubr.bf16.vlgmr.msra.gmra.mxu0 %v6420_v59  ;;  %v6483_v59 = vrot.slane %v6455_v53, %v34953_v35 }
 0x825   : > { %v31449_v5 = vpop.f32.mrf.mxu1  ;;  %31720 = vmatpush3.bf16.msra.mxu0 %v34244_v62  ;;  %25749 = vmatmul.mubr.bf16.vlgmr.msra.gmra.mxu1 %v6436_v0 }
 0x826   : > { %v31428_v6 = vpop.f32.mrf.mxu0  ;;  %31721 = vmatprep.subr.bf16.mxu0 %v34246_v1  ;;  %31742 = vmatpush3.bf16.msra.mxu1 %v34245_v63  ;;  %v34281_v63 = vld [vmem:[%s34917_s23 + $0x3fb0] sm:$0xff]   ;;  %v6487_v0 = vcombine.high %v6483_v59, %v6483_v59 }
 0x827   : > { %v31429_v8 = vadd.f32 %v31428_v6, %v31427_v2  ;;  %v31450_v10 = vpop.f32.mrf.mxu1  ;;  %31743 = vmatprep.subr.bf16.mxu1 %v34247_v3  ;;  %25788 = vmatprep.mubr.bf16.mxu0 %v6476_v51  ;;  %v34282_v2 = vld [vmem:[%s34917_s23 + $0x3f68] sm:$0xff]  }
 0x828   : > { %v31430_v11 = vpop.f32.mrf.mxu0  ;;  %v31451_v14 = vadd.f32 %v31450_v10, %v31449_v5  ;;  %25828 = vmatprep.mubr.bf16.mxu1 %v6486_v56  ;;  %v34283_v5 = vld [vmem:[%s34917_s23 + $0x3fe8] sm:$0xff]  }
 0x829   : > { %v25231_v13 = vadd.f32 %v31429_v8, %v37391_v37  ;;  %v31452_v16 = vpop.f32.mrf.mxu1  ;;  %31722 = vmatpush3.bf16.msra.mxu0 %v34248_v4  ;;  %v34269_v37 = vld [vmem:[%s34917_s23 + $0x3e88] sm:$0xff]  }
 0x82a   : > { %v31431_v17 = vpop.f32.mrf.mxu0  ;;  %31723 = vmatprep.subr.bf16.mxu0 %v34250_v9  ;;  %31744 = vmatpush3.bf16.msra.mxu1 %v34249_v7  ;;  %v34284_v8 = vld [vmem:[%s34917_s23 + $0x3f28] sm:$0xff]   ;;  %v34288_v16 = vld [vmem:[%s34917_s23 + $0x3f20] sm:$0xff]  }
 0x82b   : > { %v37428_v19 = vadd.f32 %v31451_v14, %v25231_v13  ;;  %v31453_v21 = vpop.f32.mrf.mxu1  ;;  %31745 = vmatprep.subr.bf16.mxu1 %v34251_v12  ;;  %v34285_v11 = vld [vmem:[%s34917_s23 + $0x3fa8] sm:$0xff]   ;;  %v34286_v13 = vld [vmem:[%s34917_s23 + $0x3f60] sm:$0xff]  }
 0x82c   : > { %v34289_v17 = vld [vmem:[%s34917_s23 + $0x3fa0] sm:$0xff]   ;;  %v34293_v21 = vld [vmem:[%s34917_s23 + $0x3f98] sm:$0xff]  }
 0x82d   : > { %31724 = vmatpush3.bf16.msra.mxu0 %v34252_v15  ;;  %v34287_v15 = vld [vmem:[%s34917_s23 + $0x3fe0] sm:$0xff]  }
 0x82e   : > { %31725 = vmatprep.subr.bf16.mxu0 %v34254_v20  ;;  %31746 = vmatpush3.bf16.msra.mxu1 %v34253_v18  ;;  %v34290_v18 = vld [vmem:[%s34917_s23 + $0x3f58] sm:$0xff]  }
 0x82f   : > { %31747 = vmatprep.subr.bf16.mxu1 %v34255_v22  ;;  %v34292_v20 = vld [vmem:[%s34917_s23 + $0x3f18] sm:$0xff]   ;;  %v34294_v22 = vld [vmem:[%s34917_s23 + $0x3f50] sm:$0xff]  }
 0x831   : > { %31726 = vmatpush3.bf16.msra.mxu0 %v34256_v23  ;;  %v34295_v23 = vld [vmem:[%s34917_s23 + $0x3fd0] sm:$0xff]  }
 0x832   : > { %31727 = vmatprep.subr.bf16.mxu0 %v34258_v25  ;;  %31748 = vmatpush3.bf16.msra.mxu1 %v34257_v24  ;;  %v34296_v24 = vld [vmem:[%s34917_s23 + $0x3f10] sm:$0xff]  }
 0x833   : > { %31749 = vmatprep.subr.bf16.mxu1 %v34259_v26  ;;  %v34297_v25 = vld [vmem:[%s34917_s23 + $0x3f90] sm:$0xff]   ;;  %v34298_v26 = vld [vmem:[%s34917_s23 + $0x3f48] sm:$0xff]  }
 0x835   : > { %31728 = vmatpush3.bf16.msra.mxu0 %v34260_v27  ;;  %v34299_v27 = vld [vmem:[%s34917_s23 + $0x3fc8] sm:$0xff]  }
 0x836   : > { %31729 = vmatprep.subr.bf16.mxu0 %v34262_v29  ;;  %31750 = vmatpush3.bf16.msra.mxu1 %v34261_v28  ;;  %v34300_v28 = vld [vmem:[%s34917_s23 + $0x3f08] sm:$0xff]  }
 0x837   : > { %31751 = vmatprep.subr.bf16.mxu1 %v34263_v30  ;;  %v34301_v29 = vld [vmem:[%s34917_s23 + $0x3f88] sm:$0xff]   ;;  %v34302_v30 = vld [vmem:[%s34917_s23 + $0x3f40] sm:$0xff]  }
 0x839   : > { %31730 = vmatpush3.bf16.msra.mxu0 %v34264_v31  ;;  %v34303_v31 = vld [vmem:[%s34917_s23 + $0x3fc0] sm:$0xff]  }
 0x83a   : > { %31731 = vmatprep.subr.bf16.mxu0 %v34266_v33  ;;  %31752 = vmatpush3.bf16.msra.mxu1 %v34265_v32  ;;  %v34304_v32 = vld [vmem:[%s34917_s23 + $0x3f00] sm:$0xff]  }
 0x83b   : > { %31753 = vmatprep.subr.bf16.mxu1 %v34267_v34  ;;  %v34305_v33 = vld [vmem:[%s34917_s23 + $0x3f80] sm:$0xff]   ;;  %v6469_v34 = vrot.slane %v37455_v49, %v34953_v35  ;;  %v34315_v49 = vld [vmem:[%s34917_s23 + $0x4068] sm:$0xff]  }
 0x83d   : > { %31732 = vmatpush3.bf16.msra.mxu0 %v34268_v36  ;;  %v34307_v36 = vld [vmem:[%s34917_s23 + $0x4078] sm:$0xff]  }
 0x83e   : > { %31733 = vmatprep.subr.bf16.mxu0 %v34270_v38  ;;  %31754 = vmatpush3.bf16.msra.mxu1 %v34269_v37  ;;  %v34308_v37 = vld [vmem:[%s34917_s23 + $0x40f8] sm:$0xff]  }
 0x83f   : > { %31755 = vmatprep.subr.bf16.mxu1 %v34271_v39  ;;  %v34309_v38 = vld [vmem:[%s34917_s23 + $0x4038] sm:$0xff]  }
 0x840   : > { %v34310_v39 = vld [vmem:[%s34917_s23 + $0x40b8] sm:$0xff]  }
 0x841   : > { %31734 = vmatpush3.bf16.msra.mxu0 %v34272_v40  ;;  %v6485_v40 = vcombine.high %v6469_v34, %v6469_v34 }
 0x842   : > { %31763 = vmatprep.subr.bf16.mxu0 %v34274_v45  ;;  %31756 = vmatpush3.bf16.msra.mxu1 %v34273_v42 }
 0x843   : > { %31785 = vmatprep.subr.bf16.mxu1 %v34275_v48 }
 0x844   : > { %v31471_v57 = vpop.f32.mrf.mxu0  ;;  %25789 = vmatmul.mubr.bf16.vlgmr.msra.gmra.mxu0 %v6462_v47  ;;  %v34314_v47 = vld [vmem:[%s34917_s23 + $0x40b0] sm:$0xff]  }
 0x845   : > { %v31493_v61 = vpop.f32.mrf.mxu1  ;;  %31764 = vmatpush3.bf16.msra.mxu0 %v34276_v50  ;;  %25829 = vmatmul.mubr.bf16.vlgmr.msra.gmra.mxu1 %v6484_v54 }
 0x846   : > { %v31472_v62 = vpop.f32.mrf.mxu0  ;;  %31765 = vmatprep.subr.bf16.mxu0 %v34278_v55  ;;  %31786 = vmatpush3.bf16.msra.mxu1 %v34277_v52  ;;  %v34316_v52 = vld [vmem:[%s34917_s23 + $0x40e8] sm:$0xff]  }
 0x847   : > { %v31473_v1 = vadd.f32 %v31472_v62, %v31471_v57  ;;  %v31494_v3 = vpop.f32.mrf.mxu1  ;;  %25868 = vmatprep.mubr.bf16.mxu0 %v6483_v59  ;;  %31787 = vmatprep.subr.bf16.mxu1 %v34279_v58  ;;  %v34317_v55 = vld [vmem:[%s34917_s23 + $0x4028] sm:$0xff]   ;;  %v34320_v62 = vld [vmem:[%s34917_s23 + $0x40e0] sm:$0xff]  }
 0x848   : > { %v31474_v4 = vpop.f32.mrf.mxu0  ;;  %v31495_v7 = vadd.f32 %v31494_v3, %v31493_v61  ;;  %25908 = vmatprep.mubr.bf16.mxu1 %v6487_v0  ;;  %v34318_v58 = vld [vmem:[%s34917_s23 + $0x40a8] sm:$0xff]   ;;  %v34322_v0 = vld [vmem:[%s34917_s23 + $0x40a0] sm:$0xff]   ;;  %v34325_v3 = vld [vmem:[%s34917_s23 + $0x4018] sm:$0xff]  }
 0x849   : > { %v25311_v6 = vadd.f32 %v31473_v1, %v37428_v19  ;;  %v31496_v9 = vpop.f32.mrf.mxu1  ;;  %31766 = vmatpush3.bf16.msra.mxu0 %v34280_v60  ;;  %v34291_v19 = vld [vmem:[%s34917_s23 + $0x3fd8] sm:$0xff]   ;;  %v34319_v60 = vld [vmem:[%s34917_s23 + $0x4060] sm:$0xff]  }
 0x84a   : > { %v31475_v10 = vpop.f32.mrf.mxu0  ;;  %31767 = vmatprep.subr.bf16.mxu0 %v34282_v2  ;;  %31788 = vmatpush3.bf16.msra.mxu1 %v34281_v63  ;;  %v34321_v63 = vld [vmem:[%s34917_s23 + $0x4020] sm:$0xff]   ;;  %v34323_v1 = vld [vmem:[%s34917_s23 + $0x4058] sm:$0xff]   ;;  %v34331_v9 = vld [vmem:[%s34917_s23 + $0x4048] sm:$0xff]  }
 0x84b   : > { %v37472_v12 = vadd.f32 %v31495_v7, %v25311_v6  ;;  %v31497_v14 = vpop.f32.mrf.mxu1  ;;  %31789 = vmatprep.subr.bf16.mxu1 %v34283_v5  ;;  %v34324_v2 = vld [vmem:[%s34917_s23 + $0x40d8] sm:$0xff]   ;;  %v34327_v5 = vld [vmem:[%s34917_s23 + $0x4050] sm:$0xff]   ;;  %v34332_v10 = vld [vmem:[%s34917_s23 + $0x40c8] sm:$0xff]  }
 0x84c   : > { %v34326_v4 = vld [vmem:[%s34917_s23 + $0x4098] sm:$0xff]   ;;  %v34328_v6 = vld [vmem:[%s34917_s23 + $0x40d0] sm:$0xff]   ;;  %v34336_v14 = vld [vmem:[%s34917_s23 + $0x40c0] sm:$0xff]  }
 0x84d   : > { %31768 = vmatpush3.bf16.msra.mxu0 %v34284_v8  ;;  %v34329_v7 = vld [vmem:[%s34917_s23 + $0x4010] sm:$0xff]  }
 0x84e   : > { %31769 = vmatprep.subr.bf16.mxu0 %v34286_v13  ;;  %31790 = vmatpush3.bf16.msra.mxu1 %v34285_v11  ;;  %v34330_v8 = vld [vmem:[%s34917_s23 + $0x4090] sm:$0xff]   ;;  %v34333_v11 = vld [vmem:[%s34917_s23 + $0x4008] sm:$0xff]   ;;  %v34335_v13 = vld [vmem:[%s34917_s23 + $0x4040] sm:$0xff]  }
 0x84f   : > { %31791 = vmatprep.subr.bf16.mxu1 %v34287_v15  ;;  %v34337_v15 = vld [vmem:[%s34917_s23 + $0x4000] sm:$0xff]  }
 0x851   : > { %31770 = vmatpush3.bf16.msra.mxu0 %v34288_v16  ;;  %v265_v16 = vld [vmem:[#allocation2 + $0x100] sm:$0xff] }
 0x852   : > { %31771 = vmatprep.subr.bf16.mxu0 %v34290_v18  ;;  %31792 = vmatpush3.bf16.msra.mxu1 %v34289_v17  ;;  %v6495_v17 = vrot.slane %v265_v16, %v34953_v35  ;;  %v34339_v18 = vld [vmem:[%s34917_s23 + $0x4178] sm:$0xff]  }
 0x853   : > { %31793 = vmatprep.subr.bf16.mxu1 %v34291_v19  ;;  %v6488_v19 = vcombine.high %v265_v16, %v265_v16  ;;  %v34376_v16 = vld [vmem:[%s34917_s23 + $0x4270] sm:$0xff]  }
 0x855   : > { %31772 = vmatpush3.bf16.msra.mxu0 %v34292_v20  ;;  %v34338_v20 = vld [vmem:[%s34917_s23 + $0x4080] sm:$0xff]  }
 0x856   : > { %31773 = vmatprep.subr.bf16.mxu0 %v34294_v22  ;;  %31794 = vmatpush3.bf16.msra.mxu1 %v34293_v21  ;;  %v6503_v21 = vcombine.high %v6495_v17, %v6495_v17  ;;  %v6511_v22 = vrot.slane %v6495_v17, %v34953_v35 }
 0x857   : > { %31795 = vmatprep.subr.bf16.mxu1 %v34295_v23  ;;  %v34340_v23 = vld [vmem:[%s34917_s23 + $0x41f8] sm:$0xff]  }
 0x859   : > { %31774 = vmatpush3.bf16.msra.mxu0 %v34296_v24  ;;  %v37536_v24 = vrot.slane %v6488_v19, %v34953_v35  ;;  %v34378_v19 = vld [vmem:[%s34917_s23 + $0x4230] sm:$0xff]  }
 0x85a   : > { %31775 = vmatprep.subr.bf16.mxu0 %v34298_v26  ;;  %31796 = vmatpush3.bf16.msra.mxu1 %v34297_v25  ;;  %v34341_v25 = vld [vmem:[%s34917_s23 + $0x4138] sm:$0xff]   ;;  %v6525_v26 = vrot.slane %v6503_v21, %v34953_v35 }
 0x85b   : > { %31797 = vmatprep.subr.bf16.mxu1 %v34299_v27  ;;  %v34342_v27 = vld [vmem:[%s34917_s23 + $0x41b8] sm:$0xff]  }
 0x85d   : > { %31776 = vmatpush3.bf16.msra.mxu0 %v34300_v28  ;;  %v6504_v28 = vcombine.high %v37536_v24, %v37536_v24 }
 0x85e   : > { %31777 = vmatprep.subr.bf16.mxu0 %v34302_v30  ;;  %31798 = vmatpush3.bf16.msra.mxu1 %v34301_v29  ;;  %v6533_v29 = vcombine.high %v6511_v22, %v6511_v22  ;;  %v34343_v30 = vld [vmem:[%s34917_s23 + $0x4170] sm:$0xff]  }
 0x85f   : > { %31799 = vmatprep.subr.bf16.mxu1 %v34303_v31  ;;  %v6535_v31 = vcombine.high %v6525_v26, %v6525_v26 }
 0x861   : > { %31778 = vmatpush3.bf16.msra.mxu0 %v34304_v32 }
 0x862   : > { %31807 = vmatprep.subr.bf16.mxu0 %v34307_v36  ;;  %31800 = vmatpush3.bf16.msra.mxu1 %v34305_v33  ;;  %v34344_v33 = vld [vmem:[%s34917_s23 + $0x41f0] sm:$0xff]  }
 0x863   : > { %31829 = vmatprep.subr.bf16.mxu1 %v34308_v37  ;;  %v34345_v36 = vld [vmem:[%s34917_s23 + $0x4130] sm:$0xff]  }
 0x864   : > { %v31515_v42 = vpop.f32.mrf.mxu0  ;;  %25869 = vmatmul.mubr.bf16.vlgmr.msra.gmra.mxu0 %v6469_v34  ;;  %v6532_v34 = vrot.slane %v6504_v28, %v34953_v35 }
 0x865   : > { %v31537_v45 = vpop.f32.mrf.mxu1  ;;  %31808 = vmatpush3.bf16.msra.mxu0 %v34309_v38  ;;  %25909 = vmatmul.mubr.bf16.vlgmr.msra.gmra.mxu1 %v6485_v40 }
 0x866   : > { %v31516_v46 = vpop.f32.mrf.mxu0  ;;  %31809 = vmatprep.subr.bf16.mxu0 %v34311_v41  ;;  %31830 = vmatpush3.bf16.msra.mxu1 %v34310_v39  ;;  %v34346_v39 = vld [vmem:[%s34917_s23 + $0x41b0] sm:$0xff]   ;;  %v6536_v40 = vcombine.high %v6532_v34, %v6532_v34 }
 0x867   : > { %v31517_v48 = vadd.f32 %v31516_v46, %v31515_v42  ;;  %v31538_v50 = vpop.f32.mrf.mxu1  ;;  %31831 = vmatprep.subr.bf16.mxu1 %v34312_v43  ;;  %25948 = vmatprep.mubr.bf16.mxu0 %v6525_v26  ;;  %v34347_v42 = vld [vmem:[%s34917_s23 + $0x4168] sm:$0xff]  }
 0x868   : > { %v31518_v51 = vpop.f32.mrf.mxu0  ;;  %v31539_v54 = vadd.f32 %v31538_v50, %v31537_v45  ;;  %25988 = vmatprep.mubr.bf16.mxu1 %v6535_v31  ;;  %v34348_v45 = vld [vmem:[%s34917_s23 + $0x41e8] sm:$0xff]  }
 0x869   : > { %v25391_v53 = vadd.f32 %v31517_v48, %v37472_v12  ;;  %v31540_v56 = vpop.f32.mrf.mxu1  ;;  %31810 = vmatpush3.bf16.msra.mxu0 %v34313_v44  ;;  %v34334_v12 = vld [vmem:[%s34917_s23 + $0x4088] sm:$0xff]  }
 0x86a   : > { %v31519_v57 = vpop.f32.mrf.mxu0  ;;  %31811 = vmatprep.subr.bf16.mxu0 %v34315_v49  ;;  %31832 = vmatpush3.bf16.msra.mxu1 %v34314_v47  ;;  %v34349_v48 = vld [vmem:[%s34917_s23 + $0x4128] sm:$0xff]   ;;  %v34353_v56 = vld [vmem:[%s34917_s23 + $0x4120] sm:$0xff]  }
 0x86b   : > { %v37509_v59 = vadd.f32 %v31539_v54, %v25391_v53  ;;  %v31541_v61 = vpop.f32.mrf.mxu1  ;;  %31833 = vmatprep.subr.bf16.mxu1 %v34316_v52  ;;  %v34350_v51 = vld [vmem:[%s34917_s23 + $0x41a8] sm:$0xff]   ;;  %v34351_v53 = vld [vmem:[%s34917_s23 + $0x4160] sm:$0xff]  }
 0x86c   : > { %v34354_v57 = vld [vmem:[%s34917_s23 + $0x41a0] sm:$0xff]   ;;  %v34358_v61 = vld [vmem:[%s34917_s23 + $0x4198] sm:$0xff]  }
 0x86d   : > { %31812 = vmatpush3.bf16.msra.mxu0 %v34317_v55  ;;  %v34352_v55 = vld [vmem:[%s34917_s23 + $0x41e0] sm:$0xff]  }
 0x86e   : > { %31813 = vmatprep.subr.bf16.mxu0 %v34319_v60  ;;  %31834 = vmatpush3.bf16.msra.mxu1 %v34318_v58  ;;  %v34355_v58 = vld [vmem:[%s34917_s23 + $0x4158] sm:$0xff]  }
 0x86f   : > { %31835 = vmatprep.subr.bf16.mxu1 %v34320_v62  ;;  %v34357_v60 = vld [vmem:[%s34917_s23 + $0x4118] sm:$0xff]   ;;  %v34359_v62 = vld [vmem:[%s34917_s23 + $0x4150] sm:$0xff]  }
 0x871   : > { %31814 = vmatpush3.bf16.msra.mxu0 %v34321_v63  ;;  %v34360_v63 = vld [vmem:[%s34917_s23 + $0x41d0] sm:$0xff]  }
 0x872   : > { %31815 = vmatprep.subr.bf16.mxu0 %v34323_v1  ;;  %31836 = vmatpush3.bf16.msra.mxu1 %v34322_v0  ;;  %v34361_v0 = vld [vmem:[%s34917_s23 + $0x4110] sm:$0xff]  }
 0x873   : > { %31837 = vmatprep.subr.bf16.mxu1 %v34324_v2  ;;  %v34362_v1 = vld [vmem:[%s34917_s23 + $0x4190] sm:$0xff]   ;;  %v34363_v2 = vld [vmem:[%s34917_s23 + $0x4148] sm:$0xff]  }
 0x875   : > { %31816 = vmatpush3.bf16.msra.mxu0 %v34325_v3  ;;  %v34364_v3 = vld [vmem:[%s34917_s23 + $0x41c8] sm:$0xff]  }
 0x876   : > { %31817 = vmatprep.subr.bf16.mxu0 %v34327_v5  ;;  %31838 = vmatpush3.bf16.msra.mxu1 %v34326_v4  ;;  %v34365_v4 = vld [vmem:[%s34917_s23 + $0x4108] sm:$0xff]  }
 0x877   : > { %31839 = vmatprep.subr.bf16.mxu1 %v34328_v6  ;;  %v34366_v5 = vld [vmem:[%s34917_s23 + $0x4188] sm:$0xff]   ;;  %v34367_v6 = vld [vmem:[%s34917_s23 + $0x4140] sm:$0xff]  }
 0x879   : > { %31818 = vmatpush3.bf16.msra.mxu0 %v34329_v7  ;;  %v34368_v7 = vld [vmem:[%s34917_s23 + $0x41c0] sm:$0xff]  }
 0x87a   : > { %31819 = vmatprep.subr.bf16.mxu0 %v34331_v9  ;;  %31840 = vmatpush3.bf16.msra.mxu1 %v34330_v8  ;;  %v34369_v8 = vld [vmem:[%s34917_s23 + $0x4100] sm:$0xff]  }
 0x87b   : > { %31841 = vmatprep.subr.bf16.mxu1 %v34332_v10  ;;  %v34370_v9 = vld [vmem:[%s34917_s23 + $0x4180] sm:$0xff]   ;;  %v6518_v10 = vrot.slane %v37536_v24, %v34953_v35  ;;  %v34380_v24 = vld [vmem:[%s34917_s23 + $0x4268] sm:$0xff]  }
 0x87d   : > { %31820 = vmatpush3.bf16.msra.mxu0 %v34333_v11  ;;  %v34372_v11 = vld [vmem:[%s34917_s23 + $0x4278] sm:$0xff]  }
 0x87e   : > { %31821 = vmatprep.subr.bf16.mxu0 %v34335_v13  ;;  %31842 = vmatpush3.bf16.msra.mxu1 %v34334_v12  ;;  %v34373_v12 = vld [vmem:[%s34917_s23 + $0x42f8] sm:$0xff]  }
 0x87f   : > { %31843 = vmatprep.subr.bf16.mxu1 %v34336_v14  ;;  %v34374_v13 = vld [vmem:[%s34917_s23 + $0x4238] sm:$0xff]  }
 0x880   : > { %v34375_v14 = vld [vmem:[%s34917_s23 + $0x42b8] sm:$0xff]  }
 0x881   : > { %31822 = vmatpush3.bf16.msra.mxu0 %v34337_v15  ;;  %v6534_v15 = vcombine.high %v6518_v10, %v6518_v10 }
 0x882   : > { %31851 = vmatprep.subr.bf16.mxu0 %v34339_v18  ;;  %31844 = vmatpush3.bf16.msra.mxu1 %v34338_v20  ;;  %v34377_v18 = vld [vmem:[%s34917_s23 + $0x42f0] sm:$0xff]  }
 0x883   : > { %31873 = vmatprep.subr.bf16.mxu1 %v34340_v23 }
 0x884   : > { %v31559_v32 = vpop.f32.mrf.mxu0  ;;  %25949 = vmatmul.mubr.bf16.vlgmr.msra.gmra.mxu0 %v6511_v22  ;;  %v34379_v22 = vld [vmem:[%s34917_s23 + $0x42b0] sm:$0xff]  }
 0x885   : > { %v31581_v37 = vpop.f32.mrf.mxu1  ;;  %31852 = vmatpush3.bf16.msra.mxu0 %v34341_v25  ;;  %25989 = vmatmul.mubr.bf16.vlgmr.msra.gmra.mxu1 %v6533_v29 }
 0x886   : > { %v31560_v38 = vpop.f32.mrf.mxu0  ;;  %31853 = vmatprep.subr.bf16.mxu0 %v34343_v30  ;;  %31874 = vmatpush3.bf16.msra.mxu1 %v34342_v27  ;;  %v34381_v27 = vld [vmem:[%s34917_s23 + $0x42e8] sm:$0xff]  }
 0x887   : > { %v31561_v41 = vadd.f32 %v31560_v38, %v31559_v32  ;;  %v31582_v43 = vpop.f32.mrf.mxu1  ;;  %26028 = vmatprep.mubr.bf16.mxu0 %v6532_v34  ;;  %31875 = vmatprep.subr.bf16.mxu1 %v34344_v33  ;;  %v34382_v30 = vld [vmem:[%s34917_s23 + $0x4228] sm:$0xff]   ;;  %v34385_v38 = vld [vmem:[%s34917_s23 + $0x42e0] sm:$0xff]  }
 0x888   : > { %v31562_v44 = vpop.f32.mrf.mxu0  ;;  %v31583_v47 = vadd.f32 %v31582_v43, %v31581_v37  ;;  %26068 = vmatprep.mubr.bf16.mxu1 %v6536_v40  ;;  %v34383_v33 = vld [vmem:[%s34917_s23 + $0x42a8] sm:$0xff]   ;;  %v34387_v40 = vld [vmem:[%s34917_s23 + $0x42a0] sm:$0xff]   ;;  %v34390_v43 = vld [vmem:[%s34917_s23 + $0x4218] sm:$0xff]  }
 0x889   : > { %v25471_v46 = vadd.f32 %v31561_v41, %v37509_v59  ;;  %v31584_v49 = vpop.f32.mrf.mxu1  ;;  %31854 = vmatpush3.bf16.msra.mxu0 %v34345_v36  ;;  %v34356_v59 = vld [vmem:[%s34917_s23 + $0x41d8] sm:$0xff]   ;;  %v34384_v36 = vld [vmem:[%s34917_s23 + $0x4260] sm:$0xff]  }
 0x88a   : > { %v31563_v50 = vpop.f32.mrf.mxu0  ;;  %31855 = vmatprep.subr.bf16.mxu0 %v34347_v42  ;;  %31876 = vmatpush3.bf16.msra.mxu1 %v34346_v39  ;;  %v34386_v39 = vld [vmem:[%s34917_s23 + $0x4220] sm:$0xff]   ;;  %v34388_v41 = vld [vmem:[%s34917_s23 + $0x4258] sm:$0xff]   ;;  %v34396_v49 = vld [vmem:[%s34917_s23 + $0x4248] sm:$0xff]  }
 0x88b   : > { %v37553_v52 = vadd.f32 %v31583_v47, %v25471_v46  ;;  %v31585_v54 = vpop.f32.mrf.mxu1  ;;  %31877 = vmatprep.subr.bf16.mxu1 %v34348_v45  ;;  %v34389_v42 = vld [vmem:[%s34917_s23 + $0x42d8] sm:$0xff]   ;;  %v34392_v45 = vld [vmem:[%s34917_s23 + $0x4250] sm:$0xff]   ;;  %v34397_v50 = vld [vmem:[%s34917_s23 + $0x42c8] sm:$0xff]  }
 0x88c   : > { %v34391_v44 = vld [vmem:[%s34917_s23 + $0x4298] sm:$0xff]   ;;  %v34393_v46 = vld [vmem:[%s34917_s23 + $0x42d0] sm:$0xff]   ;;  %v34401_v54 = vld [vmem:[%s34917_s23 + $0x42c0] sm:$0xff]  }
 0x88d   : > { %31856 = vmatpush3.bf16.msra.mxu0 %v34349_v48  ;;  %v34394_v47 = vld [vmem:[%s34917_s23 + $0x4210] sm:$0xff]  }
 0x88e   : > { %31857 = vmatprep.subr.bf16.mxu0 %v34351_v53  ;;  %31878 = vmatpush3.bf16.msra.mxu1 %v34350_v51  ;;  %v34395_v48 = vld [vmem:[%s34917_s23 + $0x4290] sm:$0xff]   ;;  %v34398_v51 = vld [vmem:[%s34917_s23 + $0x4208] sm:$0xff]   ;;  %v34400_v53 = vld [vmem:[%s34917_s23 + $0x4240] sm:$0xff]  }
 0x88f   : > { %31879 = vmatprep.subr.bf16.mxu1 %v34352_v55  ;;  %v34402_v55 = vld [vmem:[%s34917_s23 + $0x4200] sm:$0xff]  }
 0x891   : > { %31858 = vmatpush3.bf16.msra.mxu0 %v34353_v56  ;;  %v266_v56 = vld [vmem:[#allocation2 + $0x108] sm:$0xff] }
 0x892   : > { %31859 = vmatprep.subr.bf16.mxu0 %v34355_v58  ;;  %31880 = vmatpush3.bf16.msra.mxu1 %v34354_v57  ;;  %v34403_v57 = vld [vmem:[%s34917_s23 + $0x4280] sm:$0xff]   ;;  %v6544_v58 = vrot.slane %v266_v56, %v34953_v35 }
 0x893   : > { %31881 = vmatprep.subr.bf16.mxu1 %v34356_v59  ;;  %v6537_v59 = vcombine.high %v266_v56, %v266_v56  ;;  %v34441_v56 = vld [vmem:[%s34917_s23 + $0x4470] sm:$0xff]  }
 0x895   : > { %31860 = vmatpush3.bf16.msra.mxu0 %v34357_v60  ;;  %v34404_v60 = vld [vmem:[%s34917_s23 + $0x4378] sm:$0xff]  }
 0x896   : > { %31861 = vmatprep.subr.bf16.mxu0 %v34359_v62  ;;  %31882 = vmatpush3.bf16.msra.mxu1 %v34358_v61  ;;  %v6552_v61 = vcombine.high %v6544_v58, %v6544_v58  ;;  %v6560_v62 = vrot.slane %v6544_v58, %v34953_v35  ;;  %v34442_v58 = vld [vmem:[%s34917_s23 + $0x44f0] sm:$0xff]  }
 0x897   : > { %31883 = vmatprep.subr.bf16.mxu1 %v34360_v63  ;;  %v34405_v63 = vld [vmem:[%s34917_s23 + $0x43f8] sm:$0xff]  }
 0x899   : > { %31862 = vmatpush3.bf16.msra.mxu0 %v34361_v0  ;;  %v37617_v0 = vrot.slane %v6537_v59, %v34953_v35  ;;  %v34443_v59 = vld [vmem:[%s34917_s23 + $0x4430] sm:$0xff]  }
 0x89a   : > { %31863 = vmatprep.subr.bf16.mxu0 %v34363_v2  ;;  %31884 = vmatpush3.bf16.msra.mxu1 %v34362_v1  ;;  %v34406_v1 = vld [vmem:[%s34917_s23 + $0x4338] sm:$0xff]   ;;  %v6574_v2 = vrot.slane %v6552_v61, %v34953_v35 }
 0x89b   : > { %31885 = vmatprep.subr.bf16.mxu1 %v34364_v3  ;;  %v34407_v3 = vld [vmem:[%s34917_s23 + $0x43b8] sm:$0xff]  }
 0x89d   : > { %31864 = vmatpush3.bf16.msra.mxu0 %v34365_v4  ;;  %v6553_v4 = vcombine.high %v37617_v0, %v37617_v0 }
 0x89e   : > { %31865 = vmatprep.subr.bf16.mxu0 %v34367_v6  ;;  %31886 = vmatpush3.bf16.msra.mxu1 %v34366_v5  ;;  %v6582_v5 = vcombine.high %v6560_v62, %v6560_v62  ;;  %v34408_v6 = vld [vmem:[%s34917_s23 + $0x4370] sm:$0xff]  }
 0x89f   : > { %31887 = vmatprep.subr.bf16.mxu1 %v34368_v7  ;;  %v6584_v7 = vcombine.high %v6574_v2, %v6574_v2 }
 0x8a1   : > { %31866 = vmatpush3.bf16.msra.mxu0 %v34369_v8 }
 0x8a2   : > { %31895 = vmatprep.subr.bf16.mxu0 %v34372_v11  ;;  %31888 = vmatpush3.bf16.msra.mxu1 %v34370_v9  ;;  %v34409_v9 = vld [vmem:[%s34917_s23 + $0x43f0] sm:$0xff]  }
 0x8a3   : > { %31917 = vmatprep.subr.bf16.mxu1 %v34373_v12  ;;  %v34410_v11 = vld [vmem:[%s34917_s23 + $0x4330] sm:$0xff]  }
 0x8a4   : > { %v31603_v17 = vpop.f32.mrf.mxu0  ;;  %26029 = vmatmul.mubr.bf16.vlgmr.msra.gmra.mxu0 %v6518_v10  ;;  %v6581_v10 = vrot.slane %v6553_v4, %v34953_v35 }
 0x8a5   : > { %v31625_v20 = vpop.f32.mrf.mxu1  ;;  %31896 = vmatpush3.bf16.msra.mxu0 %v34374_v13  ;;  %26069 = vmatmul.mubr.bf16.vlgmr.msra.gmra.mxu1 %v6534_v15 }
 0x8a6   : > { %v31604_v21 = vpop.f32.mrf.mxu0  ;;  %31897 = vmatprep.subr.bf16.mxu0 %v34376_v16  ;;  %31918 = vmatpush3.bf16.msra.mxu1 %v34375_v14  ;;  %v34411_v14 = vld [vmem:[%s34917_s23 + $0x43b0] sm:$0xff]   ;;  %v6585_v15 = vcombine.high %v6581_v10, %v6581_v10 }
 0x8a7   : > { %v31605_v23 = vadd.f32 %v31604_v21, %v31603_v17  ;;  %v31626_v25 = vpop.f32.mrf.mxu1  ;;  %31919 = vmatprep.subr.bf16.mxu1 %v34377_v18  ;;  %26108 = vmatprep.mubr.bf16.mxu0 %v6574_v2  ;;  %v34412_v17 = vld [vmem:[%s34917_s23 + $0x4368] sm:$0xff]  }
 0x8a8   : > { %v31606_v26 = vpop.f32.mrf.mxu0  ;;  %v31627_v29 = vadd.f32 %v31626_v25, %v31625_v20  ;;  %26148 = vmatprep.mubr.bf16.mxu1 %v6584_v7  ;;  %v34413_v20 = vld [vmem:[%s34917_s23 + $0x43e8] sm:$0xff]  }
 0x8a9   : > { %v25551_v28 = vadd.f32 %v31605_v23, %v37553_v52  ;;  %v31628_v31 = vpop.f32.mrf.mxu1  ;;  %31898 = vmatpush3.bf16.msra.mxu0 %v34378_v19  ;;  %v34399_v52 = vld [vmem:[%s34917_s23 + $0x4288] sm:$0xff]  }
 0x8aa   : > { %v31607_v32 = vpop.f32.mrf.mxu0  ;;  %31899 = vmatprep.subr.bf16.mxu0 %v34380_v24  ;;  %31920 = vmatpush3.bf16.msra.mxu1 %v34379_v22  ;;  %v34414_v23 = vld [vmem:[%s34917_s23 + $0x4328] sm:$0xff]   ;;  %v34418_v31 = vld [vmem:[%s34917_s23 + $0x4320] sm:$0xff]  }
 0x8ab   : > { %v37590_v34 = vadd.f32 %v31627_v29, %v25551_v28  ;;  %v31629_v37 = vpop.f32.mrf.mxu1  ;;  %31921 = vmatprep.subr.bf16.mxu1 %v34381_v27  ;;  %v34415_v26 = vld [vmem:[%s34917_s23 + $0x43a8] sm:$0xff]   ;;  %v34416_v28 = vld [vmem:[%s34917_s23 + $0x4360] sm:$0xff]  }
 0x8ac   : > { %v34419_v32 = vld [vmem:[%s34917_s23 + $0x43a0] sm:$0xff]   ;;  %v34423_v37 = vld [vmem:[%s34917_s23 + $0x4398] sm:$0xff]  }
 0x8ad   : > { %31900 = vmatpush3.bf16.msra.mxu0 %v34382_v30  ;;  %v34417_v30 = vld [vmem:[%s34917_s23 + $0x43e0] sm:$0xff]  }
 0x8ae   : > { %31901 = vmatprep.subr.bf16.mxu0 %v34384_v36  ;;  %31922 = vmatpush3.bf16.msra.mxu1 %v34383_v33  ;;  %v34420_v33 = vld [vmem:[%s34917_s23 + $0x4358] sm:$0xff]  }
 0x8af   : > { %31923 = vmatprep.subr.bf16.mxu1 %v34385_v38  ;;  %v34422_v36 = vld [vmem:[%s34917_s23 + $0x4318] sm:$0xff]   ;;  %v34424_v38 = vld [vmem:[%s34917_s23 + $0x4350] sm:$0xff]  }
 0x8b1   : > { %31902 = vmatpush3.bf16.msra.mxu0 %v34386_v39  ;;  %v34425_v39 = vld [vmem:[%s34917_s23 + $0x43d0] sm:$0xff]  }
 0x8b2   : > { %31903 = vmatprep.subr.bf16.mxu0 %v34388_v41  ;;  %31924 = vmatpush3.bf16.msra.mxu1 %v34387_v40  ;;  %v34426_v40 = vld [vmem:[%s34917_s23 + $0x4310] sm:$0xff]  }
 0x8b3   : > { %31925 = vmatprep.subr.bf16.mxu1 %v34389_v42  ;;  %v34427_v41 = vld [vmem:[%s34917_s23 + $0x4390] sm:$0xff]   ;;  %v34428_v42 = vld [vmem:[%s34917_s23 + $0x4348] sm:$0xff]  }
 0x8b5   : > { %31904 = vmatpush3.bf16.msra.mxu0 %v34390_v43  ;;  %v34429_v43 = vld [vmem:[%s34917_s23 + $0x43c8] sm:$0xff]  }
 0x8b6   : > { %31905 = vmatprep.subr.bf16.mxu0 %v34392_v45  ;;  %31926 = vmatpush3.bf16.msra.mxu1 %v34391_v44  ;;  %v34430_v44 = vld [vmem:[%s34917_s23 + $0x4308] sm:$0xff]  }
 0x8b7   : > { %31927 = vmatprep.subr.bf16.mxu1 %v34393_v46  ;;  %v34431_v45 = vld [vmem:[%s34917_s23 + $0x4388] sm:$0xff]   ;;  %v34432_v46 = vld [vmem:[%s34917_s23 + $0x4340] sm:$0xff]  }
 0x8b9   : > { %31906 = vmatpush3.bf16.msra.mxu0 %v34394_v47  ;;  %v34433_v47 = vld [vmem:[%s34917_s23 + $0x43c0] sm:$0xff]  }
 0x8ba   : > { %31907 = vmatprep.subr.bf16.mxu0 %v34396_v49  ;;  %31928 = vmatpush3.bf16.msra.mxu1 %v34395_v48  ;;  %v34434_v48 = vld [vmem:[%s34917_s23 + $0x4300] sm:$0xff]  }
 0x8bb   : > { %31929 = vmatprep.subr.bf16.mxu1 %v34397_v50  ;;  %v34435_v49 = vld [vmem:[%s34917_s23 + $0x4380] sm:$0xff]   ;;  %v6567_v50 = vrot.slane %v37617_v0, %v34953_v35  ;;  %v34445_v0 = vld [vmem:[%s34917_s23 + $0x4468] sm:$0xff]  }
 0x8bd   : > { %31908 = vmatpush3.bf16.msra.mxu0 %v34398_v51  ;;  %v34437_v51 = vld [vmem:[%s34917_s23 + $0x4478] sm:$0xff]  }
 0x8be   : > { %31909 = vmatprep.subr.bf16.mxu0 %v34400_v53  ;;  %31930 = vmatpush3.bf16.msra.mxu1 %v34399_v52  ;;  %v34438_v52 = vld [vmem:[%s34917_s23 + $0x44f8] sm:$0xff]  }
 0x8bf   : > { %31931 = vmatprep.subr.bf16.mxu1 %v34401_v54  ;;  %v34439_v53 = vld [vmem:[%s34917_s23 + $0x4438] sm:$0xff]  }
 0x8c0   : > { %v34440_v54 = vld [vmem:[%s34917_s23 + $0x44b8] sm:$0xff]  }
 0x8c1   : > { %31910 = vmatpush3.bf16.msra.mxu0 %v34402_v55  ;;  %v6583_v55 = vcombine.high %v6567_v50, %v6567_v50 }
 0x8c2   : > { %31939 = vmatprep.subr.bf16.mxu0 %v34404_v60  ;;  %31932 = vmatpush3.bf16.msra.mxu1 %v34403_v57 }
 0x8c3   : > { %31961 = vmatprep.subr.bf16.mxu1 %v34405_v63 }
 0x8c4   : > { %v31647_v8 = vpop.f32.mrf.mxu0  ;;  %26109 = vmatmul.mubr.bf16.vlgmr.msra.gmra.mxu0 %v6560_v62  ;;  %v34444_v62 = vld [vmem:[%s34917_s23 + $0x44b0] sm:$0xff]  }
 0x8c5   : > { %v31669_v12 = vpop.f32.mrf.mxu1  ;;  %31940 = vmatpush3.bf16.msra.mxu0 %v34406_v1  ;;  %26149 = vmatmul.mubr.bf16.vlgmr.msra.gmra.mxu1 %v6582_v5 }
 0x8c6   : > { %v31648_v13 = vpop.f32.mrf.mxu0  ;;  %31941 = vmatprep.subr.bf16.mxu0 %v34408_v6  ;;  %31962 = vmatpush3.bf16.msra.mxu1 %v34407_v3  ;;  %v34446_v3 = vld [vmem:[%s34917_s23 + $0x44e8] sm:$0xff]  }
 0x8c7   : > { %v31649_v16 = vadd.f32 %v31648_v13, %v31647_v8  ;;  %v31670_v18 = vpop.f32.mrf.mxu1  ;;  %26188 = vmatprep.mubr.bf16.mxu0 %v6581_v10  ;;  %31963 = vmatprep.subr.bf16.mxu1 %v34409_v9  ;;  %v34447_v6 = vld [vmem:[%s34917_s23 + $0x4428] sm:$0xff]   ;;  %v34450_v13 = vld [vmem:[%s34917_s23 + $0x44e0] sm:$0xff]  }
 0x8c8   : > { %v31650_v19 = vpop.f32.mrf.mxu0  ;;  %v31671_v22 = vadd.f32 %v31670_v18, %v31669_v12  ;;  %26228 = vmatprep.mubr.bf16.mxu1 %v6585_v15  ;;  %v34448_v9 = vld [vmem:[%s34917_s23 + $0x44a8] sm:$0xff]   ;;  %v34452_v15 = vld [vmem:[%s34917_s23 + $0x44a0] sm:$0xff]   ;;  %v34455_v18 = vld [vmem:[%s34917_s23 + $0x4418] sm:$0xff]  }
 0x8c9   : > { %v25631_v21 = vadd.f32 %v31649_v16, %v37590_v34  ;;  %v31672_v24 = vpop.f32.mrf.mxu1  ;;  %31942 = vmatpush3.bf16.msra.mxu0 %v34410_v11  ;;  %v34421_v34 = vld [vmem:[%s34917_s23 + $0x43d8] sm:$0xff]   ;;  %v34449_v11 = vld [vmem:[%s34917_s23 + $0x4460] sm:$0xff]  }
 0x8ca   : > { %v31651_v25 = vpop.f32.mrf.mxu0  ;;  %31943 = vmatprep.subr.bf16.mxu0 %v34412_v17  ;;  %31964 = vmatpush3.bf16.msra.mxu1 %v34411_v14  ;;  %v34451_v14 = vld [vmem:[%s34917_s23 + $0x4420] sm:$0xff]   ;;  %v34453_v16 = vld [vmem:[%s34917_s23 + $0x4458] sm:$0xff]   ;;  %v34461_v24 = vld [vmem:[%s34917_s23 + $0x4448] sm:$0xff]  }
 0x8cb   : > { %v37634_v27 = vadd.f32 %v31671_v22, %v25631_v21  ;;  %v31673_v29 = vpop.f32.mrf.mxu1  ;;  %31965 = vmatprep.subr.bf16.mxu1 %v34413_v20  ;;  %v34454_v17 = vld [vmem:[%s34917_s23 + $0x44d8] sm:$0xff]   ;;  %v34457_v20 = vld [vmem:[%s34917_s23 + $0x4450] sm:$0xff]   ;;  %v34462_v25 = vld [vmem:[%s34917_s23 + $0x44c8] sm:$0xff]  }
 0x8cc   : > { %v34456_v19 = vld [vmem:[%s34917_s23 + $0x4498] sm:$0xff]   ;;  %v34458_v21 = vld [vmem:[%s34917_s23 + $0x44d0] sm:$0xff]   ;;  %v34466_v29 = vld [vmem:[%s34917_s23 + $0x44c0] sm:$0xff]  }
 0x8cd   : > { %31944 = vmatpush3.bf16.msra.mxu0 %v34414_v23  ;;  %v34459_v22 = vld [vmem:[%s34917_s23 + $0x4410] sm:$0xff]  }
 0x8ce   : > { %31945 = vmatprep.subr.bf16.mxu0 %v34416_v28  ;;  %31966 = vmatpush3.bf16.msra.mxu1 %v34415_v26  ;;  %v34460_v23 = vld [vmem:[%s34917_s23 + $0x4490] sm:$0xff]   ;;  %v34463_v26 = vld [vmem:[%s34917_s23 + $0x4408] sm:$0xff]   ;;  %v34465_v28 = vld [vmem:[%s34917_s23 + $0x4440] sm:$0xff]  }
 0x8cf   : > { %31967 = vmatprep.subr.bf16.mxu1 %v34417_v30  ;;  %v34467_v30 = vld [vmem:[%s34917_s23 + $0x4400] sm:$0xff]  }
 0x8d1   : > { %31946 = vmatpush3.bf16.msra.mxu0 %v34418_v31  ;;  %v267_v31 = vld [vmem:[#allocation2 + $0x110] sm:$0xff] }
 0x8d2   : > { %31947 = vmatprep.subr.bf16.mxu0 %v34420_v33  ;;  %31968 = vmatpush3.bf16.msra.mxu1 %v34419_v32  ;;  %v34468_v32 = vld [vmem:[%s34917_s23 + $0x4480] sm:$0xff]   ;;  %v6593_v33 = vrot.slane %v267_v31, %v34953_v35 }
 0x8d3   : > { %31969 = vmatprep.subr.bf16.mxu1 %v34421_v34  ;;  %v6586_v34 = vcombine.high %v267_v31, %v267_v31  ;;  %v34506_v31 = vld [vmem:[%s34917_s23 + $0x4670] sm:$0xff]  }
 0x8d5   : > { %31948 = vmatpush3.bf16.msra.mxu0 %v34422_v36  ;;  %v34469_v36 = vld [vmem:[%s34917_s23 + $0x4578] sm:$0xff]  }
 0x8d6   : > { %31949 = vmatprep.subr.bf16.mxu0 %v34424_v38  ;;  %31970 = vmatpush3.bf16.msra.mxu1 %v34423_v37  ;;  %v6601_v37 = vcombine.high %v6593_v33, %v6593_v33  ;;  %v6609_v38 = vrot.slane %v6593_v33, %v34953_v35  ;;  %v34507_v33 = vld [vmem:[%s34917_s23 + $0x46f0] sm:$0xff]  }
 0x8d7   : > { %31971 = vmatprep.subr.bf16.mxu1 %v34425_v39  ;;  %v34470_v39 = vld [vmem:[%s34917_s23 + $0x45f8] sm:$0xff]  }
 0x8d9   : > { %31950 = vmatpush3.bf16.msra.mxu0 %v34426_v40  ;;  %v37698_v40 = vrot.slane %v6586_v34, %v34953_v35  ;;  %v34508_v34 = vld [vmem:[%s34917_s23 + $0x4630] sm:$0xff]  }
 0x8da   : > { %31951 = vmatprep.subr.bf16.mxu0 %v34428_v42  ;;  %31972 = vmatpush3.bf16.msra.mxu1 %v34427_v41  ;;  %v34471_v41 = vld [vmem:[%s34917_s23 + $0x4538] sm:$0xff]   ;;  %v6623_v42 = vrot.slane %v6601_v37, %v34953_v35 }
 0x8db   : > { %31973 = vmatprep.subr.bf16.mxu1 %v34429_v43  ;;  %v34472_v43 = vld [vmem:[%s34917_s23 + $0x45b8] sm:$0xff]  }
 0x8dd   : > { %31952 = vmatpush3.bf16.msra.mxu0 %v34430_v44  ;;  %v6602_v44 = vcombine.high %v37698_v40, %v37698_v40 }
 0x8de   : > { %31953 = vmatprep.subr.bf16.mxu0 %v34432_v46  ;;  %31974 = vmatpush3.bf16.msra.mxu1 %v34431_v45  ;;  %v6631_v45 = vcombine.high %v6609_v38, %v6609_v38  ;;  %v34473_v46 = vld [vmem:[%s34917_s23 + $0x4570] sm:$0xff]  }
 0x8df   : > { %31975 = vmatprep.subr.bf16.mxu1 %v34433_v47  ;;  %v6633_v47 = vcombine.high %v6623_v42, %v6623_v42 }
 0x8e1   : > { %31954 = vmatpush3.bf16.msra.mxu0 %v34434_v48 }
 0x8e2   : > { %31983 = vmatprep.subr.bf16.mxu0 %v34437_v51  ;;  %31976 = vmatpush3.bf16.msra.mxu1 %v34435_v49  ;;  %v34474_v49 = vld [vmem:[%s34917_s23 + $0x45f0] sm:$0xff]  }
 0x8e3   : > { %32005 = vmatprep.subr.bf16.mxu1 %v34438_v52  ;;  %v34475_v51 = vld [vmem:[%s34917_s23 + $0x4530] sm:$0xff]  }
 0x8e4   : > { %v31691_v57 = vpop.f32.mrf.mxu0  ;;  %26189 = vmatmul.mubr.bf16.vlgmr.msra.gmra.mxu0 %v6567_v50  ;;  %v6630_v50 = vrot.slane %v6602_v44, %v34953_v35 }
 0x8e5   : > { %v31713_v60 = vpop.f32.mrf.mxu1  ;;  %31984 = vmatpush3.bf16.msra.mxu0 %v34439_v53  ;;  %26229 = vmatmul.mubr.bf16.vlgmr.msra.gmra.mxu1 %v6583_v55 }
 0x8e6   : > { %v31692_v61 = vpop.f32.mrf.mxu0  ;;  %31985 = vmatprep.subr.bf16.mxu0 %v34441_v56  ;;  %32006 = vmatpush3.bf16.msra.mxu1 %v34440_v54  ;;  %v34476_v54 = vld [vmem:[%s34917_s23 + $0x45b0] sm:$0xff]   ;;  %v6634_v55 = vcombine.high %v6630_v50, %v6630_v50 }
 0x8e7   : > { %v31693_v63 = vadd.f32 %v31692_v61, %v31691_v57  ;;  %v31714_v1 = vpop.f32.mrf.mxu1  ;;  %32007 = vmatprep.subr.bf16.mxu1 %v34442_v58  ;;  %26268 = vmatprep.mubr.bf16.mxu0 %v6623_v42  ;;  %v34477_v57 = vld [vmem:[%s34917_s23 + $0x4568] sm:$0xff]  }
 0x8e8   : > { %v31694_v2 = vpop.f32.mrf.mxu0  ;;  %v31715_v5 = vadd.f32 %v31714_v1, %v31713_v60  ;;  %26308 = vmatprep.mubr.bf16.mxu1 %v6633_v47  ;;  %v34478_v60 = vld [vmem:[%s34917_s23 + $0x45e8] sm:$0xff]  }
 0x8e9   : > { %v25711_v4 = vadd.f32 %v31693_v63, %v37634_v27  ;;  %v31716_v7 = vpop.f32.mrf.mxu1  ;;  %31986 = vmatpush3.bf16.msra.mxu0 %v34443_v59  ;;  %v34464_v27 = vld [vmem:[%s34917_s23 + $0x4488] sm:$0xff]  }
 0x8ea   : > { %v31695_v8 = vpop.f32.mrf.mxu0  ;;  %31987 = vmatprep.subr.bf16.mxu0 %v34445_v0  ;;  %32008 = vmatpush3.bf16.msra.mxu1 %v34444_v62  ;;  %v34479_v63 = vld [vmem:[%s34917_s23 + $0x4528] sm:$0xff]   ;;  %v34483_v7 = vld [vmem:[%s34917_s23 + $0x4520] sm:$0xff]  }
 0x8eb   : > { %v37671_v10 = vadd.f32 %v31715_v5, %v25711_v4  ;;  %v31717_v12 = vpop.f32.mrf.mxu1  ;;  %32009 = vmatprep.subr.bf16.mxu1 %v34446_v3  ;;  %v34480_v2 = vld [vmem:[%s34917_s23 + $0x45a8] sm:$0xff]   ;;  %v34481_v4 = vld [vmem:[%s34917_s23 + $0x4560] sm:$0xff]  }
 0x8ec   : > { %v34484_v8 = vld [vmem:[%s34917_s23 + $0x45a0] sm:$0xff]   ;;  %v34488_v12 = vld [vmem:[%s34917_s23 + $0x4598] sm:$0xff]  }
 0x8ed   : > { %31988 = vmatpush3.bf16.msra.mxu0 %v34447_v6  ;;  %v34482_v6 = vld [vmem:[%s34917_s23 + $0x45e0] sm:$0xff]  }
 0x8ee   : > { %31989 = vmatprep.subr.bf16.mxu0 %v34449_v11  ;;  %32010 = vmatpush3.bf16.msra.mxu1 %v34448_v9  ;;  %v34485_v9 = vld [vmem:[%s34917_s23 + $0x4558] sm:$0xff]  }
 0x8ef   : > { %32011 = vmatprep.subr.bf16.mxu1 %v34450_v13  ;;  %v34487_v11 = vld [vmem:[%s34917_s23 + $0x4518] sm:$0xff]   ;;  %v34489_v13 = vld [vmem:[%s34917_s23 + $0x4550] sm:$0xff]  }
 0x8f1   : > { %31990 = vmatpush3.bf16.msra.mxu0 %v34451_v14  ;;  %v34490_v14 = vld [vmem:[%s34917_s23 + $0x45d0] sm:$0xff]  }
 0x8f2   : > { %31991 = vmatprep.subr.bf16.mxu0 %v34453_v16  ;;  %32012 = vmatpush3.bf16.msra.mxu1 %v34452_v15  ;;  %v34491_v15 = vld [vmem:[%s34917_s23 + $0x4510] sm:$0xff]  }
 0x8f3   : > { %32013 = vmatprep.subr.bf16.mxu1 %v34454_v17  ;;  %v34492_v16 = vld [vmem:[%s34917_s23 + $0x4590] sm:$0xff]   ;;  %v34493_v17 = vld [vmem:[%s34917_s23 + $0x4548] sm:$0xff]  }
 0x8f5   : > { %31992 = vmatpush3.bf16.msra.mxu0 %v34455_v18  ;;  %v34494_v18 = vld [vmem:[%s34917_s23 + $0x45c8] sm:$0xff]  }
 0x8f6   : > { %31993 = vmatprep.subr.bf16.mxu0 %v34457_v20  ;;  %32014 = vmatpush3.bf16.msra.mxu1 %v34456_v19  ;;  %v34495_v19 = vld [vmem:[%s34917_s23 + $0x4508] sm:$0xff]  }
 0x8f7   : > { %32015 = vmatprep.subr.bf16.mxu1 %v34458_v21  ;;  %v34496_v20 = vld [vmem:[%s34917_s23 + $0x4588] sm:$0xff]   ;;  %v34497_v21 = vld [vmem:[%s34917_s23 + $0x4540] sm:$0xff]  }
 0x8f9   : > { %31994 = vmatpush3.bf16.msra.mxu0 %v34459_v22  ;;  %v34498_v22 = vld [vmem:[%s34917_s23 + $0x45c0] sm:$0xff]  }
 0x8fa   : > { %31995 = vmatprep.subr.bf16.mxu0 %v34461_v24  ;;  %32016 = vmatpush3.bf16.msra.mxu1 %v34460_v23  ;;  %v34499_v23 = vld [vmem:[%s34917_s23 + $0x4500] sm:$0xff]  }
 0x8fb   : > { %32017 = vmatprep.subr.bf16.mxu1 %v34462_v25  ;;  %v34500_v24 = vld [vmem:[%s34917_s23 + $0x4580] sm:$0xff]   ;;  %v6616_v25 = vrot.slane %v37698_v40, %v34953_v35  ;;  %v34510_v40 = vld [vmem:[%s34917_s23 + $0x4668] sm:$0xff]  }
 0x8fd   : > { %31996 = vmatpush3.bf16.msra.mxu0 %v34463_v26  ;;  %v34502_v26 = vld [vmem:[%s34917_s23 + $0x4678] sm:$0xff]  }
 0x8fe   : > { %31997 = vmatprep.subr.bf16.mxu0 %v34465_v28  ;;  %32018 = vmatpush3.bf16.msra.mxu1 %v34464_v27  ;;  %v34503_v27 = vld [vmem:[%s34917_s23 + $0x46f8] sm:$0xff]  }
 0x8ff   : > { %32019 = vmatprep.subr.bf16.mxu1 %v34466_v29  ;;  %v34504_v28 = vld [vmem:[%s34917_s23 + $0x4638] sm:$0xff]  }
 0x900   : > { %v34505_v29 = vld [vmem:[%s34917_s23 + $0x46b8] sm:$0xff]  }
 0x901   : > { %31998 = vmatpush3.bf16.msra.mxu0 %v34467_v30  ;;  %v6632_v30 = vcombine.high %v6616_v25, %v6616_v25 }
 0x902   : > { %32027 = vmatprep.subr.bf16.mxu0 %v34469_v36  ;;  %32020 = vmatpush3.bf16.msra.mxu1 %v34468_v32 }
 0x903   : > { %32049 = vmatprep.subr.bf16.mxu1 %v34470_v39 }
 0x904   : > { %v31735_v48 = vpop.f32.mrf.mxu0  ;;  %26269 = vmatmul.mubr.bf16.vlgmr.msra.gmra.mxu0 %v6609_v38  ;;  %v34509_v38 = vld [vmem:[%s34917_s23 + $0x46b0] sm:$0xff]  }
 0x905   : > { %v31757_v52 = vpop.f32.mrf.mxu1  ;;  %32028 = vmatpush3.bf16.msra.mxu0 %v34471_v41  ;;  %26309 = vmatmul.mubr.bf16.vlgmr.msra.gmra.mxu1 %v6631_v45 }
 0x906   : > { %v31736_v53 = vpop.f32.mrf.mxu0  ;;  %32029 = vmatprep.subr.bf16.mxu0 %v34473_v46  ;;  %32050 = vmatpush3.bf16.msra.mxu1 %v34472_v43  ;;  %v34511_v43 = vld [vmem:[%s34917_s23 + $0x46e8] sm:$0xff]  }
 0x907   : > { %v31737_v56 = vadd.f32 %v31736_v53, %v31735_v48  ;;  %v31758_v58 = vpop.f32.mrf.mxu1  ;;  %26348 = vmatprep.mubr.bf16.mxu0 %v6630_v50  ;;  %32051 = vmatprep.subr.bf16.mxu1 %v34474_v49  ;;  %v34512_v46 = vld [vmem:[%s34917_s23 + $0x4628] sm:$0xff]   ;;  %v34515_v53 = vld [vmem:[%s34917_s23 + $0x46e0] sm:$0xff]  }
 0x908   : > { %v31738_v59 = vpop.f32.mrf.mxu0  ;;  %v31759_v62 = vadd.f32 %v31758_v58, %v31757_v52  ;;  %26388 = vmatprep.mubr.bf16.mxu1 %v6634_v55  ;;  %v34513_v49 = vld [vmem:[%s34917_s23 + $0x46a8] sm:$0xff]   ;;  %v34517_v55 = vld [vmem:[%s34917_s23 + $0x46a0] sm:$0xff]   ;;  %v34520_v58 = vld [vmem:[%s34917_s23 + $0x4618] sm:$0xff]  }
 0x909   : > { %v25791_v61 = vadd.f32 %v31737_v56, %v37671_v10  ;;  %v31760_v0 = vpop.f32.mrf.mxu1  ;;  %32030 = vmatpush3.bf16.msra.mxu0 %v34475_v51  ;;  %v34486_v10 = vld [vmem:[%s34917_s23 + $0x45d8] sm:$0xff]   ;;  %v34514_v51 = vld [vmem:[%s34917_s23 + $0x4660] sm:$0xff]  }
 0x90a   : > { %v31739_v1 = vpop.f32.mrf.mxu0  ;;  %32031 = vmatprep.subr.bf16.mxu0 %v34477_v57  ;;  %32052 = vmatpush3.bf16.msra.mxu1 %v34476_v54  ;;  %v34516_v54 = vld [vmem:[%s34917_s23 + $0x4620] sm:$0xff]   ;;  %v34518_v56 = vld [vmem:[%s34917_s23 + $0x4658] sm:$0xff]   ;;  %v34526_v0 = vld [vmem:[%s34917_s23 + $0x4648] sm:$0xff]  }
 0x90b   : > { %v37715_v3 = vadd.f32 %v31759_v62, %v25791_v61  ;;  %v31761_v5 = vpop.f32.mrf.mxu1  ;;  %32053 = vmatprep.subr.bf16.mxu1 %v34478_v60  ;;  %v34519_v57 = vld [vmem:[%s34917_s23 + $0x46d8] sm:$0xff]   ;;  %v34522_v60 = vld [vmem:[%s34917_s23 + $0x4650] sm:$0xff]   ;;  %v34527_v1 = vld [vmem:[%s34917_s23 + $0x46c8] sm:$0xff]  }
 0x90c   : > { %v34521_v59 = vld [vmem:[%s34917_s23 + $0x4698] sm:$0xff]   ;;  %v34523_v61 = vld [vmem:[%s34917_s23 + $0x46d0] sm:$0xff]   ;;  %v34531_v5 = vld [vmem:[%s34917_s23 + $0x46c0] sm:$0xff]  }
 0x90d   : > { %32032 = vmatpush3.bf16.msra.mxu0 %v34479_v63  ;;  %v34524_v62 = vld [vmem:[%s34917_s23 + $0x4610] sm:$0xff]  }
 0x90e   : > { %32033 = vmatprep.subr.bf16.mxu0 %v34481_v4  ;;  %32054 = vmatpush3.bf16.msra.mxu1 %v34480_v2  ;;  %v34525_v63 = vld [vmem:[%s34917_s23 + $0x4690] sm:$0xff]   ;;  %v34528_v2 = vld [vmem:[%s34917_s23 + $0x4608] sm:$0xff]   ;;  %v34530_v4 = vld [vmem:[%s34917_s23 + $0x4640] sm:$0xff]  }
 0x90f   : > { %32055 = vmatprep.subr.bf16.mxu1 %v34482_v6  ;;  %v34532_v6 = vld [vmem:[%s34917_s23 + $0x4600] sm:$0xff]  }
 0x911   : > { %32034 = vmatpush3.bf16.msra.mxu0 %v34483_v7  ;;  %v268_v7 = vld [vmem:[#allocation2 + $0x118] sm:$0xff] }
 0x912   : > { %32035 = vmatprep.subr.bf16.mxu0 %v34485_v9  ;;  %32056 = vmatpush3.bf16.msra.mxu1 %v34484_v8  ;;  %v6642_v8 = vrot.slane %v268_v7, %v34953_v35  ;;  %v34534_v9 = vld [vmem:[%s34917_s23 + $0x4778] sm:$0xff]  }
 0x913   : > { %32057 = vmatprep.subr.bf16.mxu1 %v34486_v10  ;;  %v6635_v10 = vcombine.high %v268_v7, %v268_v7 }
 0x915   : > { %32036 = vmatpush3.bf16.msra.mxu0 %v34487_v11  ;;  %v34533_v11 = vld [vmem:[%s34917_s23 + $0x4680] sm:$0xff]  }
 0x916   : > { %32037 = vmatprep.subr.bf16.mxu0 %v34489_v13  ;;  %32058 = vmatpush3.bf16.msra.mxu1 %v34488_v12  ;;  %v6650_v12 = vcombine.high %v6642_v8, %v6642_v8  ;;  %v6658_v13 = vrot.slane %v6642_v8, %v34953_v35 }
 0x917   : > { %32059 = vmatprep.subr.bf16.mxu1 %v34490_v14  ;;  %v34535_v14 = vld [vmem:[%s34917_s23 + $0x47f8] sm:$0xff]  }
 0x919   : > { %32038 = vmatpush3.bf16.msra.mxu0 %v34491_v15  ;;  %v37779_v15 = vrot.slane %v6635_v10, %v34953_v35 }
 0x91a   : > { %32039 = vmatprep.subr.bf16.mxu0 %v34493_v17  ;;  %32060 = vmatpush3.bf16.msra.mxu1 %v34492_v16  ;;  %v6672_v16 = vrot.slane %v6650_v12, %v34953_v35  ;;  %v34536_v17 = vld [vmem:[%s34917_s23 + $0x4738] sm:$0xff]  }
 0x91b   : > { %32061 = vmatprep.subr.bf16.mxu1 %v34494_v18  ;;  %v6651_v18 = vcombine.high %v37779_v15, %v37779_v15 }
 0x91d   : > { %32040 = vmatpush3.bf16.msra.mxu0 %v34495_v19  ;;  %v6680_v19 = vcombine.high %v6658_v13, %v6658_v13 }
 0x91e   : > { %32041 = vmatprep.subr.bf16.mxu0 %v34497_v21  ;;  %32062 = vmatpush3.bf16.msra.mxu1 %v34496_v20  ;;  %v34538_v20 = vld [vmem:[%s34917_s23 + $0x4770] sm:$0xff]   ;;  %v6682_v21 = vcombine.high %v6672_v16, %v6672_v16 }
 0x91f   : > { %32063 = vmatprep.subr.bf16.mxu1 %v34498_v22 }
 0x921   : > { %32042 = vmatpush3.bf16.msra.mxu0 %v34499_v23  ;;  %v34537_v23 = vld [vmem:[%s34917_s23 + $0x47b8] sm:$0xff]  }
 0x922   : > { %32071 = vmatprep.subr.bf16.mxu0 %v34502_v26  ;;  %32064 = vmatpush3.bf16.msra.mxu1 %v34500_v24  ;;  %v6679_v24 = vrot.slane %v6651_v18, %v34953_v35 }
 0x923   : > { %32093 = vmatprep.subr.bf16.mxu1 %v34503_v27 }
 0x924   : > { %v31779_v32 = vpop.f32.mrf.mxu0  ;;  %26349 = vmatmul.mubr.bf16.vlgmr.msra.gmra.mxu0 %v6616_v25  ;;  %v34539_v25 = vld [vmem:[%s34917_s23 + $0x47f0] sm:$0xff]  }
 0x925   : > { %v31801_v36 = vpop.f32.mrf.mxu1  ;;  %32072 = vmatpush3.bf16.msra.mxu0 %v34504_v28  ;;  %26389 = vmatmul.mubr.bf16.vlgmr.msra.gmra.mxu1 %v6632_v30  ;;  %v34540_v28 = vld [vmem:[%s34917_s23 + $0x4730] sm:$0xff]  }
 0x926   : > { %v31780_v37 = vpop.f32.mrf.mxu0  ;;  %32073 = vmatprep.subr.bf16.mxu0 %v34506_v31  ;;  %32094 = vmatpush3.bf16.msra.mxu1 %v34505_v29  ;;  %v6683_v29 = vcombine.high %v6679_v24, %v6679_v24  ;;  %v34542_v31 = vld [vmem:[%s34917_s23 + $0x4768] sm:$0xff]  }
 0x927   : > { %v31781_v39 = vadd.f32 %v31780_v37, %v31779_v32  ;;  %v31802_v41 = vpop.f32.mrf.mxu1  ;;  %32095 = vmatprep.subr.bf16.mxu1 %v34507_v33  ;;  %26428 = vmatprep.mubr.bf16.mxu0 %v6672_v16 }
 0x928   : > { %v31782_v42 = vpop.f32.mrf.mxu0  ;;  %v31803_v45 = vadd.f32 %v31802_v41, %v31801_v36  ;;  %26468 = vmatprep.mubr.bf16.mxu1 %v6682_v21  ;;  %v34544_v41 = vld [vmem:[%s34917_s23 + $0x4728] sm:$0xff]  }
 0x929   : > { %v25871_v44 = vadd.f32 %v31781_v39, %v37715_v3  ;;  %v31804_v47 = vpop.f32.mrf.mxu1  ;;  %32074 = vmatpush3.bf16.msra.mxu0 %v34508_v34  ;;  %v34529_v3 = vld [vmem:[%s34917_s23 + $0x4688] sm:$0xff]   ;;  %v34541_v34 = vld [vmem:[%s34917_s23 + $0x47b0] sm:$0xff]  }
 0x92a   : > { %v31783_v48 = vpop.f32.mrf.mxu0  ;;  %32075 = vmatprep.subr.bf16.mxu0 %v34510_v40  ;;  %32096 = vmatpush3.bf16.msra.mxu1 %v34509_v38  ;;  %v34543_v38 = vld [vmem:[%s34917_s23 + $0x47e8] sm:$0xff]   ;;  %v34548_v47 = vld [vmem:[%s34917_s23 + $0x4720] sm:$0xff]  }
 0x92b   : > { %v37752_v50 = vadd.f32 %v31803_v45, %v25871_v44  ;;  %v31805_v52 = vpop.f32.mrf.mxu1  ;;  %32097 = vmatprep.subr.bf16.mxu1 %v34511_v43  ;;  %v34546_v43 = vld [vmem:[%s34917_s23 + $0x4760] sm:$0xff]   ;;  %v34545_v45 = vld [vmem:[%s34917_s23 + $0x47a8] sm:$0xff]   ;;  %v34550_v48 = vld [vmem:[%s34917_s23 + $0x4758] sm:$0xff]  }
 0x92c   : > { %v34554_v52 = vld [vmem:[%s34917_s23 + $0x4750] sm:$0xff]  }
 0x92d   : > { %32076 = vmatpush3.bf16.msra.mxu0 %v34512_v46  ;;  %v34547_v46 = vld [vmem:[%s34917_s23 + $0x47e0] sm:$0xff]  }
 0x92e   : > { %32077 = vmatprep.subr.bf16.mxu0 %v34514_v51  ;;  %32098 = vmatpush3.bf16.msra.mxu1 %v34513_v49  ;;  %v34549_v49 = vld [vmem:[%s34917_s23 + $0x47a0] sm:$0xff]   ;;  %v34552_v51 = vld [vmem:[%s34917_s23 + $0x4718] sm:$0xff]  }
 0x92f   : > { %32099 = vmatprep.subr.bf16.mxu1 %v34515_v53  ;;  %v34553_v53 = vld [vmem:[%s34917_s23 + $0x4798] sm:$0xff]  }
 0x931   : > { %32078 = vmatpush3.bf16.msra.mxu0 %v34516_v54  ;;  %v34555_v54 = vld [vmem:[%s34917_s23 + $0x47d0] sm:$0xff]  }
 0x932   : > { %32079 = vmatprep.subr.bf16.mxu0 %v34518_v56  ;;  %32100 = vmatpush3.bf16.msra.mxu1 %v34517_v55  ;;  %v34556_v55 = vld [vmem:[%s34917_s23 + $0x4710] sm:$0xff]   ;;  %v34558_v56 = vld [vmem:[%s34917_s23 + $0x4748] sm:$0xff]  }
 0x933   : > { %32101 = vmatprep.subr.bf16.mxu1 %v34519_v57  ;;  %v34557_v57 = vld [vmem:[%s34917_s23 + $0x4790] sm:$0xff]  }
 0x935   : > { %32080 = vmatpush3.bf16.msra.mxu0 %v34520_v58  ;;  %v34559_v58 = vld [vmem:[%s34917_s23 + $0x47c8] sm:$0xff]  }
 0x936   : > { %32081 = vmatprep.subr.bf16.mxu0 %v34522_v60  ;;  %32102 = vmatpush3.bf16.msra.mxu1 %v34521_v59  ;;  %v34560_v59 = vld [vmem:[%s34917_s23 + $0x4708] sm:$0xff]   ;;  %v34562_v60 = vld [vmem:[%s34917_s23 + $0x4740] sm:$0xff]  }
 0x937   : > { %32103 = vmatprep.subr.bf16.mxu1 %v34523_v61  ;;  %v34561_v61 = vld [vmem:[%s34917_s23 + $0x4788] sm:$0xff]  }
 0x939   : > { %32082 = vmatpush3.bf16.msra.mxu0 %v34524_v62  ;;  %v34563_v62 = vld [vmem:[%s34917_s23 + $0x47c0] sm:$0xff]  }
 0x93a   : > { %32083 = vmatprep.subr.bf16.mxu0 %v34526_v0  ;;  %32104 = vmatpush3.bf16.msra.mxu1 %v34525_v63  ;;  %v34564_v63 = vld [vmem:[%s34917_s23 + $0x4700] sm:$0xff]   ;;  %v6665_v0 = vrot.slane %v37779_v15, %v34953_v35 }
 0x93b   : > { %32105 = vmatprep.subr.bf16.mxu1 %v34527_v1  ;;  %v34565_v1 = vld [vmem:[%s34917_s23 + $0x4780] sm:$0xff]  }
 0x93d   : > { %32084 = vmatpush3.bf16.msra.mxu0 %v34528_v2  ;;  %v6681_v2 = vcombine.high %v6665_v0, %v6665_v0 }
 0x93e   : > { %32085 = vmatprep.subr.bf16.mxu0 %v34530_v4  ;;  %32106 = vmatpush3.bf16.msra.mxu1 %v34529_v3 }
 0x93f   : > { %32107 = vmatprep.subr.bf16.mxu1 %v34531_v5 }
 0x941   : > { %32086 = vmatpush3.bf16.msra.mxu0 %v34532_v6 }
 0x942   : > { %32115 = vmatprep.subr.bf16.mxu0 %v34534_v9  ;;  %32108 = vmatpush3.bf16.msra.mxu1 %v34533_v11 }
 0x943   : > { %32137 = vmatprep.subr.bf16.mxu1 %v34535_v14 }
 0x944   : > { %v31823_v22 = vpop.f32.mrf.mxu0  ;;  %26429 = vmatmul.mubr.bf16.vlgmr.msra.gmra.mxu0 %v6658_v13 }
 0x945   : > { %v31845_v26 = vpop.f32.mrf.mxu1  ;;  %32116 = vmatpush3.bf16.msra.mxu0 %v34536_v17  ;;  %26469 = vmatmul.mubr.bf16.vlgmr.msra.gmra.mxu1 %v6680_v19 }
 0x946   : > { %v31824_v27 = vpop.f32.mrf.mxu0  ;;  %32117 = vmatprep.subr.bf16.mxu0 %v34538_v20  ;;  %32138 = vmatpush3.bf16.msra.mxu1 %v34537_v23 }
 0x947   : > { %v31825_v30 = vadd.f32 %v31824_v27, %v31823_v22  ;;  %v31846_v32 = vpop.f32.mrf.mxu1  ;;  %26508 = vmatprep.mubr.bf16.mxu0 %v6679_v24  ;;  %32139 = vmatprep.subr.bf16.mxu1 %v34539_v25 }
 0x948   : > { %v31826_v33 = vpop.f32.mrf.mxu0  ;;  %v31847_v37 = vadd.f32 %v31846_v32, %v31845_v26  ;;  %26548 = vmatprep.mubr.bf16.mxu1 %v6683_v29 }
 0x949   : > { %v25951_v36 = vadd.f32 %v31825_v30, %v37752_v50  ;;  %v31848_v39 = vpop.f32.mrf.mxu1  ;;  %32118 = vmatpush3.bf16.msra.mxu0 %v34540_v28  ;;  %v34551_v50 = vld [vmem:[%s34917_s23 + $0x47d8] sm:$0xff]  }
 0x94a   : > { %v31827_v40 = vpop.f32.mrf.mxu0  ;;  %32119 = vmatprep.subr.bf16.mxu0 %v34542_v31  ;;  %32140 = vmatpush3.bf16.msra.mxu1 %v34541_v34 }
 0x94b   : > { %v25991_v42 = vadd.f32 %v31847_v37, %v25951_v36  ;;  %v31849_v44 = vpop.f32.mrf.mxu1  ;;  %32141 = vmatprep.subr.bf16.mxu1 %v34543_v38 }
 0x94d   : > { %32120 = vmatpush3.bf16.msra.mxu0 %v34544_v41 }
 0x94e   : > { %32121 = vmatprep.subr.bf16.mxu0 %v34546_v43  ;;  %32142 = vmatpush3.bf16.msra.mxu1 %v34545_v45 }
 0x94f   : > { %32143 = vmatprep.subr.bf16.mxu1 %v34547_v46 }
 0x951   : > { %32122 = vmatpush3.bf16.msra.mxu0 %v34548_v47 }
 0x952   : > { %32123 = vmatprep.subr.bf16.mxu0 %v34550_v48  ;;  %32144 = vmatpush3.bf16.msra.mxu1 %v34549_v49 }
 0x953   : > { %32145 = vmatprep.subr.bf16.mxu1 %v34551_v50 }
 0x955   : > { %32124 = vmatpush3.bf16.msra.mxu0 %v34552_v51 }
 0x956   : > { %32125 = vmatprep.subr.bf16.mxu0 %v34554_v52  ;;  %32146 = vmatpush3.bf16.msra.mxu1 %v34553_v53 }
 0x957   : > { %32147 = vmatprep.subr.bf16.mxu1 %v34555_v54 }
 0x959   : > { %32126 = vmatpush3.bf16.msra.mxu0 %v34556_v55 }
 0x95a   : > { %32127 = vmatprep.subr.bf16.mxu0 %v34558_v56  ;;  %32148 = vmatpush3.bf16.msra.mxu1 %v34557_v57 }
 0x95b   : > { %32149 = vmatprep.subr.bf16.mxu1 %v34559_v58 }
 0x95d   : > { %32128 = vmatpush3.bf16.msra.mxu0 %v34560_v59 }
 0x95e   : > { %32129 = vmatprep.subr.bf16.mxu0 %v34562_v60  ;;  %32150 = vmatpush3.bf16.msra.mxu1 %v34561_v61 }
 0x95f   : > { %32151 = vmatprep.subr.bf16.mxu1 %v34563_v62 }
 0x961   : > { %32130 = vmatpush3.bf16.msra.mxu0 %v34564_v63 }
 0x962   : > { %32152 = vmatpush3.bf16.msra.mxu1 %v34565_v1 }
 0x964   : > { %v31867_v3 = vpop.f32.mrf.mxu0  ;;  %26509 = vmatmul.mubr.bf16.vlgmr.msra.gmra.mxu0 %v6665_v0 }
 0x965   : > { %v31889_v4 = vpop.f32.mrf.mxu1  ;;  %26549 = vmatmul.mubr.bf16.vlgmr.msra.gmra.mxu1 %v6681_v2 }
 0x966   : > { %v31868_v5 = vpop.f32.mrf.mxu0 }
 0x967   : > { %v31869_v6 = vadd.f32 %v31868_v5, %v31867_v3  ;;  %v31890_v7 = vpop.f32.mrf.mxu1 }
 0x968   : > { %v31870_v8 = vpop.f32.mrf.mxu0  ;;  %v31891_v10 = vadd.f32 %v31890_v7, %v31889_v4 }
 0x969   : > { %v26031_v9 = vadd.f32 %v31869_v6, %v25991_v42  ;;  %v31892_v11 = vpop.f32.mrf.mxu1 }
 0x96a   : > { %v31871_v12 = vpop.f32.mrf.mxu0 }
 0x96b   : > { %v26071_v13 = vadd.f32 %v31891_v10, %v26031_v9  ;;  %v31893_v35 = vpop.f32.mrf.mxu1 }
 0x984   : > { %v31911_v14 = vpop.f32.mrf.mxu0 }
 0x985   : > { %v31933_v15 = vpop.f32.mrf.mxu1 }
 0x986   : > { %v31912_v16 = vpop.f32.mrf.mxu0 }
 0x987   : > { %v31913_v17 = vadd.f32 %v31912_v16, %v31911_v14  ;;  %v31934_v18 = vpop.f32.mrf.mxu1 }
 0x988   : > { %v31914_v19 = vpop.f32.mrf.mxu0  ;;  %v31935_v21 = vadd.f32 %v31934_v18, %v31933_v15 }
 0x989   : > { %v26111_v20 = vadd.f32 %v31913_v17, %v26071_v13  ;;  %v31936_v22 = vpop.f32.mrf.mxu1 }
 0x98a   : > { %v31915_v23 = vpop.f32.mrf.mxu0 }
 0x98b   : > { %v26151_v24 = vadd.f32 %v31935_v21, %v26111_v20  ;;  %v31937_v25 = vpop.f32.mrf.mxu1 }
 0x9a4   : > { %v31955_v26 = vpop.f32.mrf.mxu0 }
 0x9a5   : > { %v31977_v27 = vpop.f32.mrf.mxu1 }
 0x9a6   : > { %v31956_v28 = vpop.f32.mrf.mxu0 }
 0x9a7   : > { %v31957_v29 = vadd.f32 %v31956_v28, %v31955_v26  ;;  %v31978_v30 = vpop.f32.mrf.mxu1 }
 0x9a8   : > { %v31958_v31 = vpop.f32.mrf.mxu0  ;;  %v31979_v33 = vadd.f32 %v31978_v30, %v31977_v27 }
 0x9a9   : > { %v26191_v32 = vadd.f32 %v31957_v29, %v26151_v24  ;;  %v31980_v34 = vpop.f32.mrf.mxu1 }
 0x9aa   : > { %v31959_v36 = vpop.f32.mrf.mxu0 }
 0x9ab   : > { %v26231_v37 = vadd.f32 %v31979_v33, %v26191_v32  ;;  %v31981_v38 = vpop.f32.mrf.mxu1 }
 0x9c4   : > { %v31999_v39 = vpop.f32.mrf.mxu0 }
 0x9c5   : > { %v32021_v40 = vpop.f32.mrf.mxu1 }
 0x9c6   : > { %v32000_v41 = vpop.f32.mrf.mxu0 }
 0x9c7   : > { %v32001_v42 = vadd.f32 %v32000_v41, %v31999_v39  ;;  %v32022_v43 = vpop.f32.mrf.mxu1 }
 0x9c8   : > { %v32002_v44 = vpop.f32.mrf.mxu0  ;;  %v32023_v46 = vadd.f32 %v32022_v43, %v32021_v40 }
 0x9c9   : > { %v26271_v45 = vadd.f32 %v32001_v42, %v26231_v37  ;;  %v32024_v47 = vpop.f32.mrf.mxu1 }
 0x9ca   : > { %v32003_v48 = vpop.f32.mrf.mxu0 }
 0x9cb   : > { %v26311_v49 = vadd.f32 %v32023_v46, %v26271_v45  ;;  %v32025_v50 = vpop.f32.mrf.mxu1 }
 0x9e4   : > { %v32043_v51 = vpop.f32.mrf.mxu0 }
 0x9e5   : > { %v32065_v52 = vpop.f32.mrf.mxu1 }
 0x9e6   : > { %v32044_v53 = vpop.f32.mrf.mxu0 }
 0x9e7   : > { %v32066_v54 = vpop.f32.mrf.mxu1  ;;  %v32045_v3 = vadd.f32 %v32044_v53, %v32043_v51 }
 0x9e8   : > { %v32046_v55 = vpop.f32.mrf.mxu0  ;;  %v32067_v5 = vadd.f32 %v32066_v54, %v32065_v52 }
 0x9e9   : > { %v32068_v56 = vpop.f32.mrf.mxu1  ;;  %v26351_v4 = vadd.f32 %v32045_v3, %v26311_v49 }
 0x9ea   : > { %v32047_v57 = vpop.f32.mrf.mxu0 }
 0x9eb   : > { %v32069_v58 = vpop.f32.mrf.mxu1  ;;  %v26391_v7 = vadd.f32 %v32067_v5, %v26351_v4 }
 0xa04   : > { %v32087_v59 = vpop.f32.mrf.mxu0 }
 0xa05   : > { %v32109_v60 = vpop.f32.mrf.mxu1 }
 0xa06   : > { %v32088_v61 = vpop.f32.mrf.mxu0 }
 0xa07   : > { %v32110_v62 = vpop.f32.mrf.mxu1  ;;  %v32089_v6 = vadd.f32 %v32088_v61, %v32087_v59 }
 0xa08   : > { %v32090_v63 = vpop.f32.mrf.mxu0  ;;  %v32111_v9 = vadd.f32 %v32110_v62, %v32109_v60 }
 0xa09   : > { %v32112_v0 = vpop.f32.mrf.mxu1  ;;  %v26431_v8 = vadd.f32 %v32089_v6, %v26391_v7 }
 0xa0a   : > { %v32091_v1 = vpop.f32.mrf.mxu0 }
 0xa0b   : > { %v32113_v2 = vpop.f32.mrf.mxu1  ;;  %v26471_v13 = vadd.f32 %v32111_v9, %v26431_v8 }
 0xa24   : > { %v32131_v10 = vpop.f32.mrf.mxu0 }
 0xa25   : > { %v32153_v11 = vpop.f32.mrf.mxu1 }
 0xa26   : > { %v32132_v12 = vpop.f32.mrf.mxu0 }
 0xa27   : > { %v32133_v35 = vadd.f32 %v32132_v12, %v32131_v10  ;;  %v32154_v14 = vpop.f32.mrf.mxu1 }
 0xa28   : > { %v32134_v15 = vpop.f32.mrf.mxu0  ;;  %v32155_v17 = vadd.f32 %v32154_v14, %v32153_v11 }
 0xa29   : > { %v26511_v16 = vadd.f32 %v32133_v35, %v26471_v13  ;;  %v32156_v18 = vpop.f32.mrf.mxu1 }
 0xa2a   : > { %v32135_v19 = vpop.f32.mrf.mxu0 }
 0xa2b   : > { %v26551_v20 = vadd.f32 %v32155_v17, %v26511_v16  ;;  %v32157_v21 = vpop.f32.mrf.mxu1 }
 0xa2d   : > { %vm26556_vm0 = vcmp.gt.f32.partialorder %v26551_v20, 0.0  ;;  %v26557_v22 = vmul.f32 0.2, %v26551_v20 }
 0xa2f   : > { %v26558_v23 = vsel %vm26556_vm0, %v26551_v20, %v26557_v22 }
 0xa30   : > { %26559 = vst [vmem:[%s231_s25] sm:$0x3] %v26558_v23 }
 0xa31   : > { %34662 = shalt.err (!%p34659_p2)
}
 0xa32   : > { %s34663_s22 = scalar_lea.hbm %s37823_s8, 32  ;;  %s34667_s17 = scalar_lea.hbm %s37862_s3, 96 }
 0xa33   : > { %p34664_p8 = scmp.ne.s32.totalorder %s37823_s8, %s34663_s22  ;;  %p34668_p6 = scmp.lt.s32.totalorder %s37823_s8, %s37862_s3 }
 0xa34   : > { %p34669_p0 = scmp.lt.s32.totalorder %s34667_s17, %s34663_s22 }
 0xa35   : > { %p34665_p10 = pnand %p34664_p8, %p37879_p7 }
 0xa36   : > { %p34670_p9 = por %p34669_p0, %p34668_p6 }
 0xa37   : > { %p34666_p5 = pneg %p34665_p10 }
 0xa39   : > { %p34671_p12 = pnand %p34670_p9, %p34666_p5 }
 0xa3b   : > { %34674 = shalt.err (!%p34671_p12)
}
 0xa3c   : > { %32169 = dma.vmem_to_hbm [thread:$0]  (%p37879_p7), %s26575_s5, 32, %s37823_s8, %s26561_s9  }
 0xa3d PF: > { %p32189_p11 = scmp.ge.s32.totalorder %s34717_s15, 2  ;;  %s26586_s28 = sand.u32 1, %s34705_s12  }
 0xa3e   : > { %p37880_p3 = scmp.ne.s32.totalorder %s37871_s29, 0  ;;  %s26587_s4 = scalar_lea.sflag [#allocation4], %s26586_s28 }
 0xa40   : > { %p32183_p4 = pnand %p32189_p11, %p37880_p3 }
 0xa42   : > { %p32184_p13 = pneg %p32183_p4 }
 0xa44   : > { %34700 = dma.done.wait (%p32184_p13), %s26587_s4, 32  }
 0xa45   : > { %34702 = vsyncadd (%p32184_p13), %s26587_s4, 4294967264  ;;  %p17_p1 = scmp.ge.s32.totalorder %s34768_s16, 5   ;;  %s37881_s12 = smov %s34709_s13 }
 0xa46   : > { %s37882_s13 = smov %s34713_s14  ;;  %s37883_s14 = smov %s34778_s19 }
 0xa47   : > { %s37884_s15 = smov %s34768_s16  ;;  %19 = sbr.rel (!%p17_p1) target bundleno = 6 (0x6), region = 93 }
 0xa4c   :  { %26592 = vsyncpa [#allocation3], 1 }
 0xa4d   :  { %26594 = vsyncpa [#allocation3 + $0x1], 1 }
 0xa4e   :  { %26595 = vsyncpa [#allocation6], 1 }
 0xa4f   :  { %26597 = vsyncpa [#allocation6 + $0x1], 1 }
 0xa50   :  { %26598 = vsyncpa [#allocation4], 1 }
 0xa51   :  { %26600 = vsyncpa [#allocation4 + $0x1], 1 }

</bundles_post_ra>
